<compile_context>
chip_gen: v6e
topology: v6e:2x2x1
jax: 0.10.0
libtpu: 0.0.40
codegen_flags: <defaults>
</compile_context>

<pallas_src>
import functools

import jax
import jax.numpy as jnp
import numpy as np
from jax.experimental import pallas as pl
from jax.experimental.pallas import tpu as pltpu

HI = jax.lax.Precision.HIGHEST


# ----------------------------------------------------------------------------
# Single fused kernel: GCN encoder -> LSTM encoder -> AR LSTM decoder -> Linear
# ----------------------------------------------------------------------------
def _fused_kernel(B, T, N, F, G, H, future_len, n_gcn, n_enc, n_dec,
                  feats_ref, adj_ref, *refs):
    out_ref = refs[-1]
    o = 0
    gcn_wb = refs[o:o + 2 * n_gcn]; o += 2 * n_gcn
    enc_wb = refs[o:o + 3 * n_enc]; o += 3 * n_enc
    dec_wb = refs[o:o + 3 * n_dec]; o += 3 * n_dec
    fcw_ref = refs[o]
    fcb_ref = refs[o + 1]

    M = B * N
    adj_b = [adj_ref[b] for b in range(B)]           # each (N, N), loaded once

    # ---------------- GCN encoder ----------------
    # Weight matmul once per layer over the whole (B*T*N, Cin) slab; the tiny
    # time-invariant adjacency matmuls are statically unrolled per (b, t).
    x = feats_ref[...]                               # (B*T*N, F), rows (b, t, n)-major
    pieces = None
    for l in range(n_gcn):
        w = gcn_wb[2 * l][...]                       # (Cin, Cout)
        bia = gcn_wb[2 * l + 1][...]                 # (1, Cout)
        sup = jnp.dot(x, w, precision=HI, preferred_element_type=jnp.float32)
        pieces = []
        for b in range(B):
            for t in range(T):
                r0 = (b * T + t) * N                 # static, sublane-aligned slice
                h_bt = jnp.dot(adj_b[b], sup[r0:r0 + N, :], precision=HI,
                               preferred_element_type=jnp.float32) + bia
                pieces.append(jnp.maximum(h_bt, 0.0))   # ReLU
        if l + 1 < n_gcn:
            x = jnp.concatenate(pieces, axis=0)      # (B*T*N, Cout), (b, t)-major rows

    # Time-major encoder inputs xs[t] with rows m = b*N + n
    # (matches torch: gcn_seq.transpose(1, 2).view(B*N, T, -1)).
    xs = [jnp.concatenate([pieces[b * T + t] for b in range(B)], axis=0)
          for t in range(T)]                          # each (M, G)

    # ---------------- shared LSTM cell ----------------
    # Full-width activation: one sigmoid + one tanh over the whole (M, 4H)
    # lane-dense slab, combined with a hoisted lane mask (g-gate = lanes [2H, 3H)).
    lane = jax.lax.broadcasted_iota(jnp.int32, (M, 4 * H), 1)
    g_mask = (lane >= 2 * H) & (lane < 3 * H)

    def cell(xin, h, c, w_ih, w_hh, bias):
        gates = (jnp.dot(xin, w_ih, precision=HI, preferred_element_type=jnp.float32)
                 + jnp.dot(h, w_hh, precision=HI, preferred_element_type=jnp.float32)
                 + bias)                              # bias = b_ih + b_hh (pre-folded)
        acts = jnp.where(g_mask, jnp.tanh(gates), jax.nn.sigmoid(gates))
        i = acts[:, 0 * H:1 * H]
        f = acts[:, 1 * H:2 * H]
        g = acts[:, 2 * H:3 * H]
        og = acts[:, 3 * H:4 * H]
        c_new = f * c + i * g
        h_new = og * jnp.tanh(c_new)
        return h_new, c_new

    # ---------------- LSTM encoder over observed sequence ----------------
    enc_w = [(enc_wb[3 * l][...], enc_wb[3 * l + 1][...], enc_wb[3 * l + 2][...])
             for l in range(n_enc)]                   # loaded once, outside the T loop
    hs = [jnp.zeros((M, H), jnp.float32) for _ in range(n_enc)]
    cs = [jnp.zeros((M, H), jnp.float32) for _ in range(n_enc)]
    for t in range(T):                                # static unroll (T small)
        xin = xs[t]
        for l in range(n_enc):
            hs[l], cs[l] = cell(xin, hs[l], cs[l], *enc_w[l])
            xin = hs[l]

    # ---------------- autoregressive LSTM decoder + Linear head ----------------
    dec_w = [(dec_wb[3 * l][...], dec_wb[3 * l + 1][...], dec_wb[3 * l + 2][...])
             for l in range(n_dec)]
    fcw = fcw_ref[...]                                # (H, F)
    fcb = fcb_ref[...]                                # (1, F)
    dh = [hs[-1] for _ in range(n_dec)]               # encoder last-layer state, repeated
    dc = [cs[-1] for _ in range(n_dec)]
    x = jnp.zeros((M, F), jnp.float32)                # initial decoder input = zeros
    preds = []
    for _ in range(future_len):                       # static unroll (future_len small)
        xin = x
        for l in range(n_dec):
            dh[l], dc[l] = cell(xin, dh[l], dc[l], *dec_w[l])
            xin = dh[l]
        pred = jnp.dot(dh[-1], fcw, precision=HI,
                       preferred_element_type=jnp.float32) + fcb
        preds.append(pred)
        x = pred                                      # autoregressive feedback

    # Single batched writeback (step-major rows) instead of per-step partial stores.
    out_ref[...] = jnp.concatenate(preds, axis=0)     # (future_len*M, F)


# ----------------------------------------------------------------------------
# Wrapper: packs parameters, calls the fused kernel once, reshapes the output.
# ----------------------------------------------------------------------------
def gcn_lstm_forward(feats, adj, params, future_len):
    gcn_params, enc_params, dec_params, (fc_w, fc_b) = params
    B, T, N, F = feats.shape
    G = gcn_params[-1][0].shape[1]
    H = enc_params[0]["w_hh"].shape[0]
    M = B * N

    inputs = [feats.reshape(B * T * N, F), adj]
    for (w, b) in gcn_params:
        inputs += [w, b.reshape(1, -1)]
    for p in enc_params:   # fold b_ih + b_hh once, outside the kernel
        inputs += [p["w_ih"], p["w_hh"], (p["b_ih"] + p["b_hh"]).reshape(1, -1)]
    for p in dec_params:
        inputs += [p["w_ih"], p["w_hh"], (p["b_ih"] + p["b_hh"]).reshape(1, -1)]
    inputs += [fc_w, fc_b.reshape(1, -1)]

    kernel = functools.partial(_fused_kernel, B, T, N, F, G, H, future_len,
                               len(gcn_params), len(enc_params), len(dec_params))
    out = pl.pallas_call(
        kernel,
        out_shape=jax.ShapeDtypeStruct((future_len * M, F), jnp.float32),
        in_specs=[pl.BlockSpec(memory_space=pltpu.MemorySpace.VMEM)] * len(inputs),
        out_specs=pl.BlockSpec(memory_space=pltpu.MemorySpace.VMEM),
    )(*inputs)
    # (future_len*B*N, F) -> (future_len, B, N, F) -> (B, future_len, N, F)
    return out.reshape(future_len, B, N, F).transpose(1, 0, 2, 3)


# ----------------------------------------------------------------------------
# Deterministic parameter init (shapes follow the module __init__)
# ----------------------------------------------------------------------------
def init_params(key, in_features, gcn_hidden, lstm_hidden,
                num_gcn_layers, num_enc_layers, num_dec_layers):
    keys = iter(jax.random.split(key, 64))

    def xavier(shape):
        fan_in, fan_out = shape
        a = float(np.sqrt(6.0 / (fan_in + fan_out)))
        return jax.random.uniform(next(keys), shape, jnp.float32, -a, a)

    def unif(shape, k):
        return jax.random.uniform(next(keys), shape, jnp.float32, -k, k)

    gcn = []
    dims = [in_features] + [gcn_hidden] * num_gcn_layers
    for l in range(num_gcn_layers):
        gcn.append((xavier((dims[l], dims[l + 1])),
                    jnp.zeros((dims[l + 1],), jnp.float32)))

    k = 1.0 / float(np.sqrt(lstm_hidden))

    def lstm_stack(num_layers, in0):
        layers = []
        for l in range(num_layers):
            inp = in0 if l == 0 else lstm_hidden
            layers.append(dict(
                w_ih=unif((inp, 4 * lstm_hidden), k),
                w_hh=unif((lstm_hidden, 4 * lstm_hidden), k),
                b_ih=unif((4 * lstm_hidden,), k),
                b_hh=unif((4 * lstm_hidden,), k),
            ))
        return layers

    enc = lstm_stack(num_enc_layers, gcn_hidden)
    dec = lstm_stack(num_dec_layers, in_features)
    fc_w = unif((lstm_hidden, in_features), k)
    fc_b = unif((in_features,), k)
    return gcn, enc, dec, (fc_w, fc_b)


# ----------------------------------------------------------------------------
# Pure-JAX reference (mirrors the PyTorch forward) for a sanity check
# ----------------------------------------------------------------------------
def reference_forward(feats, adj, params, future_len):
    gcn_params, enc_params, dec_params, (fc_w, fc_b) = params
    B, T, N, F = feats.shape
    H = enc_params[0]["w_hh"].shape[0]
    M = B * N

    def gcn_enc(x, a):
        for w, b in gcn_params:
            s = jnp.matmul(x, w, precision=HI)
            x = jnp.maximum(jnp.matmul(a, s, precision=HI) + b, 0.0)
        return x

    gcn_seq = jnp.stack([gcn_enc(feats[:, t], adj) for t in range(T)], axis=1)
    seq = jnp.transpose(gcn_seq, (0, 2, 1, 3)).reshape(M, T, -1)

    def cell(x, h, c, p):
        gates = (jnp.matmul(x, p["w_ih"], precision=HI) + p["b_ih"]
                 + jnp.matmul(h, p["w_hh"], precision=HI) + p["b_hh"])
        i, f, g, o = jnp.split(gates, 4, axis=-1)
        c = jax.nn.sigmoid(f) * c + jax.nn.sigmoid(i) * jnp.tanh(g)
        h = jax.nn.sigmoid(o) * jnp.tanh(c)
        return h, c

    hs = [jnp.zeros((M, H), jnp.float32) for _ in enc_params]
    cs = [jnp.zeros((M, H), jnp.float32) for _ in enc_params]
    for t in range(T):
        x = seq[:, t]
        for l, p in enumerate(enc_params):
            hs[l], cs[l] = cell(x, hs[l], cs[l], p)
            x = hs[l]
    hL, cL = hs[-1], cs[-1]

    dh = [hL for _ in dec_params]
    dc = [cL for _ in dec_params]
    x = jnp.zeros((M, F), jnp.float32)
    preds = []
    for _ in range(future_len):
        inp = x
        for l, p in enumerate(dec_params):
            dh[l], dc[l] = cell(inp, dh[l], dc[l], p)
            inp = dh[l]
        pred = jnp.matmul(dh[-1], fc_w, precision=HI) + fc_b
        preds.append(pred)
        x = pred
    preds = jnp.stack(preds, axis=1)                       # (M, future_len, F)
    return preds.reshape(B, N, future_len, F).transpose(0, 2, 1, 3)


# ----------------------------------------------------------------------------
if __name__ == "__main__":
    in_features = 2        # [vx, vy]
    gcn_hidden = 16
    lstm_hidden = 32
    num_gcn_layers = 2
    num_lstm_encoder_layers = 2
    num_lstm_decoder_layers = 2
    future_len = 3
    B, T_obs, N = 2, 4, 8

    root = jax.random.PRNGKey(0)
    k_feats, k_adj, k_params = jax.random.split(root, 3)

    feats = jax.random.normal(k_feats, (B, T_obs, N, in_features), jnp.float32)
    # symmetric row-normalized adjacency (constant over time)
    a = jax.random.uniform(k_adj, (B, N, N), jnp.float32)
    a = 0.5 * (a + jnp.transpose(a, (0, 2, 1))) + jnp.eye(N)[None]
    adj = a / jnp.sum(a, axis=-1, keepdims=True)

    params = init_params(k_params, in_features, gcn_hidden, lstm_hidden,
                         num_gcn_layers, num_lstm_encoder_layers,
                         num_lstm_decoder_layers)

    out = gcn_lstm_forward(feats, adj, params, future_len)
    out = jax.block_until_ready(out)

    ref = jax.block_until_ready(reference_forward(feats, adj, params, future_len))
    assert out.shape == (B, future_len, N, in_features), out.shape
    assert np.allclose(np.asarray(out), np.asarray(ref), atol=1e-3, rtol=1e-3), (
        float(np.max(np.abs(np.asarray(out) - np.asarray(ref)))))

    print("KERNEL_OK")
</pallas_src>

<mosaic_0001>
module attributes {stable_mosaic.version = 11 : i64} {
  func.func @_fused_kernel(%arg0: memref<64x2xf32, #tpu.memory_space<vmem>>, %arg1: memref<2x8x8xf32, #tpu.memory_space<vmem>>, %arg2: memref<2x16xf32, #tpu.memory_space<vmem>>, %arg3: memref<1x16xf32, #tpu.memory_space<vmem>>, %arg4: memref<16x16xf32, #tpu.memory_space<vmem>>, %arg5: memref<1x16xf32, #tpu.memory_space<vmem>>, %arg6: memref<16x128xf32, #tpu.memory_space<vmem>>, %arg7: memref<32x128xf32, #tpu.memory_space<vmem>>, %arg8: memref<1x128xf32, #tpu.memory_space<vmem>>, %arg9: memref<32x128xf32, #tpu.memory_space<vmem>>, %arg10: memref<32x128xf32, #tpu.memory_space<vmem>>, %arg11: memref<1x128xf32, #tpu.memory_space<vmem>>, %arg12: memref<2x128xf32, #tpu.memory_space<vmem>>, %arg13: memref<32x128xf32, #tpu.memory_space<vmem>>, %arg14: memref<1x128xf32, #tpu.memory_space<vmem>>, %arg15: memref<32x128xf32, #tpu.memory_space<vmem>>, %arg16: memref<32x128xf32, #tpu.memory_space<vmem>>, %arg17: memref<1x128xf32, #tpu.memory_space<vmem>>, %arg18: memref<32x2xf32, #tpu.memory_space<vmem>>, %arg19: memref<1x2xf32, #tpu.memory_space<vmem>>, %arg20: memref<48x2xf32, #tpu.memory_space<vmem>>) attributes {dimension_semantics = [], scalar_prefetch = 0 : i64, scratch_operands = 0 : i64, tpu.core_type = #tpu.core_type<tc>} {
    %c0 = arith.constant 0 : index
    %c0_0 = arith.constant 0 : index
    %c0_1 = arith.constant 0 : index
    %0 = vector.load %arg1[%c0, %c0_0, %c0_1] : memref<2x8x8xf32, #tpu.memory_space<vmem>>, vector<1x8x8xf32>
    %1 = vector.shape_cast %0 : vector<1x8x8xf32> to vector<8x8xf32>
    %c1 = arith.constant 1 : index
    %c0_2 = arith.constant 0 : index
    %c0_3 = arith.constant 0 : index
    %2 = vector.load %arg1[%c1, %c0_2, %c0_3] : memref<2x8x8xf32, #tpu.memory_space<vmem>>, vector<1x8x8xf32>
    %3 = vector.shape_cast %2 : vector<1x8x8xf32> to vector<8x8xf32>
    %c0_4 = arith.constant 0 : index
    %c0_5 = arith.constant 0 : index
    %4 = vector.load %arg0[%c0_4, %c0_5] : memref<64x2xf32, #tpu.memory_space<vmem>>, vector<64x2xf32>
    %c0_6 = arith.constant 0 : index
    %c0_7 = arith.constant 0 : index
    %5 = vector.load %arg2[%c0_6, %c0_7] : memref<2x16xf32, #tpu.memory_space<vmem>>, vector<2x16xf32>
    %c0_8 = arith.constant 0 : index
    %c0_9 = arith.constant 0 : index
    %6 = vector.load %arg3[%c0_8, %c0_9] : memref<1x16xf32, #tpu.memory_space<vmem>>, vector<1x16xf32>
    %cst = arith.constant dense<0.000000e+00> : vector<64x16xf32>
    %7 = tpu.matmul %4, %5, %cst {dimension_numbers = #tpu.dot_dimension_numbers<[1], [0], [0], [1], [0, 0, 1, 1], [], []>, precision = #tpu.contract_precision<fp32>} : vector<64x2xf32>, vector<2x16xf32>, vector<64x16xf32> -> vector<64x16xf32>
    %8 = vector.extract_strided_slice %7 {offsets = [0, 0], sizes = [8, 16], strides = [1, 1]} : vector<64x16xf32> to vector<8x16xf32>
    %cst_10 = arith.constant dense<0.000000e+00> : vector<8x16xf32>
    %9 = tpu.matmul %1, %8, %cst_10 {dimension_numbers = #tpu.dot_dimension_numbers<[1], [0], [0], [1], [0, 0, 1, 1], [], []>, precision = #tpu.contract_precision<fp32>} : vector<8x8xf32>, vector<8x16xf32>, vector<8x16xf32> -> vector<8x16xf32>
    %10 = vector.broadcast %6 : vector<1x16xf32> to vector<8x16xf32>
    %11 = arith.addf %9, %10 : vector<8x16xf32>
    %cst_11 = arith.constant 0.000000e+00 : f32
    %12 = vector.broadcast %cst_11 : f32 to vector<8x16xf32>
    %13 = arith.maximumf %11, %12 : vector<8x16xf32>
    %14 = vector.extract_strided_slice %7 {offsets = [8, 0], sizes = [8, 16], strides = [1, 1]} : vector<64x16xf32> to vector<8x16xf32>
    %cst_12 = arith.constant dense<0.000000e+00> : vector<8x16xf32>
    %15 = tpu.matmul %1, %14, %cst_12 {dimension_numbers = #tpu.dot_dimension_numbers<[1], [0], [0], [1], [0, 0, 1, 1], [], []>, precision = #tpu.contract_precision<fp32>} : vector<8x8xf32>, vector<8x16xf32>, vector<8x16xf32> -> vector<8x16xf32>
    %16 = vector.broadcast %6 : vector<1x16xf32> to vector<8x16xf32>
    %17 = arith.addf %15, %16 : vector<8x16xf32>
    %cst_13 = arith.constant 0.000000e+00 : f32
    %18 = vector.broadcast %cst_13 : f32 to vector<8x16xf32>
    %19 = arith.maximumf %17, %18 : vector<8x16xf32>
    %20 = vector.extract_strided_slice %7 {offsets = [16, 0], sizes = [8, 16], strides = [1, 1]} : vector<64x16xf32> to vector<8x16xf32>
    %cst_14 = arith.constant dense<0.000000e+00> : vector<8x16xf32>
    %21 = tpu.matmul %1, %20, %cst_14 {dimension_numbers = #tpu.dot_dimension_numbers<[1], [0], [0], [1], [0, 0, 1, 1], [], []>, precision = #tpu.contract_precision<fp32>} : vector<8x8xf32>, vector<8x16xf32>, vector<8x16xf32> -> vector<8x16xf32>
    %22 = vector.broadcast %6 : vector<1x16xf32> to vector<8x16xf32>
    %23 = arith.addf %21, %22 : vector<8x16xf32>
    %cst_15 = arith.constant 0.000000e+00 : f32
    %24 = vector.broadcast %cst_15 : f32 to vector<8x16xf32>
    %25 = arith.maximumf %23, %24 : vector<8x16xf32>
    %26 = vector.extract_strided_slice %7 {offsets = [24, 0], sizes = [8, 16], strides = [1, 1]} : vector<64x16xf32> to vector<8x16xf32>
    %cst_16 = arith.constant dense<0.000000e+00> : vector<8x16xf32>
    %27 = tpu.matmul %1, %26, %cst_16 {dimension_numbers = #tpu.dot_dimension_numbers<[1], [0], [0], [1], [0, 0, 1, 1], [], []>, precision = #tpu.contract_precision<fp32>} : vector<8x8xf32>, vector<8x16xf32>, vector<8x16xf32> -> vector<8x16xf32>
    %28 = vector.broadcast %6 : vector<1x16xf32> to vector<8x16xf32>
    %29 = arith.addf %27, %28 : vector<8x16xf32>
    %cst_17 = arith.constant 0.000000e+00 : f32
    %30 = vector.broadcast %cst_17 : f32 to vector<8x16xf32>
    %31 = arith.maximumf %29, %30 : vector<8x16xf32>
    %32 = vector.extract_strided_slice %7 {offsets = [32, 0], sizes = [8, 16], strides = [1, 1]} : vector<64x16xf32> to vector<8x16xf32>
    %cst_18 = arith.constant dense<0.000000e+00> : vector<8x16xf32>
    %33 = tpu.matmul %3, %32, %cst_18 {dimension_numbers = #tpu.dot_dimension_numbers<[1], [0], [0], [1], [0, 0, 1, 1], [], []>, precision = #tpu.contract_precision<fp32>} : vector<8x8xf32>, vector<8x16xf32>, vector<8x16xf32> -> vector<8x16xf32>
    %34 = vector.broadcast %6 : vector<1x16xf32> to vector<8x16xf32>
    %35 = arith.addf %33, %34 : vector<8x16xf32>
    %cst_19 = arith.constant 0.000000e+00 : f32
    %36 = vector.broadcast %cst_19 : f32 to vector<8x16xf32>
    %37 = arith.maximumf %35, %36 : vector<8x16xf32>
    %38 = vector.extract_strided_slice %7 {offsets = [40, 0], sizes = [8, 16], strides = [1, 1]} : vector<64x16xf32> to vector<8x16xf32>
    %cst_20 = arith.constant dense<0.000000e+00> : vector<8x16xf32>
    %39 = tpu.matmul %3, %38, %cst_20 {dimension_numbers = #tpu.dot_dimension_numbers<[1], [0], [0], [1], [0, 0, 1, 1], [], []>, precision = #tpu.contract_precision<fp32>} : vector<8x8xf32>, vector<8x16xf32>, vector<8x16xf32> -> vector<8x16xf32>
    %40 = vector.broadcast %6 : vector<1x16xf32> to vector<8x16xf32>
    %41 = arith.addf %39, %40 : vector<8x16xf32>
    %cst_21 = arith.constant 0.000000e+00 : f32
    %42 = vector.broadcast %cst_21 : f32 to vector<8x16xf32>
    %43 = arith.maximumf %41, %42 : vector<8x16xf32>
    %44 = vector.extract_strided_slice %7 {offsets = [48, 0], sizes = [8, 16], strides = [1, 1]} : vector<64x16xf32> to vector<8x16xf32>
    %cst_22 = arith.constant dense<0.000000e+00> : vector<8x16xf32>
    %45 = tpu.matmul %3, %44, %cst_22 {dimension_numbers = #tpu.dot_dimension_numbers<[1], [0], [0], [1], [0, 0, 1, 1], [], []>, precision = #tpu.contract_precision<fp32>} : vector<8x8xf32>, vector<8x16xf32>, vector<8x16xf32> -> vector<8x16xf32>
    %46 = vector.broadcast %6 : vector<1x16xf32> to vector<8x16xf32>
    %47 = arith.addf %45, %46 : vector<8x16xf32>
    %cst_23 = arith.constant 0.000000e+00 : f32
    %48 = vector.broadcast %cst_23 : f32 to vector<8x16xf32>
    %49 = arith.maximumf %47, %48 : vector<8x16xf32>
    %50 = vector.extract_strided_slice %7 {offsets = [56, 0], sizes = [8, 16], strides = [1, 1]} : vector<64x16xf32> to vector<8x16xf32>
    %cst_24 = arith.constant dense<0.000000e+00> : vector<8x16xf32>
    %51 = tpu.matmul %3, %50, %cst_24 {dimension_numbers = #tpu.dot_dimension_numbers<[1], [0], [0], [1], [0, 0, 1, 1], [], []>, precision = #tpu.contract_precision<fp32>} : vector<8x8xf32>, vector<8x16xf32>, vector<8x16xf32> -> vector<8x16xf32>
    %52 = vector.broadcast %6 : vector<1x16xf32> to vector<8x16xf32>
    %53 = arith.addf %51, %52 : vector<8x16xf32>
    %cst_25 = arith.constant 0.000000e+00 : f32
    %54 = vector.broadcast %cst_25 : f32 to vector<8x16xf32>
    %55 = arith.maximumf %53, %54 : vector<8x16xf32>
    %56 = tpu.concatenate %13, %19, %25, %31, %37, %43, %49, %55 in 0 : vector<8x16xf32>, vector<8x16xf32>, vector<8x16xf32>, vector<8x16xf32>, vector<8x16xf32>, vector<8x16xf32>, vector<8x16xf32>, vector<8x16xf32> -> vector<64x16xf32>
    %c0_26 = arith.constant 0 : index
    %c0_27 = arith.constant 0 : index
    %57 = vector.load %arg4[%c0_26, %c0_27] : memref<16x16xf32, #tpu.memory_space<vmem>>, vector<16x16xf32>
    %c0_28 = arith.constant 0 : index
    %c0_29 = arith.constant 0 : index
    %58 = vector.load %arg5[%c0_28, %c0_29] : memref<1x16xf32, #tpu.memory_space<vmem>>, vector<1x16xf32>
    %cst_30 = arith.constant dense<0.000000e+00> : vector<64x16xf32>
    %59 = tpu.matmul %56, %57, %cst_30 {dimension_numbers = #tpu.dot_dimension_numbers<[1], [0], [0], [1], [0, 0, 1, 1], [], []>, precision = #tpu.contract_precision<fp32>} : vector<64x16xf32>, vector<16x16xf32>, vector<64x16xf32> -> vector<64x16xf32>
    %60 = vector.extract_strided_slice %59 {offsets = [0, 0], sizes = [8, 16], strides = [1, 1]} : vector<64x16xf32> to vector<8x16xf32>
    %cst_31 = arith.constant dense<0.000000e+00> : vector<8x16xf32>
    %61 = tpu.matmul %1, %60, %cst_31 {dimension_numbers = #tpu.dot_dimension_numbers<[1], [0], [0], [1], [0, 0, 1, 1], [], []>, precision = #tpu.contract_precision<fp32>} : vector<8x8xf32>, vector<8x16xf32>, vector<8x16xf32> -> vector<8x16xf32>
    %62 = vector.broadcast %58 : vector<1x16xf32> to vector<8x16xf32>
    %63 = arith.addf %61, %62 : vector<8x16xf32>
    %cst_32 = arith.constant 0.000000e+00 : f32
    %64 = vector.broadcast %cst_32 : f32 to vector<8x16xf32>
    %65 = arith.maximumf %63, %64 : vector<8x16xf32>
    %66 = vector.extract_strided_slice %59 {offsets = [8, 0], sizes = [8, 16], strides = [1, 1]} : vector<64x16xf32> to vector<8x16xf32>
    %cst_33 = arith.constant dense<0.000000e+00> : vector<8x16xf32>
    %67 = tpu.matmul %1, %66, %cst_33 {dimension_numbers = #tpu.dot_dimension_numbers<[1], [0], [0], [1], [0, 0, 1, 1], [], []>, precision = #tpu.contract_precision<fp32>} : vector<8x8xf32>, vector<8x16xf32>, vector<8x16xf32> -> vector<8x16xf32>
    %68 = vector.broadcast %58 : vector<1x16xf32> to vector<8x16xf32>
    %69 = arith.addf %67, %68 : vector<8x16xf32>
    %cst_34 = arith.constant 0.000000e+00 : f32
    %70 = vector.broadcast %cst_34 : f32 to vector<8x16xf32>
    %71 = arith.maximumf %69, %70 : vector<8x16xf32>
    %72 = vector.extract_strided_slice %59 {offsets = [16, 0], sizes = [8, 16], strides = [1, 1]} : vector<64x16xf32> to vector<8x16xf32>
    %cst_35 = arith.constant dense<0.000000e+00> : vector<8x16xf32>
    %73 = tpu.matmul %1, %72, %cst_35 {dimension_numbers = #tpu.dot_dimension_numbers<[1], [0], [0], [1], [0, 0, 1, 1], [], []>, precision = #tpu.contract_precision<fp32>} : vector<8x8xf32>, vector<8x16xf32>, vector<8x16xf32> -> vector<8x16xf32>
    %74 = vector.broadcast %58 : vector<1x16xf32> to vector<8x16xf32>
    %75 = arith.addf %73, %74 : vector<8x16xf32>
    %cst_36 = arith.constant 0.000000e+00 : f32
    %76 = vector.broadcast %cst_36 : f32 to vector<8x16xf32>
    %77 = arith.maximumf %75, %76 : vector<8x16xf32>
    %78 = vector.extract_strided_slice %59 {offsets = [24, 0], sizes = [8, 16], strides = [1, 1]} : vector<64x16xf32> to vector<8x16xf32>
    %cst_37 = arith.constant dense<0.000000e+00> : vector<8x16xf32>
    %79 = tpu.matmul %1, %78, %cst_37 {dimension_numbers = #tpu.dot_dimension_numbers<[1], [0], [0], [1], [0, 0, 1, 1], [], []>, precision = #tpu.contract_precision<fp32>} : vector<8x8xf32>, vector<8x16xf32>, vector<8x16xf32> -> vector<8x16xf32>
    %80 = vector.broadcast %58 : vector<1x16xf32> to vector<8x16xf32>
    %81 = arith.addf %79, %80 : vector<8x16xf32>
    %cst_38 = arith.constant 0.000000e+00 : f32
    %82 = vector.broadcast %cst_38 : f32 to vector<8x16xf32>
    %83 = arith.maximumf %81, %82 : vector<8x16xf32>
    %84 = vector.extract_strided_slice %59 {offsets = [32, 0], sizes = [8, 16], strides = [1, 1]} : vector<64x16xf32> to vector<8x16xf32>
    %cst_39 = arith.constant dense<0.000000e+00> : vector<8x16xf32>
    %85 = tpu.matmul %3, %84, %cst_39 {dimension_numbers = #tpu.dot_dimension_numbers<[1], [0], [0], [1], [0, 0, 1, 1], [], []>, precision = #tpu.contract_precision<fp32>} : vector<8x8xf32>, vector<8x16xf32>, vector<8x16xf32> -> vector<8x16xf32>
    %86 = vector.broadcast %58 : vector<1x16xf32> to vector<8x16xf32>
    %87 = arith.addf %85, %86 : vector<8x16xf32>
    %cst_40 = arith.constant 0.000000e+00 : f32
    %88 = vector.broadcast %cst_40 : f32 to vector<8x16xf32>
    %89 = arith.maximumf %87, %88 : vector<8x16xf32>
    %90 = vector.extract_strided_slice %59 {offsets = [40, 0], sizes = [8, 16], strides = [1, 1]} : vector<64x16xf32> to vector<8x16xf32>
    %cst_41 = arith.constant dense<0.000000e+00> : vector<8x16xf32>
    %91 = tpu.matmul %3, %90, %cst_41 {dimension_numbers = #tpu.dot_dimension_numbers<[1], [0], [0], [1], [0, 0, 1, 1], [], []>, precision = #tpu.contract_precision<fp32>} : vector<8x8xf32>, vector<8x16xf32>, vector<8x16xf32> -> vector<8x16xf32>
    %92 = vector.broadcast %58 : vector<1x16xf32> to vector<8x16xf32>
    %93 = arith.addf %91, %92 : vector<8x16xf32>
    %cst_42 = arith.constant 0.000000e+00 : f32
    %94 = vector.broadcast %cst_42 : f32 to vector<8x16xf32>
    %95 = arith.maximumf %93, %94 : vector<8x16xf32>
    %96 = vector.extract_strided_slice %59 {offsets = [48, 0], sizes = [8, 16], strides = [1, 1]} : vector<64x16xf32> to vector<8x16xf32>
    %cst_43 = arith.constant dense<0.000000e+00> : vector<8x16xf32>
    %97 = tpu.matmul %3, %96, %cst_43 {dimension_numbers = #tpu.dot_dimension_numbers<[1], [0], [0], [1], [0, 0, 1, 1], [], []>, precision = #tpu.contract_precision<fp32>} : vector<8x8xf32>, vector<8x16xf32>, vector<8x16xf32> -> vector<8x16xf32>
    %98 = vector.broadcast %58 : vector<1x16xf32> to vector<8x16xf32>
    %99 = arith.addf %97, %98 : vector<8x16xf32>
    %cst_44 = arith.constant 0.000000e+00 : f32
    %100 = vector.broadcast %cst_44 : f32 to vector<8x16xf32>
    %101 = arith.maximumf %99, %100 : vector<8x16xf32>
    %102 = vector.extract_strided_slice %59 {offsets = [56, 0], sizes = [8, 16], strides = [1, 1]} : vector<64x16xf32> to vector<8x16xf32>
    %cst_45 = arith.constant dense<0.000000e+00> : vector<8x16xf32>
    %103 = tpu.matmul %3, %102, %cst_45 {dimension_numbers = #tpu.dot_dimension_numbers<[1], [0], [0], [1], [0, 0, 1, 1], [], []>, precision = #tpu.contract_precision<fp32>} : vector<8x8xf32>, vector<8x16xf32>, vector<8x16xf32> -> vector<8x16xf32>
    %104 = vector.broadcast %58 : vector<1x16xf32> to vector<8x16xf32>
    %105 = arith.addf %103, %104 : vector<8x16xf32>
    %cst_46 = arith.constant 0.000000e+00 : f32
    %106 = vector.broadcast %cst_46 : f32 to vector<8x16xf32>
    %107 = arith.maximumf %105, %106 : vector<8x16xf32>
    %108 = tpu.concatenate %65, %89 in 0 : vector<8x16xf32>, vector<8x16xf32> -> vector<16x16xf32>
    %109 = tpu.concatenate %71, %95 in 0 : vector<8x16xf32>, vector<8x16xf32> -> vector<16x16xf32>
    %110 = tpu.concatenate %77, %101 in 0 : vector<8x16xf32>, vector<8x16xf32> -> vector<16x16xf32>
    %111 = tpu.concatenate %83, %107 in 0 : vector<8x16xf32>, vector<8x16xf32> -> vector<16x16xf32>
    %112 = tpu.iota {dimensions = array<i32: 1>} : vector<16x128xi32>
    %c64_i32 = arith.constant 64 : i32
    %113 = vector.broadcast %c64_i32 : i32 to vector<16x128xi32>
    %114 = arith.cmpi sge, %112, %113 : vector<16x128xi32>
    %c96_i32 = arith.constant 96 : i32
    %115 = vector.broadcast %c96_i32 : i32 to vector<16x128xi32>
    %116 = arith.cmpi slt, %112, %115 : vector<16x128xi32>
    %117 = arith.andi %114, %116 : vector<16x128xi1>
    %c0_47 = arith.constant 0 : index
    %c0_48 = arith.constant 0 : index
    %118 = vector.load %arg6[%c0_47, %c0_48] : memref<16x128xf32, #tpu.memory_space<vmem>>, vector<16x128xf32>
    %c0_49 = arith.constant 0 : index
    %c0_50 = arith.constant 0 : index
    %119 = vector.load %arg7[%c0_49, %c0_50] : memref<32x128xf32, #tpu.memory_space<vmem>>, vector<32x128xf32>
    %c0_51 = arith.constant 0 : index
    %c0_52 = arith.constant 0 : index
    %120 = vector.load %arg8[%c0_51, %c0_52] : memref<1x128xf32, #tpu.memory_space<vmem>>, vector<1x128xf32>
    %c0_53 = arith.constant 0 : index
    %c0_54 = arith.constant 0 : index
    %121 = vector.load %arg9[%c0_53, %c0_54] : memref<32x128xf32, #tpu.memory_space<vmem>>, vector<32x128xf32>
    %c0_55 = arith.constant 0 : index
    %c0_56 = arith.constant 0 : index
    %122 = vector.load %arg10[%c0_55, %c0_56] : memref<32x128xf32, #tpu.memory_space<vmem>>, vector<32x128xf32>
    %c0_57 = arith.constant 0 : index
    %c0_58 = arith.constant 0 : index
    %123 = vector.load %arg11[%c0_57, %c0_58] : memref<1x128xf32, #tpu.memory_space<vmem>>, vector<1x128xf32>
    %cst_59 = arith.constant 0.000000e+00 : f32
    %124 = vector.broadcast %cst_59 : f32 to vector<16x32xf32>
    %cst_60 = arith.constant 0.000000e+00 : f32
    %125 = vector.broadcast %cst_60 : f32 to vector<16x32xf32>
    %cst_61 = arith.constant 0.000000e+00 : f32
    %126 = vector.broadcast %cst_61 : f32 to vector<16x32xf32>
    %cst_62 = arith.constant 0.000000e+00 : f32
    %127 = vector.broadcast %cst_62 : f32 to vector<16x32xf32>
    %cst_63 = arith.constant dense<0.000000e+00> : vector<16x128xf32>
    %128 = tpu.matmul %108, %118, %cst_63 {dimension_numbers = #tpu.dot_dimension_numbers<[1], [0], [0], [1], [0, 0, 1, 1], [], []>, precision = #tpu.contract_precision<fp32>} : vector<16x16xf32>, vector<16x128xf32>, vector<16x128xf32> -> vector<16x128xf32>
    %cst_64 = arith.constant dense<0.000000e+00> : vector<16x128xf32>
    %129 = tpu.matmul %124, %119, %cst_64 {dimension_numbers = #tpu.dot_dimension_numbers<[1], [0], [0], [1], [0, 0, 1, 1], [], []>, precision = #tpu.contract_precision<fp32>} : vector<16x32xf32>, vector<32x128xf32>, vector<16x128xf32> -> vector<16x128xf32>
    %130 = arith.addf %128, %129 : vector<16x128xf32>
    %131 = vector.broadcast %120 : vector<1x128xf32> to vector<16x128xf32>
    %132 = arith.addf %130, %131 : vector<16x128xf32>
    %133 = math.tanh %132 : vector<16x128xf32>
    %134 = arith.negf %132 : vector<16x128xf32>
    %135 = math.exp %134 : vector<16x128xf32>
    %cst_65 = arith.constant 1.000000e+00 : f32
    %136 = vector.broadcast %cst_65 : f32 to vector<16x128xf32>
    %137 = arith.addf %136, %135 : vector<16x128xf32>
    %138 = arith.divf %136, %137 : vector<16x128xf32>
    %139 = arith.select %117, %133, %138 : vector<16x128xi1>, vector<16x128xf32>
    %140 = vector.extract_strided_slice %139 {offsets = [0, 0], sizes = [16, 32], strides = [1, 1]} : vector<16x128xf32> to vector<16x32xf32>
    %141 = vector.extract_strided_slice %139 {offsets = [0, 32], sizes = [16, 32], strides = [1, 1]} : vector<16x128xf32> to vector<16x32xf32>
    %142 = vector.extract_strided_slice %139 {offsets = [0, 64], sizes = [16, 32], strides = [1, 1]} : vector<16x128xf32> to vector<16x32xf32>
    %143 = vector.extract_strided_slice %139 {offsets = [0, 96], sizes = [16, 32], strides = [1, 1]} : vector<16x128xf32> to vector<16x32xf32>
    %144 = arith.mulf %141, %126 : vector<16x32xf32>
    %145 = arith.mulf %140, %142 : vector<16x32xf32>
    %146 = arith.addf %144, %145 : vector<16x32xf32>
    %147 = math.tanh %146 : vector<16x32xf32>
    %148 = arith.mulf %143, %147 : vector<16x32xf32>
    %cst_66 = arith.constant dense<0.000000e+00> : vector<16x128xf32>
    %149 = tpu.matmul %148, %121, %cst_66 {dimension_numbers = #tpu.dot_dimension_numbers<[1], [0], [0], [1], [0, 0, 1, 1], [], []>, precision = #tpu.contract_precision<fp32>} : vector<16x32xf32>, vector<32x128xf32>, vector<16x128xf32> -> vector<16x128xf32>
    %cst_67 = arith.constant dense<0.000000e+00> : vector<16x128xf32>
    %150 = tpu.matmul %125, %122, %cst_67 {dimension_numbers = #tpu.dot_dimension_numbers<[1], [0], [0], [1], [0, 0, 1, 1], [], []>, precision = #tpu.contract_precision<fp32>} : vector<16x32xf32>, vector<32x128xf32>, vector<16x128xf32> -> vector<16x128xf32>
    %151 = arith.addf %149, %150 : vector<16x128xf32>
    %152 = vector.broadcast %123 : vector<1x128xf32> to vector<16x128xf32>
    %153 = arith.addf %151, %152 : vector<16x128xf32>
    %154 = math.tanh %153 : vector<16x128xf32>
    %155 = arith.negf %153 : vector<16x128xf32>
    %156 = math.exp %155 : vector<16x128xf32>
    %cst_68 = arith.constant 1.000000e+00 : f32
    %157 = vector.broadcast %cst_68 : f32 to vector<16x128xf32>
    %158 = arith.addf %157, %156 : vector<16x128xf32>
    %159 = arith.divf %157, %158 : vector<16x128xf32>
    %160 = arith.select %117, %154, %159 : vector<16x128xi1>, vector<16x128xf32>
    %161 = vector.extract_strided_slice %160 {offsets = [0, 0], sizes = [16, 32], strides = [1, 1]} : vector<16x128xf32> to vector<16x32xf32>
    %162 = vector.extract_strided_slice %160 {offsets = [0, 32], sizes = [16, 32], strides = [1, 1]} : vector<16x128xf32> to vector<16x32xf32>
    %163 = vector.extract_strided_slice %160 {offsets = [0, 64], sizes = [16, 32], strides = [1, 1]} : vector<16x128xf32> to vector<16x32xf32>
    %164 = vector.extract_strided_slice %160 {offsets = [0, 96], sizes = [16, 32], strides = [1, 1]} : vector<16x128xf32> to vector<16x32xf32>
    %165 = arith.mulf %162, %127 : vector<16x32xf32>
    %166 = arith.mulf %161, %163 : vector<16x32xf32>
    %167 = arith.addf %165, %166 : vector<16x32xf32>
    %168 = math.tanh %167 : vector<16x32xf32>
    %169 = arith.mulf %164, %168 : vector<16x32xf32>
    %cst_69 = arith.constant dense<0.000000e+00> : vector<16x128xf32>
    %170 = tpu.matmul %109, %118, %cst_69 {dimension_numbers = #tpu.dot_dimension_numbers<[1], [0], [0], [1], [0, 0, 1, 1], [], []>, precision = #tpu.contract_precision<fp32>} : vector<16x16xf32>, vector<16x128xf32>, vector<16x128xf32> -> vector<16x128xf32>
    %cst_70 = arith.constant dense<0.000000e+00> : vector<16x128xf32>
    %171 = tpu.matmul %148, %119, %cst_70 {dimension_numbers = #tpu.dot_dimension_numbers<[1], [0], [0], [1], [0, 0, 1, 1], [], []>, precision = #tpu.contract_precision<fp32>} : vector<16x32xf32>, vector<32x128xf32>, vector<16x128xf32> -> vector<16x128xf32>
    %172 = arith.addf %170, %171 : vector<16x128xf32>
    %173 = vector.broadcast %120 : vector<1x128xf32> to vector<16x128xf32>
    %174 = arith.addf %172, %173 : vector<16x128xf32>
    %175 = math.tanh %174 : vector<16x128xf32>
    %176 = arith.negf %174 : vector<16x128xf32>
    %177 = math.exp %176 : vector<16x128xf32>
    %cst_71 = arith.constant 1.000000e+00 : f32
    %178 = vector.broadcast %cst_71 : f32 to vector<16x128xf32>
    %179 = arith.addf %178, %177 : vector<16x128xf32>
    %180 = arith.divf %178, %179 : vector<16x128xf32>
    %181 = arith.select %117, %175, %180 : vector<16x128xi1>, vector<16x128xf32>
    %182 = vector.extract_strided_slice %181 {offsets = [0, 0], sizes = [16, 32], strides = [1, 1]} : vector<16x128xf32> to vector<16x32xf32>
    %183 = vector.extract_strided_slice %181 {offsets = [0, 32], sizes = [16, 32], strides = [1, 1]} : vector<16x128xf32> to vector<16x32xf32>
    %184 = vector.extract_strided_slice %181 {offsets = [0, 64], sizes = [16, 32], strides = [1, 1]} : vector<16x128xf32> to vector<16x32xf32>
    %185 = vector.extract_strided_slice %181 {offsets = [0, 96], sizes = [16, 32], strides = [1, 1]} : vector<16x128xf32> to vector<16x32xf32>
    %186 = arith.mulf %183, %146 : vector<16x32xf32>
    %187 = arith.mulf %182, %184 : vector<16x32xf32>
    %188 = arith.addf %186, %187 : vector<16x32xf32>
    %189 = math.tanh %188 : vector<16x32xf32>
    %190 = arith.mulf %185, %189 : vector<16x32xf32>
    %cst_72 = arith.constant dense<0.000000e+00> : vector<16x128xf32>
    %191 = tpu.matmul %190, %121, %cst_72 {dimension_numbers = #tpu.dot_dimension_numbers<[1], [0], [0], [1], [0, 0, 1, 1], [], []>, precision = #tpu.contract_precision<fp32>} : vector<16x32xf32>, vector<32x128xf32>, vector<16x128xf32> -> vector<16x128xf32>
    %cst_73 = arith.constant dense<0.000000e+00> : vector<16x128xf32>
    %192 = tpu.matmul %169, %122, %cst_73 {dimension_numbers = #tpu.dot_dimension_numbers<[1], [0], [0], [1], [0, 0, 1, 1], [], []>, precision = #tpu.contract_precision<fp32>} : vector<16x32xf32>, vector<32x128xf32>, vector<16x128xf32> -> vector<16x128xf32>
    %193 = arith.addf %191, %192 : vector<16x128xf32>
    %194 = vector.broadcast %123 : vector<1x128xf32> to vector<16x128xf32>
    %195 = arith.addf %193, %194 : vector<16x128xf32>
    %196 = math.tanh %195 : vector<16x128xf32>
    %197 = arith.negf %195 : vector<16x128xf32>
    %198 = math.exp %197 : vector<16x128xf32>
    %cst_74 = arith.constant 1.000000e+00 : f32
    %199 = vector.broadcast %cst_74 : f32 to vector<16x128xf32>
    %200 = arith.addf %199, %198 : vector<16x128xf32>
    %201 = arith.divf %199, %200 : vector<16x128xf32>
    %202 = arith.select %117, %196, %201 : vector<16x128xi1>, vector<16x128xf32>
    %203 = vector.extract_strided_slice %202 {offsets = [0, 0], sizes = [16, 32], strides = [1, 1]} : vector<16x128xf32> to vector<16x32xf32>
    %204 = vector.extract_strided_slice %202 {offsets = [0, 32], sizes = [16, 32], strides = [1, 1]} : vector<16x128xf32> to vector<16x32xf32>
    %205 = vector.extract_strided_slice %202 {offsets = [0, 64], sizes = [16, 32], strides = [1, 1]} : vector<16x128xf32> to vector<16x32xf32>
    %206 = vector.extract_strided_slice %202 {offsets = [0, 96], sizes = [16, 32], strides = [1, 1]} : vector<16x128xf32> to vector<16x32xf32>
    %207 = arith.mulf %204, %167 : vector<16x32xf32>
    %208 = arith.mulf %203, %205 : vector<16x32xf32>
    %209 = arith.addf %207, %208 : vector<16x32xf32>
    %210 = math.tanh %209 : vector<16x32xf32>
    %211 = arith.mulf %206, %210 : vector<16x32xf32>
    %cst_75 = arith.constant dense<0.000000e+00> : vector<16x128xf32>
    %212 = tpu.matmul %110, %118, %cst_75 {dimension_numbers = #tpu.dot_dimension_numbers<[1], [0], [0], [1], [0, 0, 1, 1], [], []>, precision = #tpu.contract_precision<fp32>} : vector<16x16xf32>, vector<16x128xf32>, vector<16x128xf32> -> vector<16x128xf32>
    %cst_76 = arith.constant dense<0.000000e+00> : vector<16x128xf32>
    %213 = tpu.matmul %190, %119, %cst_76 {dimension_numbers = #tpu.dot_dimension_numbers<[1], [0], [0], [1], [0, 0, 1, 1], [], []>, precision = #tpu.contract_precision<fp32>} : vector<16x32xf32>, vector<32x128xf32>, vector<16x128xf32> -> vector<16x128xf32>
    %214 = arith.addf %212, %213 : vector<16x128xf32>
    %215 = vector.broadcast %120 : vector<1x128xf32> to vector<16x128xf32>
    %216 = arith.addf %214, %215 : vector<16x128xf32>
    %217 = math.tanh %216 : vector<16x128xf32>
    %218 = arith.negf %216 : vector<16x128xf32>
    %219 = math.exp %218 : vector<16x128xf32>
    %cst_77 = arith.constant 1.000000e+00 : f32
    %220 = vector.broadcast %cst_77 : f32 to vector<16x128xf32>
    %221 = arith.addf %220, %219 : vector<16x128xf32>
    %222 = arith.divf %220, %221 : vector<16x128xf32>
    %223 = arith.select %117, %217, %222 : vector<16x128xi1>, vector<16x128xf32>
    %224 = vector.extract_strided_slice %223 {offsets = [0, 0], sizes = [16, 32], strides = [1, 1]} : vector<16x128xf32> to vector<16x32xf32>
    %225 = vector.extract_strided_slice %223 {offsets = [0, 32], sizes = [16, 32], strides = [1, 1]} : vector<16x128xf32> to vector<16x32xf32>
    %226 = vector.extract_strided_slice %223 {offsets = [0, 64], sizes = [16, 32], strides = [1, 1]} : vector<16x128xf32> to vector<16x32xf32>
    %227 = vector.extract_strided_slice %223 {offsets = [0, 96], sizes = [16, 32], strides = [1, 1]} : vector<16x128xf32> to vector<16x32xf32>
    %228 = arith.mulf %225, %188 : vector<16x32xf32>
    %229 = arith.mulf %224, %226 : vector<16x32xf32>
    %230 = arith.addf %228, %229 : vector<16x32xf32>
    %231 = math.tanh %230 : vector<16x32xf32>
    %232 = arith.mulf %227, %231 : vector<16x32xf32>
    %cst_78 = arith.constant dense<0.000000e+00> : vector<16x128xf32>
    %233 = tpu.matmul %232, %121, %cst_78 {dimension_numbers = #tpu.dot_dimension_numbers<[1], [0], [0], [1], [0, 0, 1, 1], [], []>, precision = #tpu.contract_precision<fp32>} : vector<16x32xf32>, vector<32x128xf32>, vector<16x128xf32> -> vector<16x128xf32>
    %cst_79 = arith.constant dense<0.000000e+00> : vector<16x128xf32>
    %234 = tpu.matmul %211, %122, %cst_79 {dimension_numbers = #tpu.dot_dimension_numbers<[1], [0], [0], [1], [0, 0, 1, 1], [], []>, precision = #tpu.contract_precision<fp32>} : vector<16x32xf32>, vector<32x128xf32>, vector<16x128xf32> -> vector<16x128xf32>
    %235 = arith.addf %233, %234 : vector<16x128xf32>
    %236 = vector.broadcast %123 : vector<1x128xf32> to vector<16x128xf32>
    %237 = arith.addf %235, %236 : vector<16x128xf32>
    %238 = math.tanh %237 : vector<16x128xf32>
    %239 = arith.negf %237 : vector<16x128xf32>
    %240 = math.exp %239 : vector<16x128xf32>
    %cst_80 = arith.constant 1.000000e+00 : f32
    %241 = vector.broadcast %cst_80 : f32 to vector<16x128xf32>
    %242 = arith.addf %241, %240 : vector<16x128xf32>
    %243 = arith.divf %241, %242 : vector<16x128xf32>
    %244 = arith.select %117, %238, %243 : vector<16x128xi1>, vector<16x128xf32>
    %245 = vector.extract_strided_slice %244 {offsets = [0, 0], sizes = [16, 32], strides = [1, 1]} : vector<16x128xf32> to vector<16x32xf32>
    %246 = vector.extract_strided_slice %244 {offsets = [0, 32], sizes = [16, 32], strides = [1, 1]} : vector<16x128xf32> to vector<16x32xf32>
    %247 = vector.extract_strided_slice %244 {offsets = [0, 64], sizes = [16, 32], strides = [1, 1]} : vector<16x128xf32> to vector<16x32xf32>
    %248 = vector.extract_strided_slice %244 {offsets = [0, 96], sizes = [16, 32], strides = [1, 1]} : vector<16x128xf32> to vector<16x32xf32>
    %249 = arith.mulf %246, %209 : vector<16x32xf32>
    %250 = arith.mulf %245, %247 : vector<16x32xf32>
    %251 = arith.addf %249, %250 : vector<16x32xf32>
    %252 = math.tanh %251 : vector<16x32xf32>
    %253 = arith.mulf %248, %252 : vector<16x32xf32>
    %cst_81 = arith.constant dense<0.000000e+00> : vector<16x128xf32>
    %254 = tpu.matmul %111, %118, %cst_81 {dimension_numbers = #tpu.dot_dimension_numbers<[1], [0], [0], [1], [0, 0, 1, 1], [], []>, precision = #tpu.contract_precision<fp32>} : vector<16x16xf32>, vector<16x128xf32>, vector<16x128xf32> -> vector<16x128xf32>
    %cst_82 = arith.constant dense<0.000000e+00> : vector<16x128xf32>
    %255 = tpu.matmul %232, %119, %cst_82 {dimension_numbers = #tpu.dot_dimension_numbers<[1], [0], [0], [1], [0, 0, 1, 1], [], []>, precision = #tpu.contract_precision<fp32>} : vector<16x32xf32>, vector<32x128xf32>, vector<16x128xf32> -> vector<16x128xf32>
    %256 = arith.addf %254, %255 : vector<16x128xf32>
    %257 = vector.broadcast %120 : vector<1x128xf32> to vector<16x128xf32>
    %258 = arith.addf %256, %257 : vector<16x128xf32>
    %259 = math.tanh %258 : vector<16x128xf32>
    %260 = arith.negf %258 : vector<16x128xf32>
    %261 = math.exp %260 : vector<16x128xf32>
    %cst_83 = arith.constant 1.000000e+00 : f32
    %262 = vector.broadcast %cst_83 : f32 to vector<16x128xf32>
    %263 = arith.addf %262, %261 : vector<16x128xf32>
    %264 = arith.divf %262, %263 : vector<16x128xf32>
    %265 = arith.select %117, %259, %264 : vector<16x128xi1>, vector<16x128xf32>
    %266 = vector.extract_strided_slice %265 {offsets = [0, 0], sizes = [16, 32], strides = [1, 1]} : vector<16x128xf32> to vector<16x32xf32>
    %267 = vector.extract_strided_slice %265 {offsets = [0, 32], sizes = [16, 32], strides = [1, 1]} : vector<16x128xf32> to vector<16x32xf32>
    %268 = vector.extract_strided_slice %265 {offsets = [0, 64], sizes = [16, 32], strides = [1, 1]} : vector<16x128xf32> to vector<16x32xf32>
    %269 = vector.extract_strided_slice %265 {offsets = [0, 96], sizes = [16, 32], strides = [1, 1]} : vector<16x128xf32> to vector<16x32xf32>
    %270 = arith.mulf %267, %230 : vector<16x32xf32>
    %271 = arith.mulf %266, %268 : vector<16x32xf32>
    %272 = arith.addf %270, %271 : vector<16x32xf32>
    %273 = math.tanh %272 : vector<16x32xf32>
    %274 = arith.mulf %269, %273 : vector<16x32xf32>
    %cst_84 = arith.constant dense<0.000000e+00> : vector<16x128xf32>
    %275 = tpu.matmul %274, %121, %cst_84 {dimension_numbers = #tpu.dot_dimension_numbers<[1], [0], [0], [1], [0, 0, 1, 1], [], []>, precision = #tpu.contract_precision<fp32>} : vector<16x32xf32>, vector<32x128xf32>, vector<16x128xf32> -> vector<16x128xf32>
    %cst_85 = arith.constant dense<0.000000e+00> : vector<16x128xf32>
    %276 = tpu.matmul %253, %122, %cst_85 {dimension_numbers = #tpu.dot_dimension_numbers<[1], [0], [0], [1], [0, 0, 1, 1], [], []>, precision = #tpu.contract_precision<fp32>} : vector<16x32xf32>, vector<32x128xf32>, vector<16x128xf32> -> vector<16x128xf32>
    %277 = arith.addf %275, %276 : vector<16x128xf32>
    %278 = vector.broadcast %123 : vector<1x128xf32> to vector<16x128xf32>
    %279 = arith.addf %277, %278 : vector<16x128xf32>
    %280 = math.tanh %279 : vector<16x128xf32>
    %281 = arith.negf %279 : vector<16x128xf32>
    %282 = math.exp %281 : vector<16x128xf32>
    %cst_86 = arith.constant 1.000000e+00 : f32
    %283 = vector.broadcast %cst_86 : f32 to vector<16x128xf32>
    %284 = arith.addf %283, %282 : vector<16x128xf32>
    %285 = arith.divf %283, %284 : vector<16x128xf32>
    %286 = arith.select %117, %280, %285 : vector<16x128xi1>, vector<16x128xf32>
    %287 = vector.extract_strided_slice %286 {offsets = [0, 0], sizes = [16, 32], strides = [1, 1]} : vector<16x128xf32> to vector<16x32xf32>
    %288 = vector.extract_strided_slice %286 {offsets = [0, 32], sizes = [16, 32], strides = [1, 1]} : vector<16x128xf32> to vector<16x32xf32>
    %289 = vector.extract_strided_slice %286 {offsets = [0, 64], sizes = [16, 32], strides = [1, 1]} : vector<16x128xf32> to vector<16x32xf32>
    %290 = vector.extract_strided_slice %286 {offsets = [0, 96], sizes = [16, 32], strides = [1, 1]} : vector<16x128xf32> to vector<16x32xf32>
    %291 = arith.mulf %288, %251 : vector<16x32xf32>
    %292 = arith.mulf %287, %289 : vector<16x32xf32>
    %293 = arith.addf %291, %292 : vector<16x32xf32>
    %294 = math.tanh %293 : vector<16x32xf32>
    %295 = arith.mulf %290, %294 : vector<16x32xf32>
    %c0_87 = arith.constant 0 : index
    %c0_88 = arith.constant 0 : index
    %296 = vector.load %arg12[%c0_87, %c0_88] : memref<2x128xf32, #tpu.memory_space<vmem>>, vector<2x128xf32>
    %c0_89 = arith.constant 0 : index
    %c0_90 = arith.constant 0 : index
    %297 = vector.load %arg13[%c0_89, %c0_90] : memref<32x128xf32, #tpu.memory_space<vmem>>, vector<32x128xf32>
    %c0_91 = arith.constant 0 : index
    %c0_92 = arith.constant 0 : index
    %298 = vector.load %arg14[%c0_91, %c0_92] : memref<1x128xf32, #tpu.memory_space<vmem>>, vector<1x128xf32>
    %c0_93 = arith.constant 0 : index
    %c0_94 = arith.constant 0 : index
    %299 = vector.load %arg15[%c0_93, %c0_94] : memref<32x128xf32, #tpu.memory_space<vmem>>, vector<32x128xf32>
    %c0_95 = arith.constant 0 : index
    %c0_96 = arith.constant 0 : index
    %300 = vector.load %arg16[%c0_95, %c0_96] : memref<32x128xf32, #tpu.memory_space<vmem>>, vector<32x128xf32>
    %c0_97 = arith.constant 0 : index
    %c0_98 = arith.constant 0 : index
    %301 = vector.load %arg17[%c0_97, %c0_98] : memref<1x128xf32, #tpu.memory_space<vmem>>, vector<1x128xf32>
    %c0_99 = arith.constant 0 : index
    %c0_100 = arith.constant 0 : index
    %302 = vector.load %arg18[%c0_99, %c0_100] : memref<32x2xf32, #tpu.memory_space<vmem>>, vector<32x2xf32>
    %c0_101 = arith.constant 0 : index
    %c0_102 = arith.constant 0 : index
    %303 = vector.load %arg19[%c0_101, %c0_102] : memref<1x2xf32, #tpu.memory_space<vmem>>, vector<1x2xf32>
    %cst_103 = arith.constant 0.000000e+00 : f32
    %304 = vector.broadcast %cst_103 : f32 to vector<16x2xf32>
    %cst_104 = arith.constant dense<0.000000e+00> : vector<16x128xf32>
    %305 = tpu.matmul %304, %296, %cst_104 {dimension_numbers = #tpu.dot_dimension_numbers<[1], [0], [0], [1], [0, 0, 1, 1], [], []>, precision = #tpu.contract_precision<fp32>} : vector<16x2xf32>, vector<2x128xf32>, vector<16x128xf32> -> vector<16x128xf32>
    %cst_105 = arith.constant dense<0.000000e+00> : vector<16x128xf32>
    %306 = tpu.matmul %295, %297, %cst_105 {dimension_numbers = #tpu.dot_dimension_numbers<[1], [0], [0], [1], [0, 0, 1, 1], [], []>, precision = #tpu.contract_precision<fp32>} : vector<16x32xf32>, vector<32x128xf32>, vector<16x128xf32> -> vector<16x128xf32>
    %307 = arith.addf %305, %306 : vector<16x128xf32>
    %308 = vector.broadcast %298 : vector<1x128xf32> to vector<16x128xf32>
    %309 = arith.addf %307, %308 : vector<16x128xf32>
    %310 = math.tanh %309 : vector<16x128xf32>
    %311 = arith.negf %309 : vector<16x128xf32>
    %312 = math.exp %311 : vector<16x128xf32>
    %cst_106 = arith.constant 1.000000e+00 : f32
    %313 = vector.broadcast %cst_106 : f32 to vector<16x128xf32>
    %314 = arith.addf %313, %312 : vector<16x128xf32>
    %315 = arith.divf %313, %314 : vector<16x128xf32>
    %316 = arith.select %117, %310, %315 : vector<16x128xi1>, vector<16x128xf32>
    %317 = vector.extract_strided_slice %316 {offsets = [0, 0], sizes = [16, 32], strides = [1, 1]} : vector<16x128xf32> to vector<16x32xf32>
    %318 = vector.extract_strided_slice %316 {offsets = [0, 32], sizes = [16, 32], strides = [1, 1]} : vector<16x128xf32> to vector<16x32xf32>
    %319 = vector.extract_strided_slice %316 {offsets = [0, 64], sizes = [16, 32], strides = [1, 1]} : vector<16x128xf32> to vector<16x32xf32>
    %320 = vector.extract_strided_slice %316 {offsets = [0, 96], sizes = [16, 32], strides = [1, 1]} : vector<16x128xf32> to vector<16x32xf32>
    %321 = arith.mulf %318, %293 : vector<16x32xf32>
    %322 = arith.mulf %317, %319 : vector<16x32xf32>
    %323 = arith.addf %321, %322 : vector<16x32xf32>
    %324 = math.tanh %323 : vector<16x32xf32>
    %325 = arith.mulf %320, %324 : vector<16x32xf32>
    %cst_107 = arith.constant dense<0.000000e+00> : vector<16x128xf32>
    %326 = tpu.matmul %325, %299, %cst_107 {dimension_numbers = #tpu.dot_dimension_numbers<[1], [0], [0], [1], [0, 0, 1, 1], [], []>, precision = #tpu.contract_precision<fp32>} : vector<16x32xf32>, vector<32x128xf32>, vector<16x128xf32> -> vector<16x128xf32>
    %cst_108 = arith.constant dense<0.000000e+00> : vector<16x128xf32>
    %327 = tpu.matmul %295, %300, %cst_108 {dimension_numbers = #tpu.dot_dimension_numbers<[1], [0], [0], [1], [0, 0, 1, 1], [], []>, precision = #tpu.contract_precision<fp32>} : vector<16x32xf32>, vector<32x128xf32>, vector<16x128xf32> -> vector<16x128xf32>
    %328 = arith.addf %326, %327 : vector<16x128xf32>
    %329 = vector.broadcast %301 : vector<1x128xf32> to vector<16x128xf32>
    %330 = arith.addf %328, %329 : vector<16x128xf32>
    %331 = math.tanh %330 : vector<16x128xf32>
    %332 = arith.negf %330 : vector<16x128xf32>
    %333 = math.exp %332 : vector<16x128xf32>
    %cst_109 = arith.constant 1.000000e+00 : f32
    %334 = vector.broadcast %cst_109 : f32 to vector<16x128xf32>
    %335 = arith.addf %334, %333 : vector<16x128xf32>
    %336 = arith.divf %334, %335 : vector<16x128xf32>
    %337 = arith.select %117, %331, %336 : vector<16x128xi1>, vector<16x128xf32>
    %338 = vector.extract_strided_slice %337 {offsets = [0, 0], sizes = [16, 32], strides = [1, 1]} : vector<16x128xf32> to vector<16x32xf32>
    %339 = vector.extract_strided_slice %337 {offsets = [0, 32], sizes = [16, 32], strides = [1, 1]} : vector<16x128xf32> to vector<16x32xf32>
    %340 = vector.extract_strided_slice %337 {offsets = [0, 64], sizes = [16, 32], strides = [1, 1]} : vector<16x128xf32> to vector<16x32xf32>
    %341 = vector.extract_strided_slice %337 {offsets = [0, 96], sizes = [16, 32], strides = [1, 1]} : vector<16x128xf32> to vector<16x32xf32>
    %342 = arith.mulf %339, %293 : vector<16x32xf32>
    %343 = arith.mulf %338, %340 : vector<16x32xf32>
    %344 = arith.addf %342, %343 : vector<16x32xf32>
    %345 = math.tanh %344 : vector<16x32xf32>
    %346 = arith.mulf %341, %345 : vector<16x32xf32>
    %cst_110 = arith.constant dense<0.000000e+00> : vector<16x2xf32>
    %347 = tpu.matmul %346, %302, %cst_110 {dimension_numbers = #tpu.dot_dimension_numbers<[1], [0], [0], [1], [0, 0, 1, 1], [], []>, precision = #tpu.contract_precision<fp32>} : vector<16x32xf32>, vector<32x2xf32>, vector<16x2xf32> -> vector<16x2xf32>
    %348 = vector.broadcast %303 : vector<1x2xf32> to vector<16x2xf32>
    %349 = arith.addf %347, %348 : vector<16x2xf32>
    %cst_111 = arith.constant dense<0.000000e+00> : vector<16x128xf32>
    %350 = tpu.matmul %349, %296, %cst_111 {dimension_numbers = #tpu.dot_dimension_numbers<[1], [0], [0], [1], [0, 0, 1, 1], [], []>, precision = #tpu.contract_precision<fp32>} : vector<16x2xf32>, vector<2x128xf32>, vector<16x128xf32> -> vector<16x128xf32>
    %cst_112 = arith.constant dense<0.000000e+00> : vector<16x128xf32>
    %351 = tpu.matmul %325, %297, %cst_112 {dimension_numbers = #tpu.dot_dimension_numbers<[1], [0], [0], [1], [0, 0, 1, 1], [], []>, precision = #tpu.contract_precision<fp32>} : vector<16x32xf32>, vector<32x128xf32>, vector<16x128xf32> -> vector<16x128xf32>
    %352 = arith.addf %350, %351 : vector<16x128xf32>
    %353 = vector.broadcast %298 : vector<1x128xf32> to vector<16x128xf32>
    %354 = arith.addf %352, %353 : vector<16x128xf32>
    %355 = math.tanh %354 : vector<16x128xf32>
    %356 = arith.negf %354 : vector<16x128xf32>
    %357 = math.exp %356 : vector<16x128xf32>
    %cst_113 = arith.constant 1.000000e+00 : f32
    %358 = vector.broadcast %cst_113 : f32 to vector<16x128xf32>
    %359 = arith.addf %358, %357 : vector<16x128xf32>
    %360 = arith.divf %358, %359 : vector<16x128xf32>
    %361 = arith.select %117, %355, %360 : vector<16x128xi1>, vector<16x128xf32>
    %362 = vector.extract_strided_slice %361 {offsets = [0, 0], sizes = [16, 32], strides = [1, 1]} : vector<16x128xf32> to vector<16x32xf32>
    %363 = vector.extract_strided_slice %361 {offsets = [0, 32], sizes = [16, 32], strides = [1, 1]} : vector<16x128xf32> to vector<16x32xf32>
    %364 = vector.extract_strided_slice %361 {offsets = [0, 64], sizes = [16, 32], strides = [1, 1]} : vector<16x128xf32> to vector<16x32xf32>
    %365 = vector.extract_strided_slice %361 {offsets = [0, 96], sizes = [16, 32], strides = [1, 1]} : vector<16x128xf32> to vector<16x32xf32>
    %366 = arith.mulf %363, %323 : vector<16x32xf32>
    %367 = arith.mulf %362, %364 : vector<16x32xf32>
    %368 = arith.addf %366, %367 : vector<16x32xf32>
    %369 = math.tanh %368 : vector<16x32xf32>
    %370 = arith.mulf %365, %369 : vector<16x32xf32>
    %cst_114 = arith.constant dense<0.000000e+00> : vector<16x128xf32>
    %371 = tpu.matmul %370, %299, %cst_114 {dimension_numbers = #tpu.dot_dimension_numbers<[1], [0], [0], [1], [0, 0, 1, 1], [], []>, precision = #tpu.contract_precision<fp32>} : vector<16x32xf32>, vector<32x128xf32>, vector<16x128xf32> -> vector<16x128xf32>
    %cst_115 = arith.constant dense<0.000000e+00> : vector<16x128xf32>
    %372 = tpu.matmul %346, %300, %cst_115 {dimension_numbers = #tpu.dot_dimension_numbers<[1], [0], [0], [1], [0, 0, 1, 1], [], []>, precision = #tpu.contract_precision<fp32>} : vector<16x32xf32>, vector<32x128xf32>, vector<16x128xf32> -> vector<16x128xf32>
    %373 = arith.addf %371, %372 : vector<16x128xf32>
    %374 = vector.broadcast %301 : vector<1x128xf32> to vector<16x128xf32>
    %375 = arith.addf %373, %374 : vector<16x128xf32>
    %376 = math.tanh %375 : vector<16x128xf32>
    %377 = arith.negf %375 : vector<16x128xf32>
    %378 = math.exp %377 : vector<16x128xf32>
    %cst_116 = arith.constant 1.000000e+00 : f32
    %379 = vector.broadcast %cst_116 : f32 to vector<16x128xf32>
    %380 = arith.addf %379, %378 : vector<16x128xf32>
    %381 = arith.divf %379, %380 : vector<16x128xf32>
    %382 = arith.select %117, %376, %381 : vector<16x128xi1>, vector<16x128xf32>
    %383 = vector.extract_strided_slice %382 {offsets = [0, 0], sizes = [16, 32], strides = [1, 1]} : vector<16x128xf32> to vector<16x32xf32>
    %384 = vector.extract_strided_slice %382 {offsets = [0, 32], sizes = [16, 32], strides = [1, 1]} : vector<16x128xf32> to vector<16x32xf32>
    %385 = vector.extract_strided_slice %382 {offsets = [0, 64], sizes = [16, 32], strides = [1, 1]} : vector<16x128xf32> to vector<16x32xf32>
    %386 = vector.extract_strided_slice %382 {offsets = [0, 96], sizes = [16, 32], strides = [1, 1]} : vector<16x128xf32> to vector<16x32xf32>
    %387 = arith.mulf %384, %344 : vector<16x32xf32>
    %388 = arith.mulf %383, %385 : vector<16x32xf32>
    %389 = arith.addf %387, %388 : vector<16x32xf32>
    %390 = math.tanh %389 : vector<16x32xf32>
    %391 = arith.mulf %386, %390 : vector<16x32xf32>
    %cst_117 = arith.constant dense<0.000000e+00> : vector<16x2xf32>
    %392 = tpu.matmul %391, %302, %cst_117 {dimension_numbers = #tpu.dot_dimension_numbers<[1], [0], [0], [1], [0, 0, 1, 1], [], []>, precision = #tpu.contract_precision<fp32>} : vector<16x32xf32>, vector<32x2xf32>, vector<16x2xf32> -> vector<16x2xf32>
    %393 = vector.broadcast %303 : vector<1x2xf32> to vector<16x2xf32>
    %394 = arith.addf %392, %393 : vector<16x2xf32>
    %cst_118 = arith.constant dense<0.000000e+00> : vector<16x128xf32>
    %395 = tpu.matmul %394, %296, %cst_118 {dimension_numbers = #tpu.dot_dimension_numbers<[1], [0], [0], [1], [0, 0, 1, 1], [], []>, precision = #tpu.contract_precision<fp32>} : vector<16x2xf32>, vector<2x128xf32>, vector<16x128xf32> -> vector<16x128xf32>
    %cst_119 = arith.constant dense<0.000000e+00> : vector<16x128xf32>
    %396 = tpu.matmul %370, %297, %cst_119 {dimension_numbers = #tpu.dot_dimension_numbers<[1], [0], [0], [1], [0, 0, 1, 1], [], []>, precision = #tpu.contract_precision<fp32>} : vector<16x32xf32>, vector<32x128xf32>, vector<16x128xf32> -> vector<16x128xf32>
    %397 = arith.addf %395, %396 : vector<16x128xf32>
    %398 = vector.broadcast %298 : vector<1x128xf32> to vector<16x128xf32>
    %399 = arith.addf %397, %398 : vector<16x128xf32>
    %400 = math.tanh %399 : vector<16x128xf32>
    %401 = arith.negf %399 : vector<16x128xf32>
    %402 = math.exp %401 : vector<16x128xf32>
    %cst_120 = arith.constant 1.000000e+00 : f32
    %403 = vector.broadcast %cst_120 : f32 to vector<16x128xf32>
    %404 = arith.addf %403, %402 : vector<16x128xf32>
    %405 = arith.divf %403, %404 : vector<16x128xf32>
    %406 = arith.select %117, %400, %405 : vector<16x128xi1>, vector<16x128xf32>
    %407 = vector.extract_strided_slice %406 {offsets = [0, 0], sizes = [16, 32], strides = [1, 1]} : vector<16x128xf32> to vector<16x32xf32>
    %408 = vector.extract_strided_slice %406 {offsets = [0, 32], sizes = [16, 32], strides = [1, 1]} : vector<16x128xf32> to vector<16x32xf32>
    %409 = vector.extract_strided_slice %406 {offsets = [0, 64], sizes = [16, 32], strides = [1, 1]} : vector<16x128xf32> to vector<16x32xf32>
    %410 = vector.extract_strided_slice %406 {offsets = [0, 96], sizes = [16, 32], strides = [1, 1]} : vector<16x128xf32> to vector<16x32xf32>
    %411 = arith.mulf %408, %368 : vector<16x32xf32>
    %412 = arith.mulf %407, %409 : vector<16x32xf32>
    %413 = arith.addf %411, %412 : vector<16x32xf32>
    %414 = math.tanh %413 : vector<16x32xf32>
    %415 = arith.mulf %410, %414 : vector<16x32xf32>
    %cst_121 = arith.constant dense<0.000000e+00> : vector<16x128xf32>
    %416 = tpu.matmul %415, %299, %cst_121 {dimension_numbers = #tpu.dot_dimension_numbers<[1], [0], [0], [1], [0, 0, 1, 1], [], []>, precision = #tpu.contract_precision<fp32>} : vector<16x32xf32>, vector<32x128xf32>, vector<16x128xf32> -> vector<16x128xf32>
    %cst_122 = arith.constant dense<0.000000e+00> : vector<16x128xf32>
    %417 = tpu.matmul %391, %300, %cst_122 {dimension_numbers = #tpu.dot_dimension_numbers<[1], [0], [0], [1], [0, 0, 1, 1], [], []>, precision = #tpu.contract_precision<fp32>} : vector<16x32xf32>, vector<32x128xf32>, vector<16x128xf32> -> vector<16x128xf32>
    %418 = arith.addf %416, %417 : vector<16x128xf32>
    %419 = vector.broadcast %301 : vector<1x128xf32> to vector<16x128xf32>
    %420 = arith.addf %418, %419 : vector<16x128xf32>
    %421 = math.tanh %420 : vector<16x128xf32>
    %422 = arith.negf %420 : vector<16x128xf32>
    %423 = math.exp %422 : vector<16x128xf32>
    %cst_123 = arith.constant 1.000000e+00 : f32
    %424 = vector.broadcast %cst_123 : f32 to vector<16x128xf32>
    %425 = arith.addf %424, %423 : vector<16x128xf32>
    %426 = arith.divf %424, %425 : vector<16x128xf32>
    %427 = arith.select %117, %421, %426 : vector<16x128xi1>, vector<16x128xf32>
    %428 = vector.extract_strided_slice %427 {offsets = [0, 0], sizes = [16, 32], strides = [1, 1]} : vector<16x128xf32> to vector<16x32xf32>
    %429 = vector.extract_strided_slice %427 {offsets = [0, 32], sizes = [16, 32], strides = [1, 1]} : vector<16x128xf32> to vector<16x32xf32>
    %430 = vector.extract_strided_slice %427 {offsets = [0, 64], sizes = [16, 32], strides = [1, 1]} : vector<16x128xf32> to vector<16x32xf32>
    %431 = vector.extract_strided_slice %427 {offsets = [0, 96], sizes = [16, 32], strides = [1, 1]} : vector<16x128xf32> to vector<16x32xf32>
    %432 = arith.mulf %429, %389 : vector<16x32xf32>
    %433 = arith.mulf %428, %430 : vector<16x32xf32>
    %434 = arith.addf %432, %433 : vector<16x32xf32>
    %435 = math.tanh %434 : vector<16x32xf32>
    %436 = arith.mulf %431, %435 : vector<16x32xf32>
    %cst_124 = arith.constant dense<0.000000e+00> : vector<16x2xf32>
    %437 = tpu.matmul %436, %302, %cst_124 {dimension_numbers = #tpu.dot_dimension_numbers<[1], [0], [0], [1], [0, 0, 1, 1], [], []>, precision = #tpu.contract_precision<fp32>} : vector<16x32xf32>, vector<32x2xf32>, vector<16x2xf32> -> vector<16x2xf32>
    %438 = vector.broadcast %303 : vector<1x2xf32> to vector<16x2xf32>
    %439 = arith.addf %437, %438 : vector<16x2xf32>
    %440 = tpu.concatenate %349, %394, %439 in 0 : vector<16x2xf32>, vector<16x2xf32>, vector<16x2xf32> -> vector<48x2xf32>
    %c0_125 = arith.constant 0 : index
    %c0_126 = arith.constant 0 : index
    %441 = vector.load %arg20[%c0_125, %c0_126] : memref<48x2xf32, #tpu.memory_space<vmem>>, vector<48x2xf32>
    tpu.vector_store %arg20[%c0_125, %c0_126], %440 {strides = array<i32>} : memref<48x2xf32, #tpu.memory_space<vmem>>, vector<48x2xf32>,
    return
  }
}

</mosaic_0001>

<bundles_post_ra>
// kernel: tpu_custom_call.1
= control target key start
LH: loop header
LB: loop body
LE: loop exit
PB: predicated region body
PF: predicated region fallthrough
CT: control target
= control target key end

     0   :  { %s34096_s0 = inlined_call_operand.vmem [shape: f32[64,2], index: 0, kind: input, shape index: {}]   ;;  %s34097_s1 = inlined_call_operand.hbm [shape: f32[2,8,8], index: 1, kind: input, shape index: {}]   ;;  %s34098_s2 = inlined_call_operand.hbm [shape: f32[2,16], index: 2, kind: input, shape index: {}]   ;;  %s34099_s3 = inlined_call_operand.vmem [shape: f32[1,16], index: 3, kind: input, shape index: {}]   ;;  %s34100_s4 = inlined_call_operand.hbm [shape: f32[16,16], index: 4, kind: input, shape index: {}]   ;;  %s34101_s5 = inlined_call_operand.hbm [shape: f32[1,16], index: 5, kind: input, shape index: {}]   ;;  %s34102_s6 = inlined_call_operand.hbm [shape: f32[16,128], index: 6, kind: input, shape index: {}]   ;;  %s34103_s7 = inlined_call_operand.vmem [shape: f32[32,128], index: 7, kind: input, shape index: {}]   ;;  %s34104_s8 = inlined_call_operand.hbm [shape: f32[1,128], index: 8, kind: input, shape index: {}]   ;;  %s34105_s9 = inlined_call_operand.vmem [shape: f32[32,128], index: 9, kind: input, shape index: {}]   ;;  %s34106_s10 = inlined_call_operand.vmem [shape: f32[32,128], index: 10, kind: input, shape index: {}]   ;;  %s34107_s11 = inlined_call_operand.hbm [shape: f32[1,128], index: 11, kind: input, shape index: {}]   ;;  %s34108_s12 = inlined_call_operand.hbm [shape: f32[2,128], index: 12, kind: input, shape index: {}]   ;;  %s34109_s13 = inlined_call_operand.hbm [shape: f32[32,128], index: 13, kind: input, shape index: {}]   ;;  %s34110_s14 = inlined_call_operand.hbm [shape: f32[1,128], index: 14, kind: input, shape index: {}]   ;;  %s34111_s15 = inlined_call_operand.hbm [shape: f32[32,128], index: 15, kind: input, shape index: {}]   ;;  %s34112_s16 = inlined_call_operand.vmem [shape: f32[32,128], index: 16, kind: input, shape index: {}]   ;;  %s34113_s17 = inlined_call_operand.hbm [shape: f32[1,128], index: 17, kind: input, shape index: {}]   ;;  %s34114_s18 = inlined_call_operand.vmem [shape: f32[32,2], index: 18, kind: input, shape index: {}]   ;;  %s34115_s19 = inlined_call_operand.vmem [shape: f32[1,2], index: 19, kind: input, shape index: {}]   ;;  %s34116_s20 = inlined_call_operand.vmem [shape: f32[48,2], index: 20, kind: output, shape index: {}]  }
   0x1   :  { %34317 = sst [smem:[#allocation73_spill]] %s34096_s0 }
   0x2   :  { %34318 = sst [smem:[#allocation74_spill]] %s34097_s1 }
   0x3   :  { %34319 = sst [smem:[#allocation75_spill]] %s34098_s2 }
   0x4   :  { %34320 = sst [smem:[#allocation76_spill]] %s34099_s3 }
   0x5   :  { %34321 = sst [smem:[#allocation77_spill]] %s34100_s4 }
   0x6   :  { %25 = vsyncpa [#allocation3], 0 }
   0x7   :  { %26 = vsyncpa [#allocation5], 0 }
   0x8   :  { %27 = vsyncpa [#allocation8], 0 }
   0x9   :  { %28 = vsyncpa [#allocation11], 0 }
   0xa   :  { %29 = vsyncpa [#allocation14], 0 }
   0xb   :  { %30 = vsyncpa [#allocation17], 0 }
   0xc   :  { %31 = vsyncpa [#allocation20], 0  ;;  %s30470_s1 = smov [#allocation4]   ;;  %s30471_s23 = smov [#allocation7]  }
   0xd   :  { %s52_s22 = sshll.u32 %s30470_s1, 4  ;;  %s76_s24 = sshll.u32 %s30471_s23, 4  ;;  %s53_s22 = int_to_ptr.vmem [resolvable:$true] %s52_s22  ;;  %s77_s24 = int_to_ptr.vmem [resolvable:$true] %s76_s24 }
   0xe   :  { %s30224_s2 = scalar_lea.vmem %s53_s22, 32  ;;  %p30229_p1 = scmp.lt.s32.totalorder %s53_s22, %s53_s22 }
   0xf   :  { %p30225_p0 = scmp.ne.s32.totalorder %s53_s22, %s30224_s2  ;;  %p30230_p2 = scmp.lt.s32.totalorder %s30224_s2, %s30224_s2 }
  0x11   :  { %p30231_p3 = por %p30230_p2, %p30229_p1 }
  0x13   :  { %p30232_p4 = pnand %p30231_p3, %p30225_p0 }
  0x15   :  { %30235 = shalt.err (!%p30232_p4)
}
  0x16   :  { %s34322_s26 = sld [smem:[#allocation75_spill]]  ;;  %s30244_s27 = scalar_lea.vmem %s77_s24, 16 }
  0x17   :  { %p30245_p5 = scmp.ne.s32.totalorder %s77_s24, %s30244_s27  ;;  %s30248_s28 = scalar_lea.vmem %s77_s24, 32 }
  0x18   :  { %p30249_p6 = scmp.lt.s32.totalorder %s77_s24, %s77_s24  ;;  %p30250_p7 = scmp.lt.s32.totalorder %s30248_s28, %s30244_s27 }
  0x1a   :  { %p30251_p8 = por %p30250_p7, %p30249_p6 }
  0x1c   :  { %55 = dma.hbm_to_vmem [thread:$0]  %s34322_s26, 32, %s53_s22, [#allocation5]  }
  0x1d   :  { %p30252_p9 = pnand %p30251_p8, %p30245_p5 }
  0x1f   :  { %30255 = shalt.err (!%p30252_p9)
}
  0x20   :  { %79 = dma.hbm_to_vmem [thread:$0]  %s34101_s5, 16, %s77_s24, [#allocation8]  }
  0x21   :  { %s30472_s30 = smov [#allocation10]   ;;  %s30473_s21 = smov [#allocation13]  }
  0x22   :  { %s100_s0 = sshll.u32 %s30472_s30, 4  ;;  %s124_s1 = sshll.u32 %s30473_s21, 4  ;;  %s101_s0 = int_to_ptr.vmem [resolvable:$true] %s100_s0  ;;  %s125_s1 = int_to_ptr.vmem [resolvable:$true] %s124_s1 }
  0x23   :  { %s30264_s23 = scalar_lea.vmem %s101_s0, 16  ;;  %s30268_s22 = scalar_lea.vmem %s101_s0, 32 }
  0x24   :  { %p30265_p10 = scmp.ne.s32.totalorder %s101_s0, %s30264_s23  ;;  %p30269_p11 = scmp.lt.s32.totalorder %s101_s0, %s101_s0 }
  0x25   :  { %p30270_p12 = scmp.lt.s32.totalorder %s30268_s22, %s30264_s23 }
  0x27   :  { %p30271_p13 = por %p30270_p12, %p30269_p11 }
  0x29   :  { %p30272_p0 = pnand %p30271_p13, %p30265_p10 }
  0x2b   :  { %30275 = shalt.err (!%p30272_p0)
}
  0x2c   :  { %103 = dma.hbm_to_vmem [thread:$0]  %s34104_s8, 16, %s101_s0, [#allocation11]  }
  0x2d   :  { %s30284_s3 = scalar_lea.vmem %s125_s1, 32  ;;  %p30289_p2 = scmp.lt.s32.totalorder %s125_s1, %s125_s1 }
  0x2e   :  { %p30285_p1 = scmp.ne.s32.totalorder %s125_s1, %s30284_s3  ;;  %p30290_p3 = scmp.lt.s32.totalorder %s30284_s3, %s30284_s3 }
  0x30   :  { %p30291_p4 = por %p30290_p3, %p30289_p2 }
  0x32   :  { %p30292_p5 = pnand %p30291_p4, %p30285_p1 }
  0x34   :  { %30295 = shalt.err (!%p30292_p5)
}
  0x35   :  { %127 = dma.hbm_to_vmem [thread:$0]  %s34108_s12, 32, %s125_s1, [#allocation14]  }
  0x36   :  { %s30474_s26 = smov [#allocation16]   ;;  %s30475_s28 = smov [#allocation2]  }
  0x37   :  { %s146_s27 = sshll.u32 %s30474_s26, 4  ;;  %s39_s4 = sshll.u32 %s30475_s28, 4  ;;  %s147_s27 = int_to_ptr.vmem [resolvable:$true] %s146_s27  ;;  %s40_s4 = int_to_ptr.vmem [resolvable:$true] %s39_s4 }
  0x38   :  { %s30304_s29 = scalar_lea.vmem %s147_s27, 16  ;;  %s30308_s8 = scalar_lea.vmem %s147_s27, 32 }
  0x39   :  { %p30305_p6 = scmp.ne.s32.totalorder %s147_s27, %s30304_s29  ;;  %p30309_p7 = scmp.lt.s32.totalorder %s147_s27, %s147_s27 }
  0x3a   :  { %p30310_p8 = scmp.lt.s32.totalorder %s30308_s8, %s30304_s29 }
  0x3c   :  { %p30311_p9 = por %p30310_p8, %p30309_p7 }
  0x3e   :  { %p30312_p10 = pnand %p30311_p9, %p30305_p6 }
  0x40   :  { %30315 = shalt.err (!%p30312_p10)
}
  0x41   :  { %149 = dma.hbm_to_vmem [thread:$0]  %s34110_s14, 16, %s147_s27, [#allocation17]  }
  0x42   :  { %s30324_s21 = scalar_lea.vmem %s40_s4, 256  ;;  %p30329_p12 = scmp.lt.s32.totalorder %s40_s4, %s40_s4 }
  0x43   :  { %p30325_p11 = scmp.ne.s32.totalorder %s40_s4, %s30324_s21  ;;  %p30330_p13 = scmp.lt.s32.totalorder %s30324_s21, %s30324_s21 }
  0x45   :  { %p30331_p0 = por %p30330_p13, %p30329_p12 }
  0x47   :  { %p30332_p1 = pnand %p30331_p0, %p30325_p11 }
  0x49   :  { %30335 = shalt.err (!%p30332_p1)
}
  0x4a   :  { %s30476_s12 = smov 128   ;;  %s30477_s1 = smov 8  }
  0x4b   :  { %s34323_s2 = sld [smem:[#allocation74_spill]]  ;;  %s30478_s25 = smov [#allocation6]  }
  0x4c   :  { %s63_s3 = sshll.u32 %s30478_s25, 4  ;;  %s30479_s5 = smov [#allocation9]   ;;  %s64_s3 = int_to_ptr.vmem [resolvable:$true] %s63_s3 }
  0x4d   :  { %s85_s14 = sshll.u32 %s30479_s5, 4  ;;  %s30344_s24 = scalar_lea.vmem %s64_s3, 256  ;;  %s86_s14 = int_to_ptr.vmem [resolvable:$true] %s85_s14 }
  0x4e   :  { %p30345_p2 = scmp.ne.s32.totalorder %s64_s3, %s30344_s24  ;;  %p30349_p3 = scmp.lt.s32.totalorder %s64_s3, %s64_s3 }
  0x4f   :  { %p30350_p4 = scmp.lt.s32.totalorder %s30344_s24, %s30344_s24 }
  0x51   :  { %45 = dma.hbm_to_vmem [thread:$0]  %s34323_s2, 256, %s40_s4, [#allocation3], %s30476_s12, %s30476_s12, %s30477_s1  }
  0x52   :  { %p30351_p5 = por %p30350_p4, %p30349_p3 }
  0x54   :  { %p30352_p6 = pnand %p30351_p5, %p30345_p2 }
  0x56   :  { %30355 = shalt.err (!%p30352_p6)
}
  0x57   :  { %s34324_s28 = sld [smem:[#allocation77_spill]]  ;;  %s30364_s4 = scalar_lea.vmem %s86_s14, 256 }
  0x58   :  { %p30365_p7 = scmp.ne.s32.totalorder %s86_s14, %s30364_s4  ;;  %p30369_p8 = scmp.lt.s32.totalorder %s86_s14, %s86_s14 }
  0x59   :  { %p30370_p9 = scmp.lt.s32.totalorder %s30364_s4, %s30364_s4 }
  0x5b   :  { %p30371_p10 = por %p30370_p9, %p30369_p8 }
  0x5d   :  { %69 = dma.hbm_to_vmem [thread:$0]  %s34324_s28, 256, %s64_s3, [#allocation5], %s30476_s12, %s30476_s12, %s30477_s1  }
  0x5e   :  { %p30372_p11 = pnand %p30371_p10, %p30365_p7 }
  0x60   :  { %30375 = shalt.err (!%p30372_p11)
}
  0x61   :  { %91 = dma.hbm_to_vmem [thread:$0]  %s34102_s6, 256, %s86_s14, [#allocation8], %s30476_s12, %s30476_s12, %s30477_s1  }
  0x62   :  { %s30480_s30 = smov [#allocation12]   ;;  %s30481_s21 = smov [#allocation15]  }
  0x63   :  { %s114_s0 = sshll.u32 %s30480_s30, 4  ;;  %s133_s23 = sshll.u32 %s30481_s21, 4  ;;  %s115_s0 = int_to_ptr.vmem [resolvable:$true] %s114_s0  ;;  %s134_s23 = int_to_ptr.vmem [resolvable:$true] %s133_s23 }
  0x64   :  { %s30384_s22 = scalar_lea.vmem %s115_s0, 16  ;;  %s30388_s2 = scalar_lea.vmem %s115_s0, 32 }
  0x65   :  { %p30385_p12 = scmp.ne.s32.totalorder %s115_s0, %s30384_s22  ;;  %p30389_p13 = scmp.lt.s32.totalorder %s115_s0, %s115_s0 }
  0x66   :  { %p30390_p0 = scmp.lt.s32.totalorder %s30388_s2, %s30384_s22 }
  0x68   :  { %p30391_p1 = por %p30390_p0, %p30389_p13 }
  0x6a   :  { %p30392_p2 = pnand %p30391_p1, %p30385_p12 }
  0x6c   :  { %30395 = shalt.err (!%p30392_p2)
}
  0x6d   :  { %117 = dma.hbm_to_vmem [thread:$0]  %s34107_s11, 16, %s115_s0, [#allocation11]  }
  0x6e   :  { %s30404_s5 = scalar_lea.vmem %s134_s23, 512  ;;  %p30409_p4 = scmp.lt.s32.totalorder %s134_s23, %s134_s23 }
  0x6f   :  { %p30405_p3 = scmp.ne.s32.totalorder %s134_s23, %s30404_s5  ;;  %p30410_p5 = scmp.lt.s32.totalorder %s30404_s5, %s30404_s5 }
  0x71   :  { %p30411_p6 = por %p30410_p5, %p30409_p4 }
  0x73   :  { %p30412_p7 = pnand %p30411_p6, %p30405_p3 }
  0x75   :  { %30415 = shalt.err (!%p30412_p7)
}
  0x76   :  { %139 = dma.hbm_to_vmem [thread:$0]  %s34109_s13, 512, %s134_s23, [#allocation14], %s30476_s12, %s30476_s12, %s30477_s1  }
  0x77   :  { %s30482_s24 = smov [#allocation18]   ;;  %s30483_s27 = smov [#allocation19]  }
  0x78   :  { %s155_s26 = sshll.u32 %s30482_s24, 4  ;;  %s170_s28 = sshll.u32 %s30483_s27, 4  ;;  %s156_s26 = int_to_ptr.vmem [resolvable:$true] %s155_s26  ;;  %s171_s28 = int_to_ptr.vmem [resolvable:$true] %s170_s28 }
  0x79   :  { %s30424_s11 = scalar_lea.vmem %s156_s26, 512  ;;  %p30429_p9 = scmp.lt.s32.totalorder %s156_s26, %s156_s26 }
  0x7a   :  { %p30425_p8 = scmp.ne.s32.totalorder %s156_s26, %s30424_s11  ;;  %p30430_p10 = scmp.lt.s32.totalorder %s30424_s11, %s30424_s11 }
  0x7c   :  { %p30431_p11 = por %p30430_p10, %p30429_p9 }
  0x7e   :  { %p30432_p12 = pnand %p30431_p11, %p30425_p8 }
  0x80   :  { %30435 = shalt.err (!%p30432_p12)
}
  0x81   :  { %161 = dma.hbm_to_vmem [thread:$0]  %s34111_s15, 512, %s156_s26, [#allocation17], %s30476_s12, %s30476_s12, %s30477_s1  }
  0x82   :  { %s30444_s13 = scalar_lea.vmem %s171_s28, 16  ;;  %s30448_s8 = scalar_lea.vmem %s171_s28, 32 }
  0x83   :  { %p30445_p13 = scmp.ne.s32.totalorder %s171_s28, %s30444_s13  ;;  %p30449_p0 = scmp.lt.s32.totalorder %s171_s28, %s171_s28 }
  0x84   :  { %p30450_p1 = scmp.lt.s32.totalorder %s30448_s8, %s30444_s13 }
  0x86   :  { %p30451_p2 = por %p30450_p1, %p30449_p0 }
  0x88   :  { %p30452_p3 = pnand %p30451_p2, %p30445_p13 }
  0x8a   :  { %30455 = shalt.err (!%p30452_p3)
}
  0x8b   :  { %173 = dma.hbm_to_vmem [thread:$0]  %s34113_s17, 16, %s171_s28, [#allocation20]  }
  0x8c   :  { %30456 = dma.done.wait [#allocation3], 256  }
  0x8d   :  { %30457 = vsyncadd [#allocation3], 4294967040 }
  0x8e   :  { %30458 = dma.done.wait [#allocation5], 288  }
  0x8f   :  { %30459 = vsyncadd [#allocation5], 4294967008 }
  0x90   :  { %30460 = dma.done.wait [#allocation8], 272  }
  0x91   :  { %30461 = vsyncadd [#allocation8], 4294967024 }
  0x92   :  { %30462 = dma.done.wait [#allocation11], 32  }
  0x93   :  { %30463 = vsyncadd [#allocation11], 4294967264 }
  0x94   :  { %30464 = dma.done.wait [#allocation14], 544  }
  0x95   :  { %30465 = vsyncadd [#allocation14], 4294966752 }
  0x96   :  { %30466 = dma.done.wait [#allocation17], 528  }
  0x97   :  { %30467 = vsyncadd [#allocation17], 4294966768 }
  0x98   :  { %30468 = dma.done.wait [#allocation20], 16  }
  0x99   :  { %30469 = vsyncadd [#allocation20], 4294967280  ;;  %vm252_vm0 = vcmask 1041408   ;;  %vm227_vm1 = vcmask 15360   ;;  %v225_v0 = vld [vmem:[#allocation4] sm:$0x3] }
  0x9a   :  { %s34325_s17 = sld [smem:[#allocation73_spill]]  ;;  %v254_v2 = vsel %vm252_vm0, %v225_v0, 0  ;;  %v34118_v63 = vmov 0.0   ;;  %vm30485_vm2 = vmmov 0   ;;  %vm1009_vm3 = vcmask 64512   ;;  %s30487_s21 = smov 32  }
  0x9b   :  { %v30658_v7 = vand.u32 4294901760, %v254_v2  ;;  %s34326_s29 = sld [smem:[#allocation76_spill]]  ;;  %vm4595_vm4 = vcmask 130048   ;;  %vm8983_vm8 = vcmask 261120  }
  0x9d   :  { %27465 = vmatprep.subr.mxu0 %v30658_v7  ;;  %v434_v17 = vsub.f32 %v254_v2, %v30658_v7 }
  0x9e   :  { %27466 = vmatpush3.msra.mxu0 %v30658_v7 }
  0x9f   :  { %v30695_v25 = vand.u32 4294901760, %v434_v17  ;;  %27493 = vmatprep.subr.mxu0 %v434_v17 }
  0xa0   :  { %v217_v1 = vld [vmem:[%s34325_s17] sm:$0xff]  ;;  %v218_v4 = vld [vmem:[%s34325_s17 + $0x8] sm:$0xff]  ;;  %v219_v5 = vld [vmem:[%s34325_s17 + $0x10] sm:$0xff] }
  0xa1   :  { %v229_v3 = vsel %vm227_vm1, %v217_v1, 0  ;;  %v220_v6 = vld [vmem:[%s34325_s17 + $0x18] sm:$0xff]  ;;  %v232_v9 = vsel %vm227_vm1, %v218_v4, 0  ;;  %v221_v10 = vld [vmem:[%s34325_s17 + $0x20] sm:$0xff]  ;;  %v222_v11 = vld [vmem:[%s34325_s17 + $0x28] sm:$0xff]  ;;  %v235_v13 = vsel %vm227_vm1, %v219_v5, 0  ;;  %v436_v33 = vsub.f32 %v434_v17, %v30695_v25 }
  0xa2   :  { %v30660_v8 = vand.u32 4294901760, %v229_v3  ;;  %v30669_v12 = vand.u32 4294901760, %v232_v9  ;;  %v238_v14 = vsel %vm227_vm1, %v220_v6, 0  ;;  %v241_v15 = vsel %vm227_vm1, %v221_v10, 0  ;;  %v223_v19 = vld [vmem:[%s34325_s17 + $0x30] sm:$0xff]  ;;  %v224_v40 = vld [vmem:[%s34325_s17 + $0x38] sm:$0xff] }
  0xa3   :  { %v30680_v18 = vand.u32 4294901760, %v235_v13  ;;  %v30689_v21 = vand.u32 4294901760, %v238_v14  ;;  %v30691_v22 = vand.u32 4294901760, %v241_v15  ;;  %v244_v23 = vsel %vm227_vm1, %v222_v11, 0 }
  0xa4   :  { %v30676_v16 = vsub.f32 %v229_v3, %v30660_v8  ;;  %27481 = vmatprep.mubr.f32.mxu1 %v30660_v8  ;;  %v30687_v20 = vsub.f32 %v232_v9, %v30669_v12  ;;  %v30700_v27 = vand.u32 4294901760, %v244_v23  ;;  %v247_v31 = vsel %vm227_vm1, %v223_v19, 0  ;;  %v214_v19 = vld [vmem:[#allocation2] sm:$0xff] }
  0xa5   :  { %v30698_v26 = vsub.f32 %v235_v13, %v30680_v18  ;;  %v30704_v29 = vsub.f32 %v238_v14, %v30689_v21  ;;  %v30707_v30 = vsub.f32 %v241_v15, %v30691_v22  ;;  %v30719_v39 = vand.u32 4294901760, %v247_v31 }
  0xa6   :  { %v324_v24 = vand.u32 4294901760, %v30676_v16  ;;  %v334_v28 = vand.u32 4294901760, %v30687_v20  ;;  %v30714_v35 = vsub.f32 %v244_v23, %v30700_v27  ;;  %v437_v42 = vand.u32 4294901760, %v436_v33 }
  0xa7   :  { %v344_v34 = vand.u32 4294901760, %v30698_v26  ;;  %v354_v37 = vand.u32 4294901760, %v30704_v29  ;;  %v364_v38 = vand.u32 4294901760, %v30707_v30  ;;  %v383_v48 = vsub.f32 %v247_v31, %v30719_v39 }
  0xa8   :  { %v325_v32 = vsub.f32 %v30676_v16, %v324_v24  ;;  %v335_v36 = vsub.f32 %v30687_v20, %v334_v28  ;;  %v374_v44 = vand.u32 4294901760, %v30714_v35  ;;  %27479 = vmatprep.subr.mxu1 %v437_v42  ;;  %v250_v50 = vsel %vm227_vm1, %v224_v40, 0 }
  0xa9   :  { %v345_v43 = vsub.f32 %v30698_v26, %v344_v34  ;;  %v355_v46 = vsub.f32 %v30704_v29, %v354_v37  ;;  %v365_v47 = vsub.f32 %v30707_v30, %v364_v38  ;;  %27480 = vmatpush3.msra.mxu1 %v437_v42  ;;  %v384_v53 = vand.u32 4294901760, %v383_v48 }
  0xaa   :  { %v326_v41 = vand.u32 4294901760, %v325_v32  ;;  %v336_v45 = vand.u32 4294901760, %v335_v36  ;;  %v375_v52 = vsub.f32 %v30714_v35, %v374_v44  ;;  %v392_v54 = vand.u32 4294901760, %v250_v50  ;;  %27482 = vmatmul.mubr.f32.vlgmr.msra.gmra.mxu1 %v30669_v12  ;;  %27507 = vmatprep.subr.mxu1 %v30658_v7 }
  0xab   :  { %v346_v49 = vand.u32 4294901760, %v345_v43  ;;  %v356_v51 = vand.u32 4294901760, %v355_v46  ;;  %v366_v55 = vand.u32 4294901760, %v365_v47  ;;  %27484 = vmatprep.mubr.f32.mxu1 %v30680_v18  ;;  %v385_v56 = vsub.f32 %v383_v48, %v384_v53  ;;  %27508 = vmatpush3.msra.mxu1 %v30658_v7 }
  0xac   :  { %27467 = vmatprep.mubr.f32.mxu0 %v326_v41  ;;  %v393_v57 = vsub.f32 %v250_v50, %v392_v54  ;;  %v376_v58 = vand.u32 4294901760, %v375_v52  ;;  %27535 = vmatprep.subr.mxu1 %v30658_v7  ;;  %v1011_v23 = vsel %vm1009_vm3, %v214_v19, 0 }
  0xad   :  { %27468 = vmatmul.mubr.f32.vlgmr.msra.gmra.mxu0 %v336_v45  ;;  %v386_v60 = vand.u32 4294901760, %v385_v56 }
  0xae   :  { %27470 = vmatprep.mubr.f32.mxu0 %v346_v49  ;;  %27494 = vmatpush3.msra.mxu0 %v434_v17  ;;  %v394_v59 = vand.u32 4294901760, %v393_v57 }
  0xaf   :  { %27521 = vmatprep.subr.mxu0 %v30695_v25  ;;  %27485 = vmatmul.mubr.f32.gmra.mxu1 %v30689_v21 }
  0xb0   :  { %27487 = vmatprep.mubr.f32.mxu1 %v30691_v22  ;;  %v395_v61 = vsub.f32 %v393_v57, %v394_v59 }
  0xb1   :  { %27471 = vmatmul.mubr.f32.gmra.mxu0 %v356_v51 }
  0xb2   :  { %27473 = vmatprep.mubr.f32.mxu0 %v366_v55  ;;  %v396_v62 = vand.u32 4294901760, %v395_v61 }
  0xb3   :  { %27488 = vmatmul.mubr.f32.gmra.mxu1 %v30700_v27 }
  0xb4   :  { %27490 = vmatprep.mubr.f32.mxu1 %v30719_v39 }
  0xb5   :  { %27474 = vmatmul.mubr.f32.gmra.mxu0 %v376_v58 }
  0xb6   :  { %27476 = vmatprep.mubr.f32.mxu0 %v386_v60 }
  0xb7   :  { %27491 = vmatmul.mubr.f32.gmra.mxu1 %v392_v54 }
  0xb8   :  { %27509 = vmatprep.mubr.f32.mxu1 %v324_v24 }
  0xb9   :  { %27477 = vmatmul.mubr.f32.gmra.mxu0 %v396_v62 }
  0xba   :  { %27495 = vmatprep.mubr.f32.mxu0 %v30676_v16 }
  0xbb   :  { %27510 = vmatmul.mubr.f32.vlgmr.msra.gmra.mxu1 %v334_v28 }
  0xbc   :  { %27512 = vmatprep.mubr.f32.mxu1 %v344_v34  ;;  %27536 = vmatpush3.msra.mxu1 %v30658_v7 }
  0xbd   :  { %27496 = vmatmul.mubr.f32.vlgmr.msra.gmra.mxu0 %v30687_v20  ;;  %27554 = vmatprep.subr.mxu1 %v34118_v63 }
  0xbe   :  { %27498 = vmatprep.mubr.f32.mxu0 %v30698_v26  ;;  %27522 = vmatpush3.msra.mxu0 %v30695_v25 }
  0xbf   :  { %27513 = vmatmul.mubr.f32.gmra.mxu1 %v354_v37  ;;  %27549 = vmatprep.subr.mxu0 %v34118_v63 }
  0xc0   :  { %27515 = vmatprep.mubr.f32.mxu1 %v364_v38 }
  0xc1   :  { %27499 = vmatmul.mubr.f32.gmra.mxu0 %v30704_v29 }
  0xc2   :  { %27501 = vmatprep.mubr.f32.mxu0 %v30707_v30 }
  0xc3   :  { %27516 = vmatmul.mubr.f32.gmra.mxu1 %v374_v44 }
  0xc4   :  { %27518 = vmatprep.mubr.f32.mxu1 %v384_v53 }
  0xc5   :  { %27502 = vmatmul.mubr.f32.gmra.mxu0 %v30714_v35 }
  0xc6   :  { %27504 = vmatprep.mubr.f32.mxu0 %v383_v48 }
  0xc7   :  { %27519 = vmatmul.mubr.f32.gmra.mxu1 %v394_v59 }
  0xc8   :  { %27537 = vmatprep.mubr.f32.mxu1 %v30660_v8 }
  0xc9   :  { %27505 = vmatmul.mubr.f32.gmra.mxu0 %v393_v57 }
  0xca   :  { %27523 = vmatprep.mubr.f32.mxu0 %v30660_v8 }
  0xcb   :  { %27538 = vmatmul.mubr.f32.vlgmr.msra.gmra.mxu1 %v30669_v12 }
  0xcc   :  { %27540 = vmatprep.mubr.f32.mxu1 %v30680_v18 }
  0xcd   :  { %27524 = vmatmul.mubr.f32.vlgmr.msra.gmra.mxu0 %v30669_v12 }
  0xce   :  { %27526 = vmatprep.mubr.f32.mxu0 %v30680_v18 }
  0xcf   :  { %27541 = vmatmul.mubr.f32.gmra.mxu1 %v30689_v21 }
  0xd0   :  { %27543 = vmatprep.mubr.f32.mxu1 %v30691_v22 }
  0xd1   :  { %27527 = vmatmul.mubr.f32.gmra.mxu0 %v30689_v21 }
  0xd2   :  { %27529 = vmatprep.mubr.f32.mxu0 %v30691_v22 }
  0xd3   :  { %27544 = vmatmul.mubr.f32.gmra.mxu1 %v30700_v27 }
  0xd4   :  { %27546 = vmatprep.mubr.f32.mxu1 %v30719_v39 }
  0xd5   :  { %27530 = vmatmul.mubr.f32.gmra.mxu0 %v30700_v27  ;;  %v30786_v27 = vand.u32 4294901760, %v1011_v23 }
  0xd6   :  { %27532 = vmatprep.mubr.f32.mxu0 %v30719_v39 }
  0xd7   :  { %27547 = vmatmul.mubr.f32.gmra.mxu1 %v392_v54  ;;  %v30791_v34 = vsub.f32 %v1011_v23, %v30786_v27 }
  0xd8   :  { %27556 = vmatprep.mubr.msk.f32.mxu1 %vm30485_vm2, %v34118_v63 }
  0xd9   :  { %27533 = vmatmul.mubr.f32.gmra.mxu0 %v392_v54  ;;  %v30800_v44 = vand.u32 4294901760, %v30791_v34 }
  0xda   :  { %27551 = vmatprep.mubr.msk.f32.mxu0 %vm30485_vm2, %v34118_v63 }
  0xdb   :  { %v1082_v53 = vsub.f32 %v30791_v34, %v30800_v44 }
  0xdd   :  { %v30808_v59 = vand.u32 4294901760, %v1082_v53 }
 0x16a   :  { %v27483_v1 = vpop.f32.mrf.mxu1 }
 0x16c   :  { %v474_v3 = vpop.f32.mrf.mxu1 }
 0x16d   :  { %v27469_v0 = vpop.f32.mrf.mxu0 }
 0x16e   :  { %v481_v32 = vadd.f32 %v27483_v1, %v27469_v0 }
 0x16f   :  { %v328_v2 = vpop.f32.mrf.mxu0  ;;  %v30771_v5 = vpop.f32.mrf.mxu1 }
 0x170   :  { %v475_v35 = vadd.f32 %v474_v3, %v328_v2 }
 0x171   :  { %v30769_v4 = vpop.f32.mrf.mxu0  ;;  %v486_v7 = vpop.f32.mrf.mxu1 }
 0x173   :  { %v348_v6 = vpop.f32.mrf.mxu0  ;;  %v27489_v9 = vpop.f32.mrf.mxu1 }
 0x174   :  { %v487_v57 = vadd.f32 %v486_v7, %v348_v6 }
 0x175   :  { %v27475_v8 = vpop.f32.mrf.mxu0  ;;  %v30775_v12 = vpop.f32.mrf.mxu1 }
 0x176   :  { %v505_v10 = vadd.f32 %v27489_v9, %v27475_v8 }
 0x177   :  { %v30773_v11 = vpop.f32.mrf.mxu0  ;;  %v27492_v14 = vpop.f32.mrf.mxu1 }
 0x179   :  { %v27478_v13 = vpop.f32.mrf.mxu0  ;;  %v30779_v17 = vpop.f32.mrf.mxu1 }
 0x17a   :  { %v517_v15 = vadd.f32 %v27492_v14, %v27478_v13 }
 0x17b   :  { %v30777_v16 = vpop.f32.mrf.mxu0  ;;  %v27511_v20 = vpop.f32.mrf.mxu1 }
 0x17d   :  { %v27497_v18 = vpop.f32.mrf.mxu0  ;;  %v713_v22 = vpop.f32.mrf.mxu1 }
 0x17e   :  { %v598_v38 = vadd.f32 %v27497_v18, %v481_v32 }
 0x17f   :  { %v590_v21 = vpop.f32.mrf.mxu0  ;;  %v30784_v25 = vpop.f32.mrf.mxu1 }
 0x180   :  { %v591_v40 = vadd.f32 %v590_v21, %v475_v35  ;;  %v722_v47 = vadd.f32 %v27511_v20, %v598_v38 }
 0x181   :  { %v30782_v24 = vpop.f32.mrf.mxu0  ;;  %v729_v28 = vpop.f32.mrf.mxu1 }
 0x182   :  { %v714_v49 = vadd.f32 %v713_v22, %v591_v40 }
 0x183   :  { %v604_v26 = vpop.f32.mrf.mxu0  ;;  %v27517_v31 = vpop.f32.mrf.mxu1 }
 0x184   :  { %v605_v62 = vadd.f32 %v604_v26, %v487_v57 }
 0x185   :  { %v27503_v29 = vpop.f32.mrf.mxu0  ;;  %v30795_v37 = vpop.f32.mrf.mxu1 }
 0x186   :  { %v626_v30 = vadd.f32 %v27503_v29, %v505_v10  ;;  %v730_v8 = vadd.f32 %v729_v28, %v605_v62 }
 0x187   :  { %v30788_v33 = vpop.f32.mrf.mxu0  ;;  %v27520_v42 = vpop.f32.mrf.mxu1 }
 0x188   :  { %v30793_v36 = vadd.f32 %v27517_v31, %v626_v30 }
 0x189   :  { %v27506_v39 = vpop.f32.mrf.mxu0  ;;  %v30804_v46 = vpop.f32.mrf.mxu1 }
 0x18a   :  { %v640_v41 = vadd.f32 %v27506_v39, %v517_v15  ;;  %v493_v15 = vadd.f32 %v30771_v5, %v30769_v4 }
 0x18b   :  { %v30797_v43 = vpop.f32.mrf.mxu0  ;;  %v27539_v50 = vpop.f32.mrf.mxu1 }
 0x18c   :  { %v30802_v45 = vadd.f32 %v27520_v42, %v640_v41  ;;  %v612_v20 = vadd.f32 %v30782_v24, %v493_v15 }
 0x18d   :  { %v27525_v48 = vpop.f32.mrf.mxu0  ;;  %v957_v55 = vpop.f32.mrf.mxu1 }
 0x18e   :  { %v850_v51 = vadd.f32 %v27525_v48, %v722_v47  ;;  %v738_v21 = vadd.f32 %v30784_v25, %v612_v20  ;;  %v499_v25 = vadd.f32 %v30775_v12, %v30773_v11  ;;  %v216_v11 = vld [vmem:[#allocation2 + $0x8] sm:$0xff] }
 0x18f   :  { %v843_v52 = vpop.f32.mrf.mxu0  ;;  %v27542_v3 = vpop.f32.mrf.mxu1  ;;  %v2802_v38 = vsel %vm1009_vm3, %v216_v11, 0 }
 0x190   :  { %v844_v54 = vadd.f32 %v843_v52, %v714_v49  ;;  %v964_v58 = vadd.f32 %v27539_v50, %v850_v51  ;;  %v619_v30 = vadd.f32 %v30788_v33, %v499_v25  ;;  %v30884_v42 = vand.u32 4294901760, %v2802_v38 }
 0x191   :  { %v27528_v61 = vpop.f32.mrf.mxu0  ;;  %v969_v13 = vpop.f32.mrf.mxu1 }
 0x192   :  { %v958_v56 = vadd.f32 %v957_v55, %v844_v54  ;;  %v30810_v1 = vand.u32 4294901760, %v964_v58  ;;  %v862_v22 = vadd.f32 %v27528_v61, %v738_v21  ;;  %v746_v35 = vadd.f32 %v30795_v37, %v619_v30 }
 0x193   :  { %v855_v2 = vpop.f32.mrf.mxu0  ;;  %v27545_v33 = vpop.f32.mrf.mxu1  ;;  %v30895_v49 = vsub.f32 %v2802_v38, %v30884_v42 }
 0x194   :  { %v1044_v60 = vand.u32 4294901760, %v958_v56  ;;  %v1568_v7 = vsub.f32 %v964_v58, %v30810_v1  ;;  %v856_v9 = vadd.f32 %v855_v2, %v730_v8  ;;  %v976_v26 = vadd.f32 %v27542_v3, %v862_v22 }
 0x195   :  { %v27531_v29 = vpop.f32.mrf.mxu0  ;;  %v981_v37 = vpop.f32.mrf.mxu1  ;;  %v30910_v52 = vand.u32 4294901760, %v30895_v49 }
 0x196   :  { %v1121_v0 = vsub.f32 %v958_v56, %v1044_v60  ;;  %27550 = vmatpush3.msra.mxu0 %v1044_v60  ;;  %v1569_v18 = vand.u32 4294901760, %v1568_v7  ;;  %v970_v19 = vadd.f32 %v969_v13, %v856_v9  ;;  %v30865_v12 = vand.u32 4294901760, %v976_v26 }
 0x197   :  { %27552 = vmatmul.mubr.f32.vlgmr.msra.gmra.mxu0 %v30808_v59  ;;  %27559 = vmatprep.subr.mxu0 %v34118_v63  ;;  %v867_v32 = vpop.f32.mrf.mxu0  ;;  %v874_v53 = vadd.f32 %v27531_v29, %v30793_v36  ;;  %v2873_v56 = vsub.f32 %v30895_v49, %v30910_v52  ;;  %v511_v36 = vadd.f32 %v30779_v17, %v30777_v16 }
 0x198   :  { %27560 = vmatpush3.msra.mxu0 %v1121_v0  ;;  %27561 = vmatprep.mubr.msk.f32.mxu0 %vm30485_vm2, %v34118_v63  ;;  %v1122_v6 = vand.u32 4294901760, %v1121_v0  ;;  %v1570_v4 = vsub.f32 %v1568_v7, %v1569_v18  ;;  %v30832_v5 = vand.u32 4294901760, %v970_v19  ;;  %v2462_v39 = vsub.f32 %v976_v26, %v30865_v12  ;;  %v4592_v26 = vld [vmem:[#allocation6] sm:$0xff] }
 0x199   :  { %27569 = vmatprep.subr.mxu0 %v34118_v63  ;;  %v868_v40 = vadd.f32 %v867_v32, %v746_v35  ;;  %v988_v57 = vadd.f32 %v27545_v33, %v874_v53  ;;  %v30935_v61 = vand.u32 4294901760, %v2873_v56  ;;  %v633_v62 = vadd.f32 %v30797_v43, %v511_v36 }
 0x19a   :  { %v1123_v10 = vsub.f32 %v1121_v0, %v1122_v6  ;;  %v2015_v23 = vsub.f32 %v970_v19, %v30832_v5  ;;  %v1571_v24 = vand.u32 4294901760, %v1570_v4  ;;  %v2463_v47 = vand.u32 4294901760, %v2462_v39 }
 0x19b   :  { %27562 = vmatmul.mubr.f32.vlgmr.msra.gmra.mxu0 %v30791_v34  ;;  %v982_v48 = vadd.f32 %v981_v37, %v868_v40  ;;  %v30943_v16 = vand.u32 4294901760, %v988_v57  ;;  %v762_v43 = vadd.f32 %v30804_v46, %v633_v62  ;;  %v31054_v29 = vand.u32 4294901760, %v4592_v26  ;;  %v31094_v40 = vld [vmem:[%s34326_s29] ss:$0 sm:$0xff] }
 0x19c   :  { %27570 = vmatpush3.msra.mxu0 %v1122_v6  ;;  %27571 = vmatprep.mubr.msk.f32.mxu0 %vm30485_vm2, %v34118_v63  ;;  %v1124_v14 = vand.u32 4294901760, %v1123_v10  ;;  %v2016_v28 = vand.u32 4294901760, %v2015_v23  ;;  %v2464_v50 = vsub.f32 %v2462_v39, %v2463_v47 }
 0x19d   :  { %27579 = vmatprep.subr.mxu0 %v34118_v63  ;;  %v30902_v51 = vand.u32 4294901760, %v982_v48  ;;  %v3359_v2 = vsub.f32 %v988_v57, %v30943_v16  ;;  %v31065_v11 = vsub.f32 %v4592_v26, %v31054_v29 }
 0x19e   :  { %27555 = vmatpush3.msra.mxu1 %v1124_v14  ;;  %v2017_v31 = vsub.f32 %v2015_v23, %v2016_v28  ;;  %v2465_v55 = vand.u32 4294901760, %v2464_v50 }
 0x19f   :  { %27572 = vmatmul.mubr.f32.vlgmr.msra.gmra.mxu0 %v30786_v27  ;;  %27557 = vmatmul.mubr.f32.vlgmr.msra.gmra.mxu1 %v30786_v27  ;;  %v2912_v54 = vsub.f32 %v982_v48, %v30902_v51  ;;  %v3360_v46 = vand.u32 4294901760, %v3359_v2 }
 0x1a0   :  { %27564 = vmatprep.subr.mxu1 %v34118_v63  ;;  %27580 = vmatpush3.msra.mxu0 %v30810_v1  ;;  %v2018_v41 = vand.u32 4294901760, %v2017_v31  ;;  %v31076_v31 = vand.u32 4294901760, %v31065_v11 }
 0x1a1   :  { %27565 = vmatpush3.msra.mxu1 %v1044_v60  ;;  %27566 = vmatprep.mubr.msk.f32.mxu1 %vm30485_vm2, %v34118_v63  ;;  %v2913_v58 = vand.u32 4294901760, %v2912_v54  ;;  %v3361_v9 = vsub.f32 %v3359_v2, %v3360_v46 }
 0x1a2   :  { %27574 = vmatprep.subr.mxu1 %v34118_v63  ;;  %27581 = vmatprep.mubr.msk.f32.mxu0 %vm30485_vm2, %v34118_v63  ;;  %v4806_v33 = vsub.f32 %v31065_v11, %v31076_v31 }
 0x1a3   :  { %27589 = vmatprep.subr.mxu0 %v34118_v63  ;;  %27567 = vmatmul.mubr.f32.vlgmr.msra.gmra.mxu1 %v30800_v44  ;;  %v2914_v17 = vsub.f32 %v2912_v54, %v2913_v58  ;;  %v3362_v15 = vand.u32 4294901760, %v3361_v9 }
 0x1a4   :  { %27582 = vmatmul.mubr.f32.vlgmr.msra.gmra.mxu0 %v30808_v59  ;;  %27575 = vmatpush3.msra.mxu1 %v1044_v60  ;;  %v27534_v60 = vpop.f32.mrf.mxu0  ;;  %v4807_v35 = vand.u32 4294901760, %v4806_v33 }
 0x1a5   :  { %27590 = vmatpush3.msra.mxu0 %v1568_v7  ;;  %27576 = vmatprep.mubr.msk.f32.mxu1 %vm30485_vm2, %v34118_v63  ;;  %v2915_v8 = vand.u32 4294901760, %v2914_v17  ;;  %v886_v13 = vadd.f32 %v27534_v60, %v30802_v45 }
 0x1a6   :  { %27584 = vmatprep.subr.mxu1 %v34118_v63  ;;  %27591 = vmatprep.mubr.msk.f32.mxu0 %vm30485_vm2, %v34118_v63  ;;  %v879_v0 = vpop.f32.mrf.mxu0 }
 0x1a7   :  { %27599 = vmatprep.subr.mxu0 %v34118_v63  ;;  %27577 = vmatmul.mubr.f32.vlgmr.msra.gmra.mxu1 %v30786_v27  ;;  %v880_v3 = vadd.f32 %v879_v0, %v762_v43 }
 0x1a8   :  { %27592 = vmatmul.mubr.f32.vlgmr.msra.gmra.mxu0 %v30791_v34  ;;  %27585 = vmatpush3.msra.mxu1 %v1571_v24 }
 0x1a9   :  { %27600 = vmatpush3.msra.mxu0 %v1569_v18  ;;  %27586 = vmatprep.mubr.msk.f32.mxu1 %vm30485_vm2, %v34118_v63 }
 0x1aa   :  { %27594 = vmatprep.subr.mxu1 %v34118_v63  ;;  %27601 = vmatprep.mubr.msk.f32.mxu0 %vm30485_vm2, %v34118_v63 }
 0x1ab   :  { %27609 = vmatprep.subr.mxu0 %v34118_v63  ;;  %27587 = vmatmul.mubr.f32.vlgmr.msra.gmra.mxu1 %v30786_v27 }
 0x1ac   :  { %27602 = vmatmul.mubr.f32.vlgmr.msra.gmra.mxu0 %v30786_v27  ;;  %27595 = vmatpush3.msra.mxu1 %v30810_v1 }
 0x1ad   :  { %27610 = vmatpush3.msra.mxu0 %v30832_v5  ;;  %27596 = vmatprep.mubr.msk.f32.mxu1 %vm30485_vm2, %v34118_v63 }
 0x1ae   :  { %27604 = vmatprep.subr.mxu1 %v34118_v63  ;;  %27611 = vmatprep.mubr.msk.f32.mxu0 %vm30485_vm2, %v34118_v63 }
 0x1af   :  { %27619 = vmatprep.subr.mxu0 %v34118_v63  ;;  %27597 = vmatmul.mubr.f32.vlgmr.msra.gmra.mxu1 %v30800_v44 }
 0x1b0   :  { %27612 = vmatmul.mubr.f32.vlgmr.msra.gmra.mxu0 %v30808_v59  ;;  %27605 = vmatpush3.msra.mxu1 %v30810_v1  ;;  %v27548_v1 = vpop.f32.mrf.mxu1 }
 0x1b1   :  { %27620 = vmatpush3.msra.mxu0 %v2015_v23  ;;  %27606 = vmatprep.mubr.msk.f32.mxu1 %vm30485_vm2, %v34118_v63  ;;  %v1000_v45 = vadd.f32 %v27548_v1, %v886_v13  ;;  %v4593_v23 = vld [vmem:[#allocation6 + $0x8] sm:$0xff] }
 0x1b2   :  { %27614 = vmatprep.subr.mxu1 %v34118_v63  ;;  %27621 = vmatprep.mubr.msk.f32.mxu0 %vm30485_vm2, %v34118_v63  ;;  %v993_v6 = vpop.f32.mrf.mxu1  ;;  %v31047_v25 = vand.u32 4294901760, %v4593_v23 }
 0x1b3   :  { %27629 = vmatprep.subr.mxu0 %v34118_v63  ;;  %27607 = vmatmul.mubr.f32.vlgmr.msra.gmra.mxu1 %v30786_v27  ;;  %v994_v7 = vadd.f32 %v993_v6, %v880_v3  ;;  %v31005_v19 = vand.u32 4294901760, %v1000_v45 }
 0x1b4   :  { %27622 = vmatmul.mubr.f32.vlgmr.msra.gmra.mxu0 %v30791_v34  ;;  %27615 = vmatpush3.msra.mxu1 %v2018_v41 }
 0x1b5   :  { %27630 = vmatpush3.msra.mxu0 %v2016_v28  ;;  %27616 = vmatprep.mubr.msk.f32.mxu1 %vm30485_vm2, %v34118_v63  ;;  %v30974_v10 = vand.u32 4294901760, %v994_v7  ;;  %v4253_v4 = vsub.f32 %v1000_v45, %v31005_v19  ;;  %v31052_v28 = vsub.f32 %v4593_v23, %v31047_v25 }
 0x1b6   :  { %27624 = vmatprep.subr.mxu1 %v34118_v63  ;;  %27631 = vmatprep.mubr.msk.f32.mxu0 %vm30485_vm2, %v34118_v63 }
 0x1b7   :  { %27639 = vmatprep.subr.mxu0 %v34118_v63  ;;  %27617 = vmatmul.mubr.f32.vlgmr.msra.gmra.mxu1 %v30786_v27  ;;  %v3806_v14 = vsub.f32 %v994_v7, %v30974_v10  ;;  %v4254_v21 = vand.u32 4294901760, %v4253_v4  ;;  %v31062_v30 = vand.u32 4294901760, %v31052_v28 }
 0x1b8   :  { %27632 = vmatmul.mubr.f32.vlgmr.msra.gmra.mxu0 %v30786_v27  ;;  %27625 = vmatpush3.msra.mxu1 %v30832_v5 }
 0x1b9   :  { %27640 = vmatpush3.msra.mxu0 %v30865_v12  ;;  %27626 = vmatprep.mubr.msk.f32.mxu1 %vm30485_vm2, %v34118_v63  ;;  %v3807_v18 = vand.u32 4294901760, %v3806_v14  ;;  %v4255_v22 = vsub.f32 %v4253_v4, %v4254_v21 }
 0x1ba   :  { %27634 = vmatprep.subr.mxu1 %v34118_v63  ;;  %27641 = vmatprep.mubr.msk.f32.mxu0 %vm30485_vm2, %v34118_v63 }
 0x1bb   :  { %27649 = vmatprep.subr.mxu0 %v34118_v63  ;;  %27627 = vmatmul.mubr.f32.vlgmr.msra.gmra.mxu1 %v30800_v44  ;;  %v3808_v20 = vsub.f32 %v3806_v14, %v3807_v18  ;;  %v4256_v24 = vand.u32 4294901760, %v4255_v22 }
 0x1bc   :  { %27642 = vmatmul.mubr.f32.vlgmr.msra.gmra.mxu0 %v30808_v59  ;;  %27635 = vmatpush3.msra.mxu1 %v30832_v5 }
 0x1bd   :  { %27650 = vmatpush3.msra.mxu0 %v2462_v39  ;;  %27636 = vmatprep.mubr.msk.f32.mxu1 %vm30485_vm2, %v34118_v63  ;;  %v3809_v5 = vand.u32 4294901760, %v3808_v20 }
 0x1be   :  { %27644 = vmatprep.subr.mxu1 %v34118_v63  ;;  %27651 = vmatprep.mubr.msk.f32.mxu0 %vm30485_vm2, %v34118_v63 }
 0x1bf   :  { %27659 = vmatprep.subr.mxu0 %v34118_v63  ;;  %27637 = vmatmul.mubr.f32.vlgmr.msra.gmra.mxu1 %v30786_v27 }
 0x1c0   :  { %27652 = vmatmul.mubr.f32.vlgmr.msra.gmra.mxu0 %v30791_v34  ;;  %27645 = vmatpush3.msra.mxu1 %v2465_v55 }
 0x1c1   :  { %27660 = vmatpush3.msra.mxu0 %v2463_v47  ;;  %27646 = vmatprep.mubr.msk.f32.mxu1 %vm30485_vm2, %v34118_v63 }
 0x1c2   :  { %27654 = vmatprep.subr.mxu1 %v34118_v63  ;;  %27661 = vmatprep.mubr.msk.f32.mxu0 %vm30485_vm2, %v34118_v63 }
 0x1c3   :  { %27669 = vmatprep.subr.mxu0 %v34118_v63  ;;  %27647 = vmatmul.mubr.f32.vlgmr.msra.gmra.mxu1 %v30786_v27 }
 0x1c4   :  { %27662 = vmatmul.mubr.f32.vlgmr.msra.gmra.mxu0 %v30786_v27  ;;  %27655 = vmatpush3.msra.mxu1 %v30865_v12 }
 0x1c5   :  { %27670 = vmatpush3.msra.mxu0 %v30902_v51  ;;  %27656 = vmatprep.mubr.msk.f32.mxu1 %vm30485_vm2, %v34118_v63 }
 0x1c6   :  { %27664 = vmatprep.subr.mxu1 %v34118_v63  ;;  %27671 = vmatprep.mubr.msk.f32.mxu0 %vm30485_vm2, %v34118_v63 }
 0x1c7   :  { %27679 = vmatprep.subr.mxu0 %v34118_v63  ;;  %27657 = vmatmul.mubr.f32.vlgmr.msra.gmra.mxu1 %v30800_v44 }
 0x1c8   :  { %27672 = vmatmul.mubr.f32.vlgmr.msra.gmra.mxu0 %v30935_v61  ;;  %27665 = vmatpush3.msra.mxu1 %v30865_v12  ;;  %v4799_v12 = vsub.f32 %v31052_v28, %v31062_v30 }
 0x1c9   :  { %27680 = vmatpush3.msra.mxu0 %v2912_v54  ;;  %27666 = vmatprep.mubr.msk.f32.mxu1 %vm30485_vm2, %v34118_v63 }
 0x1ca   :  { %27674 = vmatprep.subr.mxu1 %v34118_v63  ;;  %27681 = vmatprep.mubr.msk.f32.mxu0 %vm30485_vm2, %v34118_v63  ;;  %v4800_v32 = vand.u32 4294901760, %v4799_v12 }
 0x1cb   :  { %27689 = vmatprep.subr.mxu0 %v34118_v63  ;;  %27667 = vmatmul.mubr.f32.vlgmr.msra.gmra.mxu1 %v30786_v27 }
 0x1cc   :  { %27682 = vmatmul.mubr.f32.vlgmr.msra.gmra.mxu0 %v30895_v49  ;;  %27675 = vmatpush3.msra.mxu1 %v2915_v8 }
 0x1cd   :  { %27690 = vmatpush3.msra.mxu0 %v2913_v58  ;;  %27676 = vmatprep.mubr.msk.f32.mxu1 %vm30485_vm2, %v34118_v63 }
 0x1ce   :  { %27684 = vmatprep.subr.mxu1 %v34118_v63  ;;  %27691 = vmatprep.mubr.msk.f32.mxu0 %vm30485_vm2, %v34118_v63 }
 0x1cf   :  { %27699 = vmatprep.subr.mxu0 %v34118_v63  ;;  %27677 = vmatmul.mubr.f32.vlgmr.msra.gmra.mxu1 %v30884_v42 }
 0x1d0   :  { %27692 = vmatmul.mubr.f32.vlgmr.msra.gmra.mxu0 %v30884_v42  ;;  %27685 = vmatpush3.msra.mxu1 %v30902_v51 }
 0x1d1   :  { %27700 = vmatpush3.msra.mxu0 %v30943_v16  ;;  %27686 = vmatprep.mubr.msk.f32.mxu1 %vm30485_vm2, %v34118_v63 }
 0x1d2   :  { %27694 = vmatprep.subr.mxu1 %v34118_v63  ;;  %27701 = vmatprep.mubr.msk.f32.mxu0 %vm30485_vm2, %v34118_v63 }
 0x1d3   :  { %27709 = vmatprep.subr.mxu0 %v34118_v63  ;;  %27687 = vmatmul.mubr.f32.vlgmr.msra.gmra.mxu1 %v30910_v52 }
 0x1d4   :  { %27702 = vmatmul.mubr.f32.vlgmr.msra.gmra.mxu0 %v30935_v61  ;;  %27695 = vmatpush3.msra.mxu1 %v30902_v51 }
 0x1d5   :  { %27710 = vmatpush3.msra.mxu0 %v3359_v2  ;;  %27696 = vmatprep.mubr.msk.f32.mxu1 %vm30485_vm2, %v34118_v63 }
 0x1d6   :  { %27704 = vmatprep.subr.mxu1 %v34118_v63  ;;  %27711 = vmatprep.mubr.msk.f32.mxu0 %vm30485_vm2, %v34118_v63 }
 0x1d7   :  { %27719 = vmatprep.subr.mxu0 %v34118_v63  ;;  %27697 = vmatmul.mubr.f32.vlgmr.msra.gmra.mxu1 %v30884_v42 }
 0x1d8   :  { %27712 = vmatmul.mubr.f32.vlgmr.msra.gmra.mxu0 %v30895_v49  ;;  %27705 = vmatpush3.msra.mxu1 %v3362_v15 }
 0x1d9   :  { %27720 = vmatpush3.msra.mxu0 %v3360_v46  ;;  %27706 = vmatprep.mubr.msk.f32.mxu1 %vm30485_vm2, %v34118_v63 }
 0x1da   :  { %27714 = vmatprep.subr.mxu1 %v34118_v63  ;;  %27721 = vmatprep.mubr.msk.f32.mxu0 %vm30485_vm2, %v34118_v63 }
 0x1db   :  { %27729 = vmatprep.subr.mxu0 %v34118_v63  ;;  %27707 = vmatmul.mubr.f32.vlgmr.msra.gmra.mxu1 %v30884_v42 }
 0x1dc   :  { %27722 = vmatmul.mubr.f32.vlgmr.msra.gmra.mxu0 %v30884_v42  ;;  %27715 = vmatpush3.msra.mxu1 %v30943_v16 }
 0x1dd   :  { %27730 = vmatpush3.msra.mxu0 %v30974_v10  ;;  %27716 = vmatprep.mubr.msk.f32.mxu1 %vm30485_vm2, %v34118_v63 }
 0x1de   :  { %27724 = vmatprep.subr.mxu1 %v34118_v63  ;;  %27731 = vmatprep.mubr.msk.f32.mxu0 %vm30485_vm2, %v34118_v63 }
 0x1df   :  { %27739 = vmatprep.subr.mxu0 %v34118_v63  ;;  %27717 = vmatmul.mubr.f32.vlgmr.msra.gmra.mxu1 %v30910_v52 }
 0x1e0   :  { %27732 = vmatmul.mubr.f32.vlgmr.msra.gmra.mxu0 %v30935_v61  ;;  %27725 = vmatpush3.msra.mxu1 %v30943_v16 }
 0x1e1   :  { %27740 = vmatpush3.msra.mxu0 %v3806_v14  ;;  %27726 = vmatprep.mubr.msk.f32.mxu1 %vm30485_vm2, %v34118_v63 }
 0x1e2   :  { %27734 = vmatprep.subr.mxu1 %v34118_v63  ;;  %27741 = vmatprep.mubr.msk.f32.mxu0 %vm30485_vm2, %v34118_v63 }
 0x1e3   :  { %27749 = vmatprep.subr.mxu0 %v34118_v63  ;;  %27727 = vmatmul.mubr.f32.vlgmr.msra.gmra.mxu1 %v30884_v42 }
 0x1e4   :  { %27742 = vmatmul.mubr.f32.vlgmr.msra.gmra.mxu0 %v30895_v49  ;;  %27735 = vmatpush3.msra.mxu1 %v3809_v5 }
 0x1e5   :  { %27750 = vmatpush3.msra.mxu0 %v3807_v18  ;;  %27736 = vmatprep.mubr.msk.f32.mxu1 %vm30485_vm2, %v34118_v63 }
 0x1e6   :  { %27744 = vmatprep.subr.mxu1 %v34118_v63  ;;  %27751 = vmatprep.mubr.msk.f32.mxu0 %vm30485_vm2, %v34118_v63 }
 0x1e7   :  { %27759 = vmatprep.subr.mxu0 %v34118_v63  ;;  %27737 = vmatmul.mubr.f32.vlgmr.msra.gmra.mxu1 %v30884_v42 }
 0x1e8   :  { %27752 = vmatmul.mubr.f32.vlgmr.msra.gmra.mxu0 %v30884_v42  ;;  %27745 = vmatpush3.msra.mxu1 %v30974_v10 }
 0x1e9   :  { %27760 = vmatpush3.msra.mxu0 %v31005_v19  ;;  %27746 = vmatprep.mubr.msk.f32.mxu1 %vm30485_vm2, %v34118_v63 }
 0x1ea   :  { %27754 = vmatprep.subr.mxu1 %v34118_v63  ;;  %27761 = vmatprep.mubr.msk.f32.mxu0 %vm30485_vm2, %v34118_v63 }
 0x1eb   :  { %27769 = vmatprep.subr.mxu0 %v34118_v63  ;;  %27747 = vmatmul.mubr.f32.vlgmr.msra.gmra.mxu1 %v30910_v52 }
 0x1ec   :  { %27762 = vmatmul.mubr.f32.vlgmr.msra.gmra.mxu0 %v30935_v61  ;;  %27755 = vmatpush3.msra.mxu1 %v30974_v10 }
 0x1ed   :  { %27770 = vmatpush3.msra.mxu0 %v4253_v4  ;;  %27756 = vmatprep.mubr.msk.f32.mxu1 %vm30485_vm2, %v34118_v63 }
 0x1ee   :  { %27764 = vmatprep.subr.mxu1 %v34118_v63  ;;  %27771 = vmatprep.mubr.msk.f32.mxu0 %vm30485_vm2, %v34118_v63 }
 0x1ef   :  { %27779 = vmatprep.subr.mxu0 %v34118_v63  ;;  %27757 = vmatmul.mubr.f32.vlgmr.msra.gmra.mxu1 %v30884_v42 }
 0x1f0   :  { %27772 = vmatmul.mubr.f32.vlgmr.msra.gmra.mxu0 %v30895_v49  ;;  %27765 = vmatpush3.msra.mxu1 %v4256_v24 }
 0x1f1   :  { %27780 = vmatpush3.msra.mxu0 %v4254_v21  ;;  %27766 = vmatprep.mubr.msk.f32.mxu1 %vm30485_vm2, %v34118_v63 }
 0x1f2   :  { %27774 = vmatprep.subr.mxu1 %v34118_v63  ;;  %27781 = vmatprep.mubr.msk.f32.mxu0 %vm30485_vm2, %v34118_v63 }
 0x1f3   :  { %27789 = vmatprep.subr.mxu0 %v31047_v25  ;;  %27767 = vmatmul.mubr.f32.vlgmr.msra.gmra.mxu1 %v30884_v42 }
 0x1f4   :  { %27782 = vmatmul.mubr.f32.vlgmr.msra.gmra.mxu0 %v30884_v42  ;;  %27775 = vmatpush3.msra.mxu1 %v31005_v19 }
 0x1f5   :  { %27776 = vmatprep.mubr.msk.f32.mxu1 %vm30485_vm2, %v34118_v63  ;;  %27784 = vmatprep.subr.mxu1 %v34118_v63 }
 0x1f6   :  { %27790 = vmatpush3.msra.mxu0 %v31047_v25 }
 0x1f7   :  { %27791 = vmatprep.subr.mxu0 %v31054_v29  ;;  %27777 = vmatmul.mubr.f32.vlgmr.msra.gmra.mxu1 %v30910_v52 }
 0x1f8   :  { %27792 = vmatpush3.msra.mxu0 %v31054_v29  ;;  %27785 = vmatpush3.msra.mxu1 %v31005_v19 }
 0x1f9   :  { %27786 = vmatprep.mubr.msk.f32.mxu1 %vm30485_vm2, %v34118_v63  ;;  %27805 = vmatprep.subr.mxu1 %v4800_v32 }
 0x1fa   :  { %27821 = vmatprep.subr.mxu0 %v31052_v28 }
 0x1fb   :  { %27787 = vmatmul.mubr.f32.vlgmr.msra.gmra.mxu1 %v30884_v42 }
 0x1fc   :  { %27806 = vmatpush3.msra.mxu1 %v4800_v32 }
 0x1fd   :  { %27807 = vmatprep.subr.mxu1 %v4807_v35 }
 0x1fe   :  { %27808 = vmatpush3.msra.mxu1 %v4807_v35 }
 0x1ff   :  { %27837 = vmatprep.subr.mxu1 %v31047_v25 }
 0x257   :  { %v1085_v38 = vpop.f32.mrf.mxu0 }
 0x258   :  { %v1086_v37 = vadd.f32 %v31094_v40, %v1085_v38 }
 0x259   :  { %v27553_v39 = vpop.f32.mrf.mxu0 }
 0x25b   :  { %v1235_v41 = vpop.f32.mrf.mxu0 }
 0x25d   :  { %v27563_v47 = vpop.f32.mrf.mxu0 }
 0x25f   :  { %v1383_v48 = vpop.f32.mrf.mxu0  ;;  %v1161_v50 = vpop.f32.mrf.mxu1 }
 0x260   :  { %v1162_v51 = vadd.f32 %v1161_v50, %v1086_v37 }
 0x261   :  { %v27573_v53 = vpop.f32.mrf.mxu0  ;;  %v27558_v54 = vpop.f32.mrf.mxu1 }
 0x262   :  { %v1236_v55 = vadd.f32 %v1235_v41, %v1162_v51 }
 0x263   :  { %v1309_v56 = vpop.f32.mrf.mxu1 }
 0x264   :  { %v1532_v36 = vpop.f32.mrf.mxu0  ;;  %v1310_v57 = vadd.f32 %v1309_v56, %v1236_v55 }
 0x265   :  { %v27568_v58 = vpop.f32.mrf.mxu1  ;;  %v1533_v1 = vadd.f32 %v31094_v40, %v1532_v36 }
 0x266   :  { %v27583_v60 = vpop.f32.mrf.mxu0  ;;  %v1384_v62 = vadd.f32 %v1383_v48, %v1310_v57 }
 0x267   :  { %v1455_v16 = vpop.f32.mrf.mxu1 }
 0x268   :  { %v1682_v17 = vpop.f32.mrf.mxu0  ;;  %v1456_v0 = vadd.f32 %v1455_v16, %v1384_v62 }
 0x269   :  { %v27578_v43 = vpop.f32.mrf.mxu1 }
 0x26a   :  { %v27593_v2 = vpop.f32.mrf.mxu0  ;;  %v1459_v3 = vmax.f32 %v1456_v0, 0.0 }
 0x26b   :  { %v1608_v8 = vpop.f32.mrf.mxu1 }
 0x26c   :  { %v1830_v6 = vpop.f32.mrf.mxu0  ;;  %v4597_v46 = vsel %vm4595_vm4, %v1459_v3, 0  ;;  %v1609_v7 = vadd.f32 %v1608_v8, %v1533_v1 }
 0x26d   :  { %v31099_v9 = vand.u32 4294901760, %v4597_v46  ;;  %v27588_v10 = vpop.f32.mrf.mxu1 }
 0x26e   :  { %v27603_v13 = vpop.f32.mrf.mxu0  ;;  %v1683_v14 = vadd.f32 %v1682_v17, %v1609_v7 }
 0x26f   :  { %v31102_v15 = vsub.f32 %v4597_v46, %v31099_v9  ;;  %v1756_v45 = vpop.f32.mrf.mxu1  ;;  %27809 = vmatprep.mubr.f32.mxu1 %v31099_v9 }
 0x270   :  { %v1979_v18 = vpop.f32.mrf.mxu0  ;;  %v1757_v19 = vadd.f32 %v1756_v45, %v1683_v14 }
 0x271   :  { %v27598_v20 = vpop.f32.mrf.mxu1  ;;  %v4689_v5 = vand.u32 4294901760, %v31102_v15  ;;  %v1980_v12 = vadd.f32 %v31094_v40, %v1979_v18 }
 0x272   :  { %v27613_v4 = vpop.f32.mrf.mxu0  ;;  %v1831_v21 = vadd.f32 %v1830_v6, %v1757_v19 }
 0x273   :  { %v1902_v22 = vpop.f32.mrf.mxu1  ;;  %v4690_v24 = vsub.f32 %v31102_v15, %v4689_v5 }
 0x274   :  { %v2129_v23 = vpop.f32.mrf.mxu0  ;;  %v1903_v26 = vadd.f32 %v1902_v22, %v1831_v21 }
 0x275   :  { %v27608_v32 = vpop.f32.mrf.mxu1  ;;  %v4691_v33 = vand.u32 4294901760, %v4690_v24 }
 0x276   :  { %v27623_v35 = vpop.f32.mrf.mxu0  ;;  %v1906_v38 = vmax.f32 %v1903_v26, 0.0 }
 0x277   :  { %v2055_v39 = vpop.f32.mrf.mxu1  ;;  %27793 = vmatprep.mubr.f32.mxu0 %v4691_v33 }
 0x278   :  { %v2277_v41 = vpop.f32.mrf.mxu0  ;;  %v4600_v37 = vsel %vm4595_vm4, %v1906_v38, 0  ;;  %v2056_v47 = vadd.f32 %v2055_v39, %v1980_v12 }
 0x279   :  { %v31111_v48 = vand.u32 4294901760, %v4600_v37  ;;  %v27618_v50 = vpop.f32.mrf.mxu1 }
 0x27a   :  { %v27633_v51 = vpop.f32.mrf.mxu0  ;;  %v2130_v53 = vadd.f32 %v2129_v23, %v2056_v47 }
 0x27b   :  { %v31114_v54 = vsub.f32 %v4600_v37, %v31111_v48  ;;  %v2203_v55 = vpop.f32.mrf.mxu1  ;;  %27810 = vmatmul.mubr.f32.vlgmr.msra.gmra.mxu1 %v31111_v48 }
 0x27c   :  { %v2426_v56 = vpop.f32.mrf.mxu0  ;;  %v2204_v36 = vadd.f32 %v2203_v55, %v2130_v53  ;;  %27838 = vmatpush3.msra.mxu1 %v31047_v25 }
 0x27d   :  { %v4699_v57 = vand.u32 4294901760, %v31114_v54  ;;  %v27628_v58 = vpop.f32.mrf.mxu1  ;;  %27839 = vmatprep.subr.mxu1 %v31054_v29  ;;  %v2427_v43 = vadd.f32 %v31094_v40, %v2426_v56 }
 0x27e   :  { %v27643_v60 = vpop.f32.mrf.mxu0  ;;  %v2278_v62 = vadd.f32 %v2277_v41, %v2204_v36  ;;  %27840 = vmatpush3.msra.mxu1 %v31054_v29 }
 0x27f   :  { %v2349_v16 = vpop.f32.mrf.mxu1  ;;  %v4700_v0 = vsub.f32 %v31114_v54, %v4699_v57  ;;  %27869 = vmatprep.subr.mxu1 %v31047_v25 }
 0x280   :  { %v2576_v17 = vpop.f32.mrf.mxu0  ;;  %v2350_v1 = vadd.f32 %v2349_v16, %v2278_v62 }
 0x281   :  { %v27638_v2 = vpop.f32.mrf.mxu1  ;;  %v4701_v3 = vand.u32 4294901760, %v4700_v0 }
 0x282   :  { %v27653_v8 = vpop.f32.mrf.mxu0  ;;  %v2353_v6 = vmax.f32 %v2350_v1, 0.0 }
 0x283   :  { %v2502_v46 = vpop.f32.mrf.mxu1  ;;  %27794 = vmatmul.mubr.f32.vlgmr.msra.gmra.mxu0 %v4701_v3 }
 0x284   :  { %v2724_v7 = vpop.f32.mrf.mxu0  ;;  %v4603_v10 = vsel %vm4595_vm4, %v2353_v6, 0  ;;  %v2503_v13 = vadd.f32 %v2502_v46, %v2427_v43  ;;  %27822 = vmatpush3.msra.mxu0 %v31052_v28 }
 0x285   :  { %v31128_v14 = vand.u32 4294901760, %v4603_v10  ;;  %v27648_v45 = vpop.f32.mrf.mxu1  ;;  %27823 = vmatprep.subr.mxu0 %v31065_v11 }
 0x286   :  { %v27663_v18 = vpop.f32.mrf.mxu0  ;;  %v2577_v19 = vadd.f32 %v2576_v17, %v2503_v13  ;;  %27824 = vmatpush3.msra.mxu0 %v31065_v11 }
 0x287   :  { %v31133_v20 = vsub.f32 %v4603_v10, %v31128_v14  ;;  %v2650_v4 = vpop.f32.mrf.mxu1  ;;  %27812 = vmatprep.mubr.f32.mxu1 %v31128_v14  ;;  %27853 = vmatprep.subr.mxu0 %v31062_v30 }
 0x288   :  { %v2876_v21 = vpop.f32.mrf.mxu0  ;;  %v2651_v22 = vadd.f32 %v2650_v4, %v2577_v19 }
 0x289   :  { %v27658_v28 = vpop.f32.mrf.mxu1  ;;  %v4709_v24 = vand.u32 4294901760, %v31133_v20  ;;  %v2877_v35 = vadd.f32 %v31094_v40, %v2876_v21 }
 0x28a   :  { %v27673_v23 = vpop.f32.mrf.mxu0  ;;  %v2725_v26 = vadd.f32 %v2724_v7, %v2651_v22 }
 0x28b   :  { %v2796_v12 = vpop.f32.mrf.mxu1  ;;  %v4710_v11 = vsub.f32 %v31133_v20, %v4709_v24 }
 0x28c   :  { %v3026_v32 = vpop.f32.mrf.mxu0  ;;  %v2797_v33 = vadd.f32 %v2796_v12, %v2725_v26 }
 0x28d   :  { %v27668_v38 = vpop.f32.mrf.mxu1  ;;  %v4711_v39 = vand.u32 4294901760, %v4710_v11 }
 0x28e   :  { %v27683_v41 = vpop.f32.mrf.mxu0  ;;  %v2800_v37 = vmax.f32 %v2797_v33, 0.0 }
 0x28f   :  { %v2952_v47 = vpop.f32.mrf.mxu1  ;;  %27796 = vmatprep.mubr.f32.mxu0 %v4711_v39 }
 0x290   :  { %v3174_v50 = vpop.f32.mrf.mxu0  ;;  %v4606_v51 = vsel %vm4595_vm4, %v2800_v37, 0  ;;  %v2953_v53 = vadd.f32 %v2952_v47, %v2877_v35 }
 0x291   :  { %v31143_v55 = vand.u32 4294901760, %v4606_v51  ;;  %v27678_v56 = vpop.f32.mrf.mxu1 }
 0x292   :  { %v27693_v36 = vpop.f32.mrf.mxu0  ;;  %v3027_v58 = vadd.f32 %v3026_v32, %v2953_v53 }
 0x293   :  { %v31146_v60 = vsub.f32 %v4606_v51, %v31143_v55  ;;  %v3100_v62 = vpop.f32.mrf.mxu1  ;;  %27813 = vmatmul.mubr.f32.gmra.mxu1 %v31143_v55 }
 0x294   :  { %v3323_v16 = vpop.f32.mrf.mxu0  ;;  %v3101_v17 = vadd.f32 %v3100_v62, %v3027_v58 }
 0x295   :  { %v27688_v0 = vpop.f32.mrf.mxu1  ;;  %v4719_v43 = vand.u32 4294901760, %v31146_v60  ;;  %v3324_v7 = vadd.f32 %v31094_v40, %v3323_v16 }
 0x296   :  { %v27703_v1 = vpop.f32.mrf.mxu0  ;;  %v3175_v2 = vadd.f32 %v3174_v50, %v3101_v17 }
 0x297   :  { %v3246_v3 = vpop.f32.mrf.mxu1  ;;  %v4720_v6 = vsub.f32 %v31146_v60, %v4719_v43 }
 0x298   :  { %v3473_v8 = vpop.f32.mrf.mxu0  ;;  %v3247_v46 = vadd.f32 %v3246_v3, %v3175_v2 }
 0x299   :  { %v27698_v10 = vpop.f32.mrf.mxu1  ;;  %v4721_v13 = vand.u32 4294901760, %v4720_v6 }
 0x29a   :  { %v27713_v45 = vpop.f32.mrf.mxu0  ;;  %v3250_v18 = vmax.f32 %v3247_v46, 0.0 }
 0x29b   :  { %v3399_v19 = vpop.f32.mrf.mxu1  ;;  %27797 = vmatmul.mubr.f32.gmra.mxu0 %v4721_v13 }
 0x29c   :  { %v3621_v4 = vpop.f32.mrf.mxu0  ;;  %v4609_v21 = vsel %vm4595_vm4, %v3250_v18, 0  ;;  %v3400_v22 = vadd.f32 %v3399_v19, %v3324_v7 }
 0x29d   :  { %v31155_v28 = vand.u32 4294901760, %v4609_v21  ;;  %v27708_v23 = vpop.f32.mrf.mxu1 }
 0x29e   :  { %v27723_v26 = vpop.f32.mrf.mxu0  ;;  %v3474_v12 = vadd.f32 %v3473_v8, %v3400_v22 }
 0x29f   :  { %v31158_v32 = vsub.f32 %v4609_v21, %v31155_v28  ;;  %v3547_v11 = vpop.f32.mrf.mxu1  ;;  %27815 = vmatprep.mubr.f32.mxu1 %v31155_v28 }
 0x2a0   :  { %v3770_v33 = vpop.f32.mrf.mxu0  ;;  %v3548_v35 = vadd.f32 %v3547_v11, %v3474_v12 }
 0x2a1   :  { %v27718_v38 = vpop.f32.mrf.mxu1  ;;  %v4729_v41 = vand.u32 4294901760, %v31158_v32  ;;  %v3771_v56 = vadd.f32 %v31094_v40, %v3770_v33 }
 0x2a2   :  { %v27733_v39 = vpop.f32.mrf.mxu0  ;;  %v3622_v37 = vadd.f32 %v3621_v4, %v3548_v35 }
 0x2a3   :  { %v3693_v47 = vpop.f32.mrf.mxu1  ;;  %v4730_v51 = vsub.f32 %v31158_v32, %v4729_v41 }
 0x2a4   :  { %v3920_v50 = vpop.f32.mrf.mxu0  ;;  %v3694_v53 = vadd.f32 %v3693_v47, %v3622_v37 }
 0x2a5   :  { %v27728_v36 = vpop.f32.mrf.mxu1  ;;  %v4731_v58 = vand.u32 4294901760, %v4730_v51 }
 0x2a6   :  { %v27743_v62 = vpop.f32.mrf.mxu0  ;;  %v3697_v16 = vmax.f32 %v3694_v53, 0.0 }
 0x2a7   :  { %v3846_v17 = vpop.f32.mrf.mxu1  ;;  %27799 = vmatprep.mubr.f32.mxu0 %v4731_v58 }
 0x2a8   :  { %v4068_v0 = vpop.f32.mrf.mxu0  ;;  %v4612_v1 = vsel %vm4595_vm4, %v3697_v16, 0  ;;  %v3847_v2 = vadd.f32 %v3846_v17, %v3771_v56 }
 0x2a9   :  { %v31167_v3 = vand.u32 4294901760, %v4612_v1  ;;  %v27738_v8 = vpop.f32.mrf.mxu1 }
 0x2aa   :  { %v27753_v6 = vpop.f32.mrf.mxu0  ;;  %v3921_v46 = vadd.f32 %v3920_v50, %v3847_v2 }
 0x2ab   :  { %v31170_v7 = vsub.f32 %v4612_v1, %v31167_v3  ;;  %v3994_v10 = vpop.f32.mrf.mxu1  ;;  %27816 = vmatmul.mubr.f32.gmra.mxu1 %v31167_v3 }
 0x2ac   :  { %v4217_v13 = vpop.f32.mrf.mxu0  ;;  %v3995_v45 = vadd.f32 %v3994_v10, %v3921_v46 }
 0x2ad   :  { %v27748_v18 = vpop.f32.mrf.mxu1  ;;  %v4739_v4 = vand.u32 4294901760, %v31170_v7  ;;  %v4218_v11 = vadd.f32 %v31094_v40, %v4217_v13 }
 0x2ae   :  { %v27763_v19 = vpop.f32.mrf.mxu0  ;;  %v4069_v21 = vadd.f32 %v4068_v0, %v3995_v45 }
 0x2af   :  { %v4140_v22 = vpop.f32.mrf.mxu1  ;;  %v4740_v26 = vsub.f32 %v31170_v7, %v4739_v4 }
 0x2b0   :  { %v4367_v23 = vpop.f32.mrf.mxu0  ;;  %v4141_v12 = vadd.f32 %v4140_v22, %v4069_v21 }
 0x2b1   :  { %v27758_v33 = vpop.f32.mrf.mxu1  ;;  %v4741_v35 = vand.u32 4294901760, %v4740_v26 }
 0x2b2   :  { %v27773_v38 = vpop.f32.mrf.mxu0  ;;  %v4144_v39 = vmax.f32 %v4141_v12, 0.0 }
 0x2b3   :  { %v4293_v37 = vpop.f32.mrf.mxu1  ;;  %27800 = vmatmul.mubr.f32.gmra.mxu0 %v4741_v35 }
 0x2b4   :  { %v4515_v47 = vpop.f32.mrf.mxu0  ;;  %v4615_v50 = vsel %vm4595_vm4, %v4144_v39, 0  ;;  %v4294_v51 = vadd.f32 %v4293_v37, %v4218_v11 }
 0x2b5   :  { %v31177_v53 = vand.u32 4294901760, %v4615_v50  ;;  %v27768_v56 = vpop.f32.mrf.mxu1 }
 0x2b6   :  { %v27783_v36 = vpop.f32.mrf.mxu0  ;;  %v4368_v58 = vadd.f32 %v4367_v23, %v4294_v51 }
 0x2b7   :  { %v4748_v62 = vsub.f32 %v4615_v50, %v31177_v53  ;;  %v4441_v16 = vpop.f32.mrf.mxu1  ;;  %27818 = vmatprep.mubr.f32.mxu1 %v31177_v53 }
 0x2b8   :  { %v4442_v40 = vadd.f32 %v4441_v16, %v4368_v58 }
 0x2b9   :  { %v27778_v17 = vpop.f32.mrf.mxu1  ;;  %v4749_v0 = vand.u32 4294901760, %v4748_v62 }
 0x2ba   :  { %v4516_v1 = vadd.f32 %v4515_v47, %v4442_v40 }
 0x2bb   :  { %v4587_v2 = vpop.f32.mrf.mxu1  ;;  %v4750_v8 = vsub.f32 %v4748_v62, %v4749_v0 }
 0x2bc   :  { %v4588_v6 = vadd.f32 %v4587_v2, %v4516_v1 }
 0x2bd   :  { %v27788_v46 = vpop.f32.mrf.mxu1  ;;  %v4751_v10 = vand.u32 4294901760, %v4750_v8 }
 0x2be   :  { %v4591_v13 = vmax.f32 %v4588_v6, 0.0 }
 0x2bf   :  { %27802 = vmatprep.mubr.f32.mxu0 %v4751_v10 }
 0x2c0   :  { %v4618_v45 = vsel %vm4595_vm4, %v4591_v13, 0 }
 0x2c1   :  { %v4757_v18 = vand.u32 4294901760, %v4618_v45 }
 0x2c3   :  { %v4758_v19 = vsub.f32 %v4618_v45, %v4757_v18  ;;  %27819 = vmatmul.mubr.f32.gmra.mxu1 %v4757_v18 }
 0x2c4   :  { %27841 = vmatprep.mubr.f32.mxu1 %v4689_v5 }
 0x2c5   :  { %v4759_v21 = vand.u32 4294901760, %v4758_v19 }
 0x2c7   :  { %27842 = vmatmul.mubr.f32.vlgmr.msra.gmra.mxu1 %v4699_v57  ;;  %v4760_v22 = vsub.f32 %v4758_v19, %v4759_v21 }
 0x2c8   :  { %27844 = vmatprep.mubr.f32.mxu1 %v4709_v24  ;;  %27870 = vmatpush3.msra.mxu1 %v31047_v25 }
 0x2c9   :  { %v4761_v23 = vand.u32 4294901760, %v4760_v22  ;;  %27871 = vmatprep.subr.mxu1 %v31054_v29 }
 0x2ca   :  { %27872 = vmatpush3.msra.mxu1 %v31054_v29 }
 0x2cb   :  { %27803 = vmatmul.mubr.f32.gmra.mxu0 %v4761_v23  ;;  %27845 = vmatmul.mubr.f32.gmra.mxu1 %v4719_v43 }
 0x2cc   :  { %27825 = vmatprep.mubr.f32.mxu0 %v31102_v15  ;;  %27847 = vmatprep.mubr.f32.mxu1 %v4729_v41 }
 0x2cd   :  { %27890 = vmatprep.subr.mxu1 %v34118_v63 }
 0x2cf   :  { %27826 = vmatmul.mubr.f32.vlgmr.msra.gmra.mxu0 %v31114_v54  ;;  %27848 = vmatmul.mubr.f32.gmra.mxu1 %v4739_v4 }
 0x2d0   :  { %27828 = vmatprep.mubr.f32.mxu0 %v31133_v20  ;;  %27850 = vmatprep.mubr.f32.mxu1 %v4749_v0 }
 0x2d1   :  { %27854 = vmatpush3.msra.mxu0 %v31062_v30 }
 0x2d2   :  { %27855 = vmatprep.subr.mxu0 %v31076_v31 }
 0x2d3   :  { %27829 = vmatmul.mubr.f32.gmra.mxu0 %v31146_v60  ;;  %27851 = vmatmul.mubr.f32.gmra.mxu1 %v4759_v21 }
 0x2d4   :  { %27831 = vmatprep.mubr.f32.mxu0 %v31158_v32  ;;  %27873 = vmatprep.mubr.f32.mxu1 %v31099_v9 }
 0x2d5   :  { %27856 = vmatpush3.msra.mxu0 %v31076_v31 }
 0x2d6   :  { %27885 = vmatprep.subr.mxu0 %v34118_v63 }
 0x2d7   :  { %27832 = vmatmul.mubr.f32.gmra.mxu0 %v31170_v7  ;;  %27874 = vmatmul.mubr.f32.vlgmr.msra.gmra.mxu1 %v31111_v48 }
 0x2d8   :  { %27834 = vmatprep.mubr.f32.mxu0 %v4748_v62  ;;  %27876 = vmatprep.mubr.f32.mxu1 %v31128_v14 }
 0x2db   :  { %27835 = vmatmul.mubr.f32.gmra.mxu0 %v4758_v19  ;;  %27877 = vmatmul.mubr.f32.gmra.mxu1 %v31143_v55 }
 0x2dc   :  { %27857 = vmatprep.mubr.f32.mxu0 %v31099_v9  ;;  %27879 = vmatprep.mubr.f32.mxu1 %v31155_v28 }
 0x2df   :  { %27858 = vmatmul.mubr.f32.vlgmr.msra.gmra.mxu0 %v31111_v48  ;;  %27880 = vmatmul.mubr.f32.gmra.mxu1 %v31167_v3 }
 0x2e0   :  { %27860 = vmatprep.mubr.f32.mxu0 %v31128_v14  ;;  %27882 = vmatprep.mubr.f32.mxu1 %v31177_v53 }
 0x2e3   :  { %27861 = vmatmul.mubr.f32.gmra.mxu0 %v31143_v55  ;;  %27883 = vmatmul.mubr.f32.gmra.mxu1 %v4757_v18 }
 0x2e4   :  { %27863 = vmatprep.mubr.f32.mxu0 %v31155_v28  ;;  %27892 = vmatprep.mubr.msk.f32.mxu1 %vm30485_vm2, %v34118_v63 }
 0x2e7   :  { %27864 = vmatmul.mubr.f32.gmra.mxu0 %v31167_v3 }
 0x2e8   :  { %27866 = vmatprep.mubr.f32.mxu0 %v31177_v53 }
 0x2eb   :  { %27867 = vmatmul.mubr.f32.gmra.mxu0 %v4757_v18 }
 0x2ec   :  { %27887 = vmatprep.mubr.msk.f32.mxu0 %vm30485_vm2, %v34118_v63 }
 0x33b   :  { %v27811_v25 = vpop.f32.mrf.mxu1 }
 0x33d   :  { %v4844_v30 = vpop.f32.mrf.mxu1 }
 0x343   :  { %v27795_v29 = vpop.f32.mrf.mxu0 }
 0x344   :  { %v4851_v50 = vadd.f32 %v27811_v25, %v27795_v29 }
 0x345   :  { %v4693_v31 = vpop.f32.mrf.mxu0 }
 0x346   :  { %v4845_v53 = vadd.f32 %v4844_v30, %v4693_v31 }
 0x353   :  { %v31224_v9 = vpop.f32.mrf.mxu1 }
 0x355   :  { %v4856_v5 = vpop.f32.mrf.mxu1 }
 0x35b   :  { %v31226_v15 = vpop.f32.mrf.mxu0 }
 0x35d   :  { %v4713_v48 = vpop.f32.mrf.mxu0 }
 0x35e   :  { %v4857_v19 = vadd.f32 %v4856_v5, %v4713_v48 }
 0x36b   :  { %v27817_v54 = vpop.f32.mrf.mxu1 }
 0x36d   :  { %v31228_v20 = vpop.f32.mrf.mxu1 }
 0x373   :  { %v27801_v57 = vpop.f32.mrf.mxu0 }
 0x374   :  { %v4875_v14 = vadd.f32 %v27817_v54, %v27801_v57 }
 0x375   :  { %v31232_v43 = vpop.f32.mrf.mxu0 }
 0x383   :  { %v27820_v24 = vpop.f32.mrf.mxu1 }
 0x385   :  { %v31230_v55 = vpop.f32.mrf.mxu1 }
 0x387   :  { %v27843_v60 = vpop.f32.mrf.mxu1 }
 0x389   :  { %v5086_v28 = vpop.f32.mrf.mxu1 }
 0x38b   :  { %v27804_v32 = vpop.f32.mrf.mxu0  ;;  %v31234_v41 = vpop.f32.mrf.mxu1 }
 0x38c   :  { %v4887_v3 = vadd.f32 %v27820_v24, %v27804_v32  ;;  %v4863_v32 = vadd.f32 %v31224_v9, %v31226_v15 }
 0x38d   :  { %v31236_v7 = vpop.f32.mrf.mxu0  ;;  %v5102_v4 = vpop.f32.mrf.mxu1 }
 0x38f   :  { %v27827_v26 = vpop.f32.mrf.mxu0  ;;  %v27849_v12 = vpop.f32.mrf.mxu1 }
 0x390   :  { %v4970_v36 = vadd.f32 %v27827_v26, %v4851_v50 }
 0x391   :  { %v4962_v11 = vpop.f32.mrf.mxu0  ;;  %v31238_v33 = vpop.f32.mrf.mxu1 }
 0x392   :  { %v4963_v16 = vadd.f32 %v4962_v11, %v4845_v53  ;;  %v5095_v2 = vadd.f32 %v27843_v60, %v4970_v36 }
 0x393   :  { %v27830_v35 = vpop.f32.mrf.mxu0  ;;  %v27852_v39 = vpop.f32.mrf.mxu1 }
 0x394   :  { %v5087_v6 = vadd.f32 %v5086_v28, %v4963_v16  ;;  %v4984_v26 = vadd.f32 %v27830_v35, %v4863_v32 }
 0x395   :  { %v4976_v38 = vpop.f32.mrf.mxu0  ;;  %v31244_v58 = vpop.f32.mrf.mxu1 }
 0x396   :  { %v4977_v25 = vadd.f32 %v4976_v38, %v4857_v19  ;;  %v5111_v15 = vadd.f32 %v31234_v41, %v4984_v26  ;;  %v4869_v41 = vadd.f32 %v31228_v20, %v31232_v43  ;;  %v8970_v26 = vld [vmem:[%s34103_s7 + $0x8] sm:$0xff] }
 0x397   :  { %v27833_v37 = vpop.f32.mrf.mxu0  ;;  %v27875_v1 = vpop.f32.mrf.mxu1 }
 0x398   :  { %v4998_v47 = vadd.f32 %v27833_v37, %v4875_v14  ;;  %v5103_v57 = vadd.f32 %v5102_v4, %v4977_v25 }
 0x399   :  { %v31240_v51 = vpop.f32.mrf.mxu0  ;;  %v5334_v45 = vpop.f32.mrf.mxu1 }
 0x39a   :  { %v31242_v56 = vadd.f32 %v27849_v12, %v4998_v47  ;;  %v4991_v50 = vadd.f32 %v31240_v51, %v4869_v41 }
 0x39b   :  { %v27836_v62 = vpop.f32.mrf.mxu0  ;;  %v27878_v5 = vpop.f32.mrf.mxu1 }
 0x39c   :  { %v5012_v40 = vadd.f32 %v27836_v62, %v4887_v3  ;;  %v5119_v51 = vadd.f32 %v31238_v33, %v4991_v50 }
 0x39d   :  { %v31246_v17 = vpop.f32.mrf.mxu0  ;;  %v5346_v28 = vpop.f32.mrf.mxu1 }
 0x39e   :  { %v31248_v0 = vadd.f32 %v27852_v39, %v5012_v40 }
 0x39f   :  { %v27859_v8 = vpop.f32.mrf.mxu0  ;;  %v27881_v36 = vpop.f32.mrf.mxu1 }
 0x3a0   :  { %v5226_v46 = vadd.f32 %v27859_v8, %v5095_v2 }
 0x3a1   :  { %v5219_v10 = vpop.f32.mrf.mxu0  ;;  %v5358_v33 = vpop.f32.mrf.mxu1 }
 0x3a2   :  { %v5220_v13 = vadd.f32 %v5219_v10, %v5087_v6  ;;  %v5341_v21 = vadd.f32 %v27875_v1, %v5226_v46 }
 0x3a3   :  { %v27862_v23 = vpop.f32.mrf.mxu0 }
 0x3a4   :  { %v5335_v18 = vadd.f32 %v5334_v45, %v5220_v13  ;;  %v31250_v30 = vand.u32 4294901760, %v5341_v21  ;;  %v5238_v11 = vadd.f32 %v27862_v23, %v5111_v15 }
 0x3a5   :  { %v5231_v31 = vpop.f32.mrf.mxu0 }
 0x3a6   :  { %v5417_v22 = vand.u32 4294901760, %v5335_v18  ;;  %v5941_v48 = vsub.f32 %v5341_v21, %v31250_v30  ;;  %v5232_v14 = vadd.f32 %v5231_v31, %v5103_v57  ;;  %v5353_v39 = vadd.f32 %v27878_v5, %v5238_v11  ;;  %v27884_v21 = vpop.f32.mrf.mxu1  ;;  %v8969_v11 = vld [vmem:[%s34103_s7] sm:$0xff] }
 0x3a7   :  { %v27865_v47 = vpop.f32.mrf.mxu0 }
 0x3a8   :  { %v5494_v29 = vsub.f32 %v5335_v18, %v5417_v22  ;;  %27886 = vmatpush3.msra.mxu0 %v5417_v22  ;;  %v5942_v3 = vand.u32 4294901760, %v5941_v48  ;;  %v5347_v4 = vadd.f32 %v5346_v28, %v5232_v14  ;;  %v31304_v20 = vand.u32 4294901760, %v5353_v39  ;;  %v8972_v28 = vld [vmem:[%s34103_s7 + $0x18] sm:$0xff] }
 0x3a9   :  { %27888 = vmatmul.mubr.f32.vlgmr.msra.gmra.mxu0 %v30808_v59  ;;  %27895 = vmatprep.subr.mxu0 %v34118_v63  ;;  %v5243_v53 = vpop.f32.mrf.mxu0  ;;  %v5250_v46 = vadd.f32 %v27865_v47, %v31242_v56  ;;  %v31454_v32 = vand.u32 4294901760, %v8972_v28 }
 0x3aa   :  { %27896 = vmatpush3.msra.mxu0 %v5494_v29  ;;  %27897 = vmatprep.mubr.msk.f32.mxu0 %vm30485_vm2, %v34118_v63  ;;  %v5495_v54 = vand.u32 4294901760, %v5494_v29  ;;  %v31271_v12 = vand.u32 4294901760, %v5347_v4  ;;  %v5943_v9 = vsub.f32 %v5941_v48, %v5942_v3  ;;  %v6835_v62 = vsub.f32 %v5353_v39, %v31304_v20 }
 0x3ab   :  { %27905 = vmatprep.subr.mxu0 %v34118_v63  ;;  %v5244_v16 = vadd.f32 %v5243_v53, %v5119_v51  ;;  %v5365_v56 = vadd.f32 %v27881_v36, %v5250_v46  ;;  %v27868_v18 = vpop.f32.mrf.mxu0  ;;  %34327 = vst [vmem:[#allocation28_spill] sm:$0xff] %v31454_v32  ;;  %v31497_v39 = vand.u32 4294901760, %v8969_v11 }
 0x3ac   :  { %v5496_v24 = vsub.f32 %v5494_v29, %v5495_v54  ;;  %v6388_v35 = vsub.f32 %v5347_v4, %v31271_v12  ;;  %v5944_v38 = vand.u32 4294901760, %v5943_v9  ;;  %v6836_v1 = vand.u32 4294901760, %v6835_v62  ;;  %v8971_v4 = vld [vmem:[%s34103_s7 + $0x10] sm:$0xff]  ;;  %s30486_s7 = smov 64  }
 0x3ad   :  { %27898 = vmatmul.mubr.f32.vlgmr.msra.gmra.mxu0 %v30791_v34  ;;  %v5359_v2 = vadd.f32 %v5358_v33, %v5244_v16  ;;  %v5255_v19 = vpop.f32.mrf.mxu0  ;;  %v5262_v31 = vadd.f32 %v27868_v18, %v31248_v0  ;;  %v31475_v9 = vand.u32 4294901760, %v8971_v4  ;;  %34333 = vst [vmem:[#allocation34_spill] sm:$0xff] %v31497_v39 }
 0x3ae   :  { %27906 = vmatpush3.msra.mxu0 %v5495_v54  ;;  %27907 = vmatprep.mubr.msk.f32.mxu0 %vm30485_vm2, %v34118_v63  ;;  %v5497_v60 = vand.u32 4294901760, %v5496_v24  ;;  %v6389_v37 = vand.u32 4294901760, %v6388_v35  ;;  %v6837_v6 = vsub.f32 %v6835_v62, %v6836_v1 }
 0x3af   :  { %27915 = vmatprep.subr.mxu0 %v34118_v63  ;;  %v31335_v8 = vand.u32 4294901760, %v5359_v2  ;;  %v5377_v0 = vadd.f32 %v27884_v21, %v5262_v31  ;;  %34329 = vst [vmem:[#allocation30_spill] sm:$0xff] %v31475_v9  ;;  %v31495_v41 = vsub.f32 %v8971_v4, %v31475_v9 }
 0x3b0   :  { %27891 = vmatpush3.msra.mxu1 %v5497_v60  ;;  %v6390_v43 = vsub.f32 %v6388_v35, %v6389_v37  ;;  %v6838_v13 = vand.u32 4294901760, %v6837_v6 }
 0x3b1   :  { %27908 = vmatmul.mubr.f32.vlgmr.msra.gmra.mxu0 %v30786_v27  ;;  %27893 = vmatmul.mubr.f32.vlgmr.msra.gmra.mxu1 %v30786_v27  ;;  %v7282_v10 = vsub.f32 %v5359_v2, %v31335_v8  ;;  %34332 = vst [vmem:[#allocation33_spill] sm:$0xff] %v31495_v41  ;;  %v31513_v50 = vand.u32 4294901760, %v31495_v41 }
 0x3b2   :  { %27900 = vmatprep.subr.mxu1 %v34118_v63  ;;  %27916 = vmatpush3.msra.mxu0 %v31250_v30  ;;  %v6391_v40 = vand.u32 4294901760, %v6390_v43 }
 0x3b3   :  { %27901 = vmatpush3.msra.mxu1 %v5417_v22  ;;  %27902 = vmatprep.mubr.msk.f32.mxu1 %vm30485_vm2, %v34118_v63  ;;  %v7283_v45 = vand.u32 4294901760, %v7282_v10  ;;  %34335 = vst [vmem:[#allocation36_spill] sm:$0xff] %v31513_v50  ;;  %v9111_v53 = vsub.f32 %v31495_v41, %v31513_v50 }
 0x3b4   :  { %27910 = vmatprep.subr.mxu1 %v34118_v63  ;;  %27917 = vmatprep.mubr.msk.f32.mxu0 %vm30485_vm2, %v34118_v63 }
 0x3b5   :  { %27925 = vmatprep.subr.mxu0 %v34118_v63  ;;  %27903 = vmatmul.mubr.f32.vlgmr.msra.gmra.mxu1 %v30800_v44 }
 0x3b6   :  { %27918 = vmatmul.mubr.f32.vlgmr.msra.gmra.mxu0 %v30808_v59  ;;  %27911 = vmatpush3.msra.mxu1 %v5417_v22 }
 0x3b7   :  { %27926 = vmatpush3.msra.mxu0 %v5941_v48  ;;  %27912 = vmatprep.mubr.msk.f32.mxu1 %vm30485_vm2, %v34118_v63  ;;  %v31431_v48 = vand.u32 4294901760, %v5377_v0 }
 0x3b8   :  { %27920 = vmatprep.subr.mxu1 %v34118_v63  ;;  %27927 = vmatprep.mubr.msk.f32.mxu0 %vm30485_vm2, %v34118_v63 }
 0x3b9   :  { %27935 = vmatprep.subr.mxu0 %v34118_v63  ;;  %27913 = vmatmul.mubr.f32.vlgmr.msra.gmra.mxu1 %v30786_v27  ;;  %v8623_v24 = vsub.f32 %v5377_v0, %v31431_v48 }
 0x3ba   :  { %27928 = vmatmul.mubr.f32.vlgmr.msra.gmra.mxu0 %v30791_v34  ;;  %27921 = vmatpush3.msra.mxu1 %v5944_v38 }
 0x3bb   :  { %27936 = vmatpush3.msra.mxu0 %v5942_v3  ;;  %27922 = vmatprep.mubr.msk.f32.mxu1 %vm30485_vm2, %v34118_v63  ;;  %v8624_v3 = vand.u32 4294901760, %v8623_v24 }
 0x3bc   :  { %27930 = vmatprep.subr.mxu1 %v34118_v63  ;;  %27937 = vmatprep.mubr.msk.f32.mxu0 %vm30485_vm2, %v34118_v63 }
 0x3bd   :  { %27945 = vmatprep.subr.mxu0 %v34118_v63  ;;  %27923 = vmatmul.mubr.f32.vlgmr.msra.gmra.mxu1 %v30786_v27  ;;  %v8625_v15 = vsub.f32 %v8623_v24, %v8624_v3 }
 0x3be   :  { %27938 = vmatmul.mubr.f32.vlgmr.msra.gmra.mxu0 %v30786_v27  ;;  %27931 = vmatpush3.msra.mxu1 %v31250_v30 }
 0x3bf   :  { %27946 = vmatpush3.msra.mxu0 %v31271_v12  ;;  %27932 = vmatprep.mubr.msk.f32.mxu1 %vm30485_vm2, %v34118_v63 }
 0x3c0   :  { %27940 = vmatprep.subr.mxu1 %v34118_v63  ;;  %27947 = vmatprep.mubr.msk.f32.mxu0 %vm30485_vm2, %v34118_v63 }
 0x3c1   :  { %27955 = vmatprep.subr.mxu0 %v34118_v63  ;;  %27933 = vmatmul.mubr.f32.vlgmr.msra.gmra.mxu1 %v30800_v44 }
 0x3c2   :  { %27948 = vmatmul.mubr.f32.vlgmr.msra.gmra.mxu0 %v30808_v59  ;;  %27941 = vmatpush3.msra.mxu1 %v31250_v30 }
 0x3c3   :  { %27956 = vmatpush3.msra.mxu0 %v6388_v35  ;;  %27942 = vmatprep.mubr.msk.f32.mxu1 %vm30485_vm2, %v34118_v63  ;;  %v31485_v35 = vand.u32 4294901760, %v8970_v26 }
 0x3c4   :  { %27950 = vmatprep.subr.mxu1 %v34118_v63  ;;  %27957 = vmatprep.mubr.msk.f32.mxu0 %vm30485_vm2, %v34118_v63 }
 0x3c5   :  { %27965 = vmatprep.subr.mxu0 %v34118_v63  ;;  %27943 = vmatmul.mubr.f32.vlgmr.msra.gmra.mxu1 %v30786_v27  ;;  %34330 = vst [vmem:[#allocation31_spill] sm:$0xff] %v31485_v35 }
 0x3c6   :  { %27958 = vmatmul.mubr.f32.vlgmr.msra.gmra.mxu0 %v30791_v34  ;;  %27951 = vmatpush3.msra.mxu1 %v6391_v40 }
 0x3c7   :  { %27966 = vmatpush3.msra.mxu0 %v6389_v37  ;;  %27952 = vmatprep.mubr.msk.f32.mxu1 %vm30485_vm2, %v34118_v63  ;;  %v31505_v37 = vsub.f32 %v8970_v26, %v31485_v35 }
 0x3c8   :  { %27960 = vmatprep.subr.mxu1 %v34118_v63  ;;  %27967 = vmatprep.mubr.msk.f32.mxu0 %vm30485_vm2, %v34118_v63 }
 0x3c9   :  { %27975 = vmatprep.subr.mxu0 %v34118_v63  ;;  %27953 = vmatmul.mubr.f32.vlgmr.msra.gmra.mxu1 %v30786_v27  ;;  %34334 = vst [vmem:[#allocation35_spill] sm:$0xff] %v31505_v37 }
 0x3ca   :  { %27968 = vmatmul.mubr.f32.vlgmr.msra.gmra.mxu0 %v30786_v27  ;;  %27961 = vmatpush3.msra.mxu1 %v31271_v12 }
 0x3cb   :  { %27976 = vmatpush3.msra.mxu0 %v31304_v20  ;;  %27962 = vmatprep.mubr.msk.f32.mxu1 %vm30485_vm2, %v34118_v63 }
 0x3cc   :  { %27970 = vmatprep.subr.mxu1 %v34118_v63  ;;  %27977 = vmatprep.mubr.msk.f32.mxu0 %vm30485_vm2, %v34118_v63 }
 0x3cd   :  { %27985 = vmatprep.subr.mxu0 %v34118_v63  ;;  %27963 = vmatmul.mubr.f32.vlgmr.msra.gmra.mxu1 %v30800_v44 }
 0x3ce   :  { %27978 = vmatmul.mubr.f32.vlgmr.msra.gmra.mxu0 %v30808_v59  ;;  %27971 = vmatpush3.msra.mxu1 %v31271_v12  ;;  %v4881_v59 = vadd.f32 %v31230_v55, %v31236_v7  ;;  %v31369_v55 = vand.u32 4294901760, %v5365_v56  ;;  %v7284_v7 = vsub.f32 %v7282_v10, %v7283_v45  ;;  %v31473_v12 = vsub.f32 %v8972_v28, %v31454_v32 }
 0x3cf   :  { %27986 = vmatpush3.msra.mxu0 %v6835_v62  ;;  %27972 = vmatprep.mubr.msk.f32.mxu1 %vm30485_vm2, %v34118_v63  ;;  %v31548_v62 = vand.u32 4294901760, %v9111_v53 }
 0x3d0   :  { %27980 = vmatprep.subr.mxu1 %v34118_v63  ;;  %27987 = vmatprep.mubr.msk.f32.mxu0 %vm30485_vm2, %v34118_v63  ;;  %v7729_v22 = vsub.f32 %v5365_v56, %v31369_v55  ;;  %34328 = vst [vmem:[#allocation29_spill] sm:$0xff] %v31473_v12  ;;  %v31492_v38 = vand.u32 4294901760, %v31473_v12 }
 0x3d1   :  { %27995 = vmatprep.subr.mxu0 %v34118_v63  ;;  %27973 = vmatmul.mubr.f32.vlgmr.msra.gmra.mxu1 %v30786_v27 }
 0x3d2   :  { %27988 = vmatmul.mubr.f32.vlgmr.msra.gmra.mxu0 %v30791_v34  ;;  %27981 = vmatpush3.msra.mxu1 %v6838_v13  ;;  %v5005_v34 = vadd.f32 %v31246_v17, %v4881_v59  ;;  %v7730_v25 = vand.u32 4294901760, %v7729_v22  ;;  %34331 = vst [vmem:[#allocation32_spill] sm:$0xff] %v31492_v38  ;;  %v9104_v47 = vsub.f32 %v31473_v12, %v31492_v38 }
 0x3d3   :  { %27996 = vmatpush3.msra.mxu0 %v6836_v1  ;;  %27982 = vmatprep.mubr.msk.f32.mxu1 %vm30485_vm2, %v34118_v63  ;;  %v8967_v1 = vld [vmem:[#allocation9] sm:$0xff] }
 0x3d4   :  { %27990 = vmatprep.subr.mxu1 %v34118_v63  ;;  %27997 = vmatprep.mubr.msk.f32.mxu0 %vm30485_vm2, %v34118_v63  ;;  %v5135_v17 = vadd.f32 %v31244_v58, %v5005_v34  ;;  %v5370_v58 = vpop.f32.mrf.mxu1  ;;  %v7731_v30 = vsub.f32 %v7729_v22, %v7730_v25  ;;  %v31530_v43 = vand.u32 4294901760, %v9104_v47 }
 0x3d5   :  { %28005 = vmatprep.subr.mxu0 %v34118_v63  ;;  %27983 = vmatmul.mubr.f32.vlgmr.msra.gmra.mxu1 %v30786_v27 }
 0x3d6   :  { %27998 = vmatmul.mubr.f32.vlgmr.msra.gmra.mxu0 %v30786_v27  ;;  %27991 = vmatpush3.msra.mxu1 %v31304_v20  ;;  %v5256_v23 = vadd.f32 %v5255_v19, %v5135_v17  ;;  %v7732_v57 = vand.u32 4294901760, %v7731_v30 }
 0x3d7   :  { %28006 = vmatpush3.msra.mxu0 %v31335_v8  ;;  %27992 = vmatprep.mubr.msk.f32.mxu1 %vm30485_vm2, %v34118_v63 }
 0x3d8   :  { %28000 = vmatprep.subr.mxu1 %v34118_v63  ;;  %28007 = vmatprep.mubr.msk.f32.mxu0 %vm30485_vm2, %v34118_v63  ;;  %v5371_v29 = vadd.f32 %v5370_v58, %v5256_v23 }
 0x3d9   :  { %28015 = vmatprep.subr.mxu0 %v34118_v63  ;;  %27993 = vmatmul.mubr.f32.vlgmr.msra.gmra.mxu1 %v30800_v44  ;;  %v7285_v44 = vand.u32 4294901760, %v7284_v7 }
 0x3da   :  { %28008 = vmatmul.mubr.f32.vlgmr.msra.gmra.mxu0 %v30935_v61  ;;  %28001 = vmatpush3.msra.mxu1 %v31304_v20  ;;  %v31516_v20 = vsub.f32 %v8969_v11, %v31497_v39 }
 0x3db   :  { %28016 = vmatpush3.msra.mxu0 %v7282_v10  ;;  %28002 = vmatprep.mubr.msk.f32.mxu1 %vm30485_vm2, %v34118_v63 }
 0x3dc   :  { %28010 = vmatprep.subr.mxu1 %v34118_v63  ;;  %28017 = vmatprep.mubr.msk.f32.mxu0 %vm30485_vm2, %v34118_v63  ;;  %34336 = vst [vmem:[#allocation37_spill] sm:$0xff] %v31516_v20  ;;  %v31536_v51 = vand.u32 4294901760, %v31516_v20 }
 0x3dd   :  { %28025 = vmatprep.subr.mxu0 %v34118_v63  ;;  %28003 = vmatmul.mubr.f32.vlgmr.msra.gmra.mxu1 %v30786_v27  ;;  %v31400_v27 = vand.u32 4294901760, %v5371_v29 }
 0x3de   :  { %28018 = vmatmul.mubr.f32.vlgmr.msra.gmra.mxu0 %v30895_v49  ;;  %28011 = vmatpush3.msra.mxu1 %v7285_v44  ;;  %34338 = vst [vmem:[#allocation39_spill] sm:$0xff] %v31536_v51  ;;  %v9125_v16 = vsub.f32 %v31516_v20, %v31536_v51 }
 0x3df   :  { %28026 = vmatpush3.msra.mxu0 %v7283_v45  ;;  %28012 = vmatprep.mubr.msk.f32.mxu1 %vm30485_vm2, %v34118_v63  ;;  %v8176_v54 = vsub.f32 %v5371_v29, %v31400_v27 }
 0x3e0   :  { %28020 = vmatprep.subr.mxu1 %v34118_v63  ;;  %28027 = vmatprep.mubr.msk.f32.mxu0 %vm30485_vm2, %v34118_v63  ;;  %v31561_v40 = vand.u32 4294901760, %v9125_v16 }
 0x3e1   :  { %28035 = vmatprep.subr.mxu0 %v34118_v63  ;;  %28013 = vmatmul.mubr.f32.vlgmr.msra.gmra.mxu1 %v30884_v42  ;;  %v8177_v5 = vand.u32 4294901760, %v8176_v54 }
 0x3e2   :  { %28028 = vmatmul.mubr.f32.vlgmr.msra.gmra.mxu0 %v30884_v42  ;;  %28021 = vmatpush3.msra.mxu1 %v31335_v8  ;;  %34339 = vst [vmem:[#allocation40_spill] sm:$0xff] %v31561_v40 }
 0x3e3   :  { %28036 = vmatpush3.msra.mxu0 %v31369_v55  ;;  %28022 = vmatprep.mubr.msk.f32.mxu1 %vm30485_vm2, %v34118_v63  ;;  %v8178_v14 = vsub.f32 %v8176_v54, %v8177_v5 }
 0x3e4   :  { %28030 = vmatprep.subr.mxu1 %v34118_v63  ;;  %28037 = vmatprep.mubr.msk.f32.mxu0 %vm30485_vm2, %v34118_v63 }
 0x3e5   :  { %28045 = vmatprep.subr.mxu0 %v34118_v63  ;;  %28023 = vmatmul.mubr.f32.vlgmr.msra.gmra.mxu1 %v30910_v52  ;;  %v8179_v60 = vand.u32 4294901760, %v8178_v14 }
 0x3e6   :  { %28038 = vmatmul.mubr.f32.vlgmr.msra.gmra.mxu0 %v30935_v61  ;;  %28031 = vmatpush3.msra.mxu1 %v31335_v8  ;;  %v31615_v8 = vand.u32 4294901760, %v8967_v1 }
 0x3e7   :  { %28046 = vmatpush3.msra.mxu0 %v7729_v22  ;;  %28032 = vmatprep.mubr.msk.f32.mxu1 %vm30485_vm2, %v34118_v63 }
 0x3e8   :  { %28040 = vmatprep.subr.mxu1 %v34118_v63  ;;  %28047 = vmatprep.mubr.msk.f32.mxu0 %vm30485_vm2, %v34118_v63  ;;  %34342 = vst [vmem:[#allocation43_spill] sm:$0xff] %v31615_v8  ;;  %v31623_v46 = vsub.f32 %v8967_v1, %v31615_v8 }
 0x3e9   :  { %28055 = vmatprep.subr.mxu0 %v34118_v63  ;;  %28033 = vmatmul.mubr.f32.vlgmr.msra.gmra.mxu1 %v30884_v42 }
 0x3ea   :  { %28048 = vmatmul.mubr.f32.vlgmr.msra.gmra.mxu0 %v30895_v49  ;;  %28041 = vmatpush3.msra.mxu1 %v7732_v57  ;;  %34344 = vst [vmem:[#allocation45_spill] sm:$0xff] %v31623_v46  ;;  %v31630_v13 = vand.u32 4294901760, %v31623_v46 }
 0x3eb   :  { %28056 = vmatpush3.msra.mxu0 %v7730_v25  ;;  %28042 = vmatprep.mubr.msk.f32.mxu1 %vm30485_vm2, %v34118_v63 }
 0x3ec   :  { %28050 = vmatprep.subr.mxu1 %v34118_v63  ;;  %28057 = vmatprep.mubr.msk.f32.mxu0 %vm30485_vm2, %v34118_v63  ;;  %34345 = vst [vmem:[#allocation46_spill] sm:$0xff] %v31630_v13  ;;  %v9647_v56 = vsub.f32 %v31623_v46, %v31630_v13 }
 0x3ed   :  { %28065 = vmatprep.subr.mxu0 %v34118_v63  ;;  %28043 = vmatmul.mubr.f32.vlgmr.msra.gmra.mxu1 %v30884_v42 }
 0x3ee   :  { %28058 = vmatmul.mubr.f32.vlgmr.msra.gmra.mxu0 %v30884_v42  ;;  %28051 = vmatpush3.msra.mxu1 %v31369_v55  ;;  %v31639_v45 = vand.u32 4294901760, %v9647_v56 }
 0x3ef   :  { %28066 = vmatpush3.msra.mxu0 %v31400_v27  ;;  %28052 = vmatprep.mubr.msk.f32.mxu1 %vm30485_vm2, %v34118_v63 }
 0x3f0   :  { %28060 = vmatprep.subr.mxu1 %v34118_v63  ;;  %28067 = vmatprep.mubr.msk.f32.mxu0 %vm30485_vm2, %v34118_v63  ;;  %34347 = vst [vmem:[#allocation48_spill] sm:$0xff] %v31639_v45 }
 0x3f1   :  { %28075 = vmatprep.subr.mxu0 %v34118_v63  ;;  %28053 = vmatmul.mubr.f32.vlgmr.msra.gmra.mxu1 %v30910_v52 }
 0x3f2   :  { %28068 = vmatmul.mubr.f32.vlgmr.msra.gmra.mxu0 %v30935_v61  ;;  %28061 = vmatpush3.msra.mxu1 %v31369_v55  ;;  %v31645_v55 = vld [vmem:[#allocation7] ss:$0 sm:$0xff] }
 0x3f3   :  { %28076 = vmatpush3.msra.mxu0 %v8176_v54  ;;  %28062 = vmatprep.mubr.msk.f32.mxu1 %vm30485_vm2, %v34118_v63 }
 0x3f4   :  { %28070 = vmatprep.subr.mxu1 %v34118_v63  ;;  %28077 = vmatprep.mubr.msk.f32.mxu0 %vm30485_vm2, %v34118_v63 }
 0x3f5   :  { %28085 = vmatprep.subr.mxu0 %v34118_v63  ;;  %28063 = vmatmul.mubr.f32.vlgmr.msra.gmra.mxu1 %v30884_v42 }
 0x3f6   :  { %28078 = vmatmul.mubr.f32.vlgmr.msra.gmra.mxu0 %v30895_v49  ;;  %28071 = vmatpush3.msra.mxu1 %v8179_v60 }
 0x3f7   :  { %28086 = vmatpush3.msra.mxu0 %v8177_v5  ;;  %28072 = vmatprep.mubr.msk.f32.mxu1 %vm30485_vm2, %v34118_v63 }
 0x3f8   :  { %28080 = vmatprep.subr.mxu1 %v34118_v63  ;;  %28087 = vmatprep.mubr.msk.f32.mxu0 %vm30485_vm2, %v34118_v63 }
 0x3f9   :  { %28095 = vmatprep.subr.mxu0 %v34118_v63  ;;  %28073 = vmatmul.mubr.f32.vlgmr.msra.gmra.mxu1 %v30884_v42 }
 0x3fa   :  { %28088 = vmatmul.mubr.f32.vlgmr.msra.gmra.mxu0 %v30884_v42  ;;  %28081 = vmatpush3.msra.mxu1 %v31400_v27 }
 0x3fb   :  { %28096 = vmatpush3.msra.mxu0 %v31431_v48  ;;  %28082 = vmatprep.mubr.msk.f32.mxu1 %vm30485_vm2, %v34118_v63 }
 0x3fc   :  { %28090 = vmatprep.subr.mxu1 %v34118_v63  ;;  %28097 = vmatprep.mubr.msk.f32.mxu0 %vm30485_vm2, %v34118_v63 }
 0x3fd   :  { %28105 = vmatprep.subr.mxu0 %v34118_v63  ;;  %28083 = vmatmul.mubr.f32.vlgmr.msra.gmra.mxu1 %v30910_v52 }
 0x3fe   :  { %28098 = vmatmul.mubr.f32.vlgmr.msra.gmra.mxu0 %v30935_v61  ;;  %28091 = vmatpush3.msra.mxu1 %v31400_v27  ;;  %v8626_v61 = vand.u32 4294901760, %v8625_v15 }
 0x3ff   :  { %28106 = vmatpush3.msra.mxu0 %v8623_v24  ;;  %28092 = vmatprep.mubr.msk.f32.mxu1 %vm30485_vm2, %v34118_v63 }
 0x400   :  { %28100 = vmatprep.subr.mxu1 %v34118_v63  ;;  %28107 = vmatprep.mubr.msk.f32.mxu0 %vm30485_vm2, %v34118_v63 }
 0x401   :  { %28115 = vmatprep.subr.mxu0 %v34118_v63  ;;  %28093 = vmatmul.mubr.f32.vlgmr.msra.gmra.mxu1 %v30884_v42 }
 0x402   :  { %28108 = vmatmul.mubr.f32.vlgmr.msra.gmra.mxu0 %v30895_v49  ;;  %28101 = vmatpush3.msra.mxu1 %v8626_v61  ;;  %v31523_v49 = vand.u32 4294901760, %v31505_v37 }
 0x403   :  { %28116 = vmatpush3.msra.mxu0 %v8624_v3  ;;  %28102 = vmatprep.mubr.msk.f32.mxu1 %vm30485_vm2, %v34118_v63 }
 0x404   :  { %28110 = vmatprep.subr.mxu1 %v34118_v63  ;;  %28117 = vmatprep.mubr.msk.f32.mxu0 %vm30485_vm2, %v34118_v63  ;;  %34337 = vst [vmem:[#allocation38_spill] sm:$0xff] %v31523_v49  ;;  %v9118_v36 = vsub.f32 %v31505_v37, %v31523_v49 }
 0x405   :  { %28125 = vmatprep.subr.mxu0 %v31454_v32  ;;  %28103 = vmatmul.mubr.f32.vlgmr.msra.gmra.mxu1 %v30884_v42 }
 0x406   :  { %28118 = vmatmul.mubr.f32.vlgmr.msra.gmra.mxu0 %v30884_v42  ;;  %28111 = vmatpush3.msra.mxu1 %v31431_v48 }
 0x407   :  { %28112 = vmatprep.mubr.msk.f32.mxu1 %vm30485_vm2, %v34118_v63  ;;  %28120 = vmatprep.subr.mxu1 %v34118_v63 }
 0x408   :  { %28126 = vmatpush3.msra.mxu0 %v31454_v32  ;;  %28133 = vmatprep.mubr.f32.mxu0 %v34118_v63 }
 0x409   :  { %28127 = vmatprep.subr.mxu0 %v31475_v9  ;;  %28113 = vmatmul.mubr.f32.vlgmr.msra.gmra.mxu1 %v30910_v52  ;;  %v31555_v52 = vand.u32 4294901760, %v9118_v36 }
 0x40a   :  { %28128 = vmatpush3.msra.mxu0 %v31475_v9  ;;  %28121 = vmatpush3.msra.mxu1 %v31431_v48 }
 0x40b   :  { %28122 = vmatprep.mubr.msk.f32.mxu1 %vm30485_vm2, %v34118_v63  ;;  %28136 = vmatprep.subr.mxu1 %v31530_v43 }
 0x40c   :  { %28129 = vmatprep.subr.mxu0 %v31485_v35 }
 0x40d   :  { %28130 = vmatpush3.msra.mxu0 %v31485_v35  ;;  %28123 = vmatmul.mubr.f32.vlgmr.msra.gmra.mxu1 %v30884_v42  ;;  %v8968_v42 = vld [vmem:[#allocation9 + $0x8] sm:$0xff] }
 0x40e   :  { %28131 = vmatprep.subr.mxu0 %v31497_v39  ;;  %28137 = vmatpush3.msra.mxu1 %v31530_v43  ;;  %v31606_v33 = vand.u32 4294901760, %v8968_v42 }
 0x40f   :  { %28144 = vmatprep.mubr.f32.mxu1 %v34118_v63  ;;  %28138 = vmatprep.subr.mxu1 %v31548_v62 }
 0x410   :  { %28132 = vmatpush3.msra.mxu0 %v31497_v39  ;;  %28139 = vmatpush3.msra.mxu1 %v31548_v62  ;;  %34340 = vst [vmem:[#allocation41_spill] sm:$0xff] %v31606_v33  ;;  %v31613_v2 = vsub.f32 %v8968_v42, %v31606_v33 }
 0x411   :  { %28147 = vmatprep.subr.mxu0 %v31473_v12  ;;  %28140 = vmatprep.subr.mxu1 %v31555_v52 }
 0x412   :  { %28134 = vmatmul.mubr.f32.vlgmr.msra.gmra.mxu0 %v34118_v63  ;;  %28141 = vmatpush3.msra.mxu1 %v31555_v52  ;;  %34341 = vst [vmem:[#allocation42_spill] sm:$0xff] %v31613_v2  ;;  %v31620_v6 = vand.u32 4294901760, %v31613_v2 }
 0x413   :  { %28148 = vmatpush3.msra.mxu0 %v31473_v12  ;;  %28142 = vmatprep.subr.mxu1 %v31561_v40 }
 0x414   :  { %28149 = vmatprep.subr.mxu0 %v31495_v41  ;;  %28143 = vmatpush3.msra.mxu1 %v31561_v40  ;;  %34343 = vst [vmem:[#allocation44_spill] sm:$0xff] %v31620_v6  ;;  %v9640_v10 = vsub.f32 %v31613_v2, %v31620_v6 }
 0x415   :  { %28150 = vmatpush3.msra.mxu0 %v31495_v41  ;;  %28158 = vmatprep.subr.mxu1 %v31454_v32 }
 0x416   :  { %28145 = vmatmul.mubr.f32.vlgmr.msra.gmra.mxu1 %v34118_v63  ;;  %28151 = vmatprep.subr.mxu0 %v31505_v37  ;;  %v31634_v59 = vand.u32 4294901760, %v9640_v10 }
 0x417   :  { %28159 = vmatpush3.msra.mxu1 %v31454_v32  ;;  %28166 = vmatprep.mubr.f32.mxu1 %v34118_v63 }
 0x418   :  { %28160 = vmatprep.subr.mxu1 %v31475_v9  ;;  %28152 = vmatpush3.msra.mxu0 %v31505_v37  ;;  %34346 = vst [vmem:[#allocation47_spill] sm:$0xff] %v31634_v59 }
 0x419   :  { %28161 = vmatpush3.msra.mxu1 %v31475_v9  ;;  %28153 = vmatprep.subr.mxu0 %v31516_v20 }
 0x41a   :  { %28162 = vmatprep.subr.mxu1 %v31485_v35  ;;  %28154 = vmatpush3.msra.mxu0 %v31516_v20 }
 0x41b   :  { %28163 = vmatpush3.msra.mxu1 %v31485_v35  ;;  %28155 = vmatprep.mubr.f32.mxu0 %v34118_v63 }
 0x41c   :  { %28164 = vmatprep.subr.mxu1 %v31497_v39  ;;  %28169 = vmatprep.subr.mxu0 %v31492_v38 }
 0x41d   :  { %28165 = vmatpush3.msra.mxu1 %v31497_v39  ;;  %28156 = vmatmul.mubr.f32.vlgmr.msra.gmra.mxu0 %v34118_v63 }
 0x41e   :  { %28180 = vmatprep.subr.mxu1 %v31454_v32  ;;  %28167 = vmatmul.mubr.f32.vlgmr.msra.gmra.mxu1 %v34118_v63 }
 0x41f   :  { %28181 = vmatpush3.msra.mxu1 %v31454_v32  ;;  %28170 = vmatpush3.msra.mxu0 %v31492_v38 }
 0x420   :  { %28182 = vmatprep.subr.mxu1 %v31475_v9  ;;  %28171 = vmatprep.subr.mxu0 %v31513_v50 }
 0x421   :  { %28183 = vmatpush3.msra.mxu1 %v31475_v9  ;;  %28172 = vmatpush3.msra.mxu0 %v31513_v50 }
 0x422   :  { %28184 = vmatprep.subr.mxu1 %v31485_v35  ;;  %28188 = vmatprep.mubr.f32.mxu1 %v34118_v63 }
 0x423   :  { %28185 = vmatpush3.msra.mxu1 %v31485_v35  ;;  %28173 = vmatprep.subr.mxu0 %v31523_v49 }
 0x424   :  { %28186 = vmatprep.subr.mxu1 %v31497_v39  ;;  %28174 = vmatpush3.msra.mxu0 %v31523_v49 }
 0x425   :  { %28187 = vmatpush3.msra.mxu1 %v31497_v39  ;;  %28175 = vmatprep.subr.mxu0 %v31536_v51 }
 0x426   :  { %28189 = vmatmul.mubr.f32.vlgmr.msra.gmra.mxu1 %v34118_v63  ;;  %28176 = vmatpush3.msra.mxu0 %v31536_v51 }
 0x427   :  { %28177 = vmatprep.mubr.f32.mxu0 %v34118_v63  ;;  %28191 = vmatprep.subr.mxu0 %v31606_v33 }
 0x428   :  { %28178 = vmatmul.mubr.f32.vlgmr.msra.gmra.mxu0 %v34118_v63  ;;  %28198 = vmatprep.subr.mxu1 %v31634_v59 }
 0x429   :  { %28192 = vmatpush3.msra.mxu0 %v31606_v33  ;;  %28199 = vmatpush3.msra.mxu1 %v31634_v59 }
 0x42a   :  { %28193 = vmatprep.subr.mxu0 %v31615_v8  ;;  %28200 = vmatprep.subr.mxu1 %v31639_v45 }
 0x42b   :  { %28194 = vmatpush3.msra.mxu0 %v31615_v8  ;;  %28201 = vmatpush3.msra.mxu1 %v31639_v45 }
 0x42c   :  { %28205 = vmatprep.subr.mxu0 %v31613_v2  ;;  %28212 = vmatprep.subr.mxu1 %v31606_v33 }
 0x469   :  { %v5458_v18 = vpop.f32.mrf.mxu0 }
 0x46a   :  { %v5459_v19 = vadd.f32 %v31645_v55, %v5458_v18 }
 0x46b   :  { %v27889_v34 = vpop.f32.mrf.mxu0 }
 0x46d   :  { %v5608_v7 = vpop.f32.mrf.mxu0 }
 0x46f   :  { %v27899_v17 = vpop.f32.mrf.mxu0 }
 0x471   :  { %v5756_v21 = vpop.f32.mrf.mxu0  ;;  %v5534_v22 = vpop.f32.mrf.mxu1 }
 0x472   :  { %v5535_v23 = vadd.f32 %v5534_v22, %v5459_v19 }
 0x473   :  { %v27909_v44 = vpop.f32.mrf.mxu0  ;;  %v27894_v58 = vpop.f32.mrf.mxu1 }
 0x474   :  { %v5609_v25 = vadd.f32 %v5608_v7, %v5535_v23 }
 0x475   :  { %v5682_v29 = vpop.f32.mrf.mxu1 }
 0x476   :  { %v5905_v27 = vpop.f32.mrf.mxu0  ;;  %v5683_v30 = vadd.f32 %v5682_v29, %v5609_v25 }
 0x477   :  { %v27904_v31 = vpop.f32.mrf.mxu1  ;;  %v5906_v14 = vadd.f32 %v31645_v55, %v5905_v27 }
 0x478   :  { %v27919_v54 = vpop.f32.mrf.mxu0  ;;  %v5757_v57 = vadd.f32 %v5756_v21, %v5683_v30 }
 0x479   :  { %v5828_v0 = vpop.f32.mrf.mxu1 }
 0x47a   :  { %v6055_v5 = vpop.f32.mrf.mxu0  ;;  %v5829_v48 = vadd.f32 %v5828_v0, %v5757_v57 }
 0x47b   :  { %v27914_v24 = vpop.f32.mrf.mxu1 }
 0x47c   :  { %v27929_v60 = vpop.f32.mrf.mxu0  ;;  %v5832_v28 = vmax.f32 %v5829_v48, 0.0 }
 0x47d   :  { %v5981_v3 = vpop.f32.mrf.mxu1 }
 0x47e   :  { %v6203_v4 = vpop.f32.mrf.mxu0  ;;  %v9516_v26 = vsel %vm4595_vm4, %v5832_v28, 0  ;;  %v5982_v15 = vadd.f32 %v5981_v3, %v5906_v14 }
 0x47f   :  { %v31650_v11 = vand.u32 4294901760, %v9516_v26  ;;  %v27924_v61 = vpop.f32.mrf.mxu1 }
 0x480   :  { %v27939_v47 = vpop.f32.mrf.mxu0  ;;  %v6056_v53 = vadd.f32 %v6055_v5, %v5982_v15 }
 0x481   :  { %v31653_v36 = vsub.f32 %v9516_v26, %v31650_v11  ;;  %v6129_v16 = vpop.f32.mrf.mxu1  ;;  %28202 = vmatprep.mubr.f32.mxu1 %v31650_v11 }
 0x482   :  { %v6352_v42 = vpop.f32.mrf.mxu0  ;;  %v6130_v1 = vadd.f32 %v6129_v16, %v6056_v53 }
 0x483   :  { %v27934_v10 = vpop.f32.mrf.mxu1  ;;  %v9590_v18 = vand.u32 4294901760, %v31653_v36  ;;  %v6353_v22 = vadd.f32 %v31645_v55, %v6352_v42 }
 0x484   :  { %v27949_v56 = vpop.f32.mrf.mxu0  ;;  %v6204_v34 = vadd.f32 %v6203_v4, %v6130_v1 }
 0x485   :  { %v6275_v7 = vpop.f32.mrf.mxu1  ;;  %v9591_v17 = vsub.f32 %v31653_v36, %v9590_v18 }
 0x486   :  { %v6502_v19 = vpop.f32.mrf.mxu0  ;;  %v31660_v21 = vadd.f32 %v6275_v7, %v6204_v34 }
 0x487   :  { %v27944_v23 = vpop.f32.mrf.mxu1  ;;  %v9592_v58 = vand.u32 4294901760, %v9591_v17 }
 0x488   :  { %v27959_v44 = vpop.f32.mrf.mxu0 }
 0x489   :  { %v6428_v25 = vpop.f32.mrf.mxu1  ;;  %28195 = vmatprep.mubr.f32.mxu0 %v9592_v58 }
 0x48a   :  { %v6650_v29 = vpop.f32.mrf.mxu0  ;;  %v6429_v27 = vadd.f32 %v6428_v25, %v6353_v22 }
 0x48b   :  { %v27954_v30 = vpop.f32.mrf.mxu1 }
 0x48c   :  { %v27969_v31 = vpop.f32.mrf.mxu0  ;;  %v6503_v54 = vadd.f32 %v6502_v19, %v6429_v27 }
 0x48d   :  { %v6576_v57 = vpop.f32.mrf.mxu1 }
 0x48e   :  { %v6799_v0 = vpop.f32.mrf.mxu0  ;;  %v6577_v5 = vadd.f32 %v6576_v57, %v6503_v54 }
 0x48f   :  { %v27964_v48 = vpop.f32.mrf.mxu1  ;;  %v6800_v4 = vadd.f32 %v31645_v55, %v6799_v0 }
 0x490   :  { %v27979_v14 = vpop.f32.mrf.mxu0  ;;  %v6651_v24 = vadd.f32 %v6650_v29, %v6577_v5 }
 0x491   :  { %v6722_v60 = vpop.f32.mrf.mxu1 }
 0x492   :  { %v6949_v28 = vpop.f32.mrf.mxu0  ;;  %v31663_v3 = vadd.f32 %v6722_v60, %v6651_v24 }
 0x493   :  { %v27974_v26 = vpop.f32.mrf.mxu1 }
 0x494   :  { %34348 = vst [vmem:[#allocation49_spill] sm:$0xff] %v31663_v3  ;;  %v27989_v15 = vpop.f32.mrf.mxu0 }
 0x495   :  { %v6875_v61 = vpop.f32.mrf.mxu1 }
 0x496   :  { %v7097_v47 = vpop.f32.mrf.mxu0  ;;  %v6876_v53 = vadd.f32 %v6875_v61, %v6800_v4 }
 0x497   :  { %v27984_v16 = vpop.f32.mrf.mxu1 }
 0x498   :  { %v27999_v42 = vpop.f32.mrf.mxu0  ;;  %v6950_v1 = vadd.f32 %v6949_v28, %v6876_v53 }
 0x499   :  { %v7023_v10 = vpop.f32.mrf.mxu1 }
 0x49a   :  { %v7246_v56 = vpop.f32.mrf.mxu0  ;;  %v7024_v34 = vadd.f32 %v7023_v10, %v6950_v1 }
 0x49b   :  { %v27994_v7 = vpop.f32.mrf.mxu1  ;;  %v7247_v58 = vadd.f32 %v31645_v55, %v7246_v56 }
 0x49c   :  { %v28009_v19 = vpop.f32.mrf.mxu0  ;;  %v7098_v17 = vadd.f32 %v7097_v47, %v7024_v34 }
 0x49d   :  { %v7169_v22 = vpop.f32.mrf.mxu1 }
 0x49e   :  { %v7396_v23 = vpop.f32.mrf.mxu0  ;;  %v31666_v44 = vadd.f32 %v7169_v22, %v7098_v17 }
 0x49f   :  { %v28004_v25 = vpop.f32.mrf.mxu1 }
 0x4a0   :  { %34349 = vst [vmem:[#allocation50_spill] sm:$0xff] %v31666_v44  ;;  %v28019_v29 = vpop.f32.mrf.mxu0 }
 0x4a1   :  { %v7322_v27 = vpop.f32.mrf.mxu1 }
 0x4a2   :  { %v7544_v30 = vpop.f32.mrf.mxu0  ;;  %v7323_v31 = vadd.f32 %v7322_v27, %v7247_v58 }
 0x4a3   :  { %v28014_v54 = vpop.f32.mrf.mxu1 }
 0x4a4   :  { %v28029_v57 = vpop.f32.mrf.mxu0  ;;  %v7397_v0 = vadd.f32 %v7396_v23, %v7323_v31 }
 0x4a5   :  { %v7470_v5 = vpop.f32.mrf.mxu1 }
 0x4a6   :  { %v7693_v48 = vpop.f32.mrf.mxu0  ;;  %v7471_v14 = vadd.f32 %v7470_v5, %v7397_v0 }
 0x4a7   :  { %v28024_v24 = vpop.f32.mrf.mxu1  ;;  %v7694_v61 = vadd.f32 %v31645_v55, %v7693_v48 }
 0x4a8   :  { %v28039_v60 = vpop.f32.mrf.mxu0  ;;  %v7545_v28 = vadd.f32 %v7544_v30, %v7471_v14 }
 0x4a9   :  { %v7616_v4 = vpop.f32.mrf.mxu1 }
 0x4aa   :  { %v7843_v26 = vpop.f32.mrf.mxu0  ;;  %v7617_v15 = vadd.f32 %v7616_v4, %v7545_v28 }
 0x4ab   :  { %v28034_v47 = vpop.f32.mrf.mxu1 }
 0x4ac   :  { %v28049_v53 = vpop.f32.mrf.mxu0  ;;  %v7620_v16 = vmax.f32 %v7617_v15, 0.0 }
 0x4ad   :  { %v7769_v42 = vpop.f32.mrf.mxu1 }
 0x4ae   :  { %v7991_v1 = vpop.f32.mrf.mxu0  ;;  %v9519_v10 = vsel %vm4595_vm4, %v7620_v16, 0  ;;  %v7770_v56 = vadd.f32 %v7769_v42, %v7694_v61 }
 0x4af   :  { %v9598_v34 = vand.u32 4294901760, %v9519_v10  ;;  %v28044_v7 = vpop.f32.mrf.mxu1 }
 0x4b0   :  { %v28059_v19 = vpop.f32.mrf.mxu0  ;;  %v7844_v17 = vadd.f32 %v7843_v26, %v7770_v56 }
 0x4b1   :  { %v9599_v22 = vsub.f32 %v9519_v10, %v9598_v34  ;;  %28203 = vmatmul.mubr.f32.vlgmr.msra.gmra.mxu1 %v9598_v34  ;;  %v7917_v23 = vpop.f32.mrf.mxu1 }
 0x4b2   :  { %v8140_v58 = vpop.f32.mrf.mxu0  ;;  %28213 = vmatpush3.msra.mxu1 %v31606_v33  ;;  %28216 = vmatprep.mubr.f32.mxu1 %v9590_v18  ;;  %v7918_v25 = vadd.f32 %v7917_v23, %v7844_v17 }
 0x4b3   :  { %v9600_v29 = vand.u32 4294901760, %v9599_v22  ;;  %28214 = vmatprep.subr.mxu1 %v31615_v8  ;;  %v28054_v27 = vpop.f32.mrf.mxu1  ;;  %v8141_v5 = vadd.f32 %v31645_v55, %v8140_v58 }
 0x4b4   :  { %v28069_v30 = vpop.f32.mrf.mxu0  ;;  %28215 = vmatpush3.msra.mxu1 %v31615_v8  ;;  %v7992_v31 = vadd.f32 %v7991_v1, %v7918_v25 }
 0x4b5   :  { %v9601_v54 = vsub.f32 %v9599_v22, %v9600_v29  ;;  %28217 = vmatmul.mubr.f32.vlgmr.msra.gmra.mxu1 %v9600_v29  ;;  %28226 = vmatprep.subr.mxu1 %v31606_v33  ;;  %v8063_v57 = vpop.f32.mrf.mxu1 }
 0x4b6   :  { %v8290_v0 = vpop.f32.mrf.mxu0  ;;  %28230 = vmatprep.mubr.f32.mxu1 %v31650_v11  ;;  %28227 = vmatpush3.msra.mxu1 %v31606_v33  ;;  %v31679_v18 = vadd.f32 %v8063_v57, %v7992_v31 }
 0x4b7   :  { %v9602_v48 = vand.u32 4294901760, %v9601_v54  ;;  %28228 = vmatprep.subr.mxu1 %v31615_v8  ;;  %v28064_v14 = vpop.f32.mrf.mxu1 }
 0x4b8   :  { %v28079_v24 = vpop.f32.mrf.mxu0  ;;  %28229 = vmatpush3.msra.mxu1 %v31615_v8 }
 0x4b9   :  { %28196 = vmatmul.mubr.f32.vlgmr.msra.gmra.mxu0 %v9602_v48  ;;  %28231 = vmatmul.mubr.f32.vlgmr.msra.gmra.mxu1 %v9598_v34  ;;  %v8216_v60 = vpop.f32.mrf.mxu1 }
 0x4ba   :  { %v8438_v28 = vpop.f32.mrf.mxu0  ;;  %28206 = vmatpush3.msra.mxu0 %v31613_v2  ;;  %28209 = vmatprep.mubr.f32.mxu0 %v31653_v36  ;;  %v8217_v4 = vadd.f32 %v8216_v60, %v8141_v5 }
 0x4bb   :  { %28207 = vmatprep.subr.mxu0 %v31623_v46  ;;  %v28074_v26 = vpop.f32.mrf.mxu1  ;;  %28252 = vmatprep.mubr.f32.mxu1 %v34118_v63 }
 0x4bc   :  { %v28089_v15 = vpop.f32.mrf.mxu0  ;;  %28208 = vmatpush3.msra.mxu0 %v31623_v46  ;;  %v8291_v61 = vadd.f32 %v8290_v0, %v8217_v4 }
 0x4bd   :  { %28210 = vmatmul.mubr.f32.vlgmr.msra.gmra.mxu0 %v9599_v22  ;;  %28219 = vmatprep.subr.mxu0 %v31620_v6  ;;  %v8364_v47 = vpop.f32.mrf.mxu1 }
 0x4be   :  { %v8587_v53 = vpop.f32.mrf.mxu0  ;;  %28220 = vmatpush3.msra.mxu0 %v31620_v6  ;;  %28223 = vmatprep.mubr.f32.mxu0 %v31650_v11  ;;  %v8365_v36 = vadd.f32 %v8364_v47, %v8291_v61 }
 0x4bf   :  { %28221 = vmatprep.subr.mxu0 %v31630_v13  ;;  %v28084_v16 = vpop.f32.mrf.mxu1  ;;  %v8588_v19 = vadd.f32 %v31645_v55, %v8587_v53 }
 0x4c0   :  { %v28099_v42 = vpop.f32.mrf.mxu0  ;;  %28222 = vmatpush3.msra.mxu0 %v31630_v13  ;;  %v8439_v1 = vadd.f32 %v8438_v28, %v8365_v36 }
 0x4c1   :  { %28224 = vmatmul.mubr.f32.vlgmr.msra.gmra.mxu0 %v9598_v34  ;;  %v8510_v10 = vpop.f32.mrf.mxu1 }
 0x4c2   :  { %v8737_v56 = vpop.f32.mrf.mxu0  ;;  %v31694_v7 = vadd.f32 %v8510_v10, %v8439_v1  ;;  %28241 = vmatprep.mubr.f32.mxu0 %v34118_v63 }
 0x4c3   :  { %v28094_v17 = vpop.f32.mrf.mxu1 }
 0x4c4   :  { %34350 = vst [vmem:[#allocation51_spill] sm:$0xff] %v31694_v7  ;;  %v28109_v22 = vpop.f32.mrf.mxu0 }
 0x4c5   :  { %v8663_v11 = vpop.f32.mrf.mxu1 }
 0x4c6   :  { %v8885_v23 = vpop.f32.mrf.mxu0  ;;  %v8664_v58 = vadd.f32 %v8663_v11, %v8588_v19 }
 0x4c7   :  { %v28104_v25 = vpop.f32.mrf.mxu1 }
 0x4c8   :  { %v28119_v29 = vpop.f32.mrf.mxu0  ;;  %v8738_v27 = vadd.f32 %v8737_v56, %v8664_v58 }
 0x4c9   :  { %v8811_v30 = vpop.f32.mrf.mxu1 }
 0x4ca   :  { %v8812_v31 = vadd.f32 %v8811_v30, %v8738_v27 }
 0x4cb   :  { %v28114_v54 = vpop.f32.mrf.mxu1 }
 0x4cc   :  { %v8886_v34 = vadd.f32 %v8885_v23, %v8812_v31 }
 0x4cd   :  { %v8957_v57 = vpop.f32.mrf.mxu1 }
 0x4ce   :  { %v31698_v0 = vadd.f32 %v8957_v57, %v8886_v34 }
 0x4cf   :  { %v28124_v5 = vpop.f32.mrf.mxu1 }
 0x4d0   :  { %34351 = vst [vmem:[#allocation52_spill] sm:$0xff] %v31698_v0 }
 0x4d2   :  { %v28135_v14 = vpop.f32.mrf.mxu0 }
 0x4d4   :  { %v9062_v60 = vpop.f32.mrf.mxu0 }
 0x4d6   :  { %v28146_v48 = vpop.f32.mrf.mxu1 }
 0x4d7   :  { %v9170_v26 = vadd.f32 %v28146_v48, %v28135_v14 }
 0x4d8   :  { %v9163_v55 = vpop.f32.mrf.mxu1 }
 0x4d9   :  { %v9164_v61 = vadd.f32 %v9163_v55, %v9062_v60 }
 0x4dd   :  { %v28157_v4 = vpop.f32.mrf.mxu0 }
 0x4de   :  { %v28168_v24 = vpop.f32.mrf.mxu1  ;;  %v9257_v53 = vadd.f32 %v28157_v4, %v9170_v26 }
 0x4df   :  { %v9249_v47 = vpop.f32.mrf.mxu0 }
 0x4e0   :  { %v9333_v28 = vpop.f32.mrf.mxu1  ;;  %v9250_v16 = vadd.f32 %v9249_v47, %v9164_v61  ;;  %v9342_v1 = vadd.f32 %v28168_v24, %v9257_v53  ;;  %v31700_v61 = vld [vmem:[#allocation10] ss:$0 sm:$0xff] }
 0x4e2   :  { %v9334_v56 = vadd.f32 %v9333_v28, %v9250_v16 }
 0x4e6   :  { %v28190_v15 = vpop.f32.mrf.mxu1 }
 0x4e8   :  { %v9505_v36 = vpop.f32.mrf.mxu1  ;;  %v28179_v42 = vpop.f32.mrf.mxu0 }
 0x4e9   :  { %v9431_v17 = vadd.f32 %v28179_v42, %v9342_v1 }
 0x4ea   :  { %v9424_v19 = vpop.f32.mrf.mxu0 }
 0x4eb   :  { %v9425_v11 = vadd.f32 %v9424_v19, %v9334_v56  ;;  %v9512_v23 = vadd.f32 %v28190_v15, %v9431_v17 }
 0x4ed   :  { %v9506_v27 = vadd.f32 %v9505_v36, %v9425_v11 }
 0x571   :  { %v28204_v10 = vpop.f32.mrf.mxu1 }
 0x573   :  { %v9685_v22 = vpop.f32.mrf.mxu1 }
 0x575   :  { %v28218_v25 = vpop.f32.mrf.mxu1 }
 0x577   :  { %v9849_v34 = vpop.f32.mrf.mxu1 }
 0x579   :  { %v28197_v58 = vpop.f32.mrf.mxu0  ;;  %v28232_v60 = vpop.f32.mrf.mxu1 }
 0x57a   :  { %v9605_v29 = vadd.f32 %v28197_v58, %v9512_v23  ;;  %v8962_v23 = vlaneseq }
 0x57b   :  { %v9594_v30 = vpop.f32.mrf.mxu0  ;;  %v10013_v36 = vpop.f32.mrf.mxu1 }
 0x57c   :  { %v9595_v31 = vadd.f32 %v9594_v30, %v9506_v27  ;;  %v9692_v54 = vadd.f32 %v28204_v10, %v9605_v29  ;;  %v8963_v58 = vand.u32 127, %v8962_v23 }
 0x57d   :  { %v28211_v57 = vpop.f32.mrf.mxu0 }
 0x57e   :  { %v9775_v5 = vadd.f32 %v28211_v57, %v9692_v54  ;;  %v9686_v48 = vadd.f32 %v9685_v22, %v9595_v31  ;;  %vm8964_vm5 = vcmp.ge.s32.totalorder %v8963_v58, 64  ;;  %vm8965_vm6 = vcmp.lt.s32.totalorder %v8963_v58, 96 }
 0x57f   :  { %v9767_v55 = vpop.f32.mrf.mxu0  ;;  %vm31704_vm7 = vmand %vm8964_vm5, %vm8965_vm6 }
 0x580   :  { %v9768_v14 = vadd.f32 %v9767_v55, %v9686_v48  ;;  %v9858_v24 = vadd.f32 %v28218_v25, %v9775_v5 }
 0x581   :  { %v28225_v28 = vpop.f32.mrf.mxu0 }
 0x582   :  { %v9941_v4 = vadd.f32 %v28225_v28, %v9858_v24  ;;  %v9850_v26 = vadd.f32 %v9849_v34, %v9768_v14 }
 0x583   :  { %v9934_v15 = vpop.f32.mrf.mxu0 }
 0x584   :  { %v10020_v47 = vadd.f32 %v28232_v60, %v9941_v4  ;;  %v9935_v53 = vadd.f32 %v9934_v15, %v9850_v26  ;;  %v8981_v15 = vld [vmem:[%s34106_s10 + $0x18] sm:$0xff] }
 0x586   :  { %v10030_v16 = vadd.f32 %v31700_v61, %v10020_v47  ;;  %v10014_v42 = vadd.f32 %v10013_v36, %v9935_v53  ;;  %v8980_v47 = vld [vmem:[%s34106_s10 + $0x10] sm:$0xff]  ;;  %v8979_v53 = vld [vmem:[%s34106_s10 + $0x8] sm:$0xff]  ;;  %v31741_v36 = vand.u32 4294901760, %v8981_v15 }
 0x588   :  { %v26114_v1 = vmul.f32 -1.442695, %v10030_v16  ;;  %v10029_v10 = vadd.f32 %v31700_v61, %v10014_v42  ;;  %v31745_v42 = vand.u32 4294901760, %v8979_v53  ;;  %28233 = vmatprep.subr.mxu0 %v31741_v36 }
 0x589   :  { %28234 = vmatpush3.msra.mxu0 %v31741_v36 }
 0x58a   :  { %29985 = vpow2.f32 %v26114_v1  ;;  %v26113_v56 = vmul.f32 -1.442695, %v10029_v10  ;;  %v8978_v1 = vld [vmem:[%s34106_s10] sm:$0xff] }
 0x58c   :  { %29987 = vpow2.f32 %v26113_v56  ;;  %v31753_v56 = vsub.f32 %v8981_v15, %v31741_v36 }
 0x58d   :  { %29989 = vtanh.f32 %v10029_v10  ;;  %v31750_v10 = vand.u32 4294901760, %v8978_v1 }
 0x597   :  { %v29986_v19 = vpop.eup %29985 }
 0x598   :  { %v10040_v22 = vadd.f32 1.0, %v29986_v19 }
 0x599   :  { %v29988_v17 = vpop.eup %29987 }
 0x59a   :  { %v10039_v11 = vadd.f32 1.0, %v29988_v17  ;;  %v29990_v25 = vpop.eup %29989  ;;  %v31759_v17 = vsub.f32 %v8979_v53, %v31745_v42 }
 0x59c   :  { %29991 = vrcp.f32 %v10039_v11  ;;  %v31767_v11 = vand.u32 4294901760, %v31753_v56  ;;  %v31773_v58 = vand.u32 4294901760, %v31759_v17 }
 0x59d   :  { %29993 = vrcp.f32 %v10040_v22  ;;  %v31763_v22 = vsub.f32 %v8978_v1, %v31750_v10 }
 0x59e   :  { %29995 = vtanh.f32 %v10030_v16  ;;  %v31743_v16 = vand.u32 4294901760, %v8980_v47  ;;  %34355 = vst [vmem:[#allocation54_spill] sm:$0xff] %v31767_v11  ;;  %34357 = vst [vmem:[#allocation56_spill] sm:$0xff] %v31773_v58 }
 0x59f   :  { %34354 = vst [vmem:[#allocation53_spill] sm:$0xff] %v31763_v22 }
 0x5a0   :  { %v31756_v19 = vsub.f32 %v8980_v47, %v31743_v16  ;;  %28235 = vmatprep.subr.mxu0 %v31743_v16 }
 0x5a1   :  { %28236 = vmatpush3.msra.mxu0 %v31743_v16 }
 0x5a2   :  { %v31770_v23 = vand.u32 4294901760, %v31756_v19  ;;  %28237 = vmatprep.subr.mxu0 %v31745_v42 }
 0x5a3   :  { %28238 = vmatpush3.msra.mxu0 %v31745_v42 }
 0x5a4   :  { %34356 = vst [vmem:[#allocation55_spill] sm:$0xff] %v31770_v23  ;;  %28239 = vmatprep.subr.mxu0 %v31750_v10 }
 0x5a5   :  { %28240 = vmatpush3.msra.mxu0 %v31750_v10 }
 0x5a6   :  { %28255 = vmatprep.subr.mxu0 %v31753_v56  ;;  %28242 = vmatmul.mubr.f32.vlgmr.msra.gmra.mxu0 %v34118_v63 }
 0x5a7   :  { %28256 = vmatpush3.msra.mxu0 %v31753_v56  ;;  %28263 = vmatprep.mubr.f32.mxu0 %v34118_v63 }
 0x5a8   :  { %28257 = vmatprep.subr.mxu0 %v31756_v19 }
 0x5a9   :  { %v29992_v29 = vpop.eup %29991  ;;  %28258 = vmatpush3.msra.mxu0 %v31756_v19 }
 0x5aa   :  { %v31710_v30 = vsel %vm31704_vm7, %v29990_v25, %v29992_v29  ;;  %v29994_v31 = vpop.eup %29993  ;;  %v31777_v29 = vand.u32 4294901760, %v31763_v22  ;;  %28259 = vmatprep.subr.mxu0 %v31759_v17 }
 0x5ab   :  { %10051 = vrot.lane.b32.xlu0 %v31710_v30, %s30486_s7  ;;  %v29996_v54 = vpop.eup %29995  ;;  %v10047_v14 = vmul.f32 0.0, %v31710_v30  ;;  %28260 = vmatpush3.msra.mxu0 %v31759_v17 }
 0x5ac   :  { %v31716_v34 = vsel %vm31704_vm7, %v29996_v54, %v29994_v31  ;;  %34358 = vst [vmem:[#allocation57_spill] sm:$0xff] %v31777_v29  ;;  %v10198_v31 = vsub.f32 %v31753_v56, %v31767_v11  ;;  %v10205_v54 = vsub.f32 %v31756_v19, %v31770_v23  ;;  %28261 = vmatprep.subr.mxu0 %v31763_v22 }
 0x5ad   :  { %v10048_v28 = vmul.f32 0.0, %v31716_v34  ;;  %28262 = vmatpush3.msra.mxu0 %v31763_v22 }
 0x5ae   :  { %28277 = vmatprep.subr.mxu0 %v31767_v11  ;;  %28264 = vmatmul.mubr.f32.vlgmr.msra.gmra.mxu0 %v34118_v63 }
 0x5af   :  { %10053 = vrot.lane.b32.xlu0 %v31716_v34, %s30486_s7  ;;  %28278 = vmatpush3.msra.mxu0 %v31767_v11 }
 0x5b0   :  { %28279 = vmatprep.subr.mxu0 %v31770_v23  ;;  %28285 = vmatprep.mubr.f32.mxu0 %v34118_v63 }
 0x5b1   :  { %28280 = vmatpush3.msra.mxu0 %v31770_v23 }
 0x5b2   :  { %28281 = vmatprep.subr.mxu0 %v31773_v58 }
 0x5b3   :  { %28282 = vmatpush3.msra.mxu0 %v31773_v58 }
 0x5b4   :  { %28283 = vmatprep.subr.mxu0 %v31777_v29 }
 0x5b5   :  { %28284 = vmatpush3.msra.mxu0 %v31777_v29 }
 0x5b6   :  { %28286 = vmatmul.mubr.f32.vlgmr.msra.gmra.mxu0 %v34118_v63 }
 0x61d   :  { %v10052_v57 = vpop.permute.xlu0 %10051 }
 0x61e   :  { %v10057_v5 = vmul.f32 %v10052_v57, %v31710_v30  ;;  %v10212_v57 = vsub.f32 %v31759_v17, %v31773_v58 }
 0x620   :  { %10061 = vrot.lane.b32.xlu1 %v10057_v5, %s30487_s21  ;;  %v31789_v5 = vand.u32 4294901760, %v10198_v31  ;;  %v8976_v31 = vld [vmem:[%s34105_s9 + $0x10] sm:$0xff] }
 0x621   :  { %v10054_v48 = vpop.permute.xlu0 %10053 }
 0x622   :  { %v10058_v55 = vmul.f32 %v10054_v48, %v31716_v34  ;;  %34359 = vst [vmem:[#allocation58_spill] sm:$0xff] %v31789_v5  ;;  %v31791_v48 = vand.u32 4294901760, %v10205_v54  ;;  %28244 = vmatprep.subr.mxu1 %v31789_v5  ;;  %v31874_v54 = vand.u32 4294901760, %v8976_v31 }
 0x623   :  { %28245 = vmatpush3.msra.mxu1 %v31789_v5 }
 0x624   :  { %10063 = vrot.lane.b32.xlu1 %v10058_v55, %s30487_s21  ;;  %34360 = vst [vmem:[#allocation59_spill] sm:$0xff] %v31791_v48  ;;  %v10219_v55 = vsub.f32 %v31763_v22, %v31777_v29  ;;  %28246 = vmatprep.subr.mxu1 %v31791_v48 }
 0x625   :  { %28247 = vmatpush3.msra.mxu1 %v31791_v48 }
 0x692   :  { %v10062_v24 = vpop.permute.xlu1 %10061 }
 0x693   :  { %v31725_v60 = vadd.f32 %v10062_v24, %v10047_v14  ;;  %v31799_v24 = vand.u32 4294901760, %v10212_v57  ;;  %v8975_v57 = vld [vmem:[%s34105_s9 + $0x8] sm:$0xff] }
 0x695   :  { %29997 = vtanh.f32 %v31725_v60  ;;  %34361 = vst [vmem:[#allocation60_spill] sm:$0xff] %v31799_v24  ;;  %28248 = vmatprep.subr.mxu1 %v31799_v24 }
 0x696   :  { %v10064_v4 = vpop.permute.xlu1 %10063  ;;  %28249 = vmatpush3.msra.mxu1 %v31799_v24 }
 0x697   :  { %v31729_v26 = vadd.f32 %v10064_v4, %v10048_v28  ;;  %v8977_v28 = vld [vmem:[%s34105_s9 + $0x18] sm:$0xff]  ;;  %v31807_v4 = vand.u32 4294901760, %v10219_v55  ;;  %v31880_v55 = vsub.f32 %v8976_v31, %v31874_v54 }
 0x698   :  { %v31814_v15 = vand.u32 4294901760, %v8977_v28 }
 0x699   :  { %29999 = vtanh.f32 %v31729_v26  ;;  %34362 = vst [vmem:[#allocation61_spill] sm:$0xff] %v31807_v4  ;;  %28250 = vmatprep.subr.mxu1 %v31807_v4 }
 0x69a   :  { %28251 = vmatpush3.msra.mxu1 %v31807_v4  ;;  %v31825_v47 = vsub.f32 %v8977_v28, %v31814_v15  ;;  %28299 = vmatprep.subr.mxu0 %v31814_v15  ;;  %v8974_v28 = vld [vmem:[%s34105_s9] sm:$0xff] }
 0x69b   :  { %28266 = vmatprep.subr.mxu1 %v31741_v36  ;;  %28253 = vmatmul.mubr.f32.vlgmr.msra.gmra.mxu1 %v34118_v63  ;;  %v31895_v0 = vand.u32 4294901760, %v8974_v28 }
 0x69c   :  { %28267 = vmatpush3.msra.mxu1 %v31741_v36  ;;  %28274 = vmatprep.mubr.f32.mxu1 %v34118_v63  ;;  %v31836_v53 = vand.u32 4294901760, %v31825_v47 }
 0x69d   :  { %28268 = vmatprep.subr.mxu1 %v31743_v16  ;;  %28300 = vmatpush3.msra.mxu0 %v31814_v15  ;;  %v31905_v7 = vsub.f32 %v8974_v28, %v31895_v0 }
 0x69e   :  { %28269 = vmatpush3.msra.mxu1 %v31743_v16  ;;  %v10736_v1 = vsub.f32 %v31825_v47, %v31836_v53  ;;  %28301 = vmatprep.subr.mxu0 %v31874_v54 }
 0x69f   :  { %28270 = vmatprep.subr.mxu1 %v31745_v42  ;;  %28302 = vmatpush3.msra.mxu0 %v31874_v54  ;;  %v31914_v29 = vand.u32 4294901760, %v31905_v7 }
 0x6a0   :  { %28271 = vmatpush3.msra.mxu1 %v31745_v42 }
 0x6a1   :  { %28272 = vmatprep.subr.mxu1 %v31750_v10  ;;  %v10757_v28 = vsub.f32 %v31905_v7, %v31914_v29 }
 0x6a2   :  { %v29998_v25 = vpop.eup %29997  ;;  %28273 = vmatpush3.msra.mxu1 %v31750_v10 }
 0x6a3   :  { %10073 = vrot.lane.b32.xlu0 %v29998_v25, %s30486_s7  ;;  %28288 = vmatprep.subr.mxu1 %v31741_v36  ;;  %v31855_v25 = vand.u32 4294901760, %v10736_v1  ;;  %v31890_v1 = vand.u32 4294901760, %v31880_v55 }
 0x6a4   :  { %28275 = vmatmul.mubr.f32.vlgmr.msra.gmra.mxu1 %v34118_v63 }
 0x6a5   :  { %28289 = vmatpush3.msra.mxu1 %v31741_v36  ;;  %28296 = vmatprep.mubr.f32.mxu1 %v34118_v63  ;;  %34363 = vst [vmem:[#allocation62_spill] sm:$0xff] %v31855_v25  ;;  %v10743_v31 = vsub.f32 %v31880_v55, %v31890_v1 }
 0x6a6   :  { %v30000_v14 = vpop.eup %29999  ;;  %28290 = vmatprep.subr.mxu1 %v31743_v16 }
 0x6a7   :  { %10075 = vrot.lane.b32.xlu1 %v30000_v14, %s30486_s7  ;;  %28291 = vmatpush3.msra.mxu1 %v31743_v16  ;;  %v31882_v14 = vand.u32 4294901760, %v8975_v57 }
 0x6a8   :  { %28292 = vmatprep.subr.mxu1 %v31745_v42 }
 0x6a9   :  { %28293 = vmatpush3.msra.mxu1 %v31745_v42  ;;  %28303 = vmatprep.subr.mxu0 %v31882_v14 }
 0x6aa   :  { %28294 = vmatprep.subr.mxu1 %v31750_v10  ;;  %28304 = vmatpush3.msra.mxu0 %v31882_v14 }
 0x6ab   :  { %28295 = vmatpush3.msra.mxu1 %v31750_v10  ;;  %28305 = vmatprep.subr.mxu0 %v31895_v0 }
 0x6ac   :  { %28310 = vmatprep.subr.mxu1 %v31855_v25  ;;  %28297 = vmatmul.mubr.f32.vlgmr.msra.gmra.mxu1 %v34118_v63  ;;  %v31893_v63 = vsub.f32 %v8975_v57, %v31882_v14  ;;  %v31909_v57 = vand.u32 4294901760, %v10743_v31  ;;  %v31924_v31 = vand.u32 4294901760, %v10757_v28 }
 0x6ad   :  { %28311 = vmatpush3.msra.mxu1 %v31855_v25  ;;  %28306 = vmatpush3.msra.mxu0 %v31895_v0 }
 0x6ae   :  { %v31902_v44 = vand.u32 4294901760, %v31893_v63  ;;  %34364 = vst [vmem:[#allocation63_spill] sm:$0xff] %v31909_v57  ;;  %28321 = vmatprep.subr.mxu0 %v31825_v47  ;;  %28312 = vmatprep.subr.mxu1 %v31909_v57  ;;  %34366 = vst [vmem:[#allocation65_spill] sm:$0xff] %v31924_v31 }
 0x6af   :  { %28313 = vmatpush3.msra.mxu1 %v31909_v57 }
 0x6b0   :  { %v10750_v3 = vsub.f32 %v31893_v63, %v31902_v44 }
 0x6b2   :  { %v31918_v58 = vand.u32 4294901760, %v10750_v3 }
 0x6b4   :  { %34365 = vst [vmem:[#allocation64_spill] sm:$0xff] %v31918_v58  ;;  %28314 = vmatprep.subr.mxu1 %v31918_v58 }
 0x6b5   :  { %28315 = vmatpush3.msra.mxu1 %v31918_v58 }
 0x6b6   :  { %28316 = vmatprep.subr.mxu1 %v31924_v31 }
 0x6b7   :  { %28317 = vmatpush3.msra.mxu1 %v31924_v31 }
 0x6b8   :  { %28332 = vmatprep.subr.mxu1 %v31814_v15 }
 0x715   :  { %v10074_v25 = vpop.permute.xlu0 %10073 }
 0x716   :  { %v10079_v3 = vmul.f32 %v10074_v25, %v31710_v30 }
 0x718   :  { %10611 = vrot.lane.b32.xlu0 %v10079_v3, %s30487_s21 }
 0x719   :  { %v10076_v23 = vpop.permute.xlu1 %10075 }
 0x71a   :  { %v10080_v57 = vmul.f32 %v10076_v23, %v31716_v34 }
 0x71c   :  { %10613 = vrot.lane.b32.xlu1 %v10080_v57, %s30487_s21 }
 0x78a   :  { %v10612_v28 = vpop.permute.xlu0 %10611 }
 0x78b   :  { %v10615_v58 = vsel %vm8983_vm8, %v10612_v28, 0 }
 0x78c   :  { %v31935_v11 = vand.u32 4294901760, %v10615_v58 }
 0x78e   :  { %v31938_v31 = vsub.f32 %v10615_v58, %v31935_v11  ;;  %v10614_v22 = vpop.permute.xlu1 %10613  ;;  %28318 = vmatprep.mubr.f32.mxu1 %v31935_v11 }
 0x78f   :  { %v10617_v30 = vsel %vm8983_vm8, %v10614_v22, 0 }
 0x790   :  { %v31942_v25 = vand.u32 4294901760, %v10617_v30  ;;  %v10690_v34 = vand.u32 4294901760, %v31938_v31 }
 0x792   :  { %v31946_v23 = vsub.f32 %v10617_v30, %v31942_v25  ;;  %28319 = vmatmul.mubr.f32.vlgmr.msra.gmra.mxu1 %v31942_v25  ;;  %v10691_v57 = vsub.f32 %v31938_v31, %v10690_v34  ;;  %v6279_v30 = vmax.f32 %v31660_v21, 0.0 }
 0x793   :  { %28333 = vmatpush3.msra.mxu1 %v31814_v15  ;;  %28340 = vmatprep.mubr.f32.mxu1 %v10690_v34 }
 0x794   :  { %v31952_v58 = vand.u32 4294901760, %v31946_v23  ;;  %28334 = vmatprep.subr.mxu1 %v31874_v54  ;;  %v10692_v22 = vand.u32 4294901760, %v10691_v57  ;;  %v11734_v57 = vsel %vm4595_vm4, %v6279_v30, 0 }
 0x795   :  { %28335 = vmatpush3.msra.mxu1 %v31874_v54  ;;  %v32031_v21 = vand.u32 4294901760, %v11734_v57 }
 0x796   :  { %v10701_v3 = vsub.f32 %v31946_v23, %v31952_v58  ;;  %28336 = vmatprep.subr.mxu1 %v31882_v14  ;;  %28307 = vmatprep.mubr.f32.mxu0 %v10692_v22 }
 0x797   :  { %28337 = vmatpush3.msra.mxu1 %v31882_v14 }
 0x798   :  { %v10702_v28 = vand.u32 4294901760, %v10701_v3  ;;  %28338 = vmatprep.subr.mxu1 %v31895_v0 }
 0x799   :  { %28339 = vmatpush3.msra.mxu1 %v31895_v0 }
 0x79a   :  { %28341 = vmatmul.mubr.f32.vlgmr.msra.gmra.mxu1 %v31952_v58  ;;  %28354 = vmatprep.subr.mxu1 %v31814_v15 }
 0x79b   :  { %28308 = vmatmul.mubr.f32.vlgmr.msra.gmra.mxu0 %v10702_v28  ;;  %28355 = vmatpush3.msra.mxu1 %v31814_v15 }
 0x79c   :  { %28322 = vmatpush3.msra.mxu0 %v31825_v47  ;;  %28362 = vmatprep.mubr.f32.mxu1 %v31935_v11 }
 0x79d   :  { %28323 = vmatprep.subr.mxu0 %v31880_v55  ;;  %28329 = vmatprep.mubr.f32.mxu0 %v31938_v31 }
 0x79e   :  { %28356 = vmatprep.subr.mxu1 %v31874_v54  ;;  %28324 = vmatpush3.msra.mxu0 %v31880_v55 }
 0x79f   :  { %28357 = vmatpush3.msra.mxu1 %v31874_v54  ;;  %28325 = vmatprep.subr.mxu0 %v31893_v63 }
 0x7a0   :  { %28358 = vmatprep.subr.mxu1 %v31882_v14  ;;  %28326 = vmatpush3.msra.mxu0 %v31893_v63 }
 0x7a1   :  { %28359 = vmatpush3.msra.mxu1 %v31882_v14  ;;  %28327 = vmatprep.subr.mxu0 %v31905_v7 }
 0x7a2   :  { %28360 = vmatprep.subr.mxu1 %v31895_v0  ;;  %28328 = vmatpush3.msra.mxu0 %v31905_v7 }
 0x7a3   :  { %28361 = vmatpush3.msra.mxu1 %v31895_v0  ;;  %28330 = vmatmul.mubr.f32.vlgmr.msra.gmra.mxu0 %v31946_v23 }
 0x7a4   :  { %28343 = vmatprep.subr.mxu0 %v31836_v53  ;;  %28363 = vmatmul.mubr.f32.vlgmr.msra.gmra.mxu1 %v31942_v25 }
 0x7a5   :  { %28376 = vmatprep.subr.mxu1 %v31530_v43  ;;  %28344 = vmatpush3.msra.mxu0 %v31836_v53 }
 0x7a6   :  { %28351 = vmatprep.mubr.f32.mxu0 %v31935_v11  ;;  %28377 = vmatpush3.msra.mxu1 %v31530_v43 }
 0x7a7   :  { %28384 = vmatprep.mubr.f32.mxu1 %v31935_v11  ;;  %28345 = vmatprep.subr.mxu0 %v31890_v1 }
 0x7a8   :  { %28378 = vmatprep.subr.mxu1 %v31548_v62  ;;  %28346 = vmatpush3.msra.mxu0 %v31890_v1 }
 0x7a9   :  { %28379 = vmatpush3.msra.mxu1 %v31548_v62  ;;  %28347 = vmatprep.subr.mxu0 %v31902_v44 }
 0x7aa   :  { %28380 = vmatprep.subr.mxu1 %v31555_v52  ;;  %28348 = vmatpush3.msra.mxu0 %v31902_v44 }
 0x7ab   :  { %28381 = vmatpush3.msra.mxu1 %v31555_v52  ;;  %28349 = vmatprep.subr.mxu0 %v31914_v29 }
 0x7ac   :  { %28382 = vmatprep.subr.mxu1 %v31561_v40  ;;  %28350 = vmatpush3.msra.mxu0 %v31914_v29 }
 0x7ad   :  { %28383 = vmatpush3.msra.mxu1 %v31561_v40  ;;  %28352 = vmatmul.mubr.f32.vlgmr.msra.gmra.mxu0 %v31942_v25 }
 0x7ae   :  { %28365 = vmatprep.subr.mxu0 %v31454_v32  ;;  %28385 = vmatmul.mubr.f32.vlgmr.msra.gmra.mxu1 %v31942_v25 }
 0x7af   :  { %28398 = vmatprep.subr.mxu1 %v31454_v32  ;;  %28366 = vmatpush3.msra.mxu0 %v31454_v32 }
 0x7b0   :  { %28373 = vmatprep.mubr.f32.mxu0 %v10692_v22  ;;  %28399 = vmatpush3.msra.mxu1 %v31454_v32 }
 0x7b1   :  { %28406 = vmatprep.mubr.f32.mxu1 %v10690_v34  ;;  %28367 = vmatprep.subr.mxu0 %v31475_v9  ;;  %v8067_v34 = vmax.f32 %v31679_v18, 0.0 }
 0x7b2   :  { %28400 = vmatprep.subr.mxu1 %v31475_v9  ;;  %28368 = vmatpush3.msra.mxu0 %v31475_v9 }
 0x7b3   :  { %28401 = vmatpush3.msra.mxu1 %v31475_v9  ;;  %28369 = vmatprep.subr.mxu0 %v31485_v35  ;;  %v11737_v18 = vsel %vm4595_vm4, %v8067_v34, 0 }
 0x7b4   :  { %28402 = vmatprep.subr.mxu1 %v31485_v35  ;;  %28370 = vmatpush3.msra.mxu0 %v31485_v35 }
 0x7b5   :  { %28403 = vmatpush3.msra.mxu1 %v31485_v35  ;;  %28371 = vmatprep.subr.mxu0 %v31497_v39 }
 0x7b6   :  { %28404 = vmatprep.subr.mxu1 %v31497_v39  ;;  %28372 = vmatpush3.msra.mxu0 %v31497_v39 }
 0x7b7   :  { %28405 = vmatpush3.msra.mxu1 %v31497_v39  ;;  %28374 = vmatmul.mubr.f32.vlgmr.msra.gmra.mxu0 %v10702_v28 }
 0x7b8   :  { %28387 = vmatprep.subr.mxu0 %v31473_v12  ;;  %28407 = vmatmul.mubr.f32.vlgmr.msra.gmra.mxu1 %v31952_v58  ;;  %v11807_v58 = vsub.f32 %v11734_v57, %v32031_v21  ;;  %v28254_v57 = vpop.f32.mrf.mxu1 }
 0x7b9   :  { %28420 = vmatprep.subr.mxu1 %v31454_v32  ;;  %28388 = vmatpush3.msra.mxu0 %v31473_v12 }
 0x7ba   :  { %28395 = vmatprep.mubr.f32.mxu0 %v31938_v31  ;;  %28421 = vmatpush3.msra.mxu1 %v31454_v32  ;;  %v11816_v31 = vand.u32 4294901760, %v11737_v18  ;;  %v11808_v3 = vand.u32 4294901760, %v11807_v58 }
 0x7bb   :  { %28428 = vmatprep.mubr.f32.mxu1 %v31935_v11  ;;  %28389 = vmatprep.subr.mxu0 %v31495_v41 }
 0x7bc   :  { %28422 = vmatprep.subr.mxu1 %v31475_v9  ;;  %28390 = vmatpush3.msra.mxu0 %v31495_v41  ;;  %v11817_v22 = vsub.f32 %v11737_v18, %v11816_v31  ;;  %v10257_v18 = vpop.f32.mrf.mxu1 }
 0x7bd   :  { %28423 = vmatpush3.msra.mxu1 %v31475_v9  ;;  %28391 = vmatprep.subr.mxu0 %v31505_v37 }
 0x7be   :  { %28424 = vmatprep.subr.mxu1 %v31485_v35  ;;  %28392 = vmatpush3.msra.mxu0 %v31505_v37 }
 0x7bf   :  { %28425 = vmatpush3.msra.mxu1 %v31485_v35  ;;  %28393 = vmatprep.subr.mxu0 %v31516_v20 }
 0x7c0   :  { %28426 = vmatprep.subr.mxu1 %v31497_v39  ;;  %28394 = vmatpush3.msra.mxu0 %v31516_v20 }
 0x7c1   :  { %28427 = vmatpush3.msra.mxu1 %v31497_v39  ;;  %28396 = vmatmul.mubr.f32.vlgmr.msra.gmra.mxu0 %v31946_v23  ;;  %v11818_v23 = vand.u32 4294901760, %v11817_v22 }
 0x7c2   :  { %28409 = vmatprep.subr.mxu0 %v31492_v38  ;;  %28429 = vmatmul.mubr.f32.vlgmr.msra.gmra.mxu1 %v31942_v25 }
 0x7c3   :  { %28438 = vmatprep.subr.mxu1 %v31634_v59  ;;  %28410 = vmatpush3.msra.mxu0 %v31492_v38  ;;  %v11819_v28 = vsub.f32 %v11817_v22, %v11818_v23 }
 0x7c4   :  { %28417 = vmatprep.mubr.f32.mxu0 %v31935_v11  ;;  %28439 = vmatpush3.msra.mxu1 %v31634_v59  ;;  %v11809_v11 = vsub.f32 %v11807_v58, %v11808_v3 }
 0x7c5   :  { %28442 = vmatprep.mubr.f32.mxu1 %v32031_v21  ;;  %28411 = vmatprep.subr.mxu0 %v31513_v50  ;;  %v11820_v34 = vand.u32 4294901760, %v11819_v28 }
 0x7c6   :  { %28440 = vmatprep.subr.mxu1 %v31639_v45  ;;  %28412 = vmatpush3.msra.mxu0 %v31513_v50  ;;  %v11810_v30 = vand.u32 4294901760, %v11809_v11 }
 0x7c7   :  { %28441 = vmatpush3.msra.mxu1 %v31639_v45  ;;  %28413 = vmatprep.subr.mxu0 %v31523_v49 }
 0x7c8   :  { %28443 = vmatmul.mubr.f32.vlgmr.msra.gmra.mxu1 %v11816_v31  ;;  %28452 = vmatprep.subr.mxu1 %v31606_v33 }
 0x7c9   :  { %28414 = vmatpush3.msra.mxu0 %v31523_v49  ;;  %28453 = vmatpush3.msra.mxu1 %v31606_v33 }
 0x7ca   :  { %28456 = vmatprep.mubr.f32.mxu1 %v11808_v3  ;;  %28415 = vmatprep.subr.mxu0 %v31536_v51  ;;  %v28276_v3 = vpop.f32.mrf.mxu1 }
 0x7cb   :  { %28454 = vmatprep.subr.mxu1 %v31615_v8  ;;  %28416 = vmatpush3.msra.mxu0 %v31536_v51 }
 0x7cc   :  { %28455 = vmatpush3.msra.mxu1 %v31615_v8  ;;  %28418 = vmatmul.mubr.f32.vlgmr.msra.gmra.mxu0 %v31942_v25  ;;  %v28243_v25 = vpop.f32.mrf.mxu0 }
 0x7cd   :  { %28431 = vmatprep.subr.mxu0 %v31606_v33  ;;  %28457 = vmatmul.mubr.f32.vlgmr.msra.gmra.mxu1 %v11818_v23 }
 0x7ce   :  { %28466 = vmatprep.subr.mxu1 %v31606_v33  ;;  %28432 = vmatpush3.msra.mxu0 %v31606_v33 }
 0x7cf   :  { %28435 = vmatprep.mubr.f32.mxu0 %v11810_v30  ;;  %28467 = vmatpush3.msra.mxu1 %v31606_v33  ;;  %v10427_v30 = vpop.f32.mrf.mxu1 }
 0x7d0   :  { %28470 = vmatprep.mubr.f32.mxu1 %v32031_v21  ;;  %28433 = vmatprep.subr.mxu0 %v31615_v8 }
 0x7d1   :  { %28468 = vmatprep.subr.mxu1 %v31615_v8  ;;  %28434 = vmatpush3.msra.mxu0 %v31615_v8 }
 0x7d2   :  { %28469 = vmatpush3.msra.mxu1 %v31615_v8  ;;  %28436 = vmatmul.mubr.f32.vlgmr.msra.gmra.mxu0 %v11820_v34 }
 0x7d3   :  { %28445 = vmatprep.subr.mxu0 %v31613_v2  ;;  %28471 = vmatmul.mubr.f32.vlgmr.msra.gmra.mxu1 %v11816_v31 }
 0x7d4   :  { %28446 = vmatpush3.msra.mxu0 %v31613_v2  ;;  %28449 = vmatprep.mubr.f32.mxu0 %v11807_v58  ;;  %v10264_v58 = vadd.f32 %v28254_v57, %v28243_v25 }
 0x7d5   :  { %28447 = vmatprep.subr.mxu0 %v31623_v46  ;;  %28484 = vmatprep.subr.mxu1 %v31789_v5 }
 0x7d6   :  { %28448 = vmatpush3.msra.mxu0 %v31623_v46  ;;  %28485 = vmatpush3.msra.mxu1 %v31789_v5 }
 0x7d7   :  { %28450 = vmatmul.mubr.f32.vlgmr.msra.gmra.mxu0 %v11817_v22  ;;  %28459 = vmatprep.subr.mxu0 %v31620_v6 }
 0x7d8   :  { %28460 = vmatpush3.msra.mxu0 %v31620_v6  ;;  %28463 = vmatprep.mubr.f32.mxu0 %v32031_v21  ;;  %v10156_v21 = vpop.f32.mrf.mxu0 }
 0x7d9   :  { %28461 = vmatprep.subr.mxu0 %v31630_v13  ;;  %28486 = vmatprep.subr.mxu1 %v31791_v48  ;;  %v10258_v22 = vadd.f32 %v10257_v18, %v10156_v21 }
 0x7da   :  { %28462 = vmatpush3.msra.mxu0 %v31630_v13  ;;  %28487 = vmatpush3.msra.mxu1 %v31791_v48  ;;  %v28298_v48 = vpop.f32.mrf.mxu1 }
 0x7db   :  { %28464 = vmatmul.mubr.f32.vlgmr.msra.gmra.mxu0 %v11816_v31  ;;  %28488 = vmatprep.subr.mxu1 %v31799_v24  ;;  %v28265_v31 = vpop.f32.mrf.mxu0 }
 0x7dc   :  { %28489 = vmatpush3.msra.mxu1 %v31799_v24  ;;  %28473 = vmatprep.subr.mxu0 %v31741_v36  ;;  %v10351_v11 = vadd.f32 %v28265_v31, %v10264_v58  ;;  %v10599_v2 = vpop.f32.mrf.mxu1 }
 0x7dd   :  { %28490 = vmatprep.subr.mxu1 %v31807_v4  ;;  %28474 = vmatpush3.msra.mxu0 %v31741_v36  ;;  %v10343_v23 = vpop.f32.mrf.mxu0 }
 0x7de   :  { %28491 = vmatpush3.msra.mxu1 %v31807_v4  ;;  %28475 = vmatprep.subr.mxu0 %v31743_v16  ;;  %v10344_v28 = vadd.f32 %v10343_v23, %v10258_v22  ;;  %v10436_v4 = vadd.f32 %v28276_v3, %v10351_v11 }
 0x7df   :  { %28506 = vmatprep.subr.mxu1 %v31741_v36  ;;  %28476 = vmatpush3.msra.mxu0 %v31743_v16  ;;  %v28287_v34 = vpop.f32.mrf.mxu0 }
 0x7e0   :  { %28477 = vmatprep.subr.mxu0 %v31745_v42  ;;  %v10428_v24 = vadd.f32 %v10427_v30, %v10344_v28  ;;  %v10525_v6 = vadd.f32 %v28287_v34, %v10436_v4 }
 0x7e1   :  { %28478 = vmatpush3.msra.mxu0 %v31745_v42  ;;  %v10518_v13 = vpop.f32.mrf.mxu0 }
 0x7e2   :  { %28479 = vmatprep.subr.mxu0 %v31750_v10  ;;  %v10519_v46 = vadd.f32 %v10518_v13, %v10428_v24  ;;  %v10606_v8 = vadd.f32 %v28298_v48, %v10525_v6  ;;  %v32101_v6 = vld [vmem:[#allocation12] ss:$0 sm:$0xff] }
 0x7e3   :  { %28480 = vmatpush3.msra.mxu0 %v31750_v10  ;;  %34367 = vst [vmem:[#allocation66_spill] sm:$0xff] %v32101_v6 }
 0x7e4   :  { %28495 = vmatprep.subr.mxu0 %v31753_v56  ;;  %v10600_v25 = vadd.f32 %v10599_v2, %v10519_v46 }
 0x852   :  { %v28320_v51 = vpop.f32.mrf.mxu1 }
 0x854   :  { %v10795_v18 = vpop.f32.mrf.mxu1 }
 0x85a   :  { %v28342_v58 = vpop.f32.mrf.mxu1 }
 0x85b   :  { %v28309_v5 = vpop.f32.mrf.mxu0 }
 0x85c   :  { %v10705_v49 = vadd.f32 %v28309_v5, %v10606_v8  ;;  %v10965_v28 = vpop.f32.mrf.mxu1 }
 0x85d   :  { %v10694_v33 = vpop.f32.mrf.mxu0 }
 0x85e   :  { %v10695_v21 = vadd.f32 %v10694_v33, %v10600_v25  ;;  %v10802_v31 = vadd.f32 %v28320_v51, %v10705_v49 }
 0x860   :  { %v10796_v3 = vadd.f32 %v10795_v18, %v10695_v21 }
 0x863   :  { %v28331_v57 = vpop.f32.mrf.mxu0 }
 0x864   :  { %v10889_v23 = vadd.f32 %v28331_v57, %v10802_v31  ;;  %v28364_v4 = vpop.f32.mrf.mxu1 }
 0x865   :  { %v10881_v22 = vpop.f32.mrf.mxu0 }
 0x866   :  { %v10882_v11 = vadd.f32 %v10881_v22, %v10796_v3  ;;  %v10974_v30 = vadd.f32 %v28342_v58, %v10889_v23  ;;  %v11137_v46 = vpop.f32.mrf.mxu1 }
 0x868   :  { %v10966_v24 = vadd.f32 %v10965_v28, %v10882_v11 }
 0x86d   :  { %v28353_v34 = vpop.f32.mrf.mxu0 }
 0x86e   :  { %v11063_v13 = vadd.f32 %v28353_v34, %v10974_v30  ;;  %v28386_v57 = vpop.f32.mrf.mxu1 }
 0x86f   :  { %v11056_v48 = vpop.f32.mrf.mxu0 }
 0x870   :  { %v11144_v8 = vadd.f32 %v28364_v4, %v11063_v13  ;;  %v11057_v2 = vadd.f32 %v11056_v48, %v10966_v24  ;;  %v11381_v21 = vpop.f32.mrf.mxu1 }
 0x872   :  { %v11154_v33 = vadd.f32 %v32101_v6, %v11144_v8  ;;  %v11138_v49 = vadd.f32 %v11137_v46, %v11057_v2 }
 0x874   :  { %v26117_v51 = vmul.f32 -1.442695, %v11154_v33  ;;  %v11153_v5 = vadd.f32 %v32101_v6, %v11138_v49 }
 0x876   :  { %30001 = vpow2.f32 %v26117_v51  ;;  %v26116_v25 = vmul.f32 -1.442695, %v11153_v5 }
 0x877   :  { %v28375_v18 = vpop.f32.mrf.mxu0 }
 0x878   :  { %30003 = vpow2.f32 %v26116_v25  ;;  %v28408_v31 = vpop.f32.mrf.mxu1  ;;  %v11388_v4 = vadd.f32 %v28386_v57, %v28375_v18 }
 0x879   :  { %v11280_v58 = vpop.f32.mrf.mxu0  ;;  %30005 = vtanh.f32 %v11154_v33 }
 0x87a   :  { %v11551_v22 = vpop.f32.mrf.mxu1  ;;  %v11382_v24 = vadd.f32 %v11381_v21, %v11280_v58 }
 0x881   :  { %v28397_v23 = vpop.f32.mrf.mxu0 }
 0x882   :  { %v28430_v11 = vpop.f32.mrf.mxu1  ;;  %v11475_v48 = vadd.f32 %v28397_v23, %v11388_v4 }
 0x883   :  { %v30002_v3 = vpop.eup %30001  ;;  %v11467_v13 = vpop.f32.mrf.mxu0 }
 0x884   :  { %v11164_v28 = vadd.f32 1.0, %v30002_v3  ;;  %v11723_v8 = vpop.f32.mrf.mxu1  ;;  %v11468_v2 = vadd.f32 %v11467_v13, %v11382_v24  ;;  %v11560_v49 = vadd.f32 %v28408_v31, %v11475_v48 }
 0x885   :  { %v30004_v30 = vpop.eup %30003 }
 0x886   :  { %30007 = vrcp.f32 %v11164_v28  ;;  %v11163_v34 = vadd.f32 1.0, %v30004_v30  ;;  %v11552_v6 = vadd.f32 %v11551_v22, %v11468_v2  ;;  %v30006_v57 = vpop.eup %30005 }
 0x887   :  { %30009 = vtanh.f32 %v11153_v5 }
 0x888   :  { %30011 = vrcp.f32 %v11163_v34  ;;  %v28444_v46 = vpop.f32.mrf.mxu1 }
 0x88a   :  { %v11903_v50 = vpop.f32.mrf.mxu1 }
 0x88c   :  { %v28419_v51 = vpop.f32.mrf.mxu0 }
 0x88d   :  { %v11649_v25 = vadd.f32 %v28419_v51, %v11560_v49  ;;  %v28458_v30 = vpop.f32.mrf.mxu1 }
 0x88e   :  { %v11642_v45 = vpop.f32.mrf.mxu0 }
 0x88f   :  { %v11643_v3 = vadd.f32 %v11642_v45, %v11552_v6  ;;  %v11730_v59 = vadd.f32 %v28430_v11, %v11649_v25  ;;  %v12067_v6 = vpop.f32.mrf.mxu1 }
 0x891   :  { %v11724_v33 = vadd.f32 %v11723_v8, %v11643_v3 }
 0x892   :  { %v28437_v18 = vpop.f32.mrf.mxu0 }
 0x893   :  { %v30008_v28 = vpop.eup %30007  ;;  %v11823_v5 = vadd.f32 %v28437_v18, %v11730_v59  ;;  %v28472_v8 = vpop.f32.mrf.mxu1 }
 0x894   :  { %v30010_v21 = vpop.eup %30009  ;;  %v11812_v58 = vpop.f32.mrf.mxu0  ;;  %v32107_v23 = vsel %vm31704_vm7, %v30006_v57, %v30008_v28 }
 0x895   :  { %v30012_v31 = vpop.eup %30011  ;;  %v11813_v4 = vadd.f32 %v11812_v58, %v11724_v33  ;;  %v11910_v34 = vadd.f32 %v28444_v46, %v11823_v5  ;;  %11177 = vrot.lane.b32.xlu1 %v32107_v23, %s30486_s7  ;;  %v12231_v33 = vpop.f32.mrf.mxu1 }
 0x896   :  { %v32113_v45 = vsel %vm31704_vm7, %v30010_v21, %v30012_v31 }
 0x897   :  { %v28451_v22 = vpop.f32.mrf.mxu0  ;;  %v11904_v11 = vadd.f32 %v11903_v50, %v11813_v4  ;;  %11175 = vrot.lane.b32.xlu0 %v32113_v45, %s30486_s7 }
 0x898   :  { %v11993_v59 = vadd.f32 %v28451_v22, %v11910_v34 }
 0x899   :  { %v11985_v13 = vpop.f32.mrf.mxu0 }
 0x89a   :  { %v11986_v24 = vadd.f32 %v11985_v13, %v11904_v11  ;;  %v12076_v48 = vadd.f32 %v28458_v30, %v11993_v59 }
 0x89b   :  { %v28465_v2 = vpop.f32.mrf.mxu0 }
 0x89c   :  { %v12159_v46 = vadd.f32 %v28465_v2, %v12076_v48  ;;  %v12068_v49 = vadd.f32 %v12067_v6, %v11986_v24 }
 0x89d   :  { %v12152_v51 = vpop.f32.mrf.mxu0 }
 0x89e   :  { %v12238_v25 = vadd.f32 %v28472_v8, %v12159_v46  ;;  %v12153_v3 = vadd.f32 %v12152_v51, %v12068_v49  ;;  %v11172_v51 = vmul.f32 0.0, %v32107_v23 }
 0x8a0   :  { %v12242_v57 = vadd.f32 %v31700_v61, %v12238_v25  ;;  %v12232_v18 = vadd.f32 %v12231_v33, %v12153_v3  ;;  %v11171_v33 = vmul.f32 0.0, %v32113_v45 }
 0x8a2   :  { %v26119_v28 = vmul.f32 -1.442695, %v12242_v57  ;;  %v12241_v50 = vadd.f32 %v31700_v61, %v12232_v18 }
 0x8a4   :  { %30013 = vpow2.f32 %v26119_v28  ;;  %v26118_v5 = vmul.f32 -1.442695, %v12241_v50 }
 0x8a6   :  { %30015 = vpow2.f32 %v26118_v5 }
 0x8a7   :  { %30017 = vtanh.f32 %v12242_v57 }
 0x8b1   :  { %v30014_v21 = vpop.eup %30013 }
 0x8b2   :  { %v12252_v58 = vadd.f32 1.0, %v30014_v21 }
 0x8b3   :  { %v30016_v30 = vpop.eup %30015 }
 0x8b4   :  { %30019 = vrcp.f32 %v12252_v58  ;;  %v12251_v31 = vadd.f32 1.0, %v30016_v30  ;;  %v30018_v4 = vpop.eup %30017 }
 0x8b5   :  { %30021 = vtanh.f32 %v12241_v50 }
 0x8b6   :  { %30023 = vrcp.f32 %v12251_v31 }
 0x8c1   :  { %v30020_v34 = vpop.eup %30019 }
 0x8c2   :  { %v30022_v6 = vpop.eup %30021  ;;  %v12258_v22 = vsel %vm31704_vm7, %v30018_v4, %v30020_v34 }
 0x8c3   :  { %v30024_v11 = vpop.eup %30023  ;;  %12265 = vrot.lane.b32.xlu1 %v12258_v22, %s30486_s7  ;;  %v12260_v5 = vmul.f32 %v12258_v22, %v31729_v26 }
 0x8c4   :  { %v12257_v61 = vsel %vm31704_vm7, %v30022_v6, %v30024_v11 }
 0x8c5   :  { %12263 = vrot.lane.b32.xlu0 %v12257_v61, %s30486_s7  ;;  %v12259_v30 = vmul.f32 %v12257_v61, %v31725_v60 }
 0x907   :  { %v11178_v59 = vpop.permute.xlu1 %11177 }
 0x908   :  { %v11182_v13 = vmul.f32 %v11178_v59, %v32107_v23 }
 0x909   :  { %v11176_v24 = vpop.permute.xlu0 %11175 }
 0x90a   :  { %v11181_v48 = vmul.f32 %v11176_v24, %v32113_v45  ;;  %11187 = vrot.lane.b32.xlu1 %v11182_v13, %s30487_s21 }
 0x90c   :  { %11185 = vrot.lane.b32.xlu0 %v11181_v48, %s30487_s21 }
 0x935   :  { %v12266_v8 = vpop.permute.xlu1 %12265 }
 0x936   :  { %v12270_v2 = vmul.f32 %v12266_v8, %v12258_v22 }
 0x937   :  { %v12264_v46 = vpop.permute.xlu0 %12263 }
 0x938   :  { %v12269_v49 = vmul.f32 %v12264_v46, %v12257_v61  ;;  %12275 = vrot.lane.b32.xlu1 %v12270_v2, %s30487_s21 }
 0x93a   :  { %12273 = vrot.lane.b32.xlu0 %v12269_v49, %s30487_s21 }
 0x97c   :  { %v11188_v25 = vpop.permute.xlu1 %11187 }
 0x97d   :  { %v32132_v3 = vadd.f32 %v11188_v25, %v11172_v51 }
 0x97e   :  { %v11186_v57 = vpop.permute.xlu0 %11185 }
 0x97f   :  { %30025 = vtanh.f32 %v32132_v3  ;;  %v32136_v18 = vadd.f32 %v11186_v57, %v11171_v33 }
 0x981   :  { %30027 = vtanh.f32 %v32136_v18 }
 0x98c   :  { %v30026_v28 = vpop.eup %30025 }
 0x98d   :  { %11199 = vrot.lane.b32.xlu1 %v30026_v28, %s30486_s7 }
 0x98e   :  { %v30028_v50 = vpop.eup %30027 }
 0x98f   :  { %11197 = vrot.lane.b32.xlu0 %v30028_v50, %s30486_s7 }
 0x9aa   :  { %v12276_v21 = vpop.permute.xlu1 %12275 }
 0x9ab   :  { %v32142_v58 = vadd.f32 %v12276_v21, %v12260_v5  ;;  %v34368_v21 = vld [vmem:[#allocation53_spill] sm:$0xff] }
 0x9ac   :  { %v12274_v31 = vpop.permute.xlu0 %12273 }
 0x9ad   :  { %30029 = vtanh.f32 %v32142_v58  ;;  %v32146_v4 = vadd.f32 %v12274_v31, %v12259_v30  ;;  %v34369_v30 = vld [vmem:[#allocation54_spill] sm:$0xff]  ;;  %v34370_v31 = vld [vmem:[#allocation55_spill] sm:$0xff] }
 0x9af   :  { %30031 = vtanh.f32 %v32146_v4 }
 0x9ba   :  { %v30030_v34 = vpop.eup %30029 }
 0x9bb   :  { %12287 = vrot.lane.b32.xlu1 %v30030_v34, %s30486_s7  ;;  %v34371_v34 = vld [vmem:[#allocation62_spill] sm:$0xff] }
 0x9bc   :  { %v30032_v6 = vpop.eup %30031 }
 0x9bd   :  { %12285 = vrot.lane.b32.xlu0 %v30032_v6, %s30486_s7  ;;  %v34372_v6 = vld [vmem:[#allocation56_spill] sm:$0xff] }
 0x9ff   :  { %v11200_v11 = vpop.permute.xlu1 %11199 }
 0xa00   :  { %v11204_v26 = vmul.f32 %v11200_v11, %v32107_v23  ;;  %v34373_v11 = vld [vmem:[#allocation63_spill] sm:$0xff] }
 0xa01   :  { %v11198_v59 = vpop.permute.xlu0 %11197 }
 0xa02   :  { %v11203_v13 = vmul.f32 %v11198_v59, %v32113_v45  ;;  %12297 = vrot.lane.b32.xlu1 %v11204_v26, %s30487_s21  ;;  %v34374_v26 = vld [vmem:[#allocation57_spill] sm:$0xff]  ;;  %v34375_v59 = vld [vmem:[#allocation64_spill] sm:$0xff] }
 0xa04   :  { %12295 = vrot.lane.b32.xlu0 %v11203_v13, %s30487_s21  ;;  %v34376_v13 = vld [vmem:[#allocation65_spill] sm:$0xff] }
 0xa2d   :  { %v12288_v60 = vpop.permute.xlu1 %12287 }
 0xa2e   :  { %v12292_v24 = vmul.f32 %v12288_v60, %v12258_v22 }
 0xa2f   :  { %v12286_v48 = vpop.permute.xlu0 %12285 }
 0xa30   :  { %v12291_v8 = vmul.f32 %v12286_v48, %v12257_v61  ;;  %12835 = vrot.lane.b32.xlu1 %v12292_v24, %s30487_s21 }
 0xa32   :  { %12833 = vrot.lane.b32.xlu0 %v12291_v8, %s30487_s21 }
 0xa74   :  { %v12298_v2 = vpop.permute.xlu1 %12297 }
 0xa75   :  { %v12301_v46 = vsel %vm8983_vm8, %v12298_v2, 0 }
 0xa76   :  { %v12382_v49 = vand.u32 4294901760, %v12301_v46  ;;  %v12296_v23 = vpop.permute.xlu0 %12295 }
 0xa77   :  { %v12299_v51 = vsel %vm8983_vm8, %v12296_v23, 0 }
 0xa78   :  { %v12383_v45 = vsub.f32 %v12301_v46, %v12382_v49  ;;  %v12372_v25 = vand.u32 4294901760, %v12299_v51 }
 0xa7a   :  { %v12384_v33 = vand.u32 4294901760, %v12383_v45  ;;  %v12373_v57 = vsub.f32 %v12299_v51, %v12372_v25  ;;  %28492 = vmatprep.mubr.f32.mxu1 %v12372_v25 }
 0xa7b   :  { %28493 = vmatmul.mubr.f32.vlgmr.msra.gmra.mxu1 %v12382_v49 }
 0xa7c   :  { %28507 = vmatpush3.msra.mxu1 %v31741_v36  ;;  %v12374_v22 = vand.u32 4294901760, %v12373_v57  ;;  %v12385_v61 = vsub.f32 %v12383_v45, %v12384_v33 }
 0xa7d   :  { %28508 = vmatprep.subr.mxu1 %v31743_v16 }
 0xa7e   :  { %28509 = vmatpush3.msra.mxu1 %v31743_v16  ;;  %28514 = vmatprep.mubr.f32.mxu1 %v12374_v22  ;;  %v12375_v28 = vsub.f32 %v12373_v57, %v12374_v22  ;;  %v12386_v5 = vand.u32 4294901760, %v12385_v61  ;;  %v34377_v61 = vld [vmem:[#allocation49_spill] sm:$0xff] }
 0xa7f   :  { %28510 = vmatprep.subr.mxu1 %v31745_v42 }
 0xa80   :  { %28511 = vmatpush3.msra.mxu1 %v31745_v42  ;;  %v12376_v50 = vand.u32 4294901760, %v12375_v28  ;;  %v6726_v28 = vmax.f32 %v34377_v61, 0.0  ;;  %v34383_v61 = vld [vmem:[#allocation41_spill] sm:$0xff] }
 0xa81   :  { %28512 = vmatprep.subr.mxu1 %v31750_v10 }
 0xa82   :  { %28513 = vmatpush3.msra.mxu1 %v31750_v10  ;;  %28481 = vmatprep.mubr.f32.mxu0 %v12376_v50  ;;  %v34378_v50 = vld [vmem:[#allocation51_spill] sm:$0xff] }
 0xa83   :  { %28515 = vmatmul.mubr.f32.vlgmr.msra.gmra.mxu1 %v12384_v33  ;;  %28528 = vmatprep.subr.mxu1 %v31741_v36 }
 0xa84   :  { %28482 = vmatmul.mubr.f32.vlgmr.msra.gmra.mxu0 %v12386_v5  ;;  %28529 = vmatpush3.msra.mxu1 %v31741_v36  ;;  %v8514_v5 = vmax.f32 %v34378_v50, 0.0  ;;  %v34385_v50 = vld [vmem:[#allocation43_spill] sm:$0xff] }
 0xa85   :  { %28496 = vmatpush3.msra.mxu0 %v31753_v56  ;;  %28536 = vmatprep.mubr.f32.mxu1 %v12372_v25 }
 0xa86   :  { %28497 = vmatprep.subr.mxu0 %v31756_v19  ;;  %28503 = vmatprep.mubr.f32.mxu0 %v12373_v57 }
 0xa87   :  { %28530 = vmatprep.subr.mxu1 %v31743_v16  ;;  %28498 = vmatpush3.msra.mxu0 %v31756_v19 }
 0xa88   :  { %28531 = vmatpush3.msra.mxu1 %v31743_v16  ;;  %28499 = vmatprep.subr.mxu0 %v31759_v17 }
 0xa89   :  { %28532 = vmatprep.subr.mxu1 %v31745_v42  ;;  %28500 = vmatpush3.msra.mxu0 %v31759_v17 }
 0xa8a   :  { %28533 = vmatpush3.msra.mxu1 %v31745_v42  ;;  %28501 = vmatprep.subr.mxu0 %v34368_v21 }
 0xa8b   :  { %28534 = vmatprep.subr.mxu1 %v31750_v10  ;;  %28502 = vmatpush3.msra.mxu0 %v34368_v21 }
 0xa8c   :  { %28535 = vmatpush3.msra.mxu1 %v31750_v10  ;;  %28504 = vmatmul.mubr.f32.vlgmr.msra.gmra.mxu0 %v12383_v45 }
 0xa8d   :  { %28517 = vmatprep.subr.mxu0 %v34369_v30  ;;  %28537 = vmatmul.mubr.f32.vlgmr.msra.gmra.mxu1 %v12382_v49 }
 0xa8e   :  { %28518 = vmatpush3.msra.mxu0 %v34369_v30  ;;  %28525 = vmatprep.mubr.f32.mxu0 %v12372_v25 }
 0xa8f   :  { %28519 = vmatprep.subr.mxu0 %v34370_v31  ;;  %28550 = vmatprep.subr.mxu1 %v34371_v34 }
 0xa90   :  { %28520 = vmatpush3.msra.mxu0 %v34370_v31  ;;  %28551 = vmatpush3.msra.mxu1 %v34371_v34 }
 0xa91   :  { %28521 = vmatprep.subr.mxu0 %v34372_v6  ;;  %28552 = vmatprep.subr.mxu1 %v34373_v11 }
 0xa92   :  { %28522 = vmatpush3.msra.mxu0 %v34372_v6  ;;  %28553 = vmatpush3.msra.mxu1 %v34373_v11 }
 0xa93   :  { %28523 = vmatprep.subr.mxu0 %v34374_v26  ;;  %28554 = vmatprep.subr.mxu1 %v34375_v59 }
 0xa94   :  { %28524 = vmatpush3.msra.mxu0 %v34374_v26  ;;  %28555 = vmatpush3.msra.mxu1 %v34375_v59 }
 0xa95   :  { %28526 = vmatmul.mubr.f32.vlgmr.msra.gmra.mxu0 %v12382_v49  ;;  %28556 = vmatprep.subr.mxu1 %v34376_v13 }
 0xa96   :  { %28557 = vmatpush3.msra.mxu1 %v34376_v13  ;;  %28539 = vmatprep.subr.mxu0 %v31814_v15 }
 0xa97   :  { %28572 = vmatprep.subr.mxu1 %v31814_v15  ;;  %28540 = vmatpush3.msra.mxu0 %v31814_v15 }
 0xa98   :  { %28541 = vmatprep.subr.mxu0 %v31874_v54 }
 0xa99   :  { %28542 = vmatpush3.msra.mxu0 %v31874_v54 }
 0xa9a   :  { %28543 = vmatprep.subr.mxu0 %v31882_v14 }
 0xa9b   :  { %28544 = vmatpush3.msra.mxu0 %v31882_v14 }
 0xa9c   :  { %28545 = vmatprep.subr.mxu0 %v31895_v0 }
 0xa9d   :  { %28546 = vmatpush3.msra.mxu0 %v31895_v0 }
 0xa9e   :  { %28561 = vmatprep.subr.mxu0 %v31825_v47 }
 0xaa2   :  { %v12836_v60 = vpop.permute.xlu1 %12835 }
 0xaa3   :  { %v12839_v24 = vsel %vm8983_vm8, %v12836_v60, 0  ;;  %v13950_v60 = vsel %vm4595_vm4, %v6726_v28, 0  ;;  %v34384_v28 = vld [vmem:[#allocation39_spill] sm:$0xff] }
 0xaa4   :  { %v32208_v48 = vand.u32 4294901760, %v12839_v24  ;;  %v12834_v8 = vpop.permute.xlu0 %12833 }
 0xaa5   :  { %v12837_v2 = vsel %vm8983_vm8, %v12834_v8, 0  ;;  %v13953_v8 = vsel %vm4595_vm4, %v8514_v5, 0 }
 0xaa6   :  { %v32212_v46 = vsub.f32 %v12839_v24, %v32208_v48  ;;  %v32214_v49 = vand.u32 4294901760, %v12837_v2  ;;  %v32304_v24 = vand.u32 4294901760, %v13950_v60 }
 0xaa8   :  { %v32217_v23 = vand.u32 4294901760, %v32212_v46  ;;  %v32220_v51 = vsub.f32 %v12837_v2, %v32214_v49  ;;  %28558 = vmatprep.mubr.f32.mxu1 %v32214_v49  ;;  %v14032_v2 = vand.u32 4294901760, %v13953_v8 }
 0xaa9   :  { %28559 = vmatmul.mubr.f32.vlgmr.msra.gmra.mxu1 %v32208_v48 }
 0xaaa   :  { %28573 = vmatpush3.msra.mxu1 %v31814_v15  ;;  %v12912_v45 = vand.u32 4294901760, %v32220_v51  ;;  %v12923_v25 = vsub.f32 %v32212_v46, %v32217_v23 }
 0xaab   :  { %28574 = vmatprep.subr.mxu1 %v31874_v54 }
 0xaac   :  { %28575 = vmatpush3.msra.mxu1 %v31874_v54  ;;  %28580 = vmatprep.mubr.f32.mxu1 %v12912_v45  ;;  %v12913_v33 = vsub.f32 %v32220_v51, %v12912_v45  ;;  %v12924_v22 = vand.u32 4294901760, %v12923_v25  ;;  %v34380_v25 = vld [vmem:[#allocation36_spill] sm:$0xff] }
 0xaad   :  { %28576 = vmatprep.subr.mxu1 %v31882_v14 }
 0xaae   :  { %28577 = vmatpush3.msra.mxu1 %v31882_v14  ;;  %v12914_v57 = vand.u32 4294901760, %v12913_v33 }
 0xaaf   :  { %28578 = vmatprep.subr.mxu1 %v31895_v0 }
 0xab0   :  { %28579 = vmatpush3.msra.mxu1 %v31895_v0  ;;  %28547 = vmatprep.mubr.f32.mxu0 %v12914_v57 }
 0xab1   :  { %28581 = vmatmul.mubr.f32.vlgmr.msra.gmra.mxu1 %v32217_v23  ;;  %28594 = vmatprep.subr.mxu1 %v31814_v15 }
 0xab2   :  { %28548 = vmatmul.mubr.f32.vlgmr.msra.gmra.mxu0 %v12924_v22  ;;  %28595 = vmatpush3.msra.mxu1 %v31814_v15 }
 0xab3   :  { %28562 = vmatpush3.msra.mxu0 %v31825_v47  ;;  %28602 = vmatprep.mubr.f32.mxu1 %v32214_v49 }
 0xab4   :  { %28563 = vmatprep.subr.mxu0 %v31880_v55  ;;  %28569 = vmatprep.mubr.f32.mxu0 %v32220_v51 }
 0xab5   :  { %28596 = vmatprep.subr.mxu1 %v31874_v54  ;;  %28564 = vmatpush3.msra.mxu0 %v31880_v55 }
 0xab6   :  { %28597 = vmatpush3.msra.mxu1 %v31874_v54  ;;  %28565 = vmatprep.subr.mxu0 %v31893_v63 }
 0xab7   :  { %28598 = vmatprep.subr.mxu1 %v31882_v14  ;;  %28566 = vmatpush3.msra.mxu0 %v31893_v63 }
 0xab8   :  { %28599 = vmatpush3.msra.mxu1 %v31882_v14  ;;  %28567 = vmatprep.subr.mxu0 %v31905_v7 }
 0xab9   :  { %28600 = vmatprep.subr.mxu1 %v31895_v0  ;;  %28568 = vmatpush3.msra.mxu0 %v31905_v7 }
 0xaba   :  { %28601 = vmatpush3.msra.mxu1 %v31895_v0  ;;  %28570 = vmatmul.mubr.f32.vlgmr.msra.gmra.mxu0 %v32212_v46 }
 0xabb   :  { %28583 = vmatprep.subr.mxu0 %v31836_v53  ;;  %28603 = vmatmul.mubr.f32.vlgmr.msra.gmra.mxu1 %v32208_v48 }
 0xabc   :  { %28616 = vmatprep.subr.mxu1 %v31530_v43  ;;  %28584 = vmatpush3.msra.mxu0 %v31836_v53 }
 0xabd   :  { %28591 = vmatprep.mubr.f32.mxu0 %v32214_v49  ;;  %28617 = vmatpush3.msra.mxu1 %v31530_v43 }
 0xabe   :  { %28624 = vmatprep.mubr.f32.mxu1 %v32214_v49  ;;  %28585 = vmatprep.subr.mxu0 %v31890_v1 }
 0xabf   :  { %28618 = vmatprep.subr.mxu1 %v31548_v62  ;;  %28586 = vmatpush3.msra.mxu0 %v31890_v1 }
 0xac0   :  { %28619 = vmatpush3.msra.mxu1 %v31548_v62  ;;  %28587 = vmatprep.subr.mxu0 %v31902_v44 }
 0xac1   :  { %28620 = vmatprep.subr.mxu1 %v31555_v52  ;;  %28588 = vmatpush3.msra.mxu0 %v31902_v44 }
 0xac2   :  { %28621 = vmatpush3.msra.mxu1 %v31555_v52  ;;  %28589 = vmatprep.subr.mxu0 %v31914_v29 }
 0xac3   :  { %28622 = vmatprep.subr.mxu1 %v31561_v40  ;;  %28590 = vmatpush3.msra.mxu0 %v31914_v29 }
 0xac4   :  { %28623 = vmatpush3.msra.mxu1 %v31561_v40  ;;  %28592 = vmatmul.mubr.f32.vlgmr.msra.gmra.mxu0 %v32208_v48 }
 0xac5   :  { %28605 = vmatprep.subr.mxu0 %v31454_v32  ;;  %28625 = vmatmul.mubr.f32.vlgmr.msra.gmra.mxu1 %v32208_v48 }
 0xac6   :  { %28638 = vmatprep.subr.mxu1 %v31454_v32  ;;  %28606 = vmatpush3.msra.mxu0 %v31454_v32 }
 0xac7   :  { %28613 = vmatprep.mubr.f32.mxu0 %v12914_v57  ;;  %28639 = vmatpush3.msra.mxu1 %v31454_v32  ;;  %v34381_v57 = vld [vmem:[#allocation48_spill] sm:$0xff] }
 0xac8   :  { %28646 = vmatprep.mubr.f32.mxu1 %v12912_v45  ;;  %28607 = vmatprep.subr.mxu0 %v31475_v9  ;;  %v14033_v45 = vsub.f32 %v13953_v8, %v14032_v2 }
 0xac9   :  { %28640 = vmatprep.subr.mxu1 %v31475_v9  ;;  %28608 = vmatpush3.msra.mxu0 %v31475_v9 }
 0xaca   :  { %28641 = vmatpush3.msra.mxu1 %v31475_v9  ;;  %28609 = vmatprep.subr.mxu0 %v31485_v35 }
 0xacb   :  { %28642 = vmatprep.subr.mxu1 %v31485_v35  ;;  %28610 = vmatpush3.msra.mxu0 %v31485_v35 }
 0xacc   :  { %28643 = vmatpush3.msra.mxu1 %v31485_v35  ;;  %28611 = vmatprep.subr.mxu0 %v31497_v39 }
 0xacd   :  { %28644 = vmatprep.subr.mxu1 %v31497_v39  ;;  %28612 = vmatpush3.msra.mxu0 %v31497_v39 }
 0xace   :  { %28645 = vmatpush3.msra.mxu1 %v31497_v39  ;;  %28614 = vmatmul.mubr.f32.vlgmr.msra.gmra.mxu0 %v12924_v22  ;;  %v14034_v22 = vand.u32 4294901760, %v14033_v45 }
 0xacf   :  { %28627 = vmatprep.subr.mxu0 %v31473_v12  ;;  %28647 = vmatmul.mubr.f32.vlgmr.msra.gmra.mxu1 %v32217_v23  ;;  %v14023_v23 = vsub.f32 %v13950_v60, %v32304_v24 }
 0xad0   :  { %28660 = vmatprep.subr.mxu1 %v31454_v32  ;;  %28628 = vmatpush3.msra.mxu0 %v31473_v12  ;;  %v14035_v5 = vsub.f32 %v14033_v45, %v14034_v22 }
 0xad1   :  { %28635 = vmatprep.mubr.f32.mxu0 %v32220_v51  ;;  %28661 = vmatpush3.msra.mxu1 %v31454_v32  ;;  %v34379_v51 = vld [vmem:[#allocation47_spill] sm:$0xff]  ;;  %v14024_v33 = vand.u32 4294901760, %v14023_v23 }
 0xad2   :  { %28668 = vmatprep.mubr.f32.mxu1 %v32214_v49  ;;  %28629 = vmatprep.subr.mxu0 %v31495_v41  ;;  %v14036_v8 = vand.u32 4294901760, %v14035_v5  ;;  %v34390_v5 = vld [vmem:[#allocation46_spill] sm:$0xff] }
 0xad3   :  { %28662 = vmatprep.subr.mxu1 %v31475_v9  ;;  %28630 = vmatpush3.msra.mxu0 %v31495_v41 }
 0xad4   :  { %28663 = vmatpush3.msra.mxu1 %v31475_v9  ;;  %28631 = vmatprep.subr.mxu0 %v31505_v37 }
 0xad5   :  { %28664 = vmatprep.subr.mxu1 %v31485_v35  ;;  %28632 = vmatpush3.msra.mxu0 %v31505_v37 }
 0xad6   :  { %28665 = vmatpush3.msra.mxu1 %v31485_v35  ;;  %28633 = vmatprep.subr.mxu0 %v31516_v20 }
 0xad7   :  { %28666 = vmatprep.subr.mxu1 %v31497_v39  ;;  %28634 = vmatpush3.msra.mxu0 %v31516_v20 }
 0xad8   :  { %28667 = vmatpush3.msra.mxu1 %v31497_v39  ;;  %28636 = vmatmul.mubr.f32.vlgmr.msra.gmra.mxu0 %v32212_v46  ;;  %v34382_v46 = vld [vmem:[#allocation38_spill] sm:$0xff] }
 0xad9   :  { %28649 = vmatprep.subr.mxu0 %v31492_v38  ;;  %28669 = vmatmul.mubr.f32.vlgmr.msra.gmra.mxu1 %v32208_v48 }
 0xada   :  { %28678 = vmatprep.subr.mxu1 %v34379_v51  ;;  %28650 = vmatpush3.msra.mxu0 %v31492_v38 }
 0xadb   :  { %28657 = vmatprep.mubr.f32.mxu0 %v32214_v49  ;;  %28679 = vmatpush3.msra.mxu1 %v34379_v51  ;;  %v14025_v49 = vsub.f32 %v14023_v23, %v14024_v33 }
 0xadc   :  { %28682 = vmatprep.mubr.f32.mxu1 %v32304_v24  ;;  %28651 = vmatprep.subr.mxu0 %v34380_v25 }
 0xadd   :  { %28680 = vmatprep.subr.mxu1 %v34381_v57  ;;  %28652 = vmatpush3.msra.mxu0 %v34380_v25  ;;  %v14026_v60 = vand.u32 4294901760, %v14025_v49  ;;  %v34389_v49 = vld [vmem:[#allocation44_spill] sm:$0xff] }
 0xade   :  { %28681 = vmatpush3.msra.mxu1 %v34381_v57  ;;  %28653 = vmatprep.subr.mxu0 %v34382_v46 }
 0xadf   :  { %28683 = vmatmul.mubr.f32.vlgmr.msra.gmra.mxu1 %v14032_v2  ;;  %28692 = vmatprep.subr.mxu1 %v34383_v61 }
 0xae0   :  { %28654 = vmatpush3.msra.mxu0 %v34382_v46  ;;  %28693 = vmatpush3.msra.mxu1 %v34383_v61 }
 0xae1   :  { %28696 = vmatprep.mubr.f32.mxu1 %v14024_v33  ;;  %28655 = vmatprep.subr.mxu0 %v34384_v28  ;;  %v34387_v33 = vld [vmem:[#allocation45_spill] sm:$0xff] }
 0xae2   :  { %28694 = vmatprep.subr.mxu1 %v34385_v50  ;;  %28656 = vmatpush3.msra.mxu0 %v34384_v28 }
 0xae3   :  { %28695 = vmatpush3.msra.mxu1 %v34385_v50  ;;  %28658 = vmatmul.mubr.f32.vlgmr.msra.gmra.mxu0 %v32208_v48  ;;  %v34386_v48 = vld [vmem:[#allocation42_spill] sm:$0xff] }
 0xae4   :  { %28671 = vmatprep.subr.mxu0 %v34383_v61  ;;  %28697 = vmatmul.mubr.f32.vlgmr.msra.gmra.mxu1 %v14034_v22  ;;  %v34388_v22 = vld [vmem:[#allocation58_spill] sm:$0xff] }
 0xae5   :  { %28706 = vmatprep.subr.mxu1 %v34383_v61  ;;  %28672 = vmatpush3.msra.mxu0 %v34383_v61 }
 0xae6   :  { %28675 = vmatprep.mubr.f32.mxu0 %v14026_v60  ;;  %28707 = vmatpush3.msra.mxu1 %v34383_v61  ;;  %v34391_v60 = vld [vmem:[#allocation59_spill] sm:$0xff] }
 0xae7   :  { %28710 = vmatprep.mubr.f32.mxu1 %v32304_v24  ;;  %28673 = vmatprep.subr.mxu0 %v34385_v50 }
 0xae8   :  { %28708 = vmatprep.subr.mxu1 %v34385_v50  ;;  %28674 = vmatpush3.msra.mxu0 %v34385_v50 }
 0xae9   :  { %28709 = vmatpush3.msra.mxu1 %v34385_v50  ;;  %28676 = vmatmul.mubr.f32.vlgmr.msra.gmra.mxu0 %v14036_v8 }
 0xaea   :  { %28685 = vmatprep.subr.mxu0 %v34386_v48  ;;  %28711 = vmatmul.mubr.f32.vlgmr.msra.gmra.mxu1 %v14032_v2 }
 0xaeb   :  { %28686 = vmatpush3.msra.mxu0 %v34386_v48  ;;  %28689 = vmatprep.mubr.f32.mxu0 %v14023_v23  ;;  %v34392_v23 = vld [vmem:[#allocation60_spill] sm:$0xff] }
 0xaec   :  { %28687 = vmatprep.subr.mxu0 %v34387_v33  ;;  %28724 = vmatprep.subr.mxu1 %v34388_v22 }
 0xaed   :  { %28688 = vmatpush3.msra.mxu0 %v34387_v33  ;;  %28725 = vmatpush3.msra.mxu1 %v34388_v22 }
 0xaee   :  { %28690 = vmatmul.mubr.f32.vlgmr.msra.gmra.mxu0 %v14033_v45  ;;  %28699 = vmatprep.subr.mxu0 %v34389_v49  ;;  %v34393_v45 = vld [vmem:[#allocation61_spill] sm:$0xff] }
 0xaef   :  { %28700 = vmatpush3.msra.mxu0 %v34389_v49  ;;  %28703 = vmatprep.mubr.f32.mxu0 %v32304_v24 }
 0xaf0   :  { %28701 = vmatprep.subr.mxu0 %v34390_v5  ;;  %28726 = vmatprep.subr.mxu1 %v34391_v60 }
 0xaf1   :  { %28702 = vmatpush3.msra.mxu0 %v34390_v5  ;;  %28727 = vmatpush3.msra.mxu1 %v34391_v60 }
 0xaf2   :  { %28704 = vmatmul.mubr.f32.vlgmr.msra.gmra.mxu0 %v14032_v2  ;;  %28728 = vmatprep.subr.mxu1 %v34392_v23 }
 0xaf3   :  { %28729 = vmatpush3.msra.mxu1 %v34392_v23  ;;  %28713 = vmatprep.subr.mxu0 %v31741_v36 }
 0xaf4   :  { %28730 = vmatprep.subr.mxu1 %v34393_v45  ;;  %28714 = vmatpush3.msra.mxu0 %v31741_v36 }
 0xaf5   :  { %28731 = vmatpush3.msra.mxu1 %v34393_v45  ;;  %28715 = vmatprep.subr.mxu0 %v31743_v16 }
 0xaf6   :  { %28746 = vmatprep.subr.mxu1 %v31741_v36  ;;  %28716 = vmatpush3.msra.mxu0 %v31743_v16 }
 0xaf7   :  { %28717 = vmatprep.subr.mxu0 %v31745_v42 }
 0xaf8   :  { %28718 = vmatpush3.msra.mxu0 %v31745_v42 }
 0xaf9   :  { %28719 = vmatprep.subr.mxu0 %v31750_v10 }
 0xafa   :  { %28720 = vmatpush3.msra.mxu0 %v31750_v10 }
 0xafb   :  { %28735 = vmatprep.subr.mxu0 %v31753_v56 }
 0xb3b   :  { %v28494_v2 = vpop.f32.mrf.mxu1 }
 0xb3d   :  { %v12479_v23 = vpop.f32.mrf.mxu1 }
 0xb43   :  { %v28516_v5 = vpop.f32.mrf.mxu1 }
 0xb44   :  { %v28483_v24 = vpop.f32.mrf.mxu0 }
 0xb45   :  { %v12486_v60 = vadd.f32 %v28494_v2, %v28483_v24  ;;  %v12649_v28 = vpop.f32.mrf.mxu1 }
 0xb46   :  { %v12378_v8 = vpop.f32.mrf.mxu0 }
 0xb47   :  { %v12480_v22 = vadd.f32 %v12479_v23, %v12378_v8 }
 0xb4c   :  { %v28505_v45 = vpop.f32.mrf.mxu0 }
 0xb4d   :  { %v12573_v33 = vadd.f32 %v28505_v45, %v12486_v60  ;;  %v28538_v46 = vpop.f32.mrf.mxu1 }
 0xb4e   :  { %v12565_v49 = vpop.f32.mrf.mxu0 }
 0xb4f   :  { %v12566_v50 = vadd.f32 %v12565_v49, %v12480_v22  ;;  %v12658_v61 = vadd.f32 %v28516_v5, %v12573_v33  ;;  %v12821_v37 = vpop.f32.mrf.mxu1 }
 0xb51   :  { %v12650_v51 = vadd.f32 %v12649_v28, %v12566_v50 }
 0xb55   :  { %v28527_v48 = vpop.f32.mrf.mxu0 }
 0xb56   :  { %v12747_v25 = vadd.f32 %v28527_v48, %v12658_v61 }
 0xb57   :  { %v12740_v57 = vpop.f32.mrf.mxu0 }
 0xb58   :  { %v12741_v20 = vadd.f32 %v12740_v57, %v12650_v51  ;;  %v12828_v41 = vadd.f32 %v28538_v46, %v12747_v25 }
 0xb5a   :  { %v12822_v24 = vadd.f32 %v12821_v37, %v12741_v20 }
 0xb69   :  { %v28560_v12 = vpop.f32.mrf.mxu1 }
 0xb6b   :  { %v13017_v23 = vpop.f32.mrf.mxu1 }
 0xb71   :  { %v28582_v45 = vpop.f32.mrf.mxu1 }
 0xb72   :  { %v28549_v38 = vpop.f32.mrf.mxu0 }
 0xb73   :  { %v12927_v35 = vadd.f32 %v28549_v38, %v12828_v41  ;;  %v13187_v8 = vpop.f32.mrf.mxu1  ;;  %v34394_v41 = vld [vmem:[#allocation66_spill] sm:$0xff] }
 0xb74   :  { %v12916_v39 = vpop.f32.mrf.mxu0 }
 0xb75   :  { %v12917_v9 = vadd.f32 %v12916_v39, %v12822_v24  ;;  %v13024_v60 = vadd.f32 %v28560_v12, %v12927_v35 }
 0xb77   :  { %v13018_v33 = vadd.f32 %v13017_v23, %v12917_v9 }
 0xb7a   :  { %v28571_v2 = vpop.f32.mrf.mxu0 }
 0xb7b   :  { %v13111_v49 = vadd.f32 %v28571_v2, %v13024_v60  ;;  %v28604_v28 = vpop.f32.mrf.mxu1 }
 0xb7c   :  { %v13103_v22 = vpop.f32.mrf.mxu0 }
 0xb7d   :  { %v13104_v5 = vadd.f32 %v13103_v22, %v13018_v33  ;;  %v13196_v61 = vadd.f32 %v28582_v45, %v13111_v49  ;;  %v13359_v38 = vpop.f32.mrf.mxu1 }
 0xb7f   :  { %v13188_v57 = vadd.f32 %v13187_v8, %v13104_v5 }
 0xb84   :  { %v28593_v50 = vpop.f32.mrf.mxu0 }
 0xb85   :  { %v13285_v51 = vadd.f32 %v28593_v50, %v13196_v61  ;;  %v28626_v9 = vpop.f32.mrf.mxu1 }
 0xb86   :  { %v13278_v25 = vpop.f32.mrf.mxu0 }
 0xb87   :  { %v13366_v46 = vadd.f32 %v28604_v28, %v13285_v51  ;;  %v13279_v48 = vadd.f32 %v13278_v25, %v13188_v57  ;;  %v13597_v24 = vpop.f32.mrf.mxu1 }
 0xb89   :  { %v13370_v37 = vadd.f32 %v34394_v41, %v13366_v46  ;;  %v13360_v39 = vadd.f32 %v13359_v38, %v13279_v48 }
 0xb8b   :  { %v26121_v20 = vmul.f32 -1.442695, %v13370_v37  ;;  %v13369_v12 = vadd.f32 %v34394_v41, %v13360_v39 }
 0xb8d   :  { %30033 = vpow2.f32 %v26121_v20  ;;  %v26120_v35 = vmul.f32 -1.442695, %v13369_v12 }
 0xb8e   :  { %v28615_v2 = vpop.f32.mrf.mxu0 }
 0xb8f   :  { %30035 = vpow2.f32 %v26120_v35  ;;  %v28648_v23 = vpop.f32.mrf.mxu1  ;;  %v13604_v61 = vadd.f32 %v28626_v9, %v28615_v2 }
 0xb90   :  { %v13496_v60 = vpop.f32.mrf.mxu0  ;;  %30037 = vtanh.f32 %v13370_v37 }
 0xb91   :  { %v13767_v45 = vpop.f32.mrf.mxu1  ;;  %v13598_v51 = vadd.f32 %v13597_v24, %v13496_v60 }
 0xb98   :  { %v28637_v22 = vpop.f32.mrf.mxu0 }
 0xb99   :  { %v28670_v33 = vpop.f32.mrf.mxu1  ;;  %v13691_v57 = vadd.f32 %v28637_v22, %v13604_v61 }
 0xb9a   :  { %v30034_v49 = vpop.eup %30033  ;;  %v13683_v50 = vpop.f32.mrf.mxu0 }
 0xb9b   :  { %v13380_v5 = vadd.f32 1.0, %v30034_v49  ;;  %v13939_v25 = vpop.f32.mrf.mxu1  ;;  %v13684_v46 = vadd.f32 %v13683_v50, %v13598_v51  ;;  %v13776_v38 = vadd.f32 %v28648_v23, %v13691_v57 }
 0xb9c   :  { %v30036_v8 = vpop.eup %30035 }
 0xb9d   :  { %30039 = vrcp.f32 %v13380_v5  ;;  %v13379_v28 = vadd.f32 1.0, %v30036_v8  ;;  %v13768_v20 = vadd.f32 %v13767_v45, %v13684_v46  ;;  %v30038_v9 = vpop.eup %30037 }
 0xb9e   :  { %30041 = vtanh.f32 %v13369_v12 }
 0xb9f   :  { %30043 = vrcp.f32 %v13379_v28  ;;  %v28684_v48 = vpop.f32.mrf.mxu1 }
 0xba1   :  { %v14119_v32 = vpop.f32.mrf.mxu1 }
 0xba3   :  { %v28659_v41 = vpop.f32.mrf.mxu0 }
 0xba4   :  { %v13865_v39 = vadd.f32 %v28659_v41, %v13776_v38  ;;  %v28698_v8 = vpop.f32.mrf.mxu1 }
 0xba5   :  { %v13858_v35 = vpop.f32.mrf.mxu0 }
 0xba6   :  { %v13859_v49 = vadd.f32 %v13858_v35, %v13768_v20  ;;  %v13946_v40 = vadd.f32 %v28670_v33, %v13865_v39  ;;  %v14283_v33 = vpop.f32.mrf.mxu1 }
 0xba8   :  { %v13940_v37 = vadd.f32 %v13939_v25, %v13859_v49 }
 0xba9   :  { %v28677_v2 = vpop.f32.mrf.mxu0 }
 0xbaa   :  { %v30040_v5 = vpop.eup %30039  ;;  %v14039_v12 = vadd.f32 %v28677_v2, %v13946_v40  ;;  %v28712_v38 = vpop.f32.mrf.mxu1 }
 0xbab   :  { %v30042_v24 = vpop.eup %30041  ;;  %v14028_v60 = vpop.f32.mrf.mxu0  ;;  %v32378_v22 = vsel %vm31704_vm7, %v30038_v9, %v30040_v5  ;;  %v32388_v9 = vld [vmem:[#allocation10] ss:$0 sm:$0xff] }
 0xbac   :  { %v30044_v23 = vpop.eup %30043  ;;  %v14029_v61 = vadd.f32 %v14028_v60, %v13940_v37  ;;  %v14126_v28 = vadd.f32 %v28684_v48, %v14039_v12  ;;  %13393 = vrot.lane.b32.xlu1 %v32378_v22, %s30486_s7  ;;  %v14447_v37 = vpop.f32.mrf.mxu1 }
 0xbad   :  { %v32384_v45 = vsel %vm31704_vm7, %v30042_v24, %v30044_v23 }
 0xbae   :  { %v28691_v50 = vpop.f32.mrf.mxu0  ;;  %v14120_v51 = vadd.f32 %v14119_v32, %v14029_v61  ;;  %13391 = vrot.lane.b32.xlu0 %v32384_v45, %s30486_s7 }
 0xbaf   :  { %v14209_v40 = vadd.f32 %v28691_v50, %v14126_v28 }
 0xbb0   :  { %v14201_v57 = vpop.f32.mrf.mxu0 }
 0xbb1   :  { %v14202_v25 = vadd.f32 %v14201_v57, %v14120_v51  ;;  %v14292_v46 = vadd.f32 %v28698_v8, %v14209_v40 }
 0xbb2   :  { %v28705_v41 = vpop.f32.mrf.mxu0 }
 0xbb3   :  { %v14375_v48 = vadd.f32 %v28705_v41, %v14292_v46  ;;  %v14284_v39 = vadd.f32 %v14283_v33, %v14202_v25 }
 0xbb4   :  { %v14368_v20 = vpop.f32.mrf.mxu0 }
 0xbb5   :  { %v14454_v35 = vadd.f32 %v28712_v38, %v14375_v48  ;;  %v14369_v49 = vadd.f32 %v14368_v20, %v14284_v39 }
 0xbb7   :  { %v14458_v2 = vadd.f32 %v32388_v9, %v14454_v35  ;;  %v14448_v32 = vadd.f32 %v14447_v37, %v14369_v49  ;;  %v13388_v49 = vmul.f32 %v32378_v22, %v32132_v3 }
 0xbb9   :  { %v26123_v5 = vmul.f32 -1.442695, %v14458_v2  ;;  %v14457_v12 = vadd.f32 %v32388_v9, %v14448_v32  ;;  %v13387_v32 = vmul.f32 %v32384_v45, %v32136_v18 }
 0xbbb   :  { %30045 = vpow2.f32 %v26123_v5  ;;  %v26122_v24 = vmul.f32 -1.442695, %v14457_v12 }
 0xbbd   :  { %30047 = vpow2.f32 %v26122_v24 }
 0xbbe   :  { %30049 = vtanh.f32 %v14458_v2 }
 0xbc8   :  { %v30046_v8 = vpop.eup %30045 }
 0xbc9   :  { %v14468_v60 = vadd.f32 1.0, %v30046_v8 }
 0xbca   :  { %v30048_v23 = vpop.eup %30047 }
 0xbcb   :  { %30051 = vrcp.f32 %v14468_v60  ;;  %v14467_v61 = vadd.f32 1.0, %v30048_v23  ;;  %v30050_v28 = vpop.eup %30049 }
 0xbcc   :  { %30053 = vtanh.f32 %v14457_v12 }
 0xbcd   :  { %30055 = vrcp.f32 %v14467_v61 }
 0xbd8   :  { %v30052_v33 = vpop.eup %30051 }
 0xbd9   :  { %v30054_v50 = vpop.eup %30053  ;;  %v14474_v51 = vsel %vm31704_vm7, %v30050_v28, %v30052_v33 }
 0xbda   :  { %v30056_v40 = vpop.eup %30055  ;;  %14481 = vrot.lane.b32.xlu1 %v14474_v51, %s30486_s7  ;;  %v14476_v3 = vmul.f32 %v14474_v51, %v32142_v58 }
 0xbdb   :  { %v14473_v57 = vsel %vm31704_vm7, %v30054_v50, %v30056_v40 }
 0xbdc   :  { %14479 = vrot.lane.b32.xlu0 %v14473_v57, %s30486_s7  ;;  %v14475_v18 = vmul.f32 %v14473_v57, %v32146_v4 }
 0xc1e   :  { %v13394_v25 = vpop.permute.xlu1 %13393 }
 0xc1f   :  { %v13398_v46 = vmul.f32 %v13394_v25, %v32378_v22 }
 0xc20   :  { %v13392_v38 = vpop.permute.xlu0 %13391 }
 0xc21   :  { %v13397_v41 = vmul.f32 %v13392_v38, %v32384_v45  ;;  %13403 = vrot.lane.b32.xlu1 %v13398_v46, %s30487_s21 }
 0xc23   :  { %13401 = vrot.lane.b32.xlu0 %v13397_v41, %s30487_s21 }
 0xc4c   :  { %v14482_v48 = vpop.permute.xlu1 %14481 }
 0xc4d   :  { %v14486_v39 = vmul.f32 %v14482_v48, %v14474_v51 }
 0xc4e   :  { %v14480_v20 = vpop.permute.xlu0 %14479 }
 0xc4f   :  { %v14485_v35 = vmul.f32 %v14480_v20, %v14473_v57  ;;  %14491 = vrot.lane.b32.xlu1 %v14486_v39, %s30487_s21 }
 0xc51   :  { %14489 = vrot.lane.b32.xlu0 %v14485_v35, %s30487_s21 }
 0xc93   :  { %v13404_v37 = vpop.permute.xlu1 %13403 }
 0xc94   :  { %v32406_v2 = vadd.f32 %v13404_v37, %v13388_v49 }
 0xc95   :  { %v13402_v5 = vpop.permute.xlu0 %13401 }
 0xc96   :  { %30057 = vtanh.f32 %v32406_v2  ;;  %v32411_v12 = vadd.f32 %v13402_v5, %v13387_v32 }
 0xc98   :  { %30059 = vtanh.f32 %v32411_v12 }
 0xca3   :  { %v30058_v24 = vpop.eup %30057 }
 0xca4   :  { %13415 = vrot.lane.b32.xlu1 %v30058_v24, %s30486_s7 }
 0xca5   :  { %v30060_v8 = vpop.eup %30059 }
 0xca6   :  { %13413 = vrot.lane.b32.xlu0 %v30060_v8, %s30486_s7 }
 0xcc1   :  { %v14492_v60 = vpop.permute.xlu1 %14491 }
 0xcc2   :  { %v32417_v23 = vadd.f32 %v14492_v60, %v14476_v3 }
 0xcc3   :  { %v14490_v61 = vpop.permute.xlu0 %14489 }
 0xcc4   :  { %30061 = vtanh.f32 %v32417_v23  ;;  %v32421_v28 = vadd.f32 %v14490_v61, %v14475_v18 }
 0xcc6   :  { %30063 = vtanh.f32 %v32421_v28 }
 0xcd1   :  { %v30062_v33 = vpop.eup %30061 }
 0xcd2   :  { %14503 = vrot.lane.b32.xlu1 %v30062_v33, %s30486_s7 }
 0xcd3   :  { %v30064_v50 = vpop.eup %30063 }
 0xcd4   :  { %14501 = vrot.lane.b32.xlu0 %v30064_v50, %s30486_s7 }
 0xd16   :  { %v13416_v40 = vpop.permute.xlu1 %13415 }
 0xd17   :  { %v13420_v58 = vmul.f32 %v13416_v40, %v32378_v22 }
 0xd18   :  { %v13414_v25 = vpop.permute.xlu0 %13413 }
 0xd19   :  { %v13419_v46 = vmul.f32 %v13414_v25, %v32384_v45  ;;  %14513 = vrot.lane.b32.xlu1 %v13420_v58, %s30487_s21 }
 0xd1b   :  { %14511 = vrot.lane.b32.xlu0 %v13419_v46, %s30487_s21 }
 0xd44   :  { %v14504_v4 = vpop.permute.xlu1 %14503 }
 0xd45   :  { %v14508_v38 = vmul.f32 %v14504_v4, %v14474_v51 }
 0xd46   :  { %v14502_v41 = vpop.permute.xlu0 %14501 }
 0xd47   :  { %v14507_v48 = vmul.f32 %v14502_v41, %v14473_v57  ;;  %15051 = vrot.lane.b32.xlu1 %v14508_v38, %s30487_s21 }
 0xd49   :  { %15049 = vrot.lane.b32.xlu0 %v14507_v48, %s30487_s21 }
 0xd8b   :  { %v14514_v39 = vpop.permute.xlu1 %14513 }
 0xd8c   :  { %v14517_v20 = vsel %vm8983_vm8, %v14514_v39, 0 }
 0xd8d   :  { %v14598_v35 = vand.u32 4294901760, %v14517_v20  ;;  %v14512_v22 = vpop.permute.xlu0 %14511 }
 0xd8e   :  { %v14515_v49 = vsel %vm8983_vm8, %v14512_v22, 0  ;;  %v34400_v22 = vld [vmem:[#allocation50_spill] sm:$0xff] }
 0xd8f   :  { %v14599_v45 = vsub.f32 %v14517_v20, %v14598_v35  ;;  %v14588_v37 = vand.u32 4294901760, %v14515_v49  ;;  %v34396_v20 = vld [vmem:[#allocation28_spill] sm:$0xff] }
 0xd91   :  { %v14600_v32 = vand.u32 4294901760, %v14599_v45  ;;  %v14589_v5 = vsub.f32 %v14515_v49, %v14588_v37  ;;  %28732 = vmatprep.mubr.f32.mxu1 %v14588_v37  ;;  %v7173_v49 = vmax.f32 %v34400_v22, 0.0  ;;  %v34416_v22 = vld [vmem:[#allocation58_spill] sm:$0xff] }
 0xd92   :  { %28733 = vmatmul.mubr.f32.vlgmr.msra.gmra.mxu1 %v14598_v35 }
 0xd93   :  { %28747 = vmatpush3.msra.mxu1 %v31741_v36  ;;  %v14590_v51 = vand.u32 4294901760, %v14589_v5  ;;  %v14601_v57 = vsub.f32 %v14599_v45, %v14600_v32 }
 0xd94   :  { %28748 = vmatprep.subr.mxu1 %v31743_v16 }
 0xd95   :  { %28749 = vmatpush3.msra.mxu1 %v31743_v16  ;;  %28754 = vmatprep.mubr.f32.mxu1 %v14590_v51  ;;  %v14591_v24 = vsub.f32 %v14589_v5, %v14590_v51  ;;  %v14602_v3 = vand.u32 4294901760, %v14601_v57  ;;  %v34403_v51 = vld [vmem:[#allocation33_spill] sm:$0xff] }
 0xd96   :  { %28750 = vmatprep.subr.mxu1 %v31745_v42 }
 0xd97   :  { %28751 = vmatpush3.msra.mxu1 %v31745_v42  ;;  %v14592_v8 = vand.u32 4294901760, %v14591_v24 }
 0xd98   :  { %28752 = vmatprep.subr.mxu1 %v31750_v10 }
 0xd99   :  { %28753 = vmatpush3.msra.mxu1 %v31750_v10  ;;  %28721 = vmatprep.mubr.f32.mxu0 %v14592_v8  ;;  %v34404_v8 = vld [vmem:[#allocation35_spill] sm:$0xff] }
 0xd9a   :  { %28755 = vmatmul.mubr.f32.vlgmr.msra.gmra.mxu1 %v14600_v32  ;;  %28768 = vmatprep.subr.mxu1 %v31741_v36 }
 0xd9b   :  { %28722 = vmatmul.mubr.f32.vlgmr.msra.gmra.mxu0 %v14602_v3  ;;  %28769 = vmatpush3.msra.mxu1 %v31741_v36  ;;  %v34405_v3 = vld [vmem:[#allocation37_spill] sm:$0xff] }
 0xd9c   :  { %28736 = vmatpush3.msra.mxu0 %v31753_v56  ;;  %28776 = vmatprep.mubr.f32.mxu1 %v14588_v37 }
 0xd9d   :  { %28737 = vmatprep.subr.mxu0 %v31756_v19  ;;  %28743 = vmatprep.mubr.f32.mxu0 %v14589_v5  ;;  %v16166_v5 = vsel %vm4595_vm4, %v7173_v49, 0  ;;  %v34417_v49 = vld [vmem:[#allocation44_spill] sm:$0xff] }
 0xd9e   :  { %28770 = vmatprep.subr.mxu1 %v31743_v16  ;;  %28738 = vmatpush3.msra.mxu0 %v31756_v19  ;;  %v32579_v57 = vand.u32 4294901760, %v16166_v5 }
 0xd9f   :  { %28771 = vmatpush3.msra.mxu1 %v31743_v16  ;;  %28739 = vmatprep.subr.mxu0 %v31759_v17 }
 0xda0   :  { %28772 = vmatprep.subr.mxu1 %v31745_v42  ;;  %28740 = vmatpush3.msra.mxu0 %v31759_v17 }
 0xda1   :  { %28773 = vmatpush3.msra.mxu1 %v31745_v42  ;;  %28741 = vmatprep.subr.mxu0 %v34368_v21 }
 0xda2   :  { %28774 = vmatprep.subr.mxu1 %v31750_v10  ;;  %28742 = vmatpush3.msra.mxu0 %v34368_v21 }
 0xda3   :  { %28775 = vmatpush3.msra.mxu1 %v31750_v10  ;;  %28744 = vmatmul.mubr.f32.vlgmr.msra.gmra.mxu0 %v14599_v45  ;;  %v34401_v45 = vld [vmem:[#allocation29_spill] sm:$0xff] }
 0xda4   :  { %28757 = vmatprep.subr.mxu0 %v34369_v30  ;;  %28777 = vmatmul.mubr.f32.vlgmr.msra.gmra.mxu1 %v14598_v35 }
 0xda5   :  { %28758 = vmatpush3.msra.mxu0 %v34369_v30  ;;  %28765 = vmatprep.mubr.f32.mxu0 %v14588_v37  ;;  %v34402_v37 = vld [vmem:[#allocation52_spill] sm:$0xff] }
 0xda6   :  { %28759 = vmatprep.subr.mxu0 %v34370_v31  ;;  %28790 = vmatprep.subr.mxu1 %v34371_v34  ;;  %v8961_v32 = vmax.f32 %v34402_v37, 0.0  ;;  %v34419_v37 = vld [vmem:[#allocation59_spill] sm:$0xff] }
 0xda7   :  { %28760 = vmatpush3.msra.mxu0 %v34370_v31  ;;  %28791 = vmatpush3.msra.mxu1 %v34371_v34 }
 0xda8   :  { %28761 = vmatprep.subr.mxu0 %v34372_v6  ;;  %28792 = vmatprep.subr.mxu1 %v34373_v11  ;;  %v16169_v24 = vsel %vm4595_vm4, %v8961_v32, 0  ;;  %v34420_v32 = vld [vmem:[#allocation60_spill] sm:$0xff] }
 0xda9   :  { %28762 = vmatpush3.msra.mxu0 %v34372_v6  ;;  %28793 = vmatpush3.msra.mxu1 %v34373_v11 }
 0xdaa   :  { %28763 = vmatprep.subr.mxu0 %v34374_v26  ;;  %28794 = vmatprep.subr.mxu1 %v34375_v59 }
 0xdab   :  { %28764 = vmatpush3.msra.mxu0 %v34374_v26  ;;  %28795 = vmatpush3.msra.mxu1 %v34375_v59 }
 0xdac   :  { %28766 = vmatmul.mubr.f32.vlgmr.msra.gmra.mxu0 %v14598_v35  ;;  %28796 = vmatprep.subr.mxu1 %v34376_v13  ;;  %v34399_v35 = vld [vmem:[#allocation34_spill] sm:$0xff] }
 0xdad   :  { %28797 = vmatpush3.msra.mxu1 %v34376_v13  ;;  %28779 = vmatprep.subr.mxu0 %v31814_v15 }
 0xdae   :  { %28812 = vmatprep.subr.mxu1 %v31814_v15  ;;  %28780 = vmatpush3.msra.mxu0 %v31814_v15 }
 0xdaf   :  { %28781 = vmatprep.subr.mxu0 %v31874_v54 }
 0xdb0   :  { %28782 = vmatpush3.msra.mxu0 %v31874_v54 }
 0xdb1   :  { %28783 = vmatprep.subr.mxu0 %v31882_v14 }
 0xdb2   :  { %28784 = vmatpush3.msra.mxu0 %v31882_v14 }
 0xdb3   :  { %28785 = vmatprep.subr.mxu0 %v31895_v0 }
 0xdb4   :  { %28786 = vmatpush3.msra.mxu0 %v31895_v0 }
 0xdb5   :  { %28801 = vmatprep.subr.mxu0 %v31825_v47 }
 0xdb9   :  { %v15052_v60 = vpop.permute.xlu1 %15051 }
 0xdba   :  { %v15055_v18 = vsel %vm8983_vm8, %v15052_v60, 0  ;;  %v16248_v60 = vand.u32 4294901760, %v16169_v24 }
 0xdbb   :  { %v32483_v61 = vand.u32 4294901760, %v15055_v18  ;;  %v15050_v33 = vpop.permute.xlu0 %15049 }
 0xdbc   :  { %v15053_v50 = vsel %vm8983_vm8, %v15050_v33, 0  ;;  %v34406_v33 = vld [vmem:[#allocation32_spill] sm:$0xff] }
 0xdbd   :  { %v32487_v40 = vsub.f32 %v15055_v18, %v32483_v61  ;;  %v32489_v58 = vand.u32 4294901760, %v15053_v50  ;;  %v16239_v18 = vsub.f32 %v16166_v5, %v32579_v57  ;;  %v34421_v5 = vld [vmem:[#allocation61_spill] sm:$0xff] }
 0xdbf   :  { %v32492_v25 = vand.u32 4294901760, %v32487_v40  ;;  %v32495_v46 = vsub.f32 %v15053_v50, %v32489_v58  ;;  %28798 = vmatprep.mubr.f32.mxu1 %v32489_v58  ;;  %v34407_v50 = vld [vmem:[#allocation47_spill] sm:$0xff] }
 0xdc0   :  { %28799 = vmatmul.mubr.f32.vlgmr.msra.gmra.mxu1 %v32483_v61 }
 0xdc1   :  { %28813 = vmatpush3.msra.mxu1 %v31814_v15  ;;  %v15128_v4 = vand.u32 4294901760, %v32495_v46  ;;  %v15139_v38 = vsub.f32 %v32487_v40, %v32492_v25 }
 0xdc2   :  { %28814 = vmatprep.subr.mxu1 %v31874_v54 }
 0xdc3   :  { %28815 = vmatpush3.msra.mxu1 %v31874_v54  ;;  %28820 = vmatprep.mubr.f32.mxu1 %v15128_v4  ;;  %v15129_v41 = vsub.f32 %v32495_v46, %v15128_v4  ;;  %v15140_v39 = vand.u32 4294901760, %v15139_v38  ;;  %v34409_v38 = vld [vmem:[#allocation48_spill] sm:$0xff] }
 0xdc4   :  { %28816 = vmatprep.subr.mxu1 %v31882_v14 }
 0xdc5   :  { %28817 = vmatpush3.msra.mxu1 %v31882_v14  ;;  %v15130_v48 = vand.u32 4294901760, %v15129_v41 }
 0xdc6   :  { %28818 = vmatprep.subr.mxu1 %v31895_v0 }
 0xdc7   :  { %28819 = vmatpush3.msra.mxu1 %v31895_v0  ;;  %28787 = vmatprep.mubr.f32.mxu0 %v15130_v48 }
 0xdc8   :  { %28821 = vmatmul.mubr.f32.vlgmr.msra.gmra.mxu1 %v32492_v25  ;;  %28834 = vmatprep.subr.mxu1 %v31814_v15 }
 0xdc9   :  { %28788 = vmatmul.mubr.f32.vlgmr.msra.gmra.mxu0 %v15140_v39  ;;  %28835 = vmatpush3.msra.mxu1 %v31814_v15 }
 0xdca   :  { %28802 = vmatpush3.msra.mxu0 %v31825_v47  ;;  %28842 = vmatprep.mubr.f32.mxu1 %v32489_v58 }
 0xdcb   :  { %28803 = vmatprep.subr.mxu0 %v31880_v55  ;;  %28809 = vmatprep.mubr.f32.mxu0 %v32495_v46 }
 0xdcc   :  { %28836 = vmatprep.subr.mxu1 %v31874_v54  ;;  %28804 = vmatpush3.msra.mxu0 %v31880_v55 }
 0xdcd   :  { %28837 = vmatpush3.msra.mxu1 %v31874_v54  ;;  %28805 = vmatprep.subr.mxu0 %v31893_v63 }
 0xdce   :  { %28838 = vmatprep.subr.mxu1 %v31882_v14  ;;  %28806 = vmatpush3.msra.mxu0 %v31893_v63 }
 0xdcf   :  { %28839 = vmatpush3.msra.mxu1 %v31882_v14  ;;  %28807 = vmatprep.subr.mxu0 %v31905_v7 }
 0xdd0   :  { %28840 = vmatprep.subr.mxu1 %v31895_v0  ;;  %28808 = vmatpush3.msra.mxu0 %v31905_v7 }
 0xdd1   :  { %28841 = vmatpush3.msra.mxu1 %v31895_v0  ;;  %28810 = vmatmul.mubr.f32.vlgmr.msra.gmra.mxu0 %v32487_v40 }
 0xdd2   :  { %28823 = vmatprep.subr.mxu0 %v31836_v53  ;;  %28843 = vmatmul.mubr.f32.vlgmr.msra.gmra.mxu1 %v32483_v61 }
 0xdd3   :  { %28856 = vmatprep.subr.mxu1 %v31530_v43  ;;  %28824 = vmatpush3.msra.mxu0 %v31836_v53 }
 0xdd4   :  { %28831 = vmatprep.mubr.f32.mxu0 %v32489_v58  ;;  %28857 = vmatpush3.msra.mxu1 %v31530_v43  ;;  %v34395_v43 = vld [vmem:[#allocation40_spill] sm:$0xff] }
 0xdd5   :  { %28864 = vmatprep.mubr.f32.mxu1 %v32489_v58  ;;  %28825 = vmatprep.subr.mxu0 %v31890_v1 }
 0xdd6   :  { %28858 = vmatprep.subr.mxu1 %v31548_v62  ;;  %28826 = vmatpush3.msra.mxu0 %v31890_v1 }
 0xdd7   :  { %28859 = vmatpush3.msra.mxu1 %v31548_v62  ;;  %28827 = vmatprep.subr.mxu0 %v31902_v44  ;;  %v34397_v62 = vld [vmem:[#allocation30_spill] sm:$0xff] }
 0xdd8   :  { %28860 = vmatprep.subr.mxu1 %v31555_v52  ;;  %28828 = vmatpush3.msra.mxu0 %v31902_v44 }
 0xdd9   :  { %28861 = vmatpush3.msra.mxu1 %v31555_v52  ;;  %28829 = vmatprep.subr.mxu0 %v31914_v29  ;;  %v34398_v52 = vld [vmem:[#allocation31_spill] sm:$0xff] }
 0xdda   :  { %28862 = vmatprep.subr.mxu1 %v34395_v43  ;;  %28830 = vmatpush3.msra.mxu0 %v31914_v29 }
 0xddb   :  { %28863 = vmatpush3.msra.mxu1 %v34395_v43  ;;  %28832 = vmatmul.mubr.f32.vlgmr.msra.gmra.mxu0 %v32483_v61  ;;  %v34413_v43 = vld [vmem:[#allocation43_spill] sm:$0xff] }
 0xddc   :  { %28845 = vmatprep.subr.mxu0 %v34396_v20  ;;  %28865 = vmatmul.mubr.f32.vlgmr.msra.gmra.mxu1 %v32483_v61 }
 0xddd   :  { %28878 = vmatprep.subr.mxu1 %v34396_v20  ;;  %28846 = vmatpush3.msra.mxu0 %v34396_v20 }
 0xdde   :  { %28853 = vmatprep.mubr.f32.mxu0 %v15130_v48  ;;  %28879 = vmatpush3.msra.mxu1 %v34396_v20  ;;  %v34411_v48 = vld [vmem:[#allocation41_spill] sm:$0xff] }
 0xddf   :  { %28886 = vmatprep.mubr.f32.mxu1 %v15128_v4  ;;  %28847 = vmatprep.subr.mxu0 %v34397_v62  ;;  %v16240_v4 = vand.u32 4294901760, %v16239_v18 }
 0xde0   :  { %28880 = vmatprep.subr.mxu1 %v34397_v62  ;;  %28848 = vmatpush3.msra.mxu0 %v34397_v62 }
 0xde1   :  { %28881 = vmatpush3.msra.mxu1 %v34397_v62  ;;  %28849 = vmatprep.subr.mxu0 %v34398_v52 }
 0xde2   :  { %28882 = vmatprep.subr.mxu1 %v34398_v52  ;;  %28850 = vmatpush3.msra.mxu0 %v34398_v52 }
 0xde3   :  { %28883 = vmatpush3.msra.mxu1 %v34398_v52  ;;  %28851 = vmatprep.subr.mxu0 %v34399_v35 }
 0xde4   :  { %28884 = vmatprep.subr.mxu1 %v34399_v35  ;;  %28852 = vmatpush3.msra.mxu0 %v34399_v35 }
 0xde5   :  { %28885 = vmatpush3.msra.mxu1 %v34399_v35  ;;  %28854 = vmatmul.mubr.f32.vlgmr.msra.gmra.mxu0 %v15140_v39  ;;  %v34412_v39 = vld [vmem:[#allocation39_spill] sm:$0xff] }
 0xde6   :  { %28867 = vmatprep.subr.mxu0 %v34401_v45  ;;  %28887 = vmatmul.mubr.f32.vlgmr.msra.gmra.mxu1 %v32492_v25  ;;  %v16249_v25 = vsub.f32 %v16169_v24, %v16248_v60 }
 0xde7   :  { %28900 = vmatprep.subr.mxu1 %v34396_v20  ;;  %28868 = vmatpush3.msra.mxu0 %v34401_v45  ;;  %v34418_v45 = vld [vmem:[#allocation46_spill] sm:$0xff] }
 0xde8   :  { %28875 = vmatprep.mubr.f32.mxu0 %v32495_v46  ;;  %28901 = vmatpush3.msra.mxu1 %v34396_v20  ;;  %v34408_v46 = vld [vmem:[#allocation36_spill] sm:$0xff]  ;;  %v16250_v41 = vand.u32 4294901760, %v16249_v25 }
 0xde9   :  { %28908 = vmatprep.mubr.f32.mxu1 %v32489_v58  ;;  %28869 = vmatprep.subr.mxu0 %v34403_v51 }
 0xdea   :  { %28902 = vmatprep.subr.mxu1 %v34397_v62  ;;  %28870 = vmatpush3.msra.mxu0 %v34403_v51  ;;  %v16251_v20 = vsub.f32 %v16249_v25, %v16250_v41 }
 0xdeb   :  { %28903 = vmatpush3.msra.mxu1 %v34397_v62  ;;  %28871 = vmatprep.subr.mxu0 %v34404_v8 }
 0xdec   :  { %28904 = vmatprep.subr.mxu1 %v34398_v52  ;;  %28872 = vmatpush3.msra.mxu0 %v34404_v8 }
 0xded   :  { %28905 = vmatpush3.msra.mxu1 %v34398_v52  ;;  %28873 = vmatprep.subr.mxu0 %v34405_v3  ;;  %v16252_v52 = vand.u32 4294901760, %v16251_v20 }
 0xdee   :  { %28906 = vmatprep.subr.mxu1 %v34399_v35  ;;  %28874 = vmatpush3.msra.mxu0 %v34405_v3 }
 0xdef   :  { %28907 = vmatpush3.msra.mxu1 %v34399_v35  ;;  %28876 = vmatmul.mubr.f32.vlgmr.msra.gmra.mxu0 %v32487_v40  ;;  %v34410_v40 = vld [vmem:[#allocation38_spill] sm:$0xff]  ;;  %v34415_v35 = vld [vmem:[#allocation45_spill] sm:$0xff] }
 0xdf0   :  { %28889 = vmatprep.subr.mxu0 %v34406_v33  ;;  %28909 = vmatmul.mubr.f32.vlgmr.msra.gmra.mxu1 %v32483_v61 }
 0xdf1   :  { %28918 = vmatprep.subr.mxu1 %v34407_v50  ;;  %28890 = vmatpush3.msra.mxu0 %v34406_v33 }
 0xdf2   :  { %28897 = vmatprep.mubr.f32.mxu0 %v32489_v58  ;;  %28919 = vmatpush3.msra.mxu1 %v34407_v50  ;;  %v16241_v58 = vsub.f32 %v16239_v18, %v16240_v4 }
 0xdf3   :  { %28922 = vmatprep.mubr.f32.mxu1 %v32579_v57  ;;  %28891 = vmatprep.subr.mxu0 %v34408_v46 }
 0xdf4   :  { %28920 = vmatprep.subr.mxu1 %v34409_v38  ;;  %28892 = vmatpush3.msra.mxu0 %v34408_v46  ;;  %v16242_v62 = vand.u32 4294901760, %v16241_v58 }
 0xdf5   :  { %28921 = vmatpush3.msra.mxu1 %v34409_v38  ;;  %28893 = vmatprep.subr.mxu0 %v34410_v40 }
 0xdf6   :  { %28923 = vmatmul.mubr.f32.vlgmr.msra.gmra.mxu1 %v16248_v60  ;;  %28932 = vmatprep.subr.mxu1 %v34411_v48 }
 0xdf7   :  { %28894 = vmatpush3.msra.mxu0 %v34410_v40  ;;  %28933 = vmatpush3.msra.mxu1 %v34411_v48 }
 0xdf8   :  { %28936 = vmatprep.mubr.f32.mxu1 %v16240_v4  ;;  %28895 = vmatprep.subr.mxu0 %v34412_v39 }
 0xdf9   :  { %28934 = vmatprep.subr.mxu1 %v34413_v43  ;;  %28896 = vmatpush3.msra.mxu0 %v34412_v39 }
 0xdfa   :  { %28935 = vmatpush3.msra.mxu1 %v34413_v43  ;;  %28898 = vmatmul.mubr.f32.vlgmr.msra.gmra.mxu0 %v32483_v61  ;;  %v34414_v61 = vld [vmem:[#allocation42_spill] sm:$0xff] }
 0xdfb   :  { %28911 = vmatprep.subr.mxu0 %v34411_v48  ;;  %28937 = vmatmul.mubr.f32.vlgmr.msra.gmra.mxu1 %v16250_v41 }
 0xdfc   :  { %28946 = vmatprep.subr.mxu1 %v34411_v48  ;;  %28912 = vmatpush3.msra.mxu0 %v34411_v48 }
 0xdfd   :  { %28915 = vmatprep.mubr.f32.mxu0 %v16242_v62  ;;  %28947 = vmatpush3.msra.mxu1 %v34411_v48 }
 0xdfe   :  { %28950 = vmatprep.mubr.f32.mxu1 %v32579_v57  ;;  %28913 = vmatprep.subr.mxu0 %v34413_v43 }
 0xdff   :  { %28948 = vmatprep.subr.mxu1 %v34413_v43  ;;  %28914 = vmatpush3.msra.mxu0 %v34413_v43 }
 0xe00   :  { %28949 = vmatpush3.msra.mxu1 %v34413_v43  ;;  %28916 = vmatmul.mubr.f32.vlgmr.msra.gmra.mxu0 %v16252_v52 }
 0xe01   :  { %28925 = vmatprep.subr.mxu0 %v34414_v61  ;;  %28951 = vmatmul.mubr.f32.vlgmr.msra.gmra.mxu1 %v16248_v60 }
 0xe02   :  { %28926 = vmatpush3.msra.mxu0 %v34414_v61  ;;  %28929 = vmatprep.mubr.f32.mxu0 %v16239_v18 }
 0xe03   :  { %28927 = vmatprep.subr.mxu0 %v34415_v35  ;;  %28964 = vmatprep.subr.mxu1 %v34416_v22 }
 0xe04   :  { %28928 = vmatpush3.msra.mxu0 %v34415_v35  ;;  %28965 = vmatpush3.msra.mxu1 %v34416_v22 }
 0xe05   :  { %28930 = vmatmul.mubr.f32.vlgmr.msra.gmra.mxu0 %v16249_v25  ;;  %28939 = vmatprep.subr.mxu0 %v34417_v49 }
 0xe06   :  { %28940 = vmatpush3.msra.mxu0 %v34417_v49  ;;  %28943 = vmatprep.mubr.f32.mxu0 %v32579_v57 }
 0xe07   :  { %28941 = vmatprep.subr.mxu0 %v34418_v45  ;;  %28966 = vmatprep.subr.mxu1 %v34419_v37 }
 0xe08   :  { %28942 = vmatpush3.msra.mxu0 %v34418_v45  ;;  %28967 = vmatpush3.msra.mxu1 %v34419_v37 }
 0xe09   :  { %28944 = vmatmul.mubr.f32.vlgmr.msra.gmra.mxu0 %v16248_v60  ;;  %28968 = vmatprep.subr.mxu1 %v34420_v32 }
 0xe0a   :  { %28969 = vmatpush3.msra.mxu1 %v34420_v32  ;;  %28953 = vmatprep.subr.mxu0 %v31741_v36 }
 0xe0b   :  { %28970 = vmatprep.subr.mxu1 %v34421_v5  ;;  %28954 = vmatpush3.msra.mxu0 %v31741_v36 }
 0xe0c   :  { %28971 = vmatpush3.msra.mxu1 %v34421_v5  ;;  %28955 = vmatprep.subr.mxu0 %v31743_v16 }
 0xe0d   :  { %28986 = vmatprep.subr.mxu1 %v31741_v36  ;;  %28956 = vmatpush3.msra.mxu0 %v31743_v16 }
 0xe0e   :  { %28957 = vmatprep.subr.mxu0 %v31745_v42 }
 0xe0f   :  { %28958 = vmatpush3.msra.mxu0 %v31745_v42 }
 0xe10   :  { %28959 = vmatprep.subr.mxu0 %v31750_v10 }
 0xe11   :  { %28960 = vmatpush3.msra.mxu0 %v31750_v10 }
 0xe12   :  { %28975 = vmatprep.subr.mxu0 %v31753_v56 }
 0xe52   :  { %v28734_v57 = vpop.f32.mrf.mxu1 }
 0xe54   :  { %v14695_v3 = vpop.f32.mrf.mxu1 }
 0xe5a   :  { %v28756_v18 = vpop.f32.mrf.mxu1 }
 0xe5b   :  { %v28723_v51 = vpop.f32.mrf.mxu0 }
 0xe5c   :  { %v14702_v60 = vadd.f32 %v28734_v57, %v28723_v51  ;;  %v14865_v38 = vpop.f32.mrf.mxu1 }
 0xe5d   :  { %v14594_v24 = vpop.f32.mrf.mxu0 }
 0xe5e   :  { %v14696_v50 = vadd.f32 %v14695_v3, %v14594_v24 }
 0xe63   :  { %v28745_v8 = vpop.f32.mrf.mxu0 }
 0xe64   :  { %v14789_v25 = vadd.f32 %v28745_v8, %v14702_v60  ;;  %v28778_v41 = vpop.f32.mrf.mxu1 }
 0xe65   :  { %v14781_v33 = vpop.f32.mrf.mxu0 }
 0xe66   :  { %v14782_v4 = vadd.f32 %v14781_v33, %v14696_v50  ;;  %v14874_v40 = vadd.f32 %v28756_v18, %v14789_v25  ;;  %v15037_v62 = vpop.f32.mrf.mxu1 }
 0xe68   :  { %v14866_v39 = vadd.f32 %v14865_v38, %v14782_v4 }
 0xe6c   :  { %v28767_v46 = vpop.f32.mrf.mxu0 }
 0xe6d   :  { %v14963_v58 = vadd.f32 %v28767_v46, %v14874_v40 }
 0xe6e   :  { %v14956_v48 = vpop.f32.mrf.mxu0 }
 0xe6f   :  { %v14957_v20 = vadd.f32 %v14956_v48, %v14866_v39  ;;  %v15044_v52 = vadd.f32 %v28778_v41, %v14963_v58  ;;  %v32649_v48 = vld [vmem:[#allocation12] ss:$0 sm:$0xff] }
 0xe71   :  { %v15038_v49 = vadd.f32 %v15037_v62, %v14957_v20 }
 0xe80   :  { %v28800_v61 = vpop.f32.mrf.mxu1 }
 0xe82   :  { %v15233_v32 = vpop.f32.mrf.mxu1 }
 0xe88   :  { %v28822_v51 = vpop.f32.mrf.mxu1 }
 0xe89   :  { %v28789_v43 = vpop.f32.mrf.mxu0 }
 0xe8a   :  { %v15143_v22 = vadd.f32 %v28789_v43, %v15044_v52  ;;  %v15403_v60 = vpop.f32.mrf.mxu1 }
 0xe8b   :  { %v15132_v35 = vpop.f32.mrf.mxu0 }
 0xe8c   :  { %v15133_v37 = vadd.f32 %v15132_v35, %v15038_v49  ;;  %v15240_v5 = vadd.f32 %v28800_v61, %v15143_v22 }
 0xe8e   :  { %v15234_v8 = vadd.f32 %v15233_v32, %v15133_v37 }
 0xe91   :  { %v28811_v45 = vpop.f32.mrf.mxu0 }
 0xe92   :  { %v15327_v24 = vadd.f32 %v28811_v45, %v15240_v5  ;;  %v28844_v33 = vpop.f32.mrf.mxu1 }
 0xe93   :  { %v15319_v57 = vpop.f32.mrf.mxu0 }
 0xe94   :  { %v15320_v3 = vadd.f32 %v15319_v57, %v15234_v8  ;;  %v15412_v18 = vadd.f32 %v28822_v51, %v15327_v24  ;;  %v15575_v41 = vpop.f32.mrf.mxu1 }
 0xe96   :  { %v15404_v46 = vadd.f32 %v15403_v60, %v15320_v3 }
 0xe9b   :  { %v28833_v50 = vpop.f32.mrf.mxu0 }
 0xe9c   :  { %v15501_v25 = vadd.f32 %v28833_v50, %v15412_v18  ;;  %v28866_v52 = vpop.f32.mrf.mxu1 }
 0xe9d   :  { %v15494_v4 = vpop.f32.mrf.mxu0 }
 0xe9e   :  { %v15582_v38 = vadd.f32 %v28844_v33, %v15501_v25  ;;  %v15495_v40 = vadd.f32 %v15494_v4, %v15404_v46  ;;  %v15813_v61 = vpop.f32.mrf.mxu1 }
 0xea0   :  { %v15586_v58 = vadd.f32 %v32649_v48, %v15582_v38  ;;  %v15576_v39 = vadd.f32 %v15575_v41, %v15495_v40 }
 0xea2   :  { %v26125_v43 = vmul.f32 -1.442695, %v15586_v58  ;;  %v15585_v20 = vadd.f32 %v32649_v48, %v15576_v39 }
 0xea4   :  { %30065 = vpow2.f32 %v26125_v43  ;;  %v26124_v62 = vmul.f32 -1.442695, %v15585_v20 }
 0xea5   :  { %v28855_v35 = vpop.f32.mrf.mxu0 }
 0xea6   :  { %30067 = vpow2.f32 %v26124_v62  ;;  %v28888_v22 = vpop.f32.mrf.mxu1  ;;  %v15820_v24 = vadd.f32 %v28866_v52, %v28855_v35 }
 0xea7   :  { %v15712_v49 = vpop.f32.mrf.mxu0  ;;  %30069 = vtanh.f32 %v15586_v58 }
 0xea8   :  { %v15983_v45 = vpop.f32.mrf.mxu1  ;;  %v15814_v60 = vadd.f32 %v15813_v61, %v15712_v49 }
 0xeaf   :  { %v28877_v37 = vpop.f32.mrf.mxu0 }
 0xeb0   :  { %v28910_v5 = vpop.f32.mrf.mxu1  ;;  %v15907_v18 = vadd.f32 %v28877_v37, %v15820_v24 }
 0xeb1   :  { %v30066_v32 = vpop.eup %30065  ;;  %v15899_v3 = vpop.f32.mrf.mxu0 }
 0xeb2   :  { %v15596_v51 = vadd.f32 1.0, %v30066_v32  ;;  %v16155_v33 = vpop.f32.mrf.mxu1  ;;  %v15900_v50 = vadd.f32 %v15899_v3, %v15814_v60  ;;  %v15992_v46 = vadd.f32 %v28888_v22, %v15907_v18 }
 0xeb3   :  { %v30068_v57 = vpop.eup %30067 }
 0xeb4   :  { %30071 = vrcp.f32 %v15596_v51  ;;  %v15595_v8 = vadd.f32 1.0, %v30068_v57  ;;  %v15984_v40 = vadd.f32 %v15983_v45, %v15900_v50  ;;  %v30070_v52 = vpop.eup %30069 }
 0xeb5   :  { %30073 = vtanh.f32 %v15585_v20 }
 0xeb6   :  { %30075 = vrcp.f32 %v15595_v8  ;;  %v28924_v25 = vpop.f32.mrf.mxu1 }
 0xeb8   :  { %v16335_v39 = vpop.f32.mrf.mxu1 }
 0xeba   :  { %v28899_v4 = vpop.f32.mrf.mxu0 }
 0xebb   :  { %v16081_v38 = vadd.f32 %v28899_v4, %v15992_v46  ;;  %v28938_v51 = vpop.f32.mrf.mxu1 }
 0xebc   :  { %v16074_v41 = vpop.f32.mrf.mxu0 }
 0xebd   :  { %v16075_v43 = vadd.f32 %v16074_v41, %v15984_v40  ;;  %v16162_v62 = vadd.f32 %v28910_v5, %v16081_v38  ;;  %v16499_v5 = vpop.f32.mrf.mxu1 }
 0xebf   :  { %v16156_v58 = vadd.f32 %v16155_v33, %v16075_v43 }
 0xec0   :  { %v28917_v35 = vpop.f32.mrf.mxu0 }
 0xec1   :  { %v30072_v32 = vpop.eup %30071  ;;  %v16255_v20 = vadd.f32 %v28917_v35, %v16162_v62  ;;  %v28952_v46 = vpop.f32.mrf.mxu1 }
 0xec2   :  { %v30074_v61 = vpop.eup %30073  ;;  %v16244_v49 = vpop.f32.mrf.mxu0  ;;  %v32655_v37 = vsel %vm31704_vm7, %v30070_v52, %v30072_v32 }
 0xec3   :  { %v30076_v22 = vpop.eup %30075  ;;  %v16245_v57 = vadd.f32 %v16244_v49, %v16156_v58  ;;  %v16342_v24 = vadd.f32 %v28924_v25, %v16255_v20  ;;  %15609 = vrot.lane.b32.xlu1 %v32655_v37, %s30486_s7  ;;  %v16663_v62 = vpop.f32.mrf.mxu1 }
 0xec4   :  { %v32661_v45 = vsel %vm31704_vm7, %v30074_v61, %v30076_v22 }
 0xec5   :  { %v28931_v8 = vpop.f32.mrf.mxu0  ;;  %v16336_v3 = vadd.f32 %v16335_v39, %v16245_v57  ;;  %15607 = vrot.lane.b32.xlu0 %v32661_v45, %s30486_s7 }
 0xec6   :  { %v16425_v60 = vadd.f32 %v28931_v8, %v16342_v24 }
 0xec7   :  { %v16417_v18 = vpop.f32.mrf.mxu0 }
 0xec8   :  { %v16418_v33 = vadd.f32 %v16417_v18, %v16336_v3  ;;  %v16508_v50 = vadd.f32 %v28938_v51, %v16425_v60 }
 0xec9   :  { %v28945_v4 = vpop.f32.mrf.mxu0 }
 0xeca   :  { %v16591_v25 = vadd.f32 %v28945_v4, %v16508_v50  ;;  %v16500_v38 = vadd.f32 %v16499_v5, %v16418_v33 }
 0xecb   :  { %v16584_v40 = vpop.f32.mrf.mxu0 }
 0xecc   :  { %v16670_v41 = vadd.f32 %v28952_v46, %v16591_v25  ;;  %v16585_v43 = vadd.f32 %v16584_v40, %v16500_v38  ;;  %v15604_v38 = vmul.f32 %v32655_v37, %v32406_v2 }
 0xece   :  { %v16674_v58 = vadd.f32 %v32388_v9, %v16670_v41  ;;  %v16664_v52 = vadd.f32 %v16663_v62, %v16585_v43  ;;  %v15603_v43 = vmul.f32 %v32661_v45, %v32411_v12 }
 0xed0   :  { %v26127_v35 = vmul.f32 -1.442695, %v16674_v58  ;;  %v16673_v39 = vadd.f32 %v32388_v9, %v16664_v52 }
 0xed2   :  { %30077 = vpow2.f32 %v26127_v35  ;;  %v26126_v32 = vmul.f32 -1.442695, %v16673_v39 }
 0xed4   :  { %30079 = vpow2.f32 %v26126_v32 }
 0xed5   :  { %30081 = vtanh.f32 %v16674_v58 }
 0xedf   :  { %v30078_v20 = vpop.eup %30077 }
 0xee0   :  { %v16684_v61 = vadd.f32 1.0, %v30078_v20 }
 0xee1   :  { %v30080_v51 = vpop.eup %30079 }
 0xee2   :  { %30083 = vrcp.f32 %v16684_v61  ;;  %v16683_v49 = vadd.f32 1.0, %v30080_v51  ;;  %v30082_v22 = vpop.eup %30081 }
 0xee3   :  { %30085 = vtanh.f32 %v16673_v39 }
 0xee4   :  { %30087 = vrcp.f32 %v16683_v49 }
 0xeef   :  { %v30084_v57 = vpop.eup %30083 }
 0xef0   :  { %v30086_v24 = vpop.eup %30085  ;;  %v16690_v5 = vsel %vm31704_vm7, %v30082_v22, %v30084_v57 }
 0xef1   :  { %v30088_v8 = vpop.eup %30087  ;;  %16697 = vrot.lane.b32.xlu1 %v16690_v5, %s30486_s7  ;;  %v16692_v2 = vmul.f32 %v16690_v5, %v32417_v23 }
 0xef2   :  { %v16689_v9 = vsel %vm31704_vm7, %v30086_v24, %v30088_v8 }
 0xef3   :  { %16695 = vrot.lane.b32.xlu0 %v16689_v9, %s30486_s7  ;;  %v16691_v20 = vmul.f32 %v16689_v9, %v32421_v28 }
 0xf35   :  { %v15610_v3 = vpop.permute.xlu1 %15609 }
 0xf36   :  { %v15614_v60 = vmul.f32 %v15610_v3, %v32655_v37 }
 0xf37   :  { %v15608_v18 = vpop.permute.xlu0 %15607 }
 0xf38   :  { %v15613_v33 = vmul.f32 %v15608_v18, %v32661_v45  ;;  %15619 = vrot.lane.b32.xlu1 %v15614_v60, %s30487_s21 }
 0xf3a   :  { %15617 = vrot.lane.b32.xlu0 %v15613_v33, %s30487_s21 }
 0xf63   :  { %v16698_v50 = vpop.permute.xlu1 %16697 }
 0xf64   :  { %v16702_v46 = vmul.f32 %v16698_v50, %v16690_v5 }
 0xf65   :  { %v16696_v4 = vpop.permute.xlu0 %16695 }
 0xf66   :  { %v16701_v25 = vmul.f32 %v16696_v4, %v16689_v9  ;;  %16707 = vrot.lane.b32.xlu1 %v16702_v46, %s30487_s21 }
 0xf68   :  { %16705 = vrot.lane.b32.xlu0 %v16701_v25, %s30487_s21 }
 0xfaa   :  { %v15620_v40 = vpop.permute.xlu1 %15619 }
 0xfab   :  { %v32681_v41 = vadd.f32 %v15620_v40, %v15604_v38 }
 0xfac   :  { %v15618_v62 = vpop.permute.xlu0 %15617 }
 0xfad   :  { %30089 = vtanh.f32 %v32681_v41  ;;  %v32686_v58 = vadd.f32 %v15618_v62, %v15603_v43 }
 0xfaf   :  { %30091 = vtanh.f32 %v32686_v58 }
 0xfba   :  { %v30090_v52 = vpop.eup %30089 }
 0xfbb   :  { %15631 = vrot.lane.b32.xlu1 %v30090_v52, %s30486_s7 }
 0xfbc   :  { %v30092_v35 = vpop.eup %30091 }
 0xfbd   :  { %15629 = vrot.lane.b32.xlu0 %v30092_v35, %s30486_s7 }
 0xfd8   :  { %v16708_v39 = vpop.permute.xlu1 %16707 }
 0xfd9   :  { %v16712_v32 = vadd.f32 %v16708_v39, %v16692_v2 }
 0xfda   :  { %v16706_v12 = vpop.permute.xlu0 %16705 }
 0xfdb   :  { %30093 = vtanh.f32 %v16712_v32  ;;  %v16711_v61 = vadd.f32 %v16706_v12, %v16691_v20 }
 0xfdd   :  { %30095 = vtanh.f32 %v16711_v61 }
 0xfe8   :  { %v30094_v51 = vpop.eup %30093 }
 0xfe9   :  { %16719 = vrot.lane.b32.xlu1 %v30094_v51, %s30486_s7 }
 0xfea   :  { %v30096_v49 = vpop.eup %30095 }
 0xfeb   :  { %16717 = vrot.lane.b32.xlu0 %v30096_v49, %s30486_s7 }
0x102d   :  { %v15632_v22 = vpop.permute.xlu1 %15631 }
0x102e   :  { %v15636_v57 = vmul.f32 %v15632_v22, %v32655_v37 }
0x102f   :  { %v15630_v24 = vpop.permute.xlu0 %15629 }
0x1030   :  { %v15635_v23 = vmul.f32 %v15630_v24, %v32661_v45  ;;  %16729 = vrot.lane.b32.xlu1 %v15636_v57, %s30487_s21 }
0x1032   :  { %16727 = vrot.lane.b32.xlu0 %v15635_v23, %s30487_s21 }
0x105b   :  { %v16720_v28 = vpop.permute.xlu1 %16719 }
0x105c   :  { %v16724_v8 = vmul.f32 %v16720_v28, %v16690_v5 }
0x105d   :  { %v16718_v3 = vpop.permute.xlu0 %16717 }
0x105e   :  { %v16723_v60 = vmul.f32 %v16718_v3, %v16689_v9  ;;  %17267 = vrot.lane.b32.xlu1 %v16724_v8, %s30487_s21 }
0x1060   :  { %17265 = vrot.lane.b32.xlu0 %v16723_v60, %s30487_s21 }
0x10a2   :  { %v16730_v18 = vpop.permute.xlu1 %16729 }
0x10a3   :  { %v16733_v33 = vsel %vm8983_vm8, %v16730_v18, 0 }
0x10a4   :  { %v16814_v50 = vand.u32 4294901760, %v16733_v33  ;;  %v16728_v37 = vpop.permute.xlu0 %16727 }
0x10a5   :  { %v16731_v46 = vsel %vm8983_vm8, %v16728_v37, 0 }
0x10a6   :  { %v16815_v45 = vsub.f32 %v16733_v33, %v16814_v50  ;;  %v16804_v4 = vand.u32 4294901760, %v16731_v46 }
0x10a8   :  { %v16816_v25 = vand.u32 4294901760, %v16815_v45  ;;  %v16805_v38 = vsub.f32 %v16731_v46, %v16804_v4  ;;  %28972 = vmatprep.mubr.f32.mxu1 %v16804_v4 }
0x10a9   :  { %28973 = vmatmul.mubr.f32.vlgmr.msra.gmra.mxu1 %v16814_v50 }
0x10aa   :  { %28987 = vmatpush3.msra.mxu1 %v31741_v36  ;;  %v16806_v5 = vand.u32 4294901760, %v16805_v38  ;;  %v16817_v9 = vsub.f32 %v16815_v45, %v16816_v25 }
0x10ab   :  { %28988 = vmatprep.subr.mxu1 %v31743_v16 }
0x10ac   :  { %28989 = vmatpush3.msra.mxu1 %v31743_v16  ;;  %28994 = vmatprep.mubr.f32.mxu1 %v16806_v5  ;;  %v16807_v40 = vsub.f32 %v16805_v38, %v16806_v5  ;;  %v16818_v62 = vand.u32 4294901760, %v16817_v9 }
0x10ad   :  { %28990 = vmatprep.subr.mxu1 %v31745_v42 }
0x10ae   :  { %28991 = vmatpush3.msra.mxu1 %v31745_v42  ;;  %v16808_v43 = vand.u32 4294901760, %v16807_v40 }
0x10af   :  { %28992 = vmatprep.subr.mxu1 %v31750_v10 }
0x10b0   :  { %28993 = vmatpush3.msra.mxu1 %v31750_v10  ;;  %28961 = vmatprep.mubr.f32.mxu0 %v16808_v43 }
0x10b1   :  { %28995 = vmatmul.mubr.f32.vlgmr.msra.gmra.mxu1 %v16816_v25  ;;  %29008 = vmatprep.subr.mxu1 %v31741_v36 }
0x10b2   :  { %28962 = vmatmul.mubr.f32.vlgmr.msra.gmra.mxu0 %v16818_v62  ;;  %29009 = vmatpush3.msra.mxu1 %v31741_v36 }
0x10b3   :  { %28976 = vmatpush3.msra.mxu0 %v31753_v56  ;;  %29016 = vmatprep.mubr.f32.mxu1 %v16804_v4 }
0x10b4   :  { %28977 = vmatprep.subr.mxu0 %v31756_v19  ;;  %28983 = vmatprep.mubr.f32.mxu0 %v16805_v38 }
0x10b5   :  { %29010 = vmatprep.subr.mxu1 %v31743_v16  ;;  %28978 = vmatpush3.msra.mxu0 %v31756_v19 }
0x10b6   :  { %29011 = vmatpush3.msra.mxu1 %v31743_v16  ;;  %28979 = vmatprep.subr.mxu0 %v31759_v17 }
0x10b7   :  { %29012 = vmatprep.subr.mxu1 %v31745_v42  ;;  %28980 = vmatpush3.msra.mxu0 %v31759_v17 }
0x10b8   :  { %29013 = vmatpush3.msra.mxu1 %v31745_v42  ;;  %28981 = vmatprep.subr.mxu0 %v34368_v21 }
0x10b9   :  { %29014 = vmatprep.subr.mxu1 %v31750_v10  ;;  %28982 = vmatpush3.msra.mxu0 %v34368_v21 }
0x10ba   :  { %29015 = vmatpush3.msra.mxu1 %v31750_v10  ;;  %28984 = vmatmul.mubr.f32.vlgmr.msra.gmra.mxu0 %v16815_v45 }
0x10bb   :  { %28997 = vmatprep.subr.mxu0 %v34369_v30  ;;  %29017 = vmatmul.mubr.f32.vlgmr.msra.gmra.mxu1 %v16814_v50 }
0x10bc   :  { %28998 = vmatpush3.msra.mxu0 %v34369_v30  ;;  %29005 = vmatprep.mubr.f32.mxu0 %v16804_v4 }
0x10bd   :  { %28999 = vmatprep.subr.mxu0 %v34370_v31  ;;  %29030 = vmatprep.subr.mxu1 %v34371_v34 }
0x10be   :  { %29000 = vmatpush3.msra.mxu0 %v34370_v31  ;;  %29031 = vmatpush3.msra.mxu1 %v34371_v34 }
0x10bf   :  { %29001 = vmatprep.subr.mxu0 %v34372_v6  ;;  %29032 = vmatprep.subr.mxu1 %v34373_v11 }
0x10c0   :  { %29002 = vmatpush3.msra.mxu0 %v34372_v6  ;;  %29033 = vmatpush3.msra.mxu1 %v34373_v11 }
0x10c1   :  { %29003 = vmatprep.subr.mxu0 %v34374_v26  ;;  %29034 = vmatprep.subr.mxu1 %v34375_v59 }
0x10c2   :  { %29004 = vmatpush3.msra.mxu0 %v34374_v26  ;;  %29035 = vmatpush3.msra.mxu1 %v34375_v59 }
0x10c3   :  { %29006 = vmatmul.mubr.f32.vlgmr.msra.gmra.mxu0 %v16814_v50  ;;  %29036 = vmatprep.subr.mxu1 %v34376_v13 }
0x10c4   :  { %29037 = vmatpush3.msra.mxu1 %v34376_v13  ;;  %29019 = vmatprep.subr.mxu0 %v31814_v15 }
0x10c5   :  { %29052 = vmatprep.subr.mxu1 %v31814_v15  ;;  %29020 = vmatpush3.msra.mxu0 %v31814_v15 }
0x10c6   :  { %29021 = vmatprep.subr.mxu0 %v31874_v54 }
0x10c7   :  { %29022 = vmatpush3.msra.mxu0 %v31874_v54 }
0x10c8   :  { %29023 = vmatprep.subr.mxu0 %v31882_v14 }
0x10c9   :  { %29024 = vmatpush3.msra.mxu0 %v31882_v14 }
0x10ca   :  { %29025 = vmatprep.subr.mxu0 %v31895_v0 }
0x10cb   :  { %29026 = vmatpush3.msra.mxu0 %v31895_v0 }
0x10cc   :  { %29041 = vmatprep.subr.mxu0 %v31825_v47 }
0x10d0   :  { %v17268_v36 = vpop.permute.xlu1 %17267 }
0x10d1   :  { %v17271_v16 = vsel %vm8983_vm8, %v17268_v36, 0 }
0x10d2   :  { %v17352_v42 = vand.u32 4294901760, %v17271_v16  ;;  %v17266_v10 = vpop.permute.xlu0 %17265 }
0x10d3   :  { %v17269_v56 = vsel %vm8983_vm8, %v17266_v10, 0 }
0x10d4   :  { %v17353_v19 = vsub.f32 %v17271_v16, %v17352_v42  ;;  %v17342_v17 = vand.u32 4294901760, %v17269_v56 }
0x10d6   :  { %v17354_v21 = vand.u32 4294901760, %v17353_v19  ;;  %v17343_v30 = vsub.f32 %v17269_v56, %v17342_v17  ;;  %29038 = vmatprep.mubr.f32.mxu1 %v17342_v17 }
0x10d7   :  { %29039 = vmatmul.mubr.f32.vlgmr.msra.gmra.mxu1 %v17352_v42 }
0x10d8   :  { %29053 = vmatpush3.msra.mxu1 %v31814_v15  ;;  %v17344_v31 = vand.u32 4294901760, %v17343_v30  ;;  %v17355_v34 = vsub.f32 %v17353_v19, %v17354_v21 }
0x10d9   :  { %29054 = vmatprep.subr.mxu1 %v31874_v54 }
0x10da   :  { %29055 = vmatpush3.msra.mxu1 %v31874_v54  ;;  %29060 = vmatprep.mubr.f32.mxu1 %v17344_v31  ;;  %v17345_v6 = vsub.f32 %v17343_v30, %v17344_v31  ;;  %v17356_v26 = vand.u32 4294901760, %v17355_v34 }
0x10db   :  { %29056 = vmatprep.subr.mxu1 %v31882_v14 }
0x10dc   :  { %29057 = vmatpush3.msra.mxu1 %v31882_v14  ;;  %v17346_v11 = vand.u32 4294901760, %v17345_v6 }
0x10dd   :  { %29058 = vmatprep.subr.mxu1 %v31895_v0 }
0x10de   :  { %29059 = vmatpush3.msra.mxu1 %v31895_v0  ;;  %29027 = vmatprep.mubr.f32.mxu0 %v17346_v11 }
0x10df   :  { %29061 = vmatmul.mubr.f32.vlgmr.msra.gmra.mxu1 %v17354_v21  ;;  %29074 = vmatprep.subr.mxu1 %v31814_v15 }
0x10e0   :  { %29028 = vmatmul.mubr.f32.vlgmr.msra.gmra.mxu0 %v17356_v26  ;;  %29075 = vmatpush3.msra.mxu1 %v31814_v15 }
0x10e1   :  { %29042 = vmatpush3.msra.mxu0 %v31825_v47  ;;  %29082 = vmatprep.mubr.f32.mxu1 %v17342_v17 }
0x10e2   :  { %29043 = vmatprep.subr.mxu0 %v31880_v55  ;;  %29049 = vmatprep.mubr.f32.mxu0 %v17343_v30 }
0x10e3   :  { %29076 = vmatprep.subr.mxu1 %v31874_v54  ;;  %29044 = vmatpush3.msra.mxu0 %v31880_v55 }
0x10e4   :  { %29077 = vmatpush3.msra.mxu1 %v31874_v54  ;;  %29045 = vmatprep.subr.mxu0 %v31893_v63 }
0x10e5   :  { %29078 = vmatprep.subr.mxu1 %v31882_v14  ;;  %29046 = vmatpush3.msra.mxu0 %v31893_v63 }
0x10e6   :  { %29079 = vmatpush3.msra.mxu1 %v31882_v14  ;;  %29047 = vmatprep.subr.mxu0 %v31905_v7 }
0x10e7   :  { %29080 = vmatprep.subr.mxu1 %v31895_v0  ;;  %29048 = vmatpush3.msra.mxu0 %v31905_v7 }
0x10e8   :  { %29081 = vmatpush3.msra.mxu1 %v31895_v0  ;;  %29050 = vmatmul.mubr.f32.vlgmr.msra.gmra.mxu0 %v17353_v19 }
0x10e9   :  { %29063 = vmatprep.subr.mxu0 %v31836_v53  ;;  %29083 = vmatmul.mubr.f32.vlgmr.msra.gmra.mxu1 %v17352_v42 }
0x10ea   :  { %29064 = vmatpush3.msra.mxu0 %v31836_v53  ;;  %29071 = vmatprep.mubr.f32.mxu0 %v17342_v17 }
0x10eb   :  { %29065 = vmatprep.subr.mxu0 %v31890_v1 }
0x10ec   :  { %29066 = vmatpush3.msra.mxu0 %v31890_v1 }
0x10ed   :  { %29067 = vmatprep.subr.mxu0 %v31902_v44 }
0x10ee   :  { %29068 = vmatpush3.msra.mxu0 %v31902_v44 }
0x10ef   :  { %29069 = vmatprep.subr.mxu0 %v31914_v29 }
0x10f0   :  { %29070 = vmatpush3.msra.mxu0 %v31914_v29 }
0x10f1   :  { %29072 = vmatmul.mubr.f32.vlgmr.msra.gmra.mxu0 %v17352_v42 }
0x1169   :  { %v28974_v7 = vpop.f32.mrf.mxu1 }
0x116b   :  { %v16911_v47 = vpop.f32.mrf.mxu1 }
0x1171   :  { %v28996_v54 = vpop.f32.mrf.mxu1 }
0x1172   :  { %v28963_v63 = vpop.f32.mrf.mxu0 }
0x1173   :  { %v16918_v53 = vadd.f32 %v28974_v7, %v28963_v63  ;;  %v17081_v52 = vpop.f32.mrf.mxu1 }
0x1174   :  { %v16810_v0 = vpop.f32.mrf.mxu0 }
0x1175   :  { %v16912_v14 = vadd.f32 %v16911_v47, %v16810_v0 }
0x117a   :  { %v28985_v15 = vpop.f32.mrf.mxu0 }
0x117b   :  { %v17005_v59 = vadd.f32 %v28985_v15, %v16918_v53  ;;  %v29018_v44 = vpop.f32.mrf.mxu1 }
0x117c   :  { %v16997_v55 = vpop.f32.mrf.mxu0 }
0x117d   :  { %v16998_v13 = vadd.f32 %v16997_v55, %v16912_v14  ;;  %v17090_v35 = vadd.f32 %v28996_v54, %v17005_v59  ;;  %v17253_v12 = vpop.f32.mrf.mxu1  ;;  %v17857_v59 = vld [vmem:[#allocation15 + $0x18] sm:$0xff] }
0x117f   :  { %v17082_v32 = vadd.f32 %v17081_v52, %v16998_v13  ;;  %v32811_v13 = vand.u32 4294901760, %v17857_v59 }
0x1181   :  { %29085 = vmatprep.subr.mxu0 %v32811_v13 }
0x1182   :  { %29086 = vmatpush3.msra.mxu0 %v32811_v13 }
0x1183   :  { %v29007_v1 = vpop.f32.mrf.mxu0 }
0x1184   :  { %v17179_v39 = vadd.f32 %v29007_v1, %v17090_v35  ;;  %v17856_v1 = vld [vmem:[#allocation15 + $0x10] sm:$0xff] }
0x1185   :  { %v17172_v2 = vpop.f32.mrf.mxu0  ;;  %v32813_v52 = vand.u32 4294901760, %v17856_v1 }
0x1186   :  { %v17173_v20 = vadd.f32 %v17172_v2, %v17082_v32  ;;  %v17260_v61 = vadd.f32 %v29018_v44, %v17179_v39 }
0x1187   :  { %v32819_v35 = vsub.f32 %v17856_v1, %v32813_v52  ;;  %29087 = vmatprep.subr.mxu0 %v32813_v52 }
0x1188   :  { %v17254_v57 = vadd.f32 %v17253_v12, %v17173_v20  ;;  %29088 = vmatpush3.msra.mxu0 %v32813_v52 }
0x1189   :  { %34423 = vst [vmem:[#allocation54_spill] sm:$0xff] %v32819_v35  ;;  %v32827_v44 = vand.u32 4294901760, %v32819_v35 }
0x118b   :  { %34425 = vst [vmem:[#allocation62_spill] sm:$0xff] %v32827_v44  ;;  %v18007_v39 = vsub.f32 %v32819_v35, %v32827_v44 }
0x118d   :  { %v32838_v20 = vand.u32 4294901760, %v18007_v39 }
0x1197   :  { %v29040_v51 = vpop.f32.mrf.mxu1 }
0x1199   :  { %v17449_v28 = vpop.f32.mrf.mxu1 }
0x119f   :  { %v29062_v3 = vpop.f32.mrf.mxu1 }
0x11a0   :  { %v29029_v29 = vpop.f32.mrf.mxu0 }
0x11a1   :  { %v17359_v22 = vadd.f32 %v29029_v29, %v17260_v61  ;;  %v17619_v37 = vpop.f32.mrf.mxu1  ;;  %v17855_v61 = vld [vmem:[#allocation15 + $0x8] sm:$0xff] }
0x11a2   :  { %v17348_v49 = vpop.f32.mrf.mxu0 }
0x11a3   :  { %v17349_v24 = vadd.f32 %v17348_v49, %v17254_v57  ;;  %v17456_v8 = vadd.f32 %v29040_v51, %v17359_v22  ;;  %v32845_v51 = vand.u32 4294901760, %v17855_v61  ;;  %v17854_v49 = vld [vmem:[#allocation15] sm:$0xff] }
0x11a4   :  { %v32850_v57 = vand.u32 4294901760, %v17854_v49 }
0x11a5   :  { %v17450_v33 = vadd.f32 %v17449_v28, %v17349_v24  ;;  %34426 = vst [vmem:[#allocation56_spill] sm:$0xff] %v32845_v51  ;;  %v32848_v22 = vsub.f32 %v17855_v61, %v32845_v51  ;;  %29089 = vmatprep.subr.mxu0 %v32845_v51 }
0x11a6   :  { %34428 = vst [vmem:[#allocation57_spill] sm:$0xff] %v32850_v57  ;;  %29090 = vmatpush3.msra.mxu0 %v32845_v51 }
0x11a7   :  { %34427 = vst [vmem:[#allocation63_spill] sm:$0xff] %v32848_v22  ;;  %v32855_v24 = vand.u32 4294901760, %v32848_v22  ;;  %29091 = vmatprep.subr.mxu0 %v32850_v57 }
0x11a8   :  { %v29051_v23 = vpop.f32.mrf.mxu0  ;;  %29092 = vmatpush3.msra.mxu0 %v32850_v57 }
0x11a9   :  { %v17543_v18 = vadd.f32 %v29051_v23, %v17456_v8  ;;  %v29084_v45 = vpop.f32.mrf.mxu1  ;;  %34429 = vst [vmem:[#allocation64_spill] sm:$0xff] %v32855_v24  ;;  %v32858_v23 = vsub.f32 %v17854_v49, %v32850_v57  ;;  %v18014_v28 = vsub.f32 %v32848_v22, %v32855_v24 }
0x11aa   :  { %v17535_v60 = vpop.f32.mrf.mxu0 }
0x11ab   :  { %v17536_v50 = vadd.f32 %v17535_v60, %v17450_v33  ;;  %v17628_v46 = vadd.f32 %v29062_v3, %v17543_v18  ;;  %v17791_v43 = vpop.f32.mrf.mxu1  ;;  %34430 = vst [vmem:[#allocation65_spill] sm:$0xff] %v32858_v23  ;;  %v32865_v8 = vand.u32 4294901760, %v32858_v23  ;;  %v32868_v3 = vand.u32 4294901760, %v18014_v28 }
0x11ad   :  { %v17620_v38 = vadd.f32 %v17619_v37, %v17536_v50  ;;  %34431 = vst [vmem:[#allocation49_spill] sm:$0xff] %v32865_v8  ;;  %v18021_v60 = vsub.f32 %v32858_v23, %v32865_v8 }
0x11af   :  { %v32873_v18 = vand.u32 4294901760, %v18021_v60 }
0x11b1   :  { %v29073_v4 = vpop.f32.mrf.mxu0 }
0x11b2   :  { %v17717_v25 = vadd.f32 %v29073_v4, %v17628_v46  ;;  %v17853_v4 = vld [vmem:[#allocation13] sm:$0x3] }
0x11b3   :  { %v17710_v5 = vpop.f32.mrf.mxu0 }
0x11b4   :  { %v17798_v9 = vadd.f32 %v29084_v45, %v17717_v25  ;;  %v17711_v40 = vadd.f32 %v17710_v5, %v17620_v38 }
0x11b6   :  { %v17802_v62 = vadd.f32 %v32649_v48, %v17798_v9  ;;  %v17792_v36 = vadd.f32 %v17791_v43, %v17711_v40  ;;  %v18414_v40 = vsel %vm252_vm0, %v17853_v4, 0 }
0x11b8   :  { %v26129_v16 = vmul.f32 -1.442695, %v17802_v62  ;;  %v17801_v42 = vadd.f32 %v32649_v48, %v17792_v36 }
0x11ba   :  { %30097 = vpow2.f32 %v26129_v16  ;;  %v26128_v10 = vmul.f32 -1.442695, %v17801_v42 }
0x11bc   :  { %30099 = vpow2.f32 %v26128_v10 }
0x11bd   :  { %30101 = vtanh.f32 %v17802_v62 }
0x11c7   :  { %v30098_v56 = vpop.eup %30097 }
0x11c8   :  { %v17812_v19 = vadd.f32 1.0, %v30098_v56 }
0x11c9   :  { %v30100_v17 = vpop.eup %30099 }
0x11ca   :  { %30103 = vrcp.f32 %v17812_v19  ;;  %v17811_v21 = vadd.f32 1.0, %v30100_v17  ;;  %v30102_v30 = vpop.eup %30101 }
0x11cb   :  { %30105 = vtanh.f32 %v17801_v42  ;;  %v32900_v42 = vand.u32 4294901760, %v18414_v40 }
0x11cc   :  { %30107 = vrcp.f32 %v17811_v21 }
0x11cd   :  { %v32915_v17 = vsub.f32 %v18414_v40, %v32900_v42 }
0x11d7   :  { %v30104_v31 = vpop.eup %30103 }
0x11d8   :  { %v30106_v34 = vpop.eup %30105  ;;  %v32787_v6 = vsel %vm31704_vm7, %v30102_v30, %v30104_v31  ;;  %v17866_v31 = vld [vmem:[%s34112_s16 + $0x18] sm:$0xff] }
0x11d9   :  { %v30108_v11 = vpop.eup %30107  ;;  %17825 = vrot.lane.b32.xlu1 %v32787_v6, %s30486_s7  ;;  %v17820_v15 = vmul.f32 %v32787_v6, %v32681_v41  ;;  %v32816_v41 = vsub.f32 %v17857_v59, %v32811_v13 }
0x11da   :  { %v32793_v48 = vsel %vm31704_vm7, %v30106_v34, %v30108_v11  ;;  %v32932_v34 = vand.u32 4294901760, %v32915_v17  ;;  %v17865_v11 = vld [vmem:[%s34112_s16 + $0x10] sm:$0xff] }
0x11db   :  { %17823 = vrot.lane.b32.xlu0 %v32793_v48, %s30486_s7  ;;  %v17819_v54 = vmul.f32 %v32793_v48, %v32686_v58  ;;  %34422 = vst [vmem:[#allocation53_spill] sm:$0xff] %v32816_v41  ;;  %v32824_v58 = vand.u32 4294901760, %v32816_v41  ;;  %29107 = vmatprep.subr.mxu0 %v32816_v41 }
0x11dd   :  { %34424 = vst [vmem:[#allocation55_spill] sm:$0xff] %v32824_v58  ;;  %v18000_v2 = vsub.f32 %v32816_v41, %v32824_v58 }
0x11df   :  { %v32836_v29 = vand.u32 4294901760, %v18000_v2 }
0x11e1   :  { %29096 = vmatprep.subr.mxu1 %v32836_v29 }
0x11e2   :  { %29097 = vmatpush3.msra.mxu1 %v32836_v29 }
0x11e3   :  { %29098 = vmatprep.subr.mxu1 %v32838_v20 }
0x11e4   :  { %29099 = vmatpush3.msra.mxu1 %v32838_v20 }
0x11e5   :  { %29100 = vmatprep.subr.mxu1 %v32868_v3 }
0x11e6   :  { %29101 = vmatpush3.msra.mxu1 %v32868_v3 }
0x11e7   :  { %29102 = vmatprep.subr.mxu1 %v32873_v18 }
0x11e8   :  { %29103 = vmatpush3.msra.mxu1 %v32873_v18 }
0x11e9   :  { %29118 = vmatprep.subr.mxu1 %v32811_v13 }
0x124b   :  { %v17826_v26 = vpop.permute.xlu1 %17825 }
0x124c   :  { %v17830_v63 = vmul.f32 %v17826_v26, %v32787_v6  ;;  %v17864_v26 = vld [vmem:[%s34112_s16 + $0x8] sm:$0xff] }
0x124d   :  { %v17824_v7 = vpop.permute.xlu0 %17823 }
0x124e   :  { %v17829_v0 = vmul.f32 %v17824_v7, %v32793_v48  ;;  %17835 = vrot.lane.b32.xlu1 %v17830_v63, %s30487_s21  ;;  %v32954_v63 = vand.u32 4294901760, %v17865_v11 }
0x1250   :  { %17833 = vrot.lane.b32.xlu0 %v17829_v0, %s30487_s21  ;;  %v17863_v0 = vld [vmem:[%s34112_s16] sm:$0xff] }
0x12c0   :  { %v17836_v47 = vpop.permute.xlu1 %17835 }
0x12c1   :  { %v32803_v53 = vadd.f32 %v17836_v47, %v17820_v15  ;;  %v32966_v15 = vand.u32 4294901760, %v17864_v26 }
0x12c2   :  { %v17834_v55 = vpop.permute.xlu0 %17833 }
0x12c3   :  { %30109 = vtanh.f32 %v32803_v53  ;;  %v32808_v14 = vadd.f32 %v17834_v55, %v17819_v54  ;;  %34433 = vst [vmem:[#allocation66_spill] sm:$0xff] %v32966_v15  ;;  %v32975_v54 = vsub.f32 %v17865_v11, %v32954_v63  ;;  %v32977_v55 = vand.u32 4294901760, %v17863_v0 }
0x12c4   :  { %v32987_v1 = vsub.f32 %v17864_v26, %v32966_v15 }
0x12c5   :  { %30111 = vtanh.f32 %v32808_v14  ;;  %34435 = vst [vmem:[#allocation28_spill] sm:$0xff] %v32975_v54  ;;  %34436 = vst [vmem:[#allocation30_spill] sm:$0xff] %v32977_v55  ;;  %v32994_v2 = vand.u32 4294901760, %v32975_v54  ;;  %v32997_v39 = vsub.f32 %v17863_v0, %v32977_v55 }
0x12c6   :  { %34438 = vst [vmem:[#allocation34_spill] sm:$0xff] %v32987_v1  ;;  %v33006_v61 = vand.u32 4294901760, %v32987_v1 }
0x12c7   :  { %34439 = vst [vmem:[#allocation50_spill] sm:$0xff] %v32994_v2  ;;  %34440 = vst [vmem:[#allocation29_spill] sm:$0xff] %v32997_v39  ;;  %v19087_v49 = vsub.f32 %v32975_v54, %v32994_v2  ;;  %v33015_v28 = vand.u32 4294901760, %v32997_v39 }
0x12c8   :  { %34442 = vst [vmem:[#allocation52_spill] sm:$0xff] %v33006_v61 }
0x12c9   :  { %34443 = vst [vmem:[#allocation33_spill] sm:$0xff] %v33015_v28 }
0x12d0   :  { %v30110_v32 = vpop.eup %30109 }
0x12d1   :  { %17847 = vrot.lane.b32.xlu1 %v30110_v32, %s30486_s7  ;;  %v34441_v32 = vmov 0.0  }
0x12d2   :  { %v30112_v12 = vpop.eup %30111 }
0x12d3   :  { %17845 = vrot.lane.b32.xlu0 %v30112_v12, %s30486_s7 }
0x1343   :  { %v17848_v33 = vpop.permute.xlu1 %17847 }
0x1344   :  { %v17852_v50 = vmul.f32 %v17848_v33, %v32787_v6  ;;  %v32938_v6 = vand.u32 4294901760, %v17866_v31  ;;  %v19094_v33 = vsub.f32 %v32987_v1, %v33006_v61 }
0x1345   :  { %v17846_v37 = vpop.permute.xlu0 %17845 }
0x1346   :  { %v17851_v46 = vmul.f32 %v17846_v37, %v32793_v48  ;;  %17877 = vrot.lane.b32.xlu1 %v17852_v50, %s30487_s21  ;;  %v18536_v48 = vsub.f32 %v32915_v17, %v32932_v34  ;;  %v32959_v7 = vsub.f32 %v17866_v31, %v32938_v6  ;;  %v33029_v50 = vand.u32 4294901760, %v19087_v49 }
0x1347   :  { %v19101_v37 = vsub.f32 %v32997_v39, %v33015_v28 }
0x1348   :  { %17875 = vrot.lane.b32.xlu0 %v17851_v46, %s30487_s21  ;;  %34432 = vst [vmem:[#allocation51_spill] sm:$0xff] %v32959_v7  ;;  %v32970_v47 = vand.u32 4294901760, %v18536_v48  ;;  %v32982_v59 = vand.u32 4294901760, %v32959_v7  ;;  %v33037_v46 = vand.u32 4294901760, %v19094_v33 }
0x134a   :  { %34434 = vst [vmem:[#allocation40_spill] sm:$0xff] %v32970_v47  ;;  %34437 = vst [vmem:[#allocation31_spill] sm:$0xff] %v32982_v59  ;;  %v19080_v12 = vsub.f32 %v32959_v7, %v32982_v59 }
0x134c   :  { %v33019_v60 = vand.u32 4294901760, %v19080_v12 }
0x13b8   :  { %v17878_v45 = vpop.permute.xlu1 %17877 }
0x13b9   :  { %v17881_v25 = vsel %vm8983_vm8, %v17878_v45, 0  ;;  %v33043_v45 = vand.u32 4294901760, %v19101_v37 }
0x13ba   :  { %v32884_v38 = vand.u32 4294901760, %v17881_v25  ;;  %v17876_v5 = vpop.permute.xlu0 %17875 }
0x13bb   :  { %v17879_v9 = vsel %vm8983_vm8, %v17876_v5, 0 }
0x13bc   :  { %v32889_v43 = vsub.f32 %v17881_v25, %v32884_v38  ;;  %v32891_v62 = vand.u32 4294901760, %v17879_v9 }
0x13be   :  { %v32894_v36 = vand.u32 4294901760, %v32889_v43  ;;  %v32897_v16 = vsub.f32 %v17879_v9, %v32891_v62  ;;  %29104 = vmatprep.mubr.f32.mxu1 %v32891_v62 }
0x13bf   :  { %29105 = vmatmul.mubr.f32.vlgmr.msra.gmra.mxu1 %v32884_v38 }
0x13c0   :  { %29119 = vmatpush3.msra.mxu1 %v32811_v13  ;;  %v32905_v10 = vand.u32 4294901760, %v32897_v16  ;;  %v17965_v56 = vsub.f32 %v32889_v43, %v32894_v36 }
0x13c1   :  { %29120 = vmatprep.subr.mxu1 %v32813_v52 }
0x13c2   :  { %29121 = vmatpush3.msra.mxu1 %v32813_v52  ;;  %29126 = vmatprep.mubr.f32.mxu1 %v32905_v10  ;;  %v17955_v19 = vsub.f32 %v32897_v16, %v32905_v10  ;;  %v32922_v30 = vand.u32 4294901760, %v17965_v56 }
0x13c3   :  { %29122 = vmatprep.subr.mxu1 %v32845_v51 }
0x13c4   :  { %29123 = vmatpush3.msra.mxu1 %v32845_v51  ;;  %v32919_v21 = vand.u32 4294901760, %v17955_v19 }
0x13c5   :  { %29124 = vmatprep.subr.mxu1 %v32850_v57 }
0x13c6   :  { %29125 = vmatpush3.msra.mxu1 %v32850_v57  ;;  %29093 = vmatprep.mubr.f32.mxu0 %v32919_v21 }
0x13c7   :  { %29127 = vmatmul.mubr.f32.vlgmr.msra.gmra.mxu1 %v32894_v36  ;;  %29140 = vmatprep.subr.mxu1 %v32811_v13 }
0x13c8   :  { %29094 = vmatmul.mubr.f32.vlgmr.msra.gmra.mxu0 %v32922_v30  ;;  %29141 = vmatpush3.msra.mxu1 %v32811_v13 }
0x13c9   :  { %29108 = vmatpush3.msra.mxu0 %v32816_v41  ;;  %29148 = vmatprep.mubr.f32.mxu1 %v32891_v62 }
0x13ca   :  { %29109 = vmatprep.subr.mxu0 %v32819_v35  ;;  %29115 = vmatprep.mubr.f32.mxu0 %v32897_v16 }
0x13cb   :  { %29142 = vmatprep.subr.mxu1 %v32813_v52  ;;  %29110 = vmatpush3.msra.mxu0 %v32819_v35 }
0x13cc   :  { %29143 = vmatpush3.msra.mxu1 %v32813_v52  ;;  %29111 = vmatprep.subr.mxu0 %v32848_v22 }
0x13cd   :  { %29144 = vmatprep.subr.mxu1 %v32845_v51  ;;  %29112 = vmatpush3.msra.mxu0 %v32848_v22 }
0x13ce   :  { %29145 = vmatpush3.msra.mxu1 %v32845_v51  ;;  %29113 = vmatprep.subr.mxu0 %v32858_v23 }
0x13cf   :  { %29146 = vmatprep.subr.mxu1 %v32850_v57  ;;  %29114 = vmatpush3.msra.mxu0 %v32858_v23 }
0x13d0   :  { %29147 = vmatpush3.msra.mxu1 %v32850_v57  ;;  %29116 = vmatmul.mubr.f32.vlgmr.msra.gmra.mxu0 %v32889_v43 }
0x13d1   :  { %29129 = vmatprep.subr.mxu0 %v32824_v58  ;;  %29149 = vmatmul.mubr.f32.vlgmr.msra.gmra.mxu1 %v32884_v38 }
0x13d2   :  { %29130 = vmatpush3.msra.mxu0 %v32824_v58  ;;  %29137 = vmatprep.mubr.f32.mxu0 %v32891_v62 }
0x13d3   :  { %29131 = vmatprep.subr.mxu0 %v32827_v44  ;;  %29156 = vmatprep.subr.mxu1 %v32970_v47 }
0x13d4   :  { %29132 = vmatpush3.msra.mxu0 %v32827_v44  ;;  %29157 = vmatpush3.msra.mxu1 %v32970_v47 }
0x13d5   :  { %29158 = vmatprep.mubr.f32.mxu1 %v34441_v32  ;;  %29133 = vmatprep.subr.mxu0 %v32855_v24 }
0x13d6   :  { %29159 = vmatmul.mubr.f32.vlgmr.msra.gmra.mxu1 %v34441_v32  ;;  %29134 = vmatpush3.msra.mxu0 %v32855_v24 }
0x13d7   :  { %29135 = vmatprep.subr.mxu0 %v32865_v8  ;;  %29166 = vmatprep.subr.mxu1 %v32900_v42 }
0x13d8   :  { %29136 = vmatpush3.msra.mxu0 %v32865_v8  ;;  %29167 = vmatpush3.msra.mxu1 %v32900_v42 }
0x13d9   :  { %29168 = vmatprep.mubr.f32.mxu1 %v34441_v32  ;;  %29138 = vmatmul.mubr.f32.vlgmr.msra.gmra.mxu0 %v32884_v38 }
0x13da   :  { %29169 = vmatmul.mubr.f32.vlgmr.msra.gmra.mxu1 %v34441_v32  ;;  %29176 = vmatprep.subr.mxu1 %v32900_v42 }
0x13db   :  { %29151 = vmatprep.subr.mxu0 %v32900_v42  ;;  %29177 = vmatpush3.msra.mxu1 %v32900_v42 }
0x13dc   :  { %29152 = vmatpush3.msra.mxu0 %v32900_v42  ;;  %29153 = vmatprep.mubr.f32.mxu0 %v34441_v32 }
0x13dd   :  { %29178 = vmatprep.mubr.f32.mxu1 %v34441_v32  ;;  %29192 = vmatprep.subr.mxu1 %v33019_v60 }
0x13de   :  { %29154 = vmatmul.mubr.f32.vlgmr.msra.gmra.mxu0 %v34441_v32  ;;  %29179 = vmatmul.mubr.f32.vlgmr.msra.gmra.mxu1 %v34441_v32 }
0x13df   :  { %29193 = vmatpush3.msra.mxu1 %v33019_v60  ;;  %29200 = vmatprep.mubr.f32.mxu1 %v32891_v62 }
0x13e0   :  { %29194 = vmatprep.subr.mxu1 %v33029_v50  ;;  %29161 = vmatprep.subr.mxu0 %v32915_v17 }
0x13e1   :  { %29195 = vmatpush3.msra.mxu1 %v33029_v50  ;;  %29162 = vmatpush3.msra.mxu0 %v32915_v17 }
0x13e2   :  { %29163 = vmatprep.mubr.f32.mxu0 %v34441_v32  ;;  %29196 = vmatprep.subr.mxu1 %v33037_v46 }
0x13e3   :  { %29164 = vmatmul.mubr.f32.vlgmr.msra.gmra.mxu0 %v34441_v32  ;;  %29197 = vmatpush3.msra.mxu1 %v33037_v46 }
0x13e4   :  { %29171 = vmatprep.subr.mxu0 %v32932_v34  ;;  %29198 = vmatprep.subr.mxu1 %v33043_v45 }
0x13e5   :  { %29172 = vmatpush3.msra.mxu0 %v32932_v34  ;;  %29199 = vmatpush3.msra.mxu1 %v33043_v45 }
0x13e6   :  { %29173 = vmatprep.mubr.f32.mxu0 %v34441_v32  ;;  %29181 = vmatprep.subr.mxu0 %v32938_v6 }
0x13e7   :  { %29201 = vmatmul.mubr.f32.vlgmr.msra.gmra.mxu1 %v32884_v38  ;;  %29214 = vmatprep.subr.mxu1 %v32938_v6 }
0x13e8   :  { %29174 = vmatmul.mubr.f32.vlgmr.msra.gmra.mxu0 %v34441_v32  ;;  %29215 = vmatpush3.msra.mxu1 %v32938_v6 }
0x13e9   :  { %29182 = vmatpush3.msra.mxu0 %v32938_v6  ;;  %29222 = vmatprep.mubr.f32.mxu1 %v32905_v10 }
0x13ea   :  { %29183 = vmatprep.subr.mxu0 %v32954_v63  ;;  %29189 = vmatprep.mubr.f32.mxu0 %v32919_v21 }
0x13eb   :  { %29216 = vmatprep.subr.mxu1 %v32954_v63  ;;  %29184 = vmatpush3.msra.mxu0 %v32954_v63 }
0x13ec   :  { %29217 = vmatpush3.msra.mxu1 %v32954_v63  ;;  %29185 = vmatprep.subr.mxu0 %v32966_v15 }
0x13ed   :  { %29218 = vmatprep.subr.mxu1 %v32966_v15  ;;  %29186 = vmatpush3.msra.mxu0 %v32966_v15 }
0x13ee   :  { %29219 = vmatpush3.msra.mxu1 %v32966_v15  ;;  %29187 = vmatprep.subr.mxu0 %v32977_v55 }
0x13ef   :  { %29220 = vmatprep.subr.mxu1 %v32977_v55  ;;  %29188 = vmatpush3.msra.mxu0 %v32977_v55 }
0x13f0   :  { %29221 = vmatpush3.msra.mxu1 %v32977_v55  ;;  %29190 = vmatmul.mubr.f32.vlgmr.msra.gmra.mxu0 %v32922_v30 }
0x13f1   :  { %29203 = vmatprep.subr.mxu0 %v32959_v7  ;;  %29223 = vmatmul.mubr.f32.vlgmr.msra.gmra.mxu1 %v32894_v36 }
0x13f2   :  { %29236 = vmatprep.subr.mxu1 %v32938_v6  ;;  %29204 = vmatpush3.msra.mxu0 %v32959_v7 }
0x13f3   :  { %29211 = vmatprep.mubr.f32.mxu0 %v32897_v16  ;;  %29237 = vmatpush3.msra.mxu1 %v32938_v6 }
0x13f4   :  { %29244 = vmatprep.mubr.f32.mxu1 %v32891_v62  ;;  %29205 = vmatprep.subr.mxu0 %v32975_v54 }
0x13f5   :  { %29238 = vmatprep.subr.mxu1 %v32954_v63  ;;  %29206 = vmatpush3.msra.mxu0 %v32975_v54 }
0x13f6   :  { %29239 = vmatpush3.msra.mxu1 %v32954_v63  ;;  %29207 = vmatprep.subr.mxu0 %v32987_v1 }
0x13f7   :  { %29240 = vmatprep.subr.mxu1 %v32966_v15  ;;  %29208 = vmatpush3.msra.mxu0 %v32987_v1 }
0x13f8   :  { %29241 = vmatpush3.msra.mxu1 %v32966_v15  ;;  %29209 = vmatprep.subr.mxu0 %v32997_v39 }
0x13f9   :  { %29242 = vmatprep.subr.mxu1 %v32977_v55  ;;  %29210 = vmatpush3.msra.mxu0 %v32997_v39 }
0x13fa   :  { %29243 = vmatpush3.msra.mxu1 %v32977_v55  ;;  %29212 = vmatmul.mubr.f32.vlgmr.msra.gmra.mxu0 %v32889_v43 }
0x13fb   :  { %29225 = vmatprep.subr.mxu0 %v32982_v59  ;;  %29245 = vmatmul.mubr.f32.vlgmr.msra.gmra.mxu1 %v32884_v38 }
0x13fc   :  { %29226 = vmatpush3.msra.mxu0 %v32982_v59  ;;  %29233 = vmatprep.mubr.f32.mxu0 %v32891_v62 }
0x13fd   :  { %29227 = vmatprep.subr.mxu0 %v32994_v2 }
0x13fe   :  { %29228 = vmatpush3.msra.mxu0 %v32994_v2 }
0x13ff   :  { %29229 = vmatprep.subr.mxu0 %v33006_v61 }
0x1400   :  { %29230 = vmatpush3.msra.mxu0 %v33006_v61 }
0x1401   :  { %29231 = vmatprep.subr.mxu0 %v33015_v28 }
0x1402   :  { %29232 = vmatpush3.msra.mxu0 %v33015_v28 }
0x1403   :  { %29234 = vmatmul.mubr.f32.vlgmr.msra.gmra.mxu0 %v32884_v38 }
0x147f   :  { %v29106_v4 = vpop.f32.mrf.mxu1 }
0x1481   :  { %v18059_v25 = vpop.f32.mrf.mxu1 }
0x1487   :  { %v29128_v9 = vpop.f32.mrf.mxu1 }
0x1488   :  { %v29095_v5 = vpop.f32.mrf.mxu0 }
0x1489   :  { %v18229_v43 = vpop.f32.mrf.mxu1  ;;  %v18066_v36 = vadd.f32 %v29106_v4, %v29095_v5 }
0x148a   :  { %v17958_v40 = vpop.f32.mrf.mxu0 }
0x148b   :  { %v18060_v56 = vadd.f32 %v18059_v25, %v17958_v40 }
0x1490   :  { %v29117_v62 = vpop.f32.mrf.mxu0 }
0x1491   :  { %v29150_v16 = vpop.f32.mrf.mxu1  ;;  %v18153_v19 = vadd.f32 %v29117_v62, %v18066_v36 }
0x1492   :  { %v18145_v10 = vpop.f32.mrf.mxu0 }
0x1493   :  { %v18146_v21 = vadd.f32 %v18145_v10, %v18060_v56  ;;  %v18401_v30 = vpop.f32.mrf.mxu1  ;;  %v18238_v11 = vadd.f32 %v29128_v9, %v18153_v19 }
0x1495   :  { %v18230_v0 = vadd.f32 %v18229_v43, %v18146_v21 }
0x1496   :  { %v29160_v31 = vpop.f32.mrf.mxu1 }
0x1498   :  { %v18574_v32 = vpop.f32.mrf.mxu1 }
0x1499   :  { %v29139_v48 = vpop.f32.mrf.mxu0 }
0x149a   :  { %v18327_v26 = vadd.f32 %v29139_v48, %v18238_v11  ;;  %v29170_v61 = vpop.f32.mrf.mxu1  ;;  %v26130_v48 = vld [vmem:[#allocation16] ss:$0 sm:$0xff] }
0x149b   :  { %v18320_v38 = vpop.f32.mrf.mxu0 }
0x149c   :  { %v18321_v12 = vadd.f32 %v18320_v38, %v18230_v0  ;;  %v18408_v49 = vadd.f32 %v29150_v16, %v18327_v26  ;;  %v18735_v62 = vpop.f32.mrf.mxu1 }
0x149e   :  { %v29155_v33 = vpop.f32.mrf.mxu0  ;;  %v18402_v37 = vadd.f32 %v18401_v30, %v18321_v12  ;;  %v29180_v19 = vpop.f32.mrf.mxu1 }
0x149f   :  { %v18499_v28 = vadd.f32 %v29155_v33, %v18408_v49 }
0x14a0   :  { %v18488_v4 = vpop.f32.mrf.mxu0  ;;  %v18895_v0 = vpop.f32.mrf.mxu1 }
0x14a1   :  { %v18489_v5 = vadd.f32 %v18488_v4, %v18402_v37  ;;  %v18581_v2 = vadd.f32 %v29160_v31, %v18499_v28 }
0x14a3   :  { %v29165_v25 = vpop.f32.mrf.mxu0  ;;  %v18575_v40 = vadd.f32 %v18574_v32, %v18489_v5 }
0x14a4   :  { %v18662_v36 = vadd.f32 %v29165_v25, %v18581_v2 }
0x14a5   :  { %v18654_v10 = vpop.f32.mrf.mxu0 }
0x14a6   :  { %v18655_v9 = vadd.f32 %v18654_v10, %v18575_v40  ;;  %v18744_v56 = vadd.f32 %v29170_v61, %v18662_v36 }
0x14a8   :  { %v29175_v43 = vpop.f32.mrf.mxu0  ;;  %v18736_v21 = vadd.f32 %v18735_v62, %v18655_v9 }
0x14a9   :  { %v18824_v11 = vadd.f32 %v29175_v43, %v18744_v56 }
0x14aa   :  { %v18817_v16 = vpop.f32.mrf.mxu0 }
0x14ab   :  { %v18902_v26 = vadd.f32 %v29180_v19, %v18824_v11  ;;  %v18818_v30 = vadd.f32 %v18817_v16, %v18736_v21 }
0x14ad   :  { %v18912_v38 = vadd.f32 %v26130_v48, %v18902_v26  ;;  %v18896_v12 = vadd.f32 %v18895_v0, %v18818_v30  ;;  %v17862_v26 = vld [vmem:[#allocation18 + $0x18] sm:$0xff]  ;;  %v17861_v30 = vld [vmem:[#allocation18 + $0x10] sm:$0xff] }
0x14ae   :  { %v33134_v0 = vand.u32 4294901760, %v17862_v26 }
0x14af   :  { %v26132_v49 = vmul.f32 -1.442695, %v18912_v38  ;;  %v18911_v28 = vadd.f32 %v26130_v48, %v18896_v12 }
0x14b0   :  { %34446 = vst [vmem:[#allocation32_spill] sm:$0xff] %v33134_v0  ;;  %v33139_v12 = vsub.f32 %v17862_v26, %v33134_v0  ;;  %29247 = vmatprep.subr.mxu0 %v33134_v0 }
0x14b1   :  { %30113 = vpow2.f32 %v26132_v49  ;;  %v26131_v31 = vmul.f32 -1.442695, %v18911_v28  ;;  %29248 = vmatpush3.msra.mxu0 %v33134_v0 }
0x14b2   :  { %34448 = vst [vmem:[#allocation36_spill] sm:$0xff] %v33139_v12 }
0x14b3   :  { %30115 = vpow2.f32 %v26131_v31 }
0x14b4   :  { %30117 = vtanh.f32 %v18912_v38  ;;  %v33136_v38 = vand.u32 4294901760, %v17861_v30 }
0x14b6   :  { %34447 = vst [vmem:[#allocation47_spill] sm:$0xff] %v33136_v38  ;;  %v33142_v49 = vsub.f32 %v17861_v30, %v33136_v38  ;;  %29249 = vmatprep.subr.mxu0 %v33136_v38 }
0x14b7   :  { %29250 = vmatpush3.msra.mxu0 %v33136_v38 }
0x14b8   :  { %34449 = vst [vmem:[#allocation48_spill] sm:$0xff] %v33142_v49  ;;  %v33150_v31 = vand.u32 4294901760, %v33142_v49 }
0x14ba   :  { %34451 = vst [vmem:[#allocation41_spill] sm:$0xff] %v33150_v31 }
0x14be   :  { %v30114_v2 = vpop.eup %30113 }
0x14bf   :  { %v18922_v32 = vadd.f32 1.0, %v30114_v2 }
0x14c0   :  { %v30116_v33 = vpop.eup %30115 }
0x14c1   :  { %30119 = vrcp.f32 %v18922_v32  ;;  %v18921_v61 = vadd.f32 1.0, %v30116_v33  ;;  %v30118_v37 = vpop.eup %30117  ;;  %v19625_v32 = vsub.f32 %v33142_v49, %v33150_v31 }
0x14c2   :  { %30121 = vtanh.f32 %v18911_v28  ;;  %v33147_v28 = vand.u32 4294901760, %v33139_v12 }
0x14c3   :  { %30123 = vrcp.f32 %v18921_v61 }
0x14c4   :  { %34450 = vst [vmem:[#allocation38_spill] sm:$0xff] %v33147_v28  ;;  %v19618_v2 = vsub.f32 %v33139_v12, %v33147_v28 }
0x14c6   :  { %v33159_v61 = vand.u32 4294901760, %v19618_v2 }
0x14c8   :  { %34452 = vst [vmem:[#allocation39_spill] sm:$0xff] %v33159_v61  ;;  %29258 = vmatprep.subr.mxu1 %v33159_v61 }
0x14c9   :  { %29259 = vmatpush3.msra.mxu1 %v33159_v61 }
0x14ce   :  { %v30120_v4 = vpop.eup %30119 }
0x14cf   :  { %v30122_v5 = vpop.eup %30121  ;;  %v33110_v25 = vsel %vm31704_vm7, %v30118_v37, %v30120_v4  ;;  %v33161_v37 = vand.u32 4294901760, %v19625_v32 }
0x14d0   :  { %v30124_v40 = vpop.eup %30123  ;;  %18935 = vrot.lane.b32.xlu1 %v33110_v25, %s30486_s7  ;;  %v18930_v19 = vmul.f32 %v33110_v25, %v32803_v53 }
0x14d1   :  { %v33116_v62 = vsel %vm31704_vm7, %v30122_v5, %v30124_v40  ;;  %34453 = vst [vmem:[#allocation43_spill] sm:$0xff] %v33161_v37  ;;  %29260 = vmatprep.subr.mxu1 %v33161_v37  ;;  %v17860_v5 = vld [vmem:[#allocation18 + $0x8] sm:$0xff] }
0x14d2   :  { %18933 = vrot.lane.b32.xlu0 %v33116_v62, %s30486_s7  ;;  %v18929_v11 = vmul.f32 %v33116_v62, %v32808_v14  ;;  %29261 = vmatpush3.msra.mxu1 %v33161_v37  ;;  %v33168_v40 = vand.u32 4294901760, %v17860_v5 }
0x14d4   :  { %34454 = vst [vmem:[#allocation42_spill] sm:$0xff] %v33168_v40  ;;  %29251 = vmatprep.subr.mxu0 %v33168_v40 }
0x14d5   :  { %29252 = vmatpush3.msra.mxu0 %v33168_v40 }
0x1542   :  { %v18936_v36 = vpop.permute.xlu1 %18935 }
0x1543   :  { %v18940_v10 = vmul.f32 %v18936_v36, %v33110_v25  ;;  %v17859_v36 = vld [vmem:[#allocation18] sm:$0xff] }
0x1544   :  { %v18934_v9 = vpop.permute.xlu0 %18933 }
0x1545   :  { %v18939_v56 = vmul.f32 %v18934_v9, %v33116_v62  ;;  %18945 = vrot.lane.b32.xlu1 %v18940_v10, %s30487_s21  ;;  %v33171_v10 = vsub.f32 %v17860_v5, %v33168_v40  ;;  %v33173_v9 = vand.u32 4294901760, %v17859_v36 }
0x1547   :  { %18943 = vrot.lane.b32.xlu0 %v18939_v56, %s30487_s21  ;;  %34455 = vst [vmem:[#allocation45_spill] sm:$0xff] %v33171_v10  ;;  %34456 = vst [vmem:[#allocation58_spill] sm:$0xff] %v33173_v9  ;;  %v33178_v56 = vand.u32 4294901760, %v33171_v10  ;;  %29253 = vmatprep.subr.mxu0 %v33173_v9 }
0x1548   :  { %29254 = vmatpush3.msra.mxu0 %v33173_v9 }
0x1549   :  { %34457 = vst [vmem:[#allocation44_spill] sm:$0xff] %v33178_v56  ;;  %29269 = vmatprep.subr.mxu0 %v33139_v12 }
0x15b7   :  { %v18946_v43 = vpop.permute.xlu1 %18945 }
0x15b8   :  { %v33126_v21 = vadd.f32 %v18946_v43, %v18930_v19  ;;  %v33181_v19 = vsub.f32 %v17859_v36, %v33173_v9  ;;  %v19632_v43 = vsub.f32 %v33171_v10, %v33178_v56 }
0x15b9   :  { %v18944_v48 = vpop.permute.xlu0 %18943 }
0x15ba   :  { %34444 = vst [vmem:[#allocation35_spill] sm:$0xff] %v33126_v21  ;;  %30125 = vtanh.f32 %v33126_v21  ;;  %v33131_v16 = vadd.f32 %v18944_v48, %v18929_v11  ;;  %34458 = vst [vmem:[#allocation46_spill] sm:$0xff] %v33181_v19  ;;  %v33188_v11 = vand.u32 4294901760, %v33181_v19  ;;  %v33191_v48 = vand.u32 4294901760, %v19632_v43 }
0x15bc   :  { %34445 = vst [vmem:[#allocation37_spill] sm:$0xff] %v33131_v16  ;;  %30127 = vtanh.f32 %v33131_v16  ;;  %34459 = vst [vmem:[#allocation59_spill] sm:$0xff] %v33188_v11  ;;  %v19639_v26 = vsub.f32 %v33181_v19, %v33188_v11  ;;  %29262 = vmatprep.subr.mxu1 %v33191_v48 }
0x15bd   :  { %34460 = vst [vmem:[#allocation60_spill] sm:$0xff] %v33191_v48  ;;  %29263 = vmatpush3.msra.mxu1 %v33191_v48 }
0x15be   :  { %v33196_v30 = vand.u32 4294901760, %v19639_v26 }
0x15c0   :  { %34461 = vst [vmem:[#allocation61_spill] sm:$0xff] %v33196_v30  ;;  %29264 = vmatprep.subr.mxu1 %v33196_v30 }
0x15c1   :  { %29265 = vmatpush3.msra.mxu1 %v33196_v30 }
0x15c2   :  { %29280 = vmatprep.subr.mxu1 %v33134_v0 }
0x15c7   :  { %v30126_v33 = vpop.eup %30125 }
0x15c8   :  { %18957 = vrot.lane.b32.xlu1 %v30126_v33, %s30486_s7 }
0x15c9   :  { %v30128_v4 = vpop.eup %30127 }
0x15ca   :  { %18955 = vrot.lane.b32.xlu0 %v30128_v4, %s30486_s7 }
0x163a   :  { %v18958_v2 = vpop.permute.xlu1 %18957 }
0x163b   :  { %v18962_v32 = vmul.f32 %v18958_v2, %v33110_v25 }
0x163c   :  { %v18956_v33 = vpop.permute.xlu0 %18955 }
0x163d   :  { %v18961_v4 = vmul.f32 %v18956_v33, %v33116_v62  ;;  %19495 = vrot.lane.b32.xlu1 %v18962_v32, %s30487_s21 }
0x163f   :  { %19493 = vrot.lane.b32.xlu0 %v18961_v4, %s30487_s21 }
0x16af   :  { %v19496_v5 = vpop.permute.xlu1 %19495 }
0x16b0   :  { %v19499_v36 = vsel %vm8983_vm8, %v19496_v5, 0  ;;  %v29191_v5 = vpop.f32.mrf.mxu0 }
0x16b1   :  { %v33207_v43 = vand.u32 4294901760, %v19499_v36  ;;  %v19494_v26 = vpop.permute.xlu0 %19493 }
0x16b2   :  { %v19497_v16 = vsel %vm8983_vm8, %v19494_v26, 0  ;;  %v19038_v26 = vpop.f32.mrf.mxu0 }
0x16b3   :  { %v33211_v21 = vsub.f32 %v19499_v36, %v33207_v43  ;;  %v33213_v30 = vand.u32 4294901760, %v19497_v16  ;;  %v29202_v36 = vpop.f32.mrf.mxu1 }
0x16b5   :  { %v33216_v25 = vand.u32 4294901760, %v33211_v21  ;;  %v33219_v62 = vsub.f32 %v19497_v16, %v33213_v30  ;;  %29266 = vmatprep.mubr.f32.mxu1 %v33213_v30 }
0x16b6   :  { %29267 = vmatmul.mubr.f32.vlgmr.msra.gmra.mxu1 %v33207_v43 }
0x16b7   :  { %29281 = vmatpush3.msra.mxu1 %v33134_v0  ;;  %v33225_v2 = vand.u32 4294901760, %v33219_v62  ;;  %v19583_v32 = vsub.f32 %v33211_v21, %v33216_v25 }
0x16b8   :  { %29282 = vmatprep.subr.mxu1 %v33136_v38 }
0x16b9   :  { %29283 = vmatpush3.msra.mxu1 %v33136_v38  ;;  %29288 = vmatprep.mubr.f32.mxu1 %v33225_v2  ;;  %v19573_v16 = vsub.f32 %v33219_v62, %v33225_v2  ;;  %v33239_v4 = vand.u32 4294901760, %v19583_v32  ;;  %v29213_v32 = vpop.f32.mrf.mxu0 }
0x16ba   :  { %29284 = vmatprep.subr.mxu1 %v33168_v40 }
0x16bb   :  { %29285 = vmatpush3.msra.mxu1 %v33168_v40  ;;  %v33236_v33 = vand.u32 4294901760, %v19573_v16  ;;  %v19139_v16 = vpop.f32.mrf.mxu1 }
0x16bc   :  { %29286 = vmatprep.subr.mxu1 %v33173_v9 }
0x16bd   :  { %29287 = vmatpush3.msra.mxu1 %v33173_v9  ;;  %29255 = vmatprep.mubr.f32.mxu0 %v33236_v33 }
0x16be   :  { %29289 = vmatmul.mubr.f32.vlgmr.msra.gmra.mxu1 %v33216_v25  ;;  %29302 = vmatprep.subr.mxu1 %v33134_v0 }
0x16bf   :  { %29256 = vmatmul.mubr.f32.vlgmr.msra.gmra.mxu0 %v33239_v4  ;;  %29303 = vmatpush3.msra.mxu1 %v33134_v0 }
0x16c0   :  { %29270 = vmatpush3.msra.mxu0 %v33139_v12  ;;  %29310 = vmatprep.mubr.f32.mxu1 %v33213_v30 }
0x16c1   :  { %29271 = vmatprep.subr.mxu0 %v33142_v49  ;;  %29277 = vmatprep.mubr.f32.mxu0 %v33219_v62 }
0x16c2   :  { %29304 = vmatprep.subr.mxu1 %v33136_v38  ;;  %29272 = vmatpush3.msra.mxu0 %v33142_v49  ;;  %v19140_v49 = vadd.f32 %v19139_v16, %v19038_v26 }
0x16c3   :  { %29305 = vmatpush3.msra.mxu1 %v33136_v38  ;;  %29273 = vmatprep.subr.mxu0 %v33171_v10 }
0x16c4   :  { %29306 = vmatprep.subr.mxu1 %v33168_v40  ;;  %29274 = vmatpush3.msra.mxu0 %v33171_v10  ;;  %v19225_v10 = vpop.f32.mrf.mxu0 }
0x16c5   :  { %29307 = vmatpush3.msra.mxu1 %v33168_v40  ;;  %29275 = vmatprep.subr.mxu0 %v33181_v19 }
0x16c6   :  { %29308 = vmatprep.subr.mxu1 %v33173_v9  ;;  %29276 = vmatpush3.msra.mxu0 %v33181_v19  ;;  %v29224_v19 = vpop.f32.mrf.mxu1  ;;  %v29235_v12 = vpop.f32.mrf.mxu0 }
0x16c7   :  { %29309 = vmatpush3.msra.mxu1 %v33173_v9  ;;  %29278 = vmatmul.mubr.f32.vlgmr.msra.gmra.mxu0 %v33211_v21  ;;  %v19226_v9 = vadd.f32 %v19225_v10, %v19140_v49 }
0x16c8   :  { %29291 = vmatprep.subr.mxu0 %v33147_v28  ;;  %29311 = vmatmul.mubr.f32.vlgmr.msra.gmra.mxu1 %v33207_v43  ;;  %v19309_v40 = vpop.f32.mrf.mxu1  ;;  %v19400_v0 = vpop.f32.mrf.mxu0 }
0x16c9   :  { %29292 = vmatpush3.msra.mxu0 %v33147_v28  ;;  %29299 = vmatprep.mubr.f32.mxu0 %v33213_v30  ;;  %v19146_v28 = vadd.f32 %v29202_v36, %v29191_v5 }
0x16ca   :  { %29293 = vmatprep.subr.mxu0 %v33150_v31  ;;  %v29246_v38 = vpop.f32.mrf.mxu1 }
0x16cb   :  { %29294 = vmatpush3.msra.mxu0 %v33150_v31  ;;  %v19233_v31 = vadd.f32 %v29213_v32, %v19146_v28 }
0x16cc   :  { %29295 = vmatprep.subr.mxu0 %v33178_v56  ;;  %v19481_v59 = vpop.f32.mrf.mxu1 }
0x16cd   :  { %29296 = vmatpush3.msra.mxu0 %v33178_v56  ;;  %v19318_v56 = vadd.f32 %v29224_v19, %v19233_v31 }
0x16ce   :  { %29297 = vmatprep.subr.mxu0 %v33188_v11 }
0x16cf   :  { %29298 = vmatpush3.msra.mxu0 %v33188_v11  ;;  %v19407_v48 = vadd.f32 %v29235_v12, %v19318_v56  ;;  %v19310_v11 = vadd.f32 %v19309_v40, %v19226_v9 }
0x16d0   :  { %29300 = vmatmul.mubr.f32.vlgmr.msra.gmra.mxu0 %v33207_v43 }
0x16d1   :  { %v19401_v61 = vadd.f32 %v19400_v0, %v19310_v11  ;;  %v19488_v39 = vadd.f32 %v29246_v38, %v19407_v48  ;;  %v26133_v38 = vld [vmem:[#allocation19] ss:$0 sm:$0xff] }
0x16d3   :  { %v19482_v5 = vadd.f32 %v19481_v59, %v19401_v61 }
0x1776   :  { %v29268_v1 = vpop.f32.mrf.mxu1 }
0x1778   :  { %v19677_v26 = vpop.f32.mrf.mxu1 }
0x177e   :  { %v29290_v32 = vpop.f32.mrf.mxu1 }
0x177f   :  { %v29257_v37 = vpop.f32.mrf.mxu0 }
0x1780   :  { %v19587_v7 = vadd.f32 %v29257_v37, %v19488_v39  ;;  %v19847_v16 = vpop.f32.mrf.mxu1 }
0x1781   :  { %v19576_v54 = vpop.f32.mrf.mxu0 }
0x1782   :  { %v19577_v36 = vadd.f32 %v19576_v54, %v19482_v5  ;;  %v19684_v28 = vadd.f32 %v29268_v1, %v19587_v7 }
0x1784   :  { %v19678_v31 = vadd.f32 %v19677_v26, %v19577_v36 }
0x1787   :  { %v29279_v55 = vpop.f32.mrf.mxu0 }
0x1788   :  { %v19771_v10 = vadd.f32 %v29279_v55, %v19684_v28  ;;  %v29312_v40 = vpop.f32.mrf.mxu1 }
0x1789   :  { %v19763_v49 = vpop.f32.mrf.mxu0 }
0x178a   :  { %v19764_v19 = vadd.f32 %v19763_v49, %v19678_v31  ;;  %v19856_v12 = vadd.f32 %v29290_v32, %v19771_v10  ;;  %v20019_v59 = vpop.f32.mrf.mxu1 }
0x178c   :  { %v19848_v56 = vadd.f32 %v19847_v16, %v19764_v19 }
0x1790   :  { %v29301_v9 = vpop.f32.mrf.mxu0 }
0x1791   :  { %v19945_v0 = vadd.f32 %v29301_v9, %v19856_v12 }
0x1792   :  { %v19938_v11 = vpop.f32.mrf.mxu0 }
0x1793   :  { %v20026_v48 = vadd.f32 %v29312_v40, %v19945_v0  ;;  %v19939_v39 = vadd.f32 %v19938_v11, %v19848_v56 }
0x1795   :  { %v20036_v54 = vadd.f32 %v26133_v38, %v20026_v48  ;;  %v20020_v61 = vadd.f32 %v20019_v59, %v19939_v39  ;;  %v17871_v59 = vld [vmem:[%s34114_s18 + $0x18] sm:$0xff] }
0x1797   :  { %v26135_v37 = vmul.f32 -1.442695, %v20036_v54  ;;  %v20035_v7 = vadd.f32 %v26133_v38, %v20020_v61 }
0x1799   :  { %30129 = vpow2.f32 %v26135_v37  ;;  %v26134_v1 = vmul.f32 -1.442695, %v20035_v7 }
0x179b   :  { %30131 = vpow2.f32 %v26134_v1 }
0x179c   :  { %30133 = vtanh.f32 %v20036_v54  ;;  %v33306_v54 = vand.u32 4294901760, %v17871_v59 }
0x179e   :  { %29313 = vmatprep.subr.mxu0 %v33306_v54 }
0x179f   :  { %29314 = vmatpush3.msra.mxu0 %v33306_v54 }
0x17a6   :  { %v30130_v55 = vpop.eup %30129 }
0x17a7   :  { %v20046_v5 = vadd.f32 1.0, %v30130_v55 }
0x17a8   :  { %v30132_v36 = vpop.eup %30131 }
0x17a9   :  { %30135 = vrcp.f32 %v20046_v5  ;;  %v20045_v26 = vadd.f32 1.0, %v30132_v36  ;;  %v30134_v28 = vpop.eup %30133 }
0x17aa   :  { %30137 = vtanh.f32 %v20035_v7 }
0x17ab   :  { %30139 = vrcp.f32 %v20045_v26 }
0x17b6   :  { %v30136_v32 = vpop.eup %30135 }
0x17b7   :  { %v30138_v49 = vpop.eup %30137  ;;  %v33276_v10 = vsel %vm31704_vm7, %v30134_v28, %v30136_v32 }
0x17b8   :  { %v30140_v31 = vpop.eup %30139  ;;  %20059 = vrot.lane.b32.xlu1 %v33276_v10, %s30486_s7  ;;  %v20054_v0 = vmul.f32 %v33276_v10, %v32803_v53  ;;  %v17870_v53 = vld [vmem:[%s34114_s18 + $0x10] sm:$0xff] }
0x17b9   :  { %v33282_v19 = vsel %vm31704_vm7, %v30138_v49, %v30140_v31  ;;  %v33308_v61 = vand.u32 4294901760, %v17870_v53  ;;  %v17869_v49 = vld [vmem:[%s34114_s18 + $0x8] sm:$0xff] }
0x17ba   :  { %20057 = vrot.lane.b32.xlu0 %v33282_v19, %s30486_s7  ;;  %v20053_v11 = vmul.f32 %v33282_v19, %v32808_v14  ;;  %v33311_v14 = vsub.f32 %v17871_v59, %v33306_v54  ;;  %v33343_v31 = vand.u32 4294901760, %v17869_v49 }
0x17bb   :  { %v33314_v37 = vsub.f32 %v17870_v53, %v33308_v61  ;;  %29315 = vmatprep.subr.mxu0 %v33308_v61 }
0x17bc   :  { %v33319_v7 = vand.u32 4294901760, %v33311_v14  ;;  %29316 = vmatpush3.msra.mxu0 %v33308_v61 }
0x17bd   :  { %v33322_v1 = vand.u32 4294901760, %v33314_v37  ;;  %29317 = vmatprep.subr.mxu0 %v33343_v31 }
0x17be   :  { %v20220_v55 = vsub.f32 %v33311_v14, %v33319_v7  ;;  %29318 = vmatpush3.msra.mxu0 %v33343_v31 }
0x17bf   :  { %v20227_v5 = vsub.f32 %v33314_v37, %v33322_v1 }
0x17c0   :  { %v33331_v26 = vand.u32 4294901760, %v20220_v55 }
0x17c1   :  { %v33333_v28 = vand.u32 4294901760, %v20227_v5 }
0x17c2   :  { %34464 = vst [vmem:[#allocation69_spill] sm:$0xff] %v33331_v26  ;;  %29324 = vmatprep.subr.mxu1 %v33331_v26 }
0x17c3   :  { %34465 = vst [vmem:[#allocation70_spill] sm:$0xff] %v33333_v28  ;;  %29325 = vmatpush3.msra.mxu1 %v33331_v26 }
0x17c4   :  { %29326 = vmatprep.subr.mxu1 %v33333_v28 }
0x17c5   :  { %29327 = vmatpush3.msra.mxu1 %v33333_v28 }
0x182a   :  { %v20060_v16 = vpop.permute.xlu1 %20059 }
0x182b   :  { %v20064_v12 = vmul.f32 %v20060_v16, %v33276_v10  ;;  %v17868_v16 = vld [vmem:[%s34114_s18] sm:$0xff] }
0x182c   :  { %v20058_v40 = vpop.permute.xlu0 %20057 }
0x182d   :  { %v20063_v9 = vmul.f32 %v20058_v40, %v33282_v19  ;;  %20069 = vrot.lane.b32.xlu1 %v20064_v12, %s30487_s21  ;;  %v33349_v12 = vsub.f32 %v17869_v49, %v33343_v31  ;;  %v33351_v40 = vand.u32 4294901760, %v17868_v16 }
0x182f   :  { %20067 = vrot.lane.b32.xlu0 %v20063_v9, %s30487_s21  ;;  %v33356_v9 = vand.u32 4294901760, %v33349_v12  ;;  %29319 = vmatprep.subr.mxu0 %v33351_v40 }
0x1830   :  { %29320 = vmatpush3.msra.mxu0 %v33351_v40 }
0x1831   :  { %29335 = vmatprep.subr.mxu0 %v33311_v14 }
0x189f   :  { %v20070_v56 = vpop.permute.xlu1 %20069 }
0x18a0   :  { %v33292_v38 = vadd.f32 %v20070_v56, %v20054_v0  ;;  %v33359_v0 = vsub.f32 %v17868_v16, %v33351_v40  ;;  %v20234_v56 = vsub.f32 %v33349_v12, %v33356_v9 }
0x18a1   :  { %v20068_v48 = vpop.permute.xlu0 %20067 }
0x18a2   :  { %34462 = vst [vmem:[#allocation67_spill] sm:$0xff] %v33292_v38  ;;  %30141 = vtanh.f32 %v33292_v38  ;;  %v33297_v39 = vadd.f32 %v20068_v48, %v20053_v11  ;;  %v33366_v11 = vand.u32 4294901760, %v33359_v0  ;;  %v33369_v48 = vand.u32 4294901760, %v20234_v56 }
0x18a4   :  { %34463 = vst [vmem:[#allocation68_spill] sm:$0xff] %v33297_v39  ;;  %30143 = vtanh.f32 %v33297_v39  ;;  %34466 = vst [vmem:[#allocation71_spill] sm:$0xff] %v33369_v48  ;;  %v20241_v59 = vsub.f32 %v33359_v0, %v33366_v11  ;;  %29328 = vmatprep.subr.mxu1 %v33369_v48 }
0x18a5   :  { %29329 = vmatpush3.msra.mxu1 %v33369_v48 }
0x18a6   :  { %v33374_v53 = vand.u32 4294901760, %v20241_v59 }
0x18a8   :  { %34467 = vst [vmem:[#allocation72_spill] sm:$0xff] %v33374_v53  ;;  %29330 = vmatprep.subr.mxu1 %v33374_v53 }
0x18a9   :  { %29331 = vmatpush3.msra.mxu1 %v33374_v53 }
0x18aa   :  { %29346 = vmatprep.subr.mxu1 %v33306_v54 }
0x18af   :  { %v30142_v36 = vpop.eup %30141 }
0x18b0   :  { %20081 = vrot.lane.b32.xlu1 %v30142_v36, %s30486_s7 }
0x18b1   :  { %v30144_v32 = vpop.eup %30143 }
0x18b2   :  { %20079 = vrot.lane.b32.xlu0 %v30144_v32, %s30486_s7 }
0x1922   :  { %v20082_v55 = vpop.permute.xlu1 %20081 }
0x1923   :  { %v20086_v5 = vmul.f32 %v20082_v55, %v33276_v10 }
0x1924   :  { %v20080_v36 = vpop.permute.xlu0 %20079 }
0x1925   :  { %v20085_v32 = vmul.f32 %v20080_v36, %v33282_v19  ;;  %20097 = vrot.lane.b32.xlu1 %v20086_v5, %s30487_s21 }
0x1927   :  { %20095 = vrot.lane.b32.xlu0 %v20085_v32, %s30487_s21 }
0x1997   :  { %v20098_v49 = vpop.permute.xlu1 %20097 }
0x1998   :  { %v20101_v16 = vsel %vm8983_vm8, %v20098_v49, 0 }
0x1999   :  { %v33385_v56 = vand.u32 4294901760, %v20101_v16  ;;  %v20096_v59 = vpop.permute.xlu0 %20095 }
0x199a   :  { %v20099_v39 = vsel %vm8983_vm8, %v20096_v59, 0 }
0x199b   :  { %v33389_v38 = vsub.f32 %v20101_v16, %v33385_v56  ;;  %v33391_v53 = vand.u32 4294901760, %v20099_v39 }
0x199d   :  { %v33394_v10 = vand.u32 4294901760, %v33389_v38  ;;  %v33397_v19 = vsub.f32 %v20099_v39, %v33391_v53  ;;  %29332 = vmatprep.mubr.f32.mxu1 %v33391_v53 }
0x199e   :  { %29333 = vmatmul.mubr.f32.vlgmr.msra.gmra.mxu1 %v33385_v56 }
0x199f   :  { %29347 = vmatpush3.msra.mxu1 %v33306_v54  ;;  %v33403_v55 = vand.u32 4294901760, %v33397_v19  ;;  %v20185_v5 = vsub.f32 %v33389_v38, %v33394_v10 }
0x19a0   :  { %29348 = vmatprep.subr.mxu1 %v33308_v61 }
0x19a1   :  { %29349 = vmatpush3.msra.mxu1 %v33308_v61  ;;  %29354 = vmatprep.mubr.f32.mxu1 %v33403_v55  ;;  %v20175_v39 = vsub.f32 %v33397_v19, %v33403_v55  ;;  %v33417_v32 = vand.u32 4294901760, %v20185_v5 }
0x19a2   :  { %29350 = vmatprep.subr.mxu1 %v33343_v31 }
0x19a3   :  { %29351 = vmatpush3.msra.mxu1 %v33343_v31  ;;  %v33414_v36 = vand.u32 4294901760, %v20175_v39 }
0x19a4   :  { %29352 = vmatprep.subr.mxu1 %v33351_v40 }
0x19a5   :  { %29353 = vmatpush3.msra.mxu1 %v33351_v40  ;;  %29321 = vmatprep.mubr.f32.mxu0 %v33414_v36 }
0x19a6   :  { %29355 = vmatmul.mubr.f32.vlgmr.msra.gmra.mxu1 %v33394_v10  ;;  %29368 = vmatprep.subr.mxu1 %v33306_v54 }
0x19a7   :  { %29322 = vmatmul.mubr.f32.vlgmr.msra.gmra.mxu0 %v33417_v32  ;;  %29369 = vmatpush3.msra.mxu1 %v33306_v54 }
0x19a8   :  { %29336 = vmatpush3.msra.mxu0 %v33311_v14  ;;  %29376 = vmatprep.mubr.f32.mxu1 %v33391_v53 }
0x19a9   :  { %29337 = vmatprep.subr.mxu0 %v33314_v37  ;;  %29343 = vmatprep.mubr.f32.mxu0 %v33397_v19 }
0x19aa   :  { %29370 = vmatprep.subr.mxu1 %v33308_v61  ;;  %29338 = vmatpush3.msra.mxu0 %v33314_v37 }
0x19ab   :  { %29371 = vmatpush3.msra.mxu1 %v33308_v61  ;;  %29339 = vmatprep.subr.mxu0 %v33349_v12 }
0x19ac   :  { %29372 = vmatprep.subr.mxu1 %v33343_v31  ;;  %29340 = vmatpush3.msra.mxu0 %v33349_v12 }
0x19ad   :  { %29373 = vmatpush3.msra.mxu1 %v33343_v31  ;;  %29341 = vmatprep.subr.mxu0 %v33359_v0 }
0x19ae   :  { %29374 = vmatprep.subr.mxu1 %v33351_v40  ;;  %29342 = vmatpush3.msra.mxu0 %v33359_v0 }
0x19af   :  { %29375 = vmatpush3.msra.mxu1 %v33351_v40  ;;  %29344 = vmatmul.mubr.f32.vlgmr.msra.gmra.mxu0 %v33389_v38 }
0x19b0   :  { %29357 = vmatprep.subr.mxu0 %v33319_v7  ;;  %29377 = vmatmul.mubr.f32.vlgmr.msra.gmra.mxu1 %v33385_v56 }
0x19b1   :  { %29390 = vmatprep.subr.mxu1 %v32836_v29  ;;  %29358 = vmatpush3.msra.mxu0 %v33319_v7 }
0x19b2   :  { %29365 = vmatprep.mubr.f32.mxu0 %v33391_v53  ;;  %29391 = vmatpush3.msra.mxu1 %v32836_v29 }
0x19b3   :  { %29398 = vmatprep.mubr.f32.mxu1 %v33213_v30  ;;  %29359 = vmatprep.subr.mxu0 %v33322_v1 }
0x19b4   :  { %29392 = vmatprep.subr.mxu1 %v32838_v20  ;;  %29360 = vmatpush3.msra.mxu0 %v33322_v1 }
0x19b5   :  { %29393 = vmatpush3.msra.mxu1 %v32838_v20  ;;  %29361 = vmatprep.subr.mxu0 %v33356_v9 }
0x19b6   :  { %29394 = vmatprep.subr.mxu1 %v32868_v3  ;;  %29362 = vmatpush3.msra.mxu0 %v33356_v9 }
0x19b7   :  { %29395 = vmatpush3.msra.mxu1 %v32868_v3  ;;  %29363 = vmatprep.subr.mxu0 %v33366_v11 }
0x19b8   :  { %29396 = vmatprep.subr.mxu1 %v32873_v18  ;;  %29364 = vmatpush3.msra.mxu0 %v33366_v11 }
0x19b9   :  { %29397 = vmatpush3.msra.mxu1 %v32873_v18  ;;  %29366 = vmatmul.mubr.f32.vlgmr.msra.gmra.mxu0 %v33385_v56 }
0x19ba   :  { %29379 = vmatprep.subr.mxu0 %v32811_v13  ;;  %29399 = vmatmul.mubr.f32.vlgmr.msra.gmra.mxu1 %v33207_v43 }
0x19bb   :  { %29412 = vmatprep.subr.mxu1 %v32811_v13  ;;  %29380 = vmatpush3.msra.mxu0 %v32811_v13 }
0x19bc   :  { %29387 = vmatprep.mubr.f32.mxu0 %v33236_v33  ;;  %29413 = vmatpush3.msra.mxu1 %v32811_v13 }
0x19bd   :  { %29420 = vmatprep.mubr.f32.mxu1 %v33225_v2  ;;  %29381 = vmatprep.subr.mxu0 %v32813_v52 }
0x19be   :  { %29414 = vmatprep.subr.mxu1 %v32813_v52  ;;  %29382 = vmatpush3.msra.mxu0 %v32813_v52 }
0x19bf   :  { %29415 = vmatpush3.msra.mxu1 %v32813_v52  ;;  %29383 = vmatprep.subr.mxu0 %v32845_v51 }
0x19c0   :  { %29416 = vmatprep.subr.mxu1 %v32845_v51  ;;  %29384 = vmatpush3.msra.mxu0 %v32845_v51 }
0x19c1   :  { %29417 = vmatpush3.msra.mxu1 %v32845_v51  ;;  %29385 = vmatprep.subr.mxu0 %v32850_v57 }
0x19c2   :  { %29418 = vmatprep.subr.mxu1 %v32850_v57  ;;  %29386 = vmatpush3.msra.mxu0 %v32850_v57 }
0x19c3   :  { %29419 = vmatpush3.msra.mxu1 %v32850_v57  ;;  %29388 = vmatmul.mubr.f32.vlgmr.msra.gmra.mxu0 %v33239_v4 }
0x19c4   :  { %29401 = vmatprep.subr.mxu0 %v32816_v41  ;;  %29421 = vmatmul.mubr.f32.vlgmr.msra.gmra.mxu1 %v33216_v25 }
0x19c5   :  { %29434 = vmatprep.subr.mxu1 %v32811_v13  ;;  %29402 = vmatpush3.msra.mxu0 %v32816_v41 }
0x19c6   :  { %29409 = vmatprep.mubr.f32.mxu0 %v33219_v62  ;;  %29435 = vmatpush3.msra.mxu1 %v32811_v13 }
0x19c7   :  { %29442 = vmatprep.mubr.f32.mxu1 %v33213_v30  ;;  %29403 = vmatprep.subr.mxu0 %v32819_v35 }
0x19c8   :  { %29436 = vmatprep.subr.mxu1 %v32813_v52  ;;  %29404 = vmatpush3.msra.mxu0 %v32819_v35 }
0x19c9   :  { %29437 = vmatpush3.msra.mxu1 %v32813_v52  ;;  %29405 = vmatprep.subr.mxu0 %v32848_v22 }
0x19ca   :  { %29438 = vmatprep.subr.mxu1 %v32845_v51  ;;  %29406 = vmatpush3.msra.mxu0 %v32848_v22 }
0x19cb   :  { %29439 = vmatpush3.msra.mxu1 %v32845_v51  ;;  %29407 = vmatprep.subr.mxu0 %v32858_v23 }
0x19cc   :  { %29440 = vmatprep.subr.mxu1 %v32850_v57  ;;  %29408 = vmatpush3.msra.mxu0 %v32858_v23 }
0x19cd   :  { %29441 = vmatpush3.msra.mxu1 %v32850_v57  ;;  %29410 = vmatmul.mubr.f32.vlgmr.msra.gmra.mxu0 %v33211_v21 }
0x19ce   :  { %29423 = vmatprep.subr.mxu0 %v32824_v58  ;;  %29443 = vmatmul.mubr.f32.vlgmr.msra.gmra.mxu1 %v33207_v43 }
0x19cf   :  { %29424 = vmatpush3.msra.mxu0 %v32824_v58  ;;  %29431 = vmatprep.mubr.f32.mxu0 %v33213_v30  ;;  %v26136_v30 = vld [vmem:[%s34115_s19] ss:$0 sm:$0xff] }
0x19d0   :  { %29425 = vmatprep.subr.mxu0 %v32827_v44  ;;  %29450 = vmatprep.subr.mxu1 %v32970_v47 }
0x19d1   :  { %29426 = vmatpush3.msra.mxu0 %v32827_v44  ;;  %29451 = vmatpush3.msra.mxu1 %v32970_v47 }
0x19d2   :  { %29427 = vmatprep.subr.mxu0 %v32855_v24  ;;  %29460 = vmatprep.subr.mxu1 %v32900_v42 }
0x19d3   :  { %29428 = vmatpush3.msra.mxu0 %v32855_v24 }
0x19d4   :  { %29429 = vmatprep.subr.mxu0 %v32865_v8 }
0x19d5   :  { %29430 = vmatpush3.msra.mxu0 %v32865_v8 }
0x19d6   :  { %29432 = vmatmul.mubr.f32.vlgmr.msra.gmra.mxu0 %v33207_v43  ;;  %29445 = vmatprep.subr.mxu0 %v32900_v42 }
0x19d7   :  { %29446 = vmatpush3.msra.mxu0 %v32900_v42 }
0x19d8   :  { %29455 = vmatprep.subr.mxu0 %v32915_v17 }
0x1a5e   :  { %v29334_v25 = vpop.f32.mrf.mxu1 }
0x1a60   :  { %v20279_v49 = vpop.f32.mrf.mxu1 }
0x1a66   :  { %v29356_v59 = vpop.f32.mrf.mxu1 }
0x1a67   :  { %v29323_v21 = vpop.f32.mrf.mxu0 }
0x1a68   :  { %v20189_v2 = vadd.f32 %v29323_v21, %v26136_v30  ;;  %v20449_v24 = vpop.f32.mrf.mxu1 }
0x1a69   :  { %v20178_v62 = vpop.f32.mrf.mxu0 }
0x1a6a   :  { %v20179_v4 = vadd.f32 %v26136_v30, %v20178_v62  ;;  %v20286_v16 = vadd.f32 %v29334_v25, %v20189_v2  ;;  %v34475_v2 = vld [vmem:[#allocation39_spill] sm:$0xff] }
0x1a6c   :  { %v20280_v39 = vadd.f32 %v20279_v49, %v20179_v4  ;;  %v34478_v4 = vld [vmem:[#allocation33_spill] sm:$0xff] }
0x1a6d   :  { %v34480_v49 = vld [vmem:[#allocation61_spill] sm:$0xff] }
0x1a6f   :  { %v29345_v33 = vpop.f32.mrf.mxu0 }
0x1a70   :  { %v20373_v5 = vadd.f32 %v29345_v33, %v20286_v16  ;;  %v29378_v44 = vpop.f32.mrf.mxu1  ;;  %v34476_v33 = vld [vmem:[#allocation52_spill] sm:$0xff] }
0x1a71   :  { %v20365_v43 = vpop.f32.mrf.mxu0  ;;  %v34481_v16 = vld [vmem:[#allocation32_spill] sm:$0xff] }
0x1a72   :  { %v20366_v8 = vadd.f32 %v20365_v43, %v20280_v39  ;;  %v20458_v47 = vadd.f32 %v29356_v59, %v20373_v5  ;;  %v20621_v51 = vpop.f32.mrf.mxu1  ;;  %v34482_v59 = vld [vmem:[#allocation47_spill] sm:$0xff]  ;;  %v34483_v43 = vld [vmem:[#allocation42_spill] sm:$0xff]  ;;  %v34485_v5 = vld [vmem:[#allocation36_spill] sm:$0xff] }
0x1a74   :  { %v20450_v22 = vadd.f32 %v20449_v24, %v20366_v8  ;;  %v34468_v8 = vld [vmem:[#allocation30_spill] sm:$0xff] }
0x1a79   :  { %v29367_v58 = vpop.f32.mrf.mxu0 }
0x1a7a   :  { %v20547_v23 = vadd.f32 %v29367_v58, %v20458_v47  ;;  %v34469_v47 = vld [vmem:[#allocation51_spill] sm:$0xff]  ;;  %v29400_v39 = vpop.f32.mrf.mxu1 }
0x1a7b   :  { %v20540_v35 = vpop.f32.mrf.mxu0 }
0x1a7c   :  { %v20628_v41 = vadd.f32 %v29378_v44, %v20547_v23  ;;  %v20541_v57 = vadd.f32 %v20540_v35, %v20450_v22 }
0x1a7e   :  { %v21163_v21 = vsel %vm227_vm1, %v20628_v41, 0  ;;  %26094 = vst.msk [vmem:[%s34116_s20 + $0x8] sm:$0xff] %vm227_vm1, %v20628_v41  ;;  %v20622_v30 = vadd.f32 %v20621_v51, %v20541_v57 }
0x1a7f   :  { %v21241_v25 = vand.u32 4294901760, %v21163_v21 }
0x1a80   :  { %v21160_v62 = vsel %vm227_vm1, %v20622_v30, 0  ;;  %26093 = vst.msk [vmem:[%s34116_s20] sm:$0xff] %vm227_vm1, %v20622_v30  ;;  %v20807_v30 = vpop.f32.mrf.mxu1 }
0x1a81   :  { %v21242_v58 = vsub.f32 %v21163_v21, %v21241_v25  ;;  %v21231_v44 = vand.u32 4294901760, %v21160_v62 }
0x1a83   :  { %v21243_v35 = vand.u32 4294901760, %v21242_v58  ;;  %v21232_v22 = vsub.f32 %v21160_v62, %v21231_v44  ;;  %29452 = vmatprep.mubr.f32.mxu1 %v21231_v44  ;;  %v29389_v21 = vpop.f32.mrf.mxu0 }
0x1a84   :  { %29453 = vmatmul.mubr.f32.vlgmr.msra.gmra.mxu1 %v21241_v25 }
0x1a85   :  { %29461 = vmatpush3.msra.mxu1 %v32900_v42  ;;  %v21233_v24 = vand.u32 4294901760, %v21232_v22  ;;  %v21244_v23 = vsub.f32 %v21242_v58, %v21243_v35  ;;  %v20706_v62 = vpop.f32.mrf.mxu0 }
0x1a86   :  { %29470 = vmatprep.subr.mxu1 %v32900_v42 }
0x1a87   :  { %29462 = vmatprep.mubr.f32.mxu1 %v21233_v24  ;;  %v21234_v41 = vsub.f32 %v21232_v22, %v21233_v24  ;;  %v21245_v57 = vand.u32 4294901760, %v21244_v23  ;;  %v20808_v23 = vadd.f32 %v20807_v30, %v20706_v62 }
0x1a88   :  { %29463 = vmatmul.mubr.f32.vlgmr.msra.gmra.mxu1 %v21243_v35  ;;  %v20814_v35 = vadd.f32 %v29400_v39, %v29389_v21 }
0x1a89   :  { %29472 = vmatprep.mubr.f32.mxu1 %v21231_v44  ;;  %29471 = vmatpush3.msra.mxu1 %v32900_v42  ;;  %v21235_v51 = vand.u32 4294901760, %v21234_v41 }
0x1a8a   :  { %29486 = vmatprep.subr.mxu1 %v33019_v60 }
0x1a8b   :  { %29447 = vmatprep.mubr.f32.mxu0 %v21235_v51 }
0x1a8c   :  { %29448 = vmatmul.mubr.f32.vlgmr.msra.gmra.mxu0 %v21245_v57  ;;  %29473 = vmatmul.mubr.f32.vlgmr.msra.gmra.mxu1 %v21241_v25 }
0x1a8d   :  { %29487 = vmatpush3.msra.mxu1 %v33019_v60  ;;  %29457 = vmatprep.mubr.f32.mxu0 %v21232_v22 }
0x1a8e   :  { %29488 = vmatprep.subr.mxu1 %v33029_v50  ;;  %29494 = vmatprep.mubr.f32.mxu1 %v33391_v53 }
0x1a8f   :  { %29489 = vmatpush3.msra.mxu1 %v33029_v50  ;;  %29456 = vmatpush3.msra.mxu0 %v32915_v17 }
0x1a90   :  { %29490 = vmatprep.subr.mxu1 %v33037_v46  ;;  %29458 = vmatmul.mubr.f32.vlgmr.msra.gmra.mxu0 %v21242_v58  ;;  %v29411_v58 = vpop.f32.mrf.mxu0 }
0x1a91   :  { %29491 = vmatpush3.msra.mxu1 %v33037_v46  ;;  %29465 = vmatprep.subr.mxu0 %v32932_v34  ;;  %v20901_v41 = vadd.f32 %v29411_v58, %v20814_v35 }
0x1a92   :  { %29467 = vmatprep.mubr.f32.mxu0 %v21231_v44  ;;  %29492 = vmatprep.subr.mxu1 %v33043_v45  ;;  %v20893_v24 = vpop.f32.mrf.mxu0 }
0x1a93   :  { %29466 = vmatpush3.msra.mxu0 %v32932_v34  ;;  %29493 = vmatpush3.msra.mxu1 %v33043_v45  ;;  %v20894_v57 = vadd.f32 %v20893_v24, %v20808_v23 }
0x1a94   :  { %29475 = vmatprep.subr.mxu0 %v32938_v6  ;;  %29495 = vmatmul.mubr.f32.vlgmr.msra.gmra.mxu1 %v33385_v56 }
0x1a95   :  { %29508 = vmatprep.subr.mxu1 %v32938_v6  ;;  %29468 = vmatmul.mubr.f32.vlgmr.msra.gmra.mxu0 %v21241_v25  ;;  %v29422_v25 = vpop.f32.mrf.mxu1 }
0x1a96   :  { %29476 = vmatpush3.msra.mxu0 %v32938_v6  ;;  %29509 = vmatpush3.msra.mxu1 %v32938_v6  ;;  %v29433_v51 = vpop.f32.mrf.mxu0 }
0x1a97   :  { %29516 = vmatprep.mubr.f32.mxu1 %v33403_v55  ;;  %29477 = vmatprep.subr.mxu0 %v32954_v63  ;;  %v34470_v55 = vld [vmem:[#allocation28_spill] sm:$0xff]  ;;  %v20977_v44 = vpop.f32.mrf.mxu1 }
0x1a98   :  { %29483 = vmatprep.mubr.f32.mxu0 %v33414_v36  ;;  %29510 = vmatprep.subr.mxu1 %v32954_v63  ;;  %v34471_v36 = vld [vmem:[#allocation34_spill] sm:$0xff] }
0x1a99   :  { %29478 = vmatpush3.msra.mxu0 %v32954_v63  ;;  %29511 = vmatpush3.msra.mxu1 %v32954_v63  ;;  %v29444_v22 = vpop.f32.mrf.mxu1 }
0x1a9a   :  { %29479 = vmatprep.subr.mxu0 %v32966_v15  ;;  %29512 = vmatprep.subr.mxu1 %v32966_v15 }
0x1a9b   :  { %29480 = vmatpush3.msra.mxu0 %v32966_v15  ;;  %29513 = vmatpush3.msra.mxu1 %v32966_v15 }
0x1a9c   :  { %29481 = vmatprep.subr.mxu0 %v34468_v8  ;;  %29514 = vmatprep.subr.mxu1 %v34468_v8 }
0x1a9d   :  { %29482 = vmatpush3.msra.mxu0 %v34468_v8  ;;  %29515 = vmatpush3.msra.mxu1 %v34468_v8 }
0x1a9e   :  { %29484 = vmatmul.mubr.f32.vlgmr.msra.gmra.mxu0 %v33417_v32  ;;  %29497 = vmatprep.subr.mxu0 %v34469_v47  ;;  %v34474_v32 = vld [vmem:[#allocation50_spill] sm:$0xff] }
0x1a9f   :  { %29517 = vmatmul.mubr.f32.vlgmr.msra.gmra.mxu1 %v33394_v10  ;;  %29530 = vmatprep.subr.mxu1 %v32938_v6  ;;  %v34472_v10 = vld [vmem:[#allocation29_spill] sm:$0xff] }
0x1aa0   :  { %29498 = vmatpush3.msra.mxu0 %v34469_v47  ;;  %29505 = vmatprep.mubr.f32.mxu0 %v33397_v19  ;;  %v34473_v19 = vld [vmem:[#allocation31_spill] sm:$0xff] }
0x1aa1   :  { %29531 = vmatpush3.msra.mxu1 %v32938_v6  ;;  %29538 = vmatprep.mubr.f32.mxu1 %v33391_v53 }
0x1aa2   :  { %29499 = vmatprep.subr.mxu0 %v34470_v55  ;;  %29532 = vmatprep.subr.mxu1 %v32954_v63 }
0x1aa3   :  { %29500 = vmatpush3.msra.mxu0 %v34470_v55  ;;  %29533 = vmatpush3.msra.mxu1 %v32954_v63 }
0x1aa4   :  { %29501 = vmatprep.subr.mxu0 %v34471_v36  ;;  %29534 = vmatprep.subr.mxu1 %v32966_v15 }
0x1aa5   :  { %29502 = vmatpush3.msra.mxu0 %v34471_v36  ;;  %29535 = vmatpush3.msra.mxu1 %v32966_v15 }
0x1aa6   :  { %29503 = vmatprep.subr.mxu0 %v34472_v10  ;;  %29536 = vmatprep.subr.mxu1 %v34468_v8 }
0x1aa7   :  { %29504 = vmatpush3.msra.mxu0 %v34472_v10  ;;  %29537 = vmatpush3.msra.mxu1 %v34468_v8 }
0x1aa8   :  { %29506 = vmatmul.mubr.f32.vlgmr.msra.gmra.mxu0 %v33389_v38  ;;  %29519 = vmatprep.subr.mxu0 %v34473_v19  ;;  %v34477_v38 = vld [vmem:[#allocation43_spill] sm:$0xff] }
0x1aa9   :  { %29539 = vmatmul.mubr.f32.vlgmr.msra.gmra.mxu1 %v33385_v56  ;;  %29520 = vmatpush3.msra.mxu0 %v34473_v19 }
0x1aaa   :  { %29527 = vmatprep.mubr.f32.mxu0 %v33391_v53  ;;  %29521 = vmatprep.subr.mxu0 %v34474_v32  ;;  %v34479_v53 = vld [vmem:[#allocation60_spill] sm:$0xff] }
0x1aab   :  { %29522 = vmatpush3.msra.mxu0 %v34474_v32  ;;  %29552 = vmatprep.subr.mxu1 %v34475_v2 }
0x1aac   :  { %29523 = vmatprep.subr.mxu0 %v34476_v33  ;;  %29553 = vmatpush3.msra.mxu1 %v34475_v2  ;;  %v20978_v2 = vadd.f32 %v20977_v44, %v20894_v57 }
0x1aad   :  { %29524 = vmatpush3.msra.mxu0 %v34476_v33  ;;  %29554 = vmatprep.subr.mxu1 %v34477_v38 }
0x1aae   :  { %29525 = vmatprep.subr.mxu0 %v34478_v4  ;;  %29555 = vmatpush3.msra.mxu1 %v34477_v38  ;;  %v21068_v38 = vpop.f32.mrf.mxu0 }
0x1aaf   :  { %29526 = vmatpush3.msra.mxu0 %v34478_v4  ;;  %29556 = vmatprep.subr.mxu1 %v34479_v53  ;;  %v21069_v32 = vadd.f32 %v21068_v38, %v20978_v2 }
0x1ab0   :  { %29528 = vmatmul.mubr.f32.vlgmr.msra.gmra.mxu0 %v33385_v56  ;;  %29557 = vmatpush3.msra.mxu1 %v34479_v53  ;;  %v34484_v56 = vld [vmem:[#allocation58_spill] sm:$0xff]  ;;  %v20986_v53 = vadd.f32 %v29422_v25, %v20901_v41 }
0x1ab1   :  { %29558 = vmatprep.subr.mxu1 %v34480_v49  ;;  %29541 = vmatprep.subr.mxu0 %v34481_v16 }
0x1ab2   :  { %29559 = vmatpush3.msra.mxu1 %v34480_v49  ;;  %29542 = vmatpush3.msra.mxu0 %v34481_v16  ;;  %v21149_v49 = vpop.f32.mrf.mxu1  ;;  %v21075_v33 = vadd.f32 %v29433_v51, %v20986_v53 }
0x1ab3   :  { %29574 = vmatprep.subr.mxu1 %v34481_v16  ;;  %29543 = vmatprep.subr.mxu0 %v34482_v59  ;;  %v21150_v8 = vadd.f32 %v21149_v49, %v21069_v32 }
0x1ab4   :  { %29544 = vmatpush3.msra.mxu0 %v34482_v59  ;;  %v21156_v10 = vadd.f32 %v29444_v22, %v21075_v33 }
0x1ab5   :  { %29545 = vmatprep.subr.mxu0 %v34483_v43 }
0x1ab6   :  { %29546 = vmatpush3.msra.mxu0 %v34483_v43 }
0x1ab7   :  { %29547 = vmatprep.subr.mxu0 %v34484_v56 }
0x1ab8   :  { %29548 = vmatpush3.msra.mxu0 %v34484_v56 }
0x1ab9   :  { %29563 = vmatprep.subr.mxu0 %v34485_v5 }
0x1b44   :  { %v29454_v4 = vpop.f32.mrf.mxu1 }
0x1b46   :  { %v21323_v19 = vpop.f32.mrf.mxu1 }
0x1b48   :  { %v29464_v55 = vpop.f32.mrf.mxu1 }
0x1b4a   :  { %v21484_v62 = vpop.f32.mrf.mxu1 }
0x1b4c   :  { %v29449_v36 = vpop.f32.mrf.mxu0  ;;  %v29474_v41 = vpop.f32.mrf.mxu1 }
0x1b4d   :  { %v21248_v47 = vadd.f32 %v29449_v36, %v21156_v10  ;;  %v30211_v36 = vld [vmem:[#allocation16] ss:$0 sm:$0xff] }
0x1b4e   :  { %v21237_v39 = vpop.f32.mrf.mxu0  ;;  %v21644_v51 = vpop.f32.mrf.mxu1 }
0x1b4f   :  { %v21238_v21 = vadd.f32 %v21237_v39, %v21150_v8  ;;  %v21330_v15 = vadd.f32 %v29454_v4, %v21248_v47 }
0x1b50   :  { %v29459_v30 = vpop.f32.mrf.mxu0 }
0x1b51   :  { %v21411_v58 = vadd.f32 %v29459_v30, %v21330_v15  ;;  %v21324_v35 = vadd.f32 %v21323_v19, %v21238_v21 }
0x1b52   :  { %v21403_v24 = vpop.f32.mrf.mxu0 }
0x1b53   :  { %v21404_v25 = vadd.f32 %v21403_v24, %v21324_v35  ;;  %v21493_v23 = vadd.f32 %v29464_v55, %v21411_v58 }
0x1b55   :  { %v29469_v53 = vpop.f32.mrf.mxu0  ;;  %v21485_v44 = vadd.f32 %v21484_v62, %v21404_v25 }
0x1b56   :  { %v21573_v2 = vadd.f32 %v29469_v53, %v21493_v23 }
0x1b57   :  { %v21566_v38 = vpop.f32.mrf.mxu0 }
0x1b58   :  { %v21651_v33 = vadd.f32 %v29474_v41, %v21573_v2  ;;  %v21567_v22 = vadd.f32 %v21566_v38, %v21485_v44  ;;  %v34486_v41 = vld [vmem:[#allocation35_spill] sm:$0xff]  ;;  %v34488_v38 = vld [vmem:[#allocation37_spill] sm:$0xff] }
0x1b5a   :  { %v21655_v10 = vadd.f32 %v30211_v36, %v21651_v33  ;;  %v21645_v32 = vadd.f32 %v21644_v51, %v21567_v22 }
0x1b5c   :  { %v26138_v8 = vmul.f32 -1.442695, %v21655_v10  ;;  %v21654_v47 = vadd.f32 %v30211_v36, %v21645_v32 }
0x1b5e   :  { %30145 = vpow2.f32 %v26138_v8  ;;  %v26137_v4 = vmul.f32 -1.442695, %v21654_v47 }
0x1b60   :  { %30147 = vpow2.f32 %v26137_v4 }
0x1b61   :  { %30149 = vtanh.f32 %v21655_v10 }
0x1b6b   :  { %v30146_v15 = vpop.eup %30145 }
0x1b6c   :  { %v21665_v19 = vadd.f32 1.0, %v30146_v15 }
0x1b6d   :  { %v30148_v49 = vpop.eup %30147 }
0x1b6e   :  { %30151 = vrcp.f32 %v21665_v19  ;;  %v21664_v55 = vadd.f32 1.0, %v30148_v49  ;;  %v30150_v57 = vpop.eup %30149 }
0x1b6f   :  { %30153 = vtanh.f32 %v21654_v47 }
0x1b70   :  { %30155 = vrcp.f32 %v21664_v55 }
0x1b7b   :  { %v30152_v39 = vpop.eup %30151 }
0x1b7c   :  { %v30154_v21 = vpop.eup %30153  ;;  %v21671_v30 = vsel %vm31704_vm7, %v30150_v57, %v30152_v39 }
0x1b7d   :  { %v30156_v62 = vpop.eup %30155  ;;  %21678 = vrot.lane.b32.xlu1 %v21671_v30, %s30486_s7  ;;  %v21673_v53 = vmul.f32 %v21671_v30, %v34486_v41  ;;  %v34490_v41 = vld [vmem:[#allocation48_spill] sm:$0xff] }
0x1b7e   :  { %v21670_v58 = vsel %vm31704_vm7, %v30154_v21, %v30156_v62 }
0x1b7f   :  { %21676 = vrot.lane.b32.xlu0 %v21670_v58, %s30486_s7  ;;  %v21672_v33 = vmul.f32 %v21670_v58, %v34488_v38  ;;  %v34493_v38 = vld [vmem:[#allocation38_spill] sm:$0xff] }
0x1bef   :  { %v21679_v35 = vpop.permute.xlu1 %21678 }
0x1bf0   :  { %v21683_v24 = vmul.f32 %v21679_v35, %v21671_v30 }
0x1bf1   :  { %v21677_v25 = vpop.permute.xlu0 %21676 }
0x1bf2   :  { %v21682_v23 = vmul.f32 %v21677_v25, %v21670_v58  ;;  %21688 = vrot.lane.b32.xlu1 %v21683_v24, %s30487_s21 }
0x1bf4   :  { %21686 = vrot.lane.b32.xlu0 %v21682_v23, %s30487_s21 }
0x1c64   :  { %v21689_v44 = vpop.permute.xlu1 %21688 }
0x1c65   :  { %v33624_v2 = vadd.f32 %v21689_v44, %v21673_v53  ;;  %v34491_v53 = vld [vmem:[#allocation45_spill] sm:$0xff]  ;;  %v34492_v44 = vld [vmem:[#allocation46_spill] sm:$0xff] }
0x1c66   :  { %v21687_v22 = vpop.permute.xlu0 %21686 }
0x1c67   :  { %34487 = vst [vmem:[#allocation32_spill] sm:$0xff] %v33624_v2  ;;  %30157 = vtanh.f32 %v33624_v2  ;;  %v33628_v51 = vadd.f32 %v21687_v22, %v21672_v33  ;;  %v34494_v33 = vld [vmem:[#allocation41_spill] sm:$0xff]  ;;  %v34495_v22 = vld [vmem:[#allocation44_spill] sm:$0xff] }
0x1c69   :  { %34489 = vst [vmem:[#allocation47_spill] sm:$0xff] %v33628_v51  ;;  %30159 = vtanh.f32 %v33628_v51 }
0x1c74   :  { %v30158_v36 = vpop.eup %30157 }
0x1c75   :  { %21700 = vrot.lane.b32.xlu1 %v30158_v36, %s30486_s7  ;;  %v34496_v36 = vld [vmem:[#allocation59_spill] sm:$0xff] }
0x1c76   :  { %v30160_v10 = vpop.eup %30159 }
0x1c77   :  { %21698 = vrot.lane.b32.xlu0 %v30160_v10, %s30486_s7  ;;  %v34497_v10 = vld [vmem:[#allocation72_spill] sm:$0xff] }
0x1ce7   :  { %v21701_v32 = vpop.permute.xlu1 %21700 }
0x1ce8   :  { %v21705_v8 = vmul.f32 %v21701_v32, %v21671_v30  ;;  %v29485_v32 = vpop.f32.mrf.mxu0 }
0x1ce9   :  { %v21699_v47 = vpop.permute.xlu0 %21698 }
0x1cea   :  { %v21704_v4 = vmul.f32 %v21699_v47, %v21670_v58  ;;  %22238 = vrot.lane.b32.xlu1 %v21705_v8, %s30487_s21  ;;  %v29496_v8 = vpop.f32.mrf.mxu1  ;;  %v21781_v47 = vpop.f32.mrf.mxu0 }
0x1cec   :  { %22236 = vrot.lane.b32.xlu0 %v21704_v4, %s30487_s21  ;;  %v29507_v4 = vpop.f32.mrf.mxu0 }
0x1d5c   :  { %v22239_v15 = vpop.permute.xlu1 %22238 }
0x1d5d   :  { %v22242_v19 = vsel %vm8983_vm8, %v22239_v15, 0  ;;  %v21882_v15 = vpop.f32.mrf.mxu1 }
0x1d5e   :  { %v33636_v49 = vand.u32 4294901760, %v22242_v19  ;;  %v22237_v55 = vpop.permute.xlu0 %22236 }
0x1d5f   :  { %v22240_v57 = vsel %vm8983_vm8, %v22237_v55, 0  ;;  %v29518_v55 = vpop.f32.mrf.mxu1 }
0x1d60   :  { %v33640_v39 = vsub.f32 %v22242_v19, %v33636_v49  ;;  %v33642_v21 = vand.u32 4294901760, %v22240_v57  ;;  %v21889_v19 = vadd.f32 %v29496_v8, %v29485_v32 }
0x1d62   :  { %v33645_v30 = vand.u32 4294901760, %v33640_v39  ;;  %v33648_v62 = vsub.f32 %v22240_v57, %v33642_v21  ;;  %29560 = vmatprep.mubr.f32.mxu1 %v33642_v21  ;;  %v21968_v57 = vpop.f32.mrf.mxu0 }
0x1d63   :  { %29561 = vmatmul.mubr.f32.vlgmr.msra.gmra.mxu1 %v33636_v49 }
0x1d64   :  { %29575 = vmatpush3.msra.mxu1 %v34481_v16  ;;  %v33654_v58 = vand.u32 4294901760, %v33648_v62  ;;  %v22326_v35 = vsub.f32 %v33640_v39, %v33645_v30 }
0x1d65   :  { %29576 = vmatprep.subr.mxu1 %v34482_v59 }
0x1d66   :  { %29577 = vmatpush3.msra.mxu1 %v34482_v59  ;;  %29582 = vmatprep.mubr.f32.mxu1 %v33654_v58  ;;  %v22316_v24 = vsub.f32 %v33648_v62, %v33654_v58  ;;  %v33668_v23 = vand.u32 4294901760, %v22326_v35  ;;  %v21883_v35 = vadd.f32 %v21882_v15, %v21781_v47 }
0x1d67   :  { %29578 = vmatprep.subr.mxu1 %v34483_v43 }
0x1d68   :  { %29579 = vmatpush3.msra.mxu1 %v34483_v43  ;;  %v33665_v25 = vand.u32 4294901760, %v22316_v24  ;;  %v21976_v24 = vadd.f32 %v29507_v4, %v21889_v19 }
0x1d69   :  { %29580 = vmatprep.subr.mxu1 %v34484_v56 }
0x1d6a   :  { %29581 = vmatpush3.msra.mxu1 %v34484_v56  ;;  %29549 = vmatprep.mubr.f32.mxu0 %v33665_v25 }
0x1d6b   :  { %29583 = vmatmul.mubr.f32.vlgmr.msra.gmra.mxu1 %v33645_v30  ;;  %29596 = vmatprep.subr.mxu1 %v34481_v16 }
0x1d6c   :  { %29550 = vmatmul.mubr.f32.vlgmr.msra.gmra.mxu0 %v33668_v23  ;;  %29597 = vmatpush3.msra.mxu1 %v34481_v16 }
0x1d6d   :  { %29564 = vmatpush3.msra.mxu0 %v34485_v5  ;;  %29604 = vmatprep.mubr.f32.mxu1 %v33642_v21 }
0x1d6e   :  { %29565 = vmatprep.subr.mxu0 %v34490_v41  ;;  %29571 = vmatprep.mubr.f32.mxu0 %v33648_v62 }
0x1d6f   :  { %29598 = vmatprep.subr.mxu1 %v34482_v59  ;;  %29566 = vmatpush3.msra.mxu0 %v34490_v41 }
0x1d70   :  { %29599 = vmatpush3.msra.mxu1 %v34482_v59  ;;  %29567 = vmatprep.subr.mxu0 %v34491_v53 }
0x1d71   :  { %29600 = vmatprep.subr.mxu1 %v34483_v43  ;;  %29568 = vmatpush3.msra.mxu0 %v34491_v53 }
0x1d72   :  { %29601 = vmatpush3.msra.mxu1 %v34483_v43  ;;  %29569 = vmatprep.subr.mxu0 %v34492_v44 }
0x1d73   :  { %29602 = vmatprep.subr.mxu1 %v34484_v56  ;;  %29570 = vmatpush3.msra.mxu0 %v34492_v44 }
0x1d74   :  { %29603 = vmatpush3.msra.mxu1 %v34484_v56  ;;  %29572 = vmatmul.mubr.f32.vlgmr.msra.gmra.mxu0 %v33640_v39 }
0x1d75   :  { %29585 = vmatprep.subr.mxu0 %v34493_v38  ;;  %29605 = vmatmul.mubr.f32.vlgmr.msra.gmra.mxu1 %v33636_v49 }
0x1d76   :  { %29586 = vmatpush3.msra.mxu0 %v34493_v38  ;;  %29593 = vmatprep.mubr.f32.mxu0 %v33642_v21 }
0x1d77   :  { %29587 = vmatprep.subr.mxu0 %v34494_v33  ;;  %29618 = vmatprep.subr.mxu1 %v33331_v26 }
0x1d78   :  { %29588 = vmatpush3.msra.mxu0 %v34494_v33  ;;  %29619 = vmatpush3.msra.mxu1 %v33331_v26 }
0x1d79   :  { %29589 = vmatprep.subr.mxu0 %v34495_v22  ;;  %29620 = vmatprep.subr.mxu1 %v33333_v28 }
0x1d7a   :  { %29590 = vmatpush3.msra.mxu0 %v34495_v22  ;;  %29621 = vmatpush3.msra.mxu1 %v33333_v28  ;;  %v22061_v28 = vadd.f32 %v29518_v55, %v21976_v24 }
0x1d7b   :  { %29591 = vmatprep.subr.mxu0 %v34496_v36  ;;  %29622 = vmatprep.subr.mxu1 %v33369_v48 }
0x1d7c   :  { %29592 = vmatpush3.msra.mxu0 %v34496_v36  ;;  %29623 = vmatpush3.msra.mxu1 %v33369_v48  ;;  %v21969_v48 = vadd.f32 %v21968_v57, %v21883_v35  ;;  %v22052_v36 = vpop.f32.mrf.mxu1 }
0x1d7d   :  { %29594 = vmatmul.mubr.f32.vlgmr.msra.gmra.mxu0 %v33636_v49  ;;  %29624 = vmatprep.subr.mxu1 %v34497_v10 }
0x1d7e   :  { %29625 = vmatpush3.msra.mxu1 %v34497_v10  ;;  %29607 = vmatprep.subr.mxu0 %v33306_v54  ;;  %v29529_v10 = vpop.f32.mrf.mxu0  ;;  %v29540_v22 = vpop.f32.mrf.mxu1  ;;  %v22053_v38 = vadd.f32 %v22052_v36, %v21969_v48 }
0x1d7f   :  { %29640 = vmatprep.subr.mxu1 %v33306_v54  ;;  %29608 = vmatpush3.msra.mxu0 %v33306_v54  ;;  %v22150_v33 = vadd.f32 %v29529_v10, %v22061_v28 }
0x1d80   :  { %29609 = vmatprep.subr.mxu0 %v33308_v61  ;;  %v22143_v26 = vpop.f32.mrf.mxu0  ;;  %v22224_v41 = vpop.f32.mrf.mxu1 }
0x1d81   :  { %29610 = vmatpush3.msra.mxu0 %v33308_v61  ;;  %v22144_v53 = vadd.f32 %v22143_v26, %v22053_v38  ;;  %v22231_v51 = vadd.f32 %v29540_v22, %v22150_v33 }
0x1d82   :  { %29611 = vmatprep.subr.mxu0 %v33343_v31 }
0x1d83   :  { %29612 = vmatpush3.msra.mxu0 %v33343_v31  ;;  %v22225_v32 = vadd.f32 %v22224_v41, %v22144_v53  ;;  %v30212_v41 = vld [vmem:[#allocation19] ss:$0 sm:$0xff] }
0x1d84   :  { %29613 = vmatprep.subr.mxu0 %v33351_v40 }
0x1d85   :  { %29614 = vmatpush3.msra.mxu0 %v33351_v40 }
0x1d86   :  { %29629 = vmatprep.subr.mxu0 %v33311_v14 }
0x1e23   :  { %v29562_v2 = vpop.f32.mrf.mxu1 }
0x1e25   :  { %v22420_v47 = vpop.f32.mrf.mxu1 }
0x1e2b   :  { %v29584_v15 = vpop.f32.mrf.mxu1 }
0x1e2c   :  { %v29551_v44 = vpop.f32.mrf.mxu0 }
0x1e2d   :  { %v22330_v56 = vadd.f32 %v29551_v44, %v22231_v51  ;;  %v22590_v24 = vpop.f32.mrf.mxu1 }
0x1e2e   :  { %v22319_v5 = vpop.f32.mrf.mxu0 }
0x1e2f   :  { %v22320_v8 = vadd.f32 %v22319_v5, %v22225_v32  ;;  %v22427_v4 = vadd.f32 %v29562_v2, %v22330_v56 }
0x1e31   :  { %v22421_v55 = vadd.f32 %v22420_v47, %v22320_v8 }
0x1e34   :  { %v29573_v43 = vpop.f32.mrf.mxu0 }
0x1e35   :  { %v22514_v57 = vadd.f32 %v29573_v43, %v22427_v4  ;;  %v29606_v48 = vpop.f32.mrf.mxu1 }
0x1e36   :  { %v22506_v19 = vpop.f32.mrf.mxu0 }
0x1e37   :  { %v22507_v35 = vadd.f32 %v22506_v19, %v22421_v55  ;;  %v22599_v28 = vadd.f32 %v29584_v15, %v22514_v57  ;;  %v22762_v51 = vpop.f32.mrf.mxu1 }
0x1e39   :  { %v22591_v38 = vadd.f32 %v22590_v24, %v22507_v35 }
0x1e3d   :  { %v29595_v36 = vpop.f32.mrf.mxu0 }
0x1e3e   :  { %v22688_v26 = vadd.f32 %v29595_v36, %v22599_v28 }
0x1e3f   :  { %v22681_v33 = vpop.f32.mrf.mxu0 }
0x1e40   :  { %v22769_v22 = vadd.f32 %v29606_v48, %v22688_v26  ;;  %v22682_v10 = vadd.f32 %v22681_v33, %v22591_v38  ;;  %v34498_v26 = vld [vmem:[#allocation67_spill] sm:$0xff] }
0x1e42   :  { %v22773_v5 = vadd.f32 %v30212_v41, %v22769_v22  ;;  %v22763_v53 = vadd.f32 %v22762_v51, %v22682_v10  ;;  %v34499_v10 = vld [vmem:[#allocation68_spill] sm:$0xff] }
0x1e44   :  { %v26140_v44 = vmul.f32 -1.442695, %v22773_v5  ;;  %v22772_v56 = vadd.f32 %v30212_v41, %v22763_v53 }
0x1e46   :  { %30161 = vpow2.f32 %v26140_v44  ;;  %v26139_v2 = vmul.f32 -1.442695, %v22772_v56 }
0x1e48   :  { %30163 = vpow2.f32 %v26139_v2 }
0x1e49   :  { %30165 = vtanh.f32 %v22773_v5 }
0x1e53   :  { %v30162_v43 = vpop.eup %30161 }
0x1e54   :  { %v22783_v32 = vadd.f32 1.0, %v30162_v43 }
0x1e55   :  { %v30164_v8 = vpop.eup %30163 }
0x1e56   :  { %30167 = vrcp.f32 %v22783_v32  ;;  %v22782_v47 = vadd.f32 1.0, %v30164_v8  ;;  %v30166_v4 = vpop.eup %30165 }
0x1e57   :  { %30169 = vtanh.f32 %v22772_v56 }
0x1e58   :  { %30171 = vrcp.f32 %v22782_v47 }
0x1e63   :  { %v30168_v15 = vpop.eup %30167 }
0x1e64   :  { %v30170_v19 = vpop.eup %30169  ;;  %v22789_v57 = vsel %vm31704_vm7, %v30166_v4, %v30168_v15 }
0x1e65   :  { %v30172_v55 = vpop.eup %30171  ;;  %22796 = vrot.lane.b32.xlu1 %v22789_v57, %s30486_s7  ;;  %v22791_v38 = vmul.f32 %v22789_v57, %v34498_v26 }
0x1e66   :  { %v22788_v35 = vsel %vm31704_vm7, %v30170_v19, %v30172_v55 }
0x1e67   :  { %22794 = vrot.lane.b32.xlu0 %v22788_v35, %s30486_s7  ;;  %v22790_v51 = vmul.f32 %v22788_v35, %v34499_v10  ;;  %v33878_v10 = vld [vmem:[%s34115_s19] ss:$0 sm:$0xff] }
0x1ed7   :  { %v22797_v24 = vpop.permute.xlu1 %22796 }
0x1ed8   :  { %v22801_v28 = vmul.f32 %v22797_v24, %v22789_v57 }
0x1ed9   :  { %v22795_v48 = vpop.permute.xlu0 %22794 }
0x1eda   :  { %v22800_v36 = vmul.f32 %v22795_v48, %v22788_v35  ;;  %22806 = vrot.lane.b32.xlu1 %v22801_v28, %s30487_s21 }
0x1edc   :  { %22804 = vrot.lane.b32.xlu0 %v22800_v36, %s30487_s21 }
0x1f4c   :  { %v22807_v33 = vpop.permute.xlu1 %22806 }
0x1f4d   :  { %v33730_v22 = vadd.f32 %v22807_v33, %v22791_v38 }
0x1f4e   :  { %v22805_v41 = vpop.permute.xlu0 %22804 }
0x1f4f   :  { %30173 = vtanh.f32 %v33730_v22  ;;  %v33734_v5 = vadd.f32 %v22805_v41, %v22790_v51 }
0x1f51   :  { %30175 = vtanh.f32 %v33734_v5 }
0x1f5c   :  { %v30174_v53 = vpop.eup %30173 }
0x1f5d   :  { %22818 = vrot.lane.b32.xlu1 %v30174_v53, %s30486_s7 }
0x1f5e   :  { %v30176_v44 = vpop.eup %30175 }
0x1f5f   :  { %22816 = vrot.lane.b32.xlu0 %v30176_v44, %s30486_s7 }
0x1fcf   :  { %v22819_v56 = vpop.permute.xlu1 %22818 }
0x1fd0   :  { %v22823_v2 = vmul.f32 %v22819_v56, %v22789_v57 }
0x1fd1   :  { %v22817_v43 = vpop.permute.xlu0 %22816 }
0x1fd2   :  { %v22822_v32 = vmul.f32 %v22817_v43, %v22788_v35  ;;  %22828 = vrot.lane.b32.xlu1 %v22823_v2, %s30487_s21 }
0x1fd4   :  { %22826 = vrot.lane.b32.xlu0 %v22822_v32, %s30487_s21 }
0x2044   :  { %v22829_v8 = vpop.permute.xlu1 %22828 }
0x2045   :  { %v22832_v47 = vsel %vm8983_vm8, %v22829_v8, 0 }
0x2046   :  { %v33742_v4 = vand.u32 4294901760, %v22832_v47  ;;  %v22827_v15 = vpop.permute.xlu0 %22826 }
0x2047   :  { %v22830_v19 = vsel %vm8983_vm8, %v22827_v15, 0 }
0x2048   :  { %v33746_v55 = vsub.f32 %v22832_v47, %v33742_v4  ;;  %v33748_v24 = vand.u32 4294901760, %v22830_v19 }
0x204a   :  { %v33751_v57 = vand.u32 4294901760, %v33746_v55  ;;  %v33754_v35 = vsub.f32 %v22830_v19, %v33748_v24  ;;  %29626 = vmatprep.mubr.f32.mxu1 %v33748_v24 }
0x204b   :  { %29627 = vmatmul.mubr.f32.vlgmr.msra.gmra.mxu1 %v33742_v4 }
0x204c   :  { %29641 = vmatpush3.msra.mxu1 %v33306_v54  ;;  %v33760_v28 = vand.u32 4294901760, %v33754_v35  ;;  %v22916_v48 = vsub.f32 %v33746_v55, %v33751_v57 }
0x204d   :  { %29642 = vmatprep.subr.mxu1 %v33308_v61 }
0x204e   :  { %29643 = vmatpush3.msra.mxu1 %v33308_v61  ;;  %29648 = vmatprep.mubr.f32.mxu1 %v33760_v28  ;;  %v22906_v36 = vsub.f32 %v33754_v35, %v33760_v28  ;;  %v33774_v38 = vand.u32 4294901760, %v22916_v48 }
0x204f   :  { %29644 = vmatprep.subr.mxu1 %v33343_v31 }
0x2050   :  { %29645 = vmatpush3.msra.mxu1 %v33343_v31  ;;  %v33771_v26 = vand.u32 4294901760, %v22906_v36 }
0x2051   :  { %29646 = vmatprep.subr.mxu1 %v33351_v40 }
0x2052   :  { %29647 = vmatpush3.msra.mxu1 %v33351_v40  ;;  %29615 = vmatprep.mubr.f32.mxu0 %v33771_v26 }
0x2053   :  { %29649 = vmatmul.mubr.f32.vlgmr.msra.gmra.mxu1 %v33751_v57  ;;  %29662 = vmatprep.subr.mxu1 %v33306_v54 }
0x2054   :  { %29616 = vmatmul.mubr.f32.vlgmr.msra.gmra.mxu0 %v33774_v38  ;;  %29663 = vmatpush3.msra.mxu1 %v33306_v54 }
0x2055   :  { %29630 = vmatpush3.msra.mxu0 %v33311_v14  ;;  %29670 = vmatprep.mubr.f32.mxu1 %v33748_v24 }
0x2056   :  { %29631 = vmatprep.subr.mxu0 %v33314_v37  ;;  %29637 = vmatprep.mubr.f32.mxu0 %v33754_v35 }
0x2057   :  { %29664 = vmatprep.subr.mxu1 %v33308_v61  ;;  %29632 = vmatpush3.msra.mxu0 %v33314_v37 }
0x2058   :  { %29665 = vmatpush3.msra.mxu1 %v33308_v61  ;;  %29633 = vmatprep.subr.mxu0 %v33349_v12 }
0x2059   :  { %29666 = vmatprep.subr.mxu1 %v33343_v31  ;;  %29634 = vmatpush3.msra.mxu0 %v33349_v12 }
0x205a   :  { %29667 = vmatpush3.msra.mxu1 %v33343_v31  ;;  %29635 = vmatprep.subr.mxu0 %v33359_v0 }
0x205b   :  { %29668 = vmatprep.subr.mxu1 %v33351_v40  ;;  %29636 = vmatpush3.msra.mxu0 %v33359_v0 }
0x205c   :  { %29669 = vmatpush3.msra.mxu1 %v33351_v40  ;;  %29638 = vmatmul.mubr.f32.vlgmr.msra.gmra.mxu0 %v33746_v55 }
0x205d   :  { %29651 = vmatprep.subr.mxu0 %v33319_v7  ;;  %29671 = vmatmul.mubr.f32.vlgmr.msra.gmra.mxu1 %v33742_v4 }
0x205e   :  { %29684 = vmatprep.subr.mxu1 %v32836_v29  ;;  %29652 = vmatpush3.msra.mxu0 %v33319_v7 }
0x205f   :  { %29659 = vmatprep.mubr.f32.mxu0 %v33748_v24  ;;  %29685 = vmatpush3.msra.mxu1 %v32836_v29  ;;  %v34500_v29 = vld [vmem:[#allocation56_spill] sm:$0xff] }
0x2060   :  { %29692 = vmatprep.mubr.f32.mxu1 %v33642_v21  ;;  %29653 = vmatprep.subr.mxu0 %v33322_v1 }
0x2061   :  { %29686 = vmatprep.subr.mxu1 %v32838_v20  ;;  %29654 = vmatpush3.msra.mxu0 %v33322_v1 }
0x2062   :  { %29687 = vmatpush3.msra.mxu1 %v32838_v20  ;;  %29655 = vmatprep.subr.mxu0 %v33356_v9  ;;  %v34501_v20 = vld [vmem:[#allocation57_spill] sm:$0xff] }
0x2063   :  { %29688 = vmatprep.subr.mxu1 %v32868_v3  ;;  %29656 = vmatpush3.msra.mxu0 %v33356_v9 }
0x2064   :  { %29689 = vmatpush3.msra.mxu1 %v32868_v3  ;;  %29657 = vmatprep.subr.mxu0 %v33366_v11  ;;  %v34502_v3 = vld [vmem:[#allocation53_spill] sm:$0xff] }
0x2065   :  { %29690 = vmatprep.subr.mxu1 %v32873_v18  ;;  %29658 = vmatpush3.msra.mxu0 %v33366_v11 }
0x2066   :  { %29691 = vmatpush3.msra.mxu1 %v32873_v18  ;;  %29660 = vmatmul.mubr.f32.vlgmr.msra.gmra.mxu0 %v33742_v4  ;;  %v34503_v18 = vld [vmem:[#allocation54_spill] sm:$0xff] }
0x2067   :  { %29673 = vmatprep.subr.mxu0 %v32811_v13  ;;  %29693 = vmatmul.mubr.f32.vlgmr.msra.gmra.mxu1 %v33636_v49 }
0x2068   :  { %29706 = vmatprep.subr.mxu1 %v32811_v13  ;;  %29674 = vmatpush3.msra.mxu0 %v32811_v13 }
0x2069   :  { %29681 = vmatprep.mubr.f32.mxu0 %v33665_v25  ;;  %29707 = vmatpush3.msra.mxu1 %v32811_v13  ;;  %v34509_v25 = vld [vmem:[#allocation64_spill] sm:$0xff] }
0x206a   :  { %29714 = vmatprep.mubr.f32.mxu1 %v33654_v58  ;;  %29675 = vmatprep.subr.mxu0 %v32813_v52  ;;  %v34504_v58 = vld [vmem:[#allocation63_spill] sm:$0xff] }
0x206b   :  { %29708 = vmatprep.subr.mxu1 %v32813_v52  ;;  %29676 = vmatpush3.msra.mxu0 %v32813_v52 }
0x206c   :  { %29709 = vmatpush3.msra.mxu1 %v32813_v52  ;;  %29677 = vmatprep.subr.mxu0 %v34500_v29 }
0x206d   :  { %29710 = vmatprep.subr.mxu1 %v34500_v29  ;;  %29678 = vmatpush3.msra.mxu0 %v34500_v29 }
0x206e   :  { %29711 = vmatpush3.msra.mxu1 %v34500_v29  ;;  %29679 = vmatprep.subr.mxu0 %v34501_v20 }
0x206f   :  { %29712 = vmatprep.subr.mxu1 %v34501_v20  ;;  %29680 = vmatpush3.msra.mxu0 %v34501_v20 }
0x2070   :  { %29713 = vmatpush3.msra.mxu1 %v34501_v20  ;;  %29682 = vmatmul.mubr.f32.vlgmr.msra.gmra.mxu0 %v33668_v23 }
0x2071   :  { %29695 = vmatprep.subr.mxu0 %v34502_v3  ;;  %29715 = vmatmul.mubr.f32.vlgmr.msra.gmra.mxu1 %v33645_v30  ;;  %v34505_v30 = vld [vmem:[#allocation65_spill] sm:$0xff] }
0x2072   :  { %29728 = vmatprep.subr.mxu1 %v32811_v13  ;;  %29696 = vmatpush3.msra.mxu0 %v34502_v3 }
0x2073   :  { %29703 = vmatprep.mubr.f32.mxu0 %v33648_v62  ;;  %29729 = vmatpush3.msra.mxu1 %v32811_v13  ;;  %v34506_v13 = vld [vmem:[#allocation55_spill] sm:$0xff]  ;;  %v34508_v62 = vld [vmem:[#allocation40_spill] sm:$0xff] }
0x2074   :  { %29736 = vmatprep.mubr.f32.mxu1 %v33642_v21  ;;  %29697 = vmatprep.subr.mxu0 %v34503_v18 }
0x2075   :  { %29730 = vmatprep.subr.mxu1 %v32813_v52  ;;  %29698 = vmatpush3.msra.mxu0 %v34503_v18 }
0x2076   :  { %29731 = vmatpush3.msra.mxu1 %v32813_v52  ;;  %29699 = vmatprep.subr.mxu0 %v34504_v58  ;;  %v34507_v52 = vld [vmem:[#allocation62_spill] sm:$0xff] }
0x2077   :  { %29732 = vmatprep.subr.mxu1 %v34500_v29  ;;  %29700 = vmatpush3.msra.mxu0 %v34504_v58 }
0x2078   :  { %29733 = vmatpush3.msra.mxu1 %v34500_v29  ;;  %29701 = vmatprep.subr.mxu0 %v34505_v30 }
0x2079   :  { %29734 = vmatprep.subr.mxu1 %v34501_v20  ;;  %29702 = vmatpush3.msra.mxu0 %v34505_v30 }
0x207a   :  { %29735 = vmatpush3.msra.mxu1 %v34501_v20  ;;  %29704 = vmatmul.mubr.f32.vlgmr.msra.gmra.mxu0 %v33640_v39  ;;  %v34510_v39 = vld [vmem:[#allocation49_spill] sm:$0xff] }
0x207b   :  { %29717 = vmatprep.subr.mxu0 %v34506_v13  ;;  %29737 = vmatmul.mubr.f32.vlgmr.msra.gmra.mxu1 %v33636_v49 }
0x207c   :  { %29718 = vmatpush3.msra.mxu0 %v34506_v13  ;;  %29725 = vmatprep.mubr.f32.mxu0 %v33642_v21 }
0x207d   :  { %29719 = vmatprep.subr.mxu0 %v34507_v52  ;;  %29744 = vmatprep.subr.mxu1 %v34508_v62 }
0x207e   :  { %29720 = vmatpush3.msra.mxu0 %v34507_v52  ;;  %29745 = vmatpush3.msra.mxu1 %v34508_v62 }
0x207f   :  { %29721 = vmatprep.subr.mxu0 %v34509_v25  ;;  %29754 = vmatprep.subr.mxu1 %v32900_v42 }
0x2080   :  { %29722 = vmatpush3.msra.mxu0 %v34509_v25 }
0x2081   :  { %29723 = vmatprep.subr.mxu0 %v34510_v39 }
0x2082   :  { %29724 = vmatpush3.msra.mxu0 %v34510_v39 }
0x2083   :  { %29726 = vmatmul.mubr.f32.vlgmr.msra.gmra.mxu0 %v33636_v49  ;;  %29739 = vmatprep.subr.mxu0 %v32900_v42 }
0x2084   :  { %29740 = vmatpush3.msra.mxu0 %v32900_v42 }
0x2085   :  { %29749 = vmatprep.subr.mxu0 %v32915_v17 }
0x210b   :  { %v29628_v23 = vpop.f32.mrf.mxu1 }
0x210d   :  { %v23010_v49 = vpop.f32.mrf.mxu1 }
0x2113   :  { %v29650_v56 = vpop.f32.mrf.mxu1 }
0x2114   :  { %v29617_v21 = vpop.f32.mrf.mxu0 }
0x2115   :  { %v22920_v51 = vadd.f32 %v33878_v10, %v29617_v21  ;;  %v23180_v47 = vpop.f32.mrf.mxu1 }
0x2116   :  { %v22909_v33 = vpop.f32.mrf.mxu0 }
0x2117   :  { %v22910_v53 = vadd.f32 %v33878_v10, %v22909_v33  ;;  %v23017_v44 = vadd.f32 %v29628_v23, %v22920_v51 }
0x2119   :  { %v23011_v32 = vadd.f32 %v23010_v49, %v22910_v53 }
0x211c   :  { %v29639_v41 = vpop.f32.mrf.mxu0 }
0x211d   :  { %v23104_v43 = vadd.f32 %v29639_v41, %v23017_v44  ;;  %v29672_v19 = vpop.f32.mrf.mxu1 }
0x211e   :  { %v23096_v2 = vpop.f32.mrf.mxu0 }
0x211f   :  { %v23097_v8 = vadd.f32 %v23096_v2, %v23011_v32  ;;  %v23189_v15 = vadd.f32 %v29650_v56, %v23104_v43  ;;  %v23352_v58 = vpop.f32.mrf.mxu1 }
0x2121   :  { %v23181_v29 = vadd.f32 %v23180_v47, %v23097_v8 }
0x2126   :  { %v29661_v48 = vpop.f32.mrf.mxu0 }
0x2127   :  { %v23278_v36 = vadd.f32 %v29661_v48, %v23189_v15  ;;  %v29694_v44 = vpop.f32.mrf.mxu1 }
0x2128   :  { %v23271_v20 = vpop.f32.mrf.mxu0 }
0x2129   :  { %v23359_v3 = vadd.f32 %v29672_v19, %v23278_v36  ;;  %v23272_v18 = vadd.f32 %v23271_v20, %v23181_v29  ;;  %v23538_v2 = vpop.f32.mrf.mxu1 }
0x212b   :  { %v23894_v30 = vsel %vm227_vm1, %v23359_v3, 0  ;;  %26096 = vst.msk [vmem:[%s34116_s20 + $0x18] sm:$0xff] %vm227_vm1, %v23359_v3  ;;  %v23353_v13 = vadd.f32 %v23352_v58, %v23272_v18 }
0x212c   :  { %v23972_v52 = vand.u32 4294901760, %v23894_v30 }
0x212d   :  { %v23891_v62 = vsel %vm227_vm1, %v23353_v13, 0  ;;  %26095 = vst.msk [vmem:[%s34116_s20 + $0x10] sm:$0xff] %vm227_vm1, %v23353_v13 }
0x212e   :  { %v23973_v25 = vsub.f32 %v23894_v30, %v23972_v52  ;;  %v23962_v39 = vand.u32 4294901760, %v23891_v62 }
0x2130   :  { %v23974_v21 = vand.u32 4294901760, %v23973_v25  ;;  %v23963_v23 = vsub.f32 %v23891_v62, %v23962_v39  ;;  %29746 = vmatprep.mubr.f32.mxu1 %v23962_v39  ;;  %v29683_v56 = vpop.f32.mrf.mxu0 }
0x2131   :  { %29747 = vmatmul.mubr.f32.vlgmr.msra.gmra.mxu1 %v23972_v52  ;;  %v29716_v43 = vpop.f32.mrf.mxu1  ;;  %v23545_v15 = vadd.f32 %v29694_v44, %v29683_v56 }
0x2132   :  { %29755 = vmatpush3.msra.mxu1 %v32900_v42  ;;  %v23964_v33 = vand.u32 4294901760, %v23963_v23  ;;  %v23975_v51 = vsub.f32 %v23973_v25, %v23974_v21  ;;  %v23437_v32 = vpop.f32.mrf.mxu0 }
0x2133   :  { %29764 = vmatprep.subr.mxu1 %v32900_v42  ;;  %v23708_v47 = vpop.f32.mrf.mxu1  ;;  %v23539_v36 = vadd.f32 %v23538_v2, %v23437_v32  ;;  %v30214_v2 = vld [vmem:[#allocation16] ss:$0 sm:$0xff] }
0x2134   :  { %29756 = vmatprep.mubr.f32.mxu1 %v23964_v33  ;;  %v23965_v41 = vsub.f32 %v23963_v23, %v23964_v33  ;;  %v23976_v49 = vand.u32 4294901760, %v23975_v51 }
0x2135   :  { %29757 = vmatmul.mubr.f32.vlgmr.msra.gmra.mxu1 %v23974_v21 }
0x2136   :  { %29766 = vmatprep.mubr.f32.mxu1 %v23962_v39  ;;  %29765 = vmatpush3.msra.mxu1 %v32900_v42  ;;  %v23966_v53 = vand.u32 4294901760, %v23965_v41  ;;  %v34511_v42 = vld [vmem:[#allocation66_spill] sm:$0xff] }
0x2137   :  { %29780 = vmatprep.subr.mxu1 %v33019_v60 }
0x2138   :  { %29741 = vmatprep.mubr.f32.mxu0 %v23966_v53 }
0x2139   :  { %29742 = vmatmul.mubr.f32.vlgmr.msra.gmra.mxu0 %v23976_v49  ;;  %29767 = vmatmul.mubr.f32.vlgmr.msra.gmra.mxu1 %v23972_v52 }
0x213a   :  { %29781 = vmatpush3.msra.mxu1 %v33019_v60  ;;  %29751 = vmatprep.mubr.f32.mxu0 %v23963_v23  ;;  %v34514_v60 = vld [vmem:[#allocation28_spill] sm:$0xff]  ;;  %v29705_v8 = vpop.f32.mrf.mxu0 }
0x213b   :  { %29782 = vmatprep.subr.mxu1 %v33029_v50  ;;  %29788 = vmatprep.mubr.f32.mxu1 %v33748_v24  ;;  %v29738_v19 = vpop.f32.mrf.mxu1  ;;  %v23632_v29 = vadd.f32 %v29705_v8, %v23545_v15 }
0x213c   :  { %29783 = vmatpush3.msra.mxu1 %v33029_v50  ;;  %29750 = vmatpush3.msra.mxu0 %v32915_v17  ;;  %v34512_v17 = vld [vmem:[#allocation30_spill] sm:$0xff]  ;;  %v23624_v48 = vpop.f32.mrf.mxu0 }
0x213d   :  { %29784 = vmatprep.subr.mxu1 %v33037_v46  ;;  %29752 = vmatmul.mubr.f32.vlgmr.msra.gmra.mxu0 %v23973_v25  ;;  %v34515_v50 = vld [vmem:[#allocation34_spill] sm:$0xff]  ;;  %v23625_v3 = vadd.f32 %v23624_v48, %v23539_v36  ;;  %v23880_v18 = vpop.f32.mrf.mxu1  ;;  %v23717_v58 = vadd.f32 %v29716_v43, %v23632_v29 }
0x213e   :  { %29785 = vmatpush3.msra.mxu1 %v33037_v46  ;;  %29759 = vmatprep.subr.mxu0 %v32932_v34  ;;  %v34516_v46 = vld [vmem:[#allocation29_spill] sm:$0xff] }
0x213f   :  { %29761 = vmatprep.mubr.f32.mxu0 %v23962_v39  ;;  %29786 = vmatprep.subr.mxu1 %v33043_v45  ;;  %v23709_v62 = vadd.f32 %v23708_v47, %v23625_v3 }
0x2140   :  { %29760 = vmatpush3.msra.mxu0 %v32932_v34  ;;  %29787 = vmatpush3.msra.mxu1 %v33043_v45  ;;  %v34513_v34 = vld [vmem:[#allocation51_spill] sm:$0xff] }
0x2141   :  { %29769 = vmatprep.subr.mxu0 %v32938_v6  ;;  %29789 = vmatmul.mubr.f32.vlgmr.msra.gmra.mxu1 %v33742_v4  ;;  %v34519_v45 = vld [vmem:[#allocation39_spill] sm:$0xff] }
0x2142   :  { %29802 = vmatprep.subr.mxu1 %v32938_v6  ;;  %29762 = vmatmul.mubr.f32.vlgmr.msra.gmra.mxu0 %v23972_v52 }
0x2143   :  { %29770 = vmatpush3.msra.mxu0 %v32938_v6  ;;  %29803 = vmatpush3.msra.mxu1 %v32938_v6  ;;  %v29727_v20 = vpop.f32.mrf.mxu0 }
0x2144   :  { %29810 = vmatprep.mubr.f32.mxu1 %v33760_v28  ;;  %29771 = vmatprep.subr.mxu0 %v32954_v63  ;;  %v34524_v28 = vld [vmem:[#allocation61_spill] sm:$0xff]  ;;  %v23806_v52 = vadd.f32 %v29727_v20, %v23717_v58 }
0x2145   :  { %29777 = vmatprep.mubr.f32.mxu0 %v33771_v26  ;;  %29804 = vmatprep.subr.mxu1 %v32954_v63  ;;  %v34525_v26 = vld [vmem:[#allocation42_spill] sm:$0xff]  ;;  %v23799_v13 = vpop.f32.mrf.mxu0 }
0x2146   :  { %29772 = vmatpush3.msra.mxu0 %v32954_v63  ;;  %29805 = vmatpush3.msra.mxu1 %v32954_v63  ;;  %v23800_v25 = vadd.f32 %v23799_v13, %v23709_v62  ;;  %v23887_v21 = vadd.f32 %v29738_v19, %v23806_v52 }
0x2147   :  { %29773 = vmatprep.subr.mxu0 %v34511_v42  ;;  %29806 = vmatprep.subr.mxu1 %v34511_v42 }
0x2148   :  { %29774 = vmatpush3.msra.mxu0 %v34511_v42  ;;  %29807 = vmatpush3.msra.mxu1 %v34511_v42  ;;  %v23881_v41 = vadd.f32 %v23880_v18, %v23800_v25 }
0x2149   :  { %29775 = vmatprep.subr.mxu0 %v34512_v17  ;;  %29808 = vmatprep.subr.mxu1 %v34512_v17 }
0x214a   :  { %29776 = vmatpush3.msra.mxu0 %v34512_v17  ;;  %29809 = vmatpush3.msra.mxu1 %v34512_v17 }
0x214b   :  { %29778 = vmatmul.mubr.f32.vlgmr.msra.gmra.mxu0 %v33774_v38  ;;  %29791 = vmatprep.subr.mxu0 %v34513_v34  ;;  %v34527_v38 = vld [vmem:[#allocation36_spill] sm:$0xff] }
0x214c   :  { %29811 = vmatmul.mubr.f32.vlgmr.msra.gmra.mxu1 %v33751_v57  ;;  %29824 = vmatprep.subr.mxu1 %v32938_v6  ;;  %v34520_v57 = vld [vmem:[#allocation52_spill] sm:$0xff] }
0x214d   :  { %29792 = vmatpush3.msra.mxu0 %v34513_v34  ;;  %29799 = vmatprep.mubr.f32.mxu0 %v33754_v35  ;;  %v34522_v35 = vld [vmem:[#allocation33_spill] sm:$0xff] }
0x214e   :  { %29825 = vmatpush3.msra.mxu1 %v32938_v6  ;;  %29832 = vmatprep.mubr.f32.mxu1 %v33748_v24  ;;  %v34517_v6 = vld [vmem:[#allocation31_spill] sm:$0xff] }
0x214f   :  { %29793 = vmatprep.subr.mxu0 %v34514_v60  ;;  %29826 = vmatprep.subr.mxu1 %v32954_v63 }
0x2150   :  { %29794 = vmatpush3.msra.mxu0 %v34514_v60  ;;  %29827 = vmatpush3.msra.mxu1 %v32954_v63  ;;  %v34518_v63 = vld [vmem:[#allocation50_spill] sm:$0xff] }
0x2151   :  { %29795 = vmatprep.subr.mxu0 %v34515_v50  ;;  %29828 = vmatprep.subr.mxu1 %v34511_v42 }
0x2152   :  { %29796 = vmatpush3.msra.mxu0 %v34515_v50  ;;  %29829 = vmatpush3.msra.mxu1 %v34511_v42 }
0x2153   :  { %29797 = vmatprep.subr.mxu0 %v34516_v46  ;;  %29830 = vmatprep.subr.mxu1 %v34512_v17 }
0x2154   :  { %29798 = vmatpush3.msra.mxu0 %v34516_v46  ;;  %29831 = vmatpush3.msra.mxu1 %v34512_v17 }
0x2155   :  { %29800 = vmatmul.mubr.f32.vlgmr.msra.gmra.mxu0 %v33746_v55  ;;  %29813 = vmatprep.subr.mxu0 %v34517_v6  ;;  %v34521_v55 = vld [vmem:[#allocation43_spill] sm:$0xff] }
0x2156   :  { %29833 = vmatmul.mubr.f32.vlgmr.msra.gmra.mxu1 %v33742_v4  ;;  %29814 = vmatpush3.msra.mxu0 %v34517_v6 }
0x2157   :  { %29821 = vmatprep.mubr.f32.mxu0 %v33748_v24  ;;  %29815 = vmatprep.subr.mxu0 %v34518_v63  ;;  %v34523_v24 = vld [vmem:[#allocation60_spill] sm:$0xff] }
0x2158   :  { %29816 = vmatpush3.msra.mxu0 %v34518_v63  ;;  %29846 = vmatprep.subr.mxu1 %v34519_v45 }
0x2159   :  { %29817 = vmatprep.subr.mxu0 %v34520_v57  ;;  %29847 = vmatpush3.msra.mxu1 %v34519_v45 }
0x215a   :  { %29818 = vmatpush3.msra.mxu0 %v34520_v57  ;;  %29848 = vmatprep.subr.mxu1 %v34521_v55 }
0x215b   :  { %29819 = vmatprep.subr.mxu0 %v34522_v35  ;;  %29849 = vmatpush3.msra.mxu1 %v34521_v55 }
0x215c   :  { %29820 = vmatpush3.msra.mxu0 %v34522_v35  ;;  %29850 = vmatprep.subr.mxu1 %v34523_v24 }
0x215d   :  { %29822 = vmatmul.mubr.f32.vlgmr.msra.gmra.mxu0 %v33742_v4  ;;  %29851 = vmatpush3.msra.mxu1 %v34523_v24  ;;  %v34526_v4 = vld [vmem:[#allocation58_spill] sm:$0xff] }
0x215e   :  { %29852 = vmatprep.subr.mxu1 %v34524_v28  ;;  %29835 = vmatprep.subr.mxu0 %v34481_v16 }
0x215f   :  { %29853 = vmatpush3.msra.mxu1 %v34524_v28  ;;  %29836 = vmatpush3.msra.mxu0 %v34481_v16 }
0x2160   :  { %29868 = vmatprep.subr.mxu1 %v34481_v16  ;;  %29837 = vmatprep.subr.mxu0 %v34482_v59 }
0x2161   :  { %29838 = vmatpush3.msra.mxu0 %v34482_v59 }
0x2162   :  { %29839 = vmatprep.subr.mxu0 %v34525_v26 }
0x2163   :  { %29840 = vmatpush3.msra.mxu0 %v34525_v26 }
0x2164   :  { %29841 = vmatprep.subr.mxu0 %v34526_v4 }
0x2165   :  { %29842 = vmatpush3.msra.mxu0 %v34526_v4 }
0x2166   :  { %29857 = vmatprep.subr.mxu0 %v34527_v38 }
0x21f1   :  { %v29748_v30 = vpop.f32.mrf.mxu1 }
0x21f3   :  { %v24054_v39 = vpop.f32.mrf.mxu1 }
0x21f5   :  { %v29758_v33 = vpop.f32.mrf.mxu1 }
0x21f7   :  { %v24215_v34 = vpop.f32.mrf.mxu1 }
0x21f9   :  { %v29743_v23 = vpop.f32.mrf.mxu0  ;;  %v29768_v45 = vpop.f32.mrf.mxu1 }
0x21fa   :  { %v23979_v51 = vadd.f32 %v29743_v23, %v23887_v21  ;;  %v34528_v21 = vld [vmem:[#allocation32_spill] sm:$0xff] }
0x21fb   :  { %v23968_v53 = vpop.f32.mrf.mxu0  ;;  %v24375_v56 = vpop.f32.mrf.mxu1 }
0x21fc   :  { %v23969_v49 = vadd.f32 %v23968_v53, %v23881_v41  ;;  %v24061_v42 = vadd.f32 %v29748_v30, %v23979_v51  ;;  %v34529_v41 = vld [vmem:[#allocation47_spill] sm:$0xff] }
0x21fd   :  { %v29753_v17 = vpop.f32.mrf.mxu0 }
0x21fe   :  { %v24142_v60 = vadd.f32 %v29753_v17, %v24061_v42  ;;  %v24055_v50 = vadd.f32 %v24054_v39, %v23969_v49 }
0x21ff   :  { %v24134_v46 = vpop.f32.mrf.mxu0 }
0x2200   :  { %v24135_v6 = vadd.f32 %v24134_v46, %v24055_v50  ;;  %v24224_v63 = vadd.f32 %v29758_v33, %v24142_v60 }
0x2202   :  { %v29763_v57 = vpop.f32.mrf.mxu0  ;;  %v24216_v55 = vadd.f32 %v24215_v34, %v24135_v6 }
0x2203   :  { %v24304_v35 = vadd.f32 %v29763_v57, %v24224_v63 }
0x2204   :  { %v24297_v24 = vpop.f32.mrf.mxu0 }
0x2205   :  { %v24382_v28 = vadd.f32 %v29768_v45, %v24304_v35  ;;  %v24298_v44 = vadd.f32 %v24297_v24, %v24216_v55 }
0x2207   :  { %v24386_v43 = vadd.f32 %v30214_v2, %v24382_v28  ;;  %v24376_v32 = vadd.f32 %v24375_v56, %v24298_v44 }
0x2209   :  { %v26142_v8 = vmul.f32 -1.442695, %v24386_v43  ;;  %v24385_v47 = vadd.f32 %v30214_v2, %v24376_v32 }
0x220b   :  { %30177 = vpow2.f32 %v26142_v8  ;;  %v26141_v15 = vmul.f32 -1.442695, %v24385_v47 }
0x220d   :  { %30179 = vpow2.f32 %v26141_v15  ;;  %v34530_v15 = vld [vmem:[#allocation48_spill] sm:$0xff] }
0x220e   :  { %30181 = vtanh.f32 %v24386_v43 }
0x2218   :  { %v30178_v19 = vpop.eup %30177 }
0x2219   :  { %v24396_v48 = vadd.f32 1.0, %v30178_v19  ;;  %v34531_v19 = vld [vmem:[#allocation45_spill] sm:$0xff] }
0x221a   :  { %v30180_v36 = vpop.eup %30179 }
0x221b   :  { %30183 = vrcp.f32 %v24396_v48  ;;  %v24395_v29 = vadd.f32 1.0, %v30180_v36  ;;  %v30182_v20 = vpop.eup %30181  ;;  %v34535_v48 = vld [vmem:[#allocation69_spill] sm:$0xff]  ;;  %v34537_v36 = vld [vmem:[#allocation70_spill] sm:$0xff] }
0x221c   :  { %30185 = vtanh.f32 %v24385_v47 }
0x221d   :  { %30187 = vrcp.f32 %v24395_v29  ;;  %v34539_v29 = vld [vmem:[#allocation71_spill] sm:$0xff] }
0x2228   :  { %v30184_v3 = vpop.eup %30183 }
0x2229   :  { %v30186_v18 = vpop.eup %30185  ;;  %v24402_v58 = vsel %vm31704_vm7, %v30182_v20, %v30184_v3  ;;  %v34540_v20 = vld [vmem:[#allocation72_spill] sm:$0xff]  ;;  %v29779_v3 = vpop.f32.mrf.mxu0 }
0x222a   :  { %v30188_v30 = vpop.eup %30187  ;;  %24409 = vrot.lane.b32.xlu1 %v24402_v58, %s30486_s7  ;;  %v24404_v23 = vmul.f32 %v24402_v58, %v34528_v21 }
0x222b   :  { %v24401_v13 = vsel %vm31704_vm7, %v30186_v18, %v30188_v30  ;;  %v29790_v18 = vpop.f32.mrf.mxu1 }
0x222c   :  { %24407 = vrot.lane.b32.xlu0 %v24401_v13, %s30486_s7  ;;  %v24403_v53 = vmul.f32 %v24401_v13, %v34529_v41 }
0x229c   :  { %v24410_v52 = vpop.permute.xlu1 %24409 }
0x229d   :  { %v24414_v62 = vmul.f32 %v24410_v52, %v24402_v58  ;;  %v24620_v52 = vadd.f32 %v29790_v18, %v29779_v3 }
0x229e   :  { %v24408_v25 = vpop.permute.xlu0 %24407 }
0x229f   :  { %v24413_v39 = vmul.f32 %v24408_v25, %v24401_v13  ;;  %24419 = vrot.lane.b32.xlu1 %v24414_v62, %s30487_s21 }
0x22a1   :  { %24417 = vrot.lane.b32.xlu0 %v24413_v39, %s30487_s21 }
0x2311   :  { %v24420_v33 = vpop.permute.xlu1 %24419 }
0x2312   :  { %v24424_v51 = vadd.f32 %v24420_v33, %v24404_v23 }
0x2313   :  { %v24418_v49 = vpop.permute.xlu0 %24417 }
0x2314   :  { %30189 = vtanh.f32 %v24424_v51  ;;  %v24423_v42 = vadd.f32 %v24418_v49, %v24403_v53 }
0x2316   :  { %30191 = vtanh.f32 %v24423_v42 }
0x2321   :  { %v30190_v17 = vpop.eup %30189 }
0x2322   :  { %24431 = vrot.lane.b32.xlu1 %v30190_v17, %s30486_s7 }
0x2323   :  { %v30192_v34 = vpop.eup %30191 }
0x2324   :  { %24429 = vrot.lane.b32.xlu0 %v30192_v34, %s30486_s7 }
0x2394   :  { %v24432_v60 = vpop.permute.xlu1 %24431 }
0x2395   :  { %v24436_v50 = vmul.f32 %v24432_v60, %v24402_v58  ;;  %v24512_v58 = vpop.f32.mrf.mxu0 }
0x2396   :  { %v24430_v46 = vpop.permute.xlu0 %24429 }
0x2397   :  { %v24435_v6 = vmul.f32 %v24430_v46, %v24401_v13  ;;  %24969 = vrot.lane.b32.xlu1 %v24436_v50, %s30487_s21  ;;  %v29801_v30 = vpop.f32.mrf.mxu0  ;;  %v24613_v13 = vpop.f32.mrf.mxu1 }
0x2398   :  { %v24614_v39 = vadd.f32 %v24613_v13, %v24512_v58  ;;  %v24707_v21 = vadd.f32 %v29801_v30, %v24620_v52 }
0x2399   :  { %24967 = vrot.lane.b32.xlu0 %v24435_v6, %s30487_s21  ;;  %v29812_v62 = vpop.f32.mrf.mxu1  ;;  %v24699_v25 = vpop.f32.mrf.mxu0 }
0x239a   :  { %v24700_v33 = vadd.f32 %v24699_v25, %v24614_v39  ;;  %v24792_v41 = vadd.f32 %v29812_v62, %v24707_v21 }
0x239b   :  { %v29823_v23 = vpop.f32.mrf.mxu0  ;;  %v24783_v51 = vpop.f32.mrf.mxu1 }
0x239c   :  { %v24881_v42 = vadd.f32 %v29823_v23, %v24792_v41  ;;  %v24784_v17 = vadd.f32 %v24783_v51, %v24700_v33 }
0x239d   :  { %v29834_v53 = vpop.f32.mrf.mxu1  ;;  %v24874_v49 = vpop.f32.mrf.mxu0 }
0x239e   :  { %v24875_v60 = vadd.f32 %v24874_v49, %v24784_v17  ;;  %v24962_v46 = vadd.f32 %v29834_v53, %v24881_v42 }
0x239f   :  { %v24955_v50 = vpop.f32.mrf.mxu1 }
0x2409   :  { %v24970_v63 = vpop.permute.xlu1 %24969 }
0x240a   :  { %v24973_v45 = vsel %vm8983_vm8, %v24970_v63, 0 }
0x240b   :  { %v25054_v57 = vand.u32 4294901760, %v24973_v45  ;;  %v24968_v55 = vpop.permute.xlu0 %24967 }
0x240c   :  { %v24971_v35 = vsel %vm8983_vm8, %v24968_v55, 0 }
0x240d   :  { %v25055_v24 = vsub.f32 %v24973_v45, %v25054_v57  ;;  %v25044_v28 = vand.u32 4294901760, %v24971_v35 }
0x240f   :  { %v25056_v44 = vand.u32 4294901760, %v25055_v24  ;;  %v25045_v56 = vsub.f32 %v24971_v35, %v25044_v28  ;;  %29854 = vmatprep.mubr.f32.mxu1 %v25044_v28 }
0x2410   :  { %29855 = vmatmul.mubr.f32.vlgmr.msra.gmra.mxu1 %v25054_v57 }
0x2411   :  { %29869 = vmatpush3.msra.mxu1 %v34481_v16  ;;  %v25046_v2 = vand.u32 4294901760, %v25045_v56  ;;  %v25057_v43 = vsub.f32 %v25055_v24, %v25056_v44 }
0x2412   :  { %29870 = vmatprep.subr.mxu1 %v34482_v59 }
0x2413   :  { %29871 = vmatpush3.msra.mxu1 %v34482_v59  ;;  %29876 = vmatprep.mubr.f32.mxu1 %v25046_v2  ;;  %v25047_v32 = vsub.f32 %v25045_v56, %v25046_v2  ;;  %v25058_v47 = vand.u32 4294901760, %v25057_v43 }
0x2414   :  { %29872 = vmatprep.subr.mxu1 %v34525_v26 }
0x2415   :  { %29873 = vmatpush3.msra.mxu1 %v34525_v26  ;;  %v25048_v8 = vand.u32 4294901760, %v25047_v32 }
0x2416   :  { %29874 = vmatprep.subr.mxu1 %v34526_v4 }
0x2417   :  { %29875 = vmatpush3.msra.mxu1 %v34526_v4  ;;  %29843 = vmatprep.mubr.f32.mxu0 %v25048_v8 }
0x2418   :  { %29877 = vmatmul.mubr.f32.vlgmr.msra.gmra.mxu1 %v25056_v44  ;;  %29890 = vmatprep.subr.mxu1 %v34481_v16 }
0x2419   :  { %29844 = vmatmul.mubr.f32.vlgmr.msra.gmra.mxu0 %v25058_v47  ;;  %29891 = vmatpush3.msra.mxu1 %v34481_v16  ;;  %v34532_v16 = vld [vmem:[#allocation46_spill] sm:$0xff] }
0x241a   :  { %29858 = vmatpush3.msra.mxu0 %v34527_v38  ;;  %29898 = vmatprep.mubr.f32.mxu1 %v25044_v28  ;;  %v34533_v38 = vld [vmem:[#allocation38_spill] sm:$0xff] }
0x241b   :  { %29859 = vmatprep.subr.mxu0 %v34530_v15  ;;  %29865 = vmatprep.mubr.f32.mxu0 %v25045_v56 }
0x241c   :  { %29892 = vmatprep.subr.mxu1 %v34482_v59  ;;  %29860 = vmatpush3.msra.mxu0 %v34530_v15 }
0x241d   :  { %29893 = vmatpush3.msra.mxu1 %v34482_v59  ;;  %29861 = vmatprep.subr.mxu0 %v34531_v19  ;;  %v34534_v59 = vld [vmem:[#allocation41_spill] sm:$0xff] }
0x241e   :  { %29894 = vmatprep.subr.mxu1 %v34525_v26  ;;  %29862 = vmatpush3.msra.mxu0 %v34531_v19 }
0x241f   :  { %29895 = vmatpush3.msra.mxu1 %v34525_v26  ;;  %29863 = vmatprep.subr.mxu0 %v34532_v16  ;;  %v34536_v26 = vld [vmem:[#allocation44_spill] sm:$0xff] }
0x2420   :  { %29896 = vmatprep.subr.mxu1 %v34526_v4  ;;  %29864 = vmatpush3.msra.mxu0 %v34532_v16 }
0x2421   :  { %29897 = vmatpush3.msra.mxu1 %v34526_v4  ;;  %29866 = vmatmul.mubr.f32.vlgmr.msra.gmra.mxu0 %v25055_v24  ;;  %v34538_v4 = vld [vmem:[#allocation59_spill] sm:$0xff] }
0x2422   :  { %29879 = vmatprep.subr.mxu0 %v34533_v38  ;;  %29899 = vmatmul.mubr.f32.vlgmr.msra.gmra.mxu1 %v25054_v57 }
0x2423   :  { %29880 = vmatpush3.msra.mxu0 %v34533_v38  ;;  %29887 = vmatprep.mubr.f32.mxu0 %v25044_v28 }
0x2424   :  { %29881 = vmatprep.subr.mxu0 %v34534_v59  ;;  %29912 = vmatprep.subr.mxu1 %v34535_v48 }
0x2425   :  { %29882 = vmatpush3.msra.mxu0 %v34534_v59  ;;  %29913 = vmatpush3.msra.mxu1 %v34535_v48 }
0x2426   :  { %29883 = vmatprep.subr.mxu0 %v34536_v26  ;;  %29914 = vmatprep.subr.mxu1 %v34537_v36 }
0x2427   :  { %29884 = vmatpush3.msra.mxu0 %v34536_v26  ;;  %29915 = vmatpush3.msra.mxu1 %v34537_v36 }
0x2428   :  { %29885 = vmatprep.subr.mxu0 %v34538_v4  ;;  %29916 = vmatprep.subr.mxu1 %v34539_v29 }
0x2429   :  { %29886 = vmatpush3.msra.mxu0 %v34538_v4  ;;  %29917 = vmatpush3.msra.mxu1 %v34539_v29  ;;  %v30215_v4 = vld [vmem:[#allocation19] ss:$0 sm:$0xff] }
0x242a   :  { %29888 = vmatmul.mubr.f32.vlgmr.msra.gmra.mxu0 %v25054_v57  ;;  %29918 = vmatprep.subr.mxu1 %v34540_v20  ;;  %v24956_v57 = vadd.f32 %v24955_v50, %v24875_v60 }
0x242b   :  { %29919 = vmatpush3.msra.mxu1 %v34540_v20  ;;  %29901 = vmatprep.subr.mxu0 %v33306_v54 }
0x242c   :  { %29934 = vmatprep.subr.mxu1 %v33306_v54  ;;  %29902 = vmatpush3.msra.mxu0 %v33306_v54 }
0x242d   :  { %29903 = vmatprep.subr.mxu0 %v33308_v61 }
0x242e   :  { %29904 = vmatpush3.msra.mxu0 %v33308_v61 }
0x242f   :  { %29905 = vmatprep.subr.mxu0 %v33343_v31 }
0x2430   :  { %29906 = vmatpush3.msra.mxu0 %v33343_v31 }
0x2431   :  { %29907 = vmatprep.subr.mxu0 %v33351_v40 }
0x2432   :  { %29908 = vmatpush3.msra.mxu0 %v33351_v40 }
0x2433   :  { %29923 = vmatprep.subr.mxu0 %v33311_v14 }
0x24d0   :  { %v29856_v6 = vpop.f32.mrf.mxu1 }
0x24d2   :  { %v25151_v24 = vpop.f32.mrf.mxu1 }
0x24d8   :  { %v29878_v44 = vpop.f32.mrf.mxu1 }
0x24d9   :  { %v29845_v34 = vpop.f32.mrf.mxu0 }
0x24da   :  { %v25061_v45 = vadd.f32 %v29845_v34, %v24962_v46  ;;  %v25321_v8 = vpop.f32.mrf.mxu1 }
0x24db   :  { %v25050_v63 = vpop.f32.mrf.mxu0 }
0x24dc   :  { %v25051_v55 = vadd.f32 %v25050_v63, %v24956_v57  ;;  %v25158_v28 = vadd.f32 %v29856_v6, %v25061_v45 }
0x24de   :  { %v25152_v43 = vadd.f32 %v25151_v24, %v25051_v55 }
0x24e1   :  { %v29867_v35 = vpop.f32.mrf.mxu0 }
0x24e2   :  { %v25245_v2 = vadd.f32 %v29867_v35, %v25158_v28  ;;  %v29900_v15 = vpop.f32.mrf.mxu1 }
0x24e3   :  { %v25237_v56 = vpop.f32.mrf.mxu0 }
0x24e4   :  { %v25238_v32 = vadd.f32 %v25237_v56, %v25152_v43  ;;  %v25330_v47 = vadd.f32 %v29878_v44, %v25245_v2  ;;  %v25493_v36 = vpop.f32.mrf.mxu1 }
0x24e6   :  { %v25322_v38 = vadd.f32 %v25321_v8, %v25238_v32 }
0x24ea   :  { %v29889_v19 = vpop.f32.mrf.mxu0 }
0x24eb   :  { %v25419_v16 = vadd.f32 %v29889_v19, %v25330_v47 }
0x24ec   :  { %v25412_v59 = vpop.f32.mrf.mxu0 }
0x24ed   :  { %v25500_v48 = vadd.f32 %v29900_v15, %v25419_v16  ;;  %v25413_v26 = vadd.f32 %v25412_v59, %v25322_v38 }
0x24ef   :  { %v25504_v29 = vadd.f32 %v30215_v4, %v25500_v48  ;;  %v25494_v20 = vadd.f32 %v25493_v36, %v25413_v26 }
0x24f1   :  { %v26144_v3 = vmul.f32 -1.442695, %v25504_v29  ;;  %v25503_v18 = vadd.f32 %v30215_v4, %v25494_v20 }
0x24f3   :  { %30193 = vpow2.f32 %v26144_v3  ;;  %v26143_v58 = vmul.f32 -1.442695, %v25503_v18 }
0x24f5   :  { %30195 = vpow2.f32 %v26143_v58 }
0x24f6   :  { %30197 = vtanh.f32 %v25504_v29 }
0x2500   :  { %v30194_v30 = vpop.eup %30193 }
0x2501   :  { %v25514_v13 = vadd.f32 1.0, %v30194_v30 }
0x2502   :  { %v30196_v52 = vpop.eup %30195 }
0x2503   :  { %30199 = vrcp.f32 %v25514_v13  ;;  %v25513_v62 = vadd.f32 1.0, %v30196_v52  ;;  %v30198_v25 = vpop.eup %30197 }
0x2504   :  { %30201 = vtanh.f32 %v25503_v18 }
0x2505   :  { %30203 = vrcp.f32 %v25513_v62 }
0x2510   :  { %v30200_v39 = vpop.eup %30199 }
0x2511   :  { %v30202_v21 = vpop.eup %30201  ;;  %v25520_v23 = vsel %vm31704_vm7, %v30198_v25, %v30200_v39 }
0x2512   :  { %v30204_v33 = vpop.eup %30203  ;;  %25527 = vrot.lane.b32.xlu1 %v25520_v23, %s30486_s7  ;;  %v25522_v17 = vmul.f32 %v25520_v23, %v33730_v22 }
0x2513   :  { %v25519_v51 = vsel %vm31704_vm7, %v30202_v21, %v30204_v33 }
0x2514   :  { %25525 = vrot.lane.b32.xlu0 %v25519_v51, %s30486_s7  ;;  %v25521_v50 = vmul.f32 %v25519_v51, %v33734_v5 }
0x2584   :  { %v25528_v41 = vpop.permute.xlu1 %25527 }
0x2585   :  { %v25532_v53 = vmul.f32 %v25528_v41, %v25520_v23 }
0x2586   :  { %v25526_v49 = vpop.permute.xlu0 %25525 }
0x2587   :  { %v25531_v42 = vmul.f32 %v25526_v49, %v25519_v51  ;;  %25537 = vrot.lane.b32.xlu1 %v25532_v53, %s30487_s21 }
0x2589   :  { %25535 = vrot.lane.b32.xlu0 %v25531_v42, %s30487_s21 }
0x25f9   :  { %v25538_v34 = vpop.permute.xlu1 %25537 }
0x25fa   :  { %v25542_v60 = vadd.f32 %v25538_v34, %v25522_v17 }
0x25fb   :  { %v25536_v46 = vpop.permute.xlu0 %25535 }
0x25fc   :  { %30205 = vtanh.f32 %v25542_v60  ;;  %v25541_v27 = vadd.f32 %v25536_v46, %v25521_v50 }
0x25fe   :  { %30207 = vtanh.f32 %v25541_v27 }
0x2609   :  { %v30206_v6 = vpop.eup %30205 }
0x260a   :  { %25549 = vrot.lane.b32.xlu1 %v30206_v6, %s30486_s7 }
0x260b   :  { %v30208_v63 = vpop.eup %30207 }
0x260c   :  { %25547 = vrot.lane.b32.xlu0 %v30208_v63, %s30486_s7 }
0x267c   :  { %v25550_v45 = vpop.permute.xlu1 %25549 }
0x267d   :  { %v25554_v57 = vmul.f32 %v25550_v45, %v25520_v23 }
0x267e   :  { %v25548_v55 = vpop.permute.xlu0 %25547 }
0x267f   :  { %v25553_v35 = vmul.f32 %v25548_v55, %v25519_v51  ;;  %25559 = vrot.lane.b32.xlu1 %v25554_v57, %s30487_s21 }
0x2681   :  { %25557 = vrot.lane.b32.xlu0 %v25553_v35, %s30487_s21 }
0x26f1   :  { %v25560_v22 = vpop.permute.xlu1 %25559 }
0x26f2   :  { %v25563_v5 = vsel %vm8983_vm8, %v25560_v22, 0 }
0x26f3   :  { %v25644_v24 = vand.u32 4294901760, %v25563_v5  ;;  %v25558_v28 = vpop.permute.xlu0 %25557 }
0x26f4   :  { %v25561_v44 = vsel %vm8983_vm8, %v25558_v28, 0 }
0x26f5   :  { %v25645_v56 = vsub.f32 %v25563_v5, %v25644_v24  ;;  %v25634_v2 = vand.u32 4294901760, %v25561_v44 }
0x26f7   :  { %v25646_v43 = vand.u32 4294901760, %v25645_v56  ;;  %v25635_v32 = vsub.f32 %v25561_v44, %v25634_v2  ;;  %29920 = vmatprep.mubr.f32.mxu1 %v25634_v2 }
0x26f8   :  { %29921 = vmatmul.mubr.f32.vlgmr.msra.gmra.mxu1 %v25644_v24 }
0x26f9   :  { %29935 = vmatpush3.msra.mxu1 %v33306_v54  ;;  %v25636_v8 = vand.u32 4294901760, %v25635_v32  ;;  %v25647_v47 = vsub.f32 %v25645_v56, %v25646_v43 }
0x26fa   :  { %29936 = vmatprep.subr.mxu1 %v33308_v61 }
0x26fb   :  { %29937 = vmatpush3.msra.mxu1 %v33308_v61  ;;  %29942 = vmatprep.mubr.f32.mxu1 %v25636_v8  ;;  %v25637_v15 = vsub.f32 %v25635_v32, %v25636_v8  ;;  %v25648_v16 = vand.u32 4294901760, %v25647_v47 }
0x26fc   :  { %29938 = vmatprep.subr.mxu1 %v33343_v31 }
0x26fd   :  { %29939 = vmatpush3.msra.mxu1 %v33343_v31  ;;  %v25638_v19 = vand.u32 4294901760, %v25637_v15 }
0x26fe   :  { %29940 = vmatprep.subr.mxu1 %v33351_v40 }
0x26ff   :  { %29941 = vmatpush3.msra.mxu1 %v33351_v40  ;;  %29909 = vmatprep.mubr.f32.mxu0 %v25638_v19 }
0x2700   :  { %29943 = vmatmul.mubr.f32.vlgmr.msra.gmra.mxu1 %v25646_v43  ;;  %29956 = vmatprep.subr.mxu1 %v33306_v54 }
0x2701   :  { %29910 = vmatmul.mubr.f32.vlgmr.msra.gmra.mxu0 %v25648_v16  ;;  %29957 = vmatpush3.msra.mxu1 %v33306_v54 }
0x2702   :  { %29924 = vmatpush3.msra.mxu0 %v33311_v14  ;;  %29964 = vmatprep.mubr.f32.mxu1 %v25634_v2 }
0x2703   :  { %29925 = vmatprep.subr.mxu0 %v33314_v37  ;;  %29931 = vmatprep.mubr.f32.mxu0 %v25635_v32 }
0x2704   :  { %29958 = vmatprep.subr.mxu1 %v33308_v61  ;;  %29926 = vmatpush3.msra.mxu0 %v33314_v37 }
0x2705   :  { %29959 = vmatpush3.msra.mxu1 %v33308_v61  ;;  %29927 = vmatprep.subr.mxu0 %v33349_v12 }
0x2706   :  { %29960 = vmatprep.subr.mxu1 %v33343_v31  ;;  %29928 = vmatpush3.msra.mxu0 %v33349_v12 }
0x2707   :  { %29961 = vmatpush3.msra.mxu1 %v33343_v31  ;;  %29929 = vmatprep.subr.mxu0 %v33359_v0 }
0x2708   :  { %29962 = vmatprep.subr.mxu1 %v33351_v40  ;;  %29930 = vmatpush3.msra.mxu0 %v33359_v0 }
0x2709   :  { %29963 = vmatpush3.msra.mxu1 %v33351_v40  ;;  %29932 = vmatmul.mubr.f32.vlgmr.msra.gmra.mxu0 %v25645_v56 }
0x270a   :  { %29945 = vmatprep.subr.mxu0 %v33319_v7  ;;  %29965 = vmatmul.mubr.f32.vlgmr.msra.gmra.mxu1 %v25644_v24 }
0x270b   :  { %29946 = vmatpush3.msra.mxu0 %v33319_v7  ;;  %29953 = vmatprep.mubr.f32.mxu0 %v25634_v2 }
0x270c   :  { %29947 = vmatprep.subr.mxu0 %v33322_v1 }
0x270d   :  { %29948 = vmatpush3.msra.mxu0 %v33322_v1 }
0x270e   :  { %29949 = vmatprep.subr.mxu0 %v33356_v9 }
0x270f   :  { %29950 = vmatpush3.msra.mxu0 %v33356_v9 }
0x2710   :  { %29951 = vmatprep.subr.mxu0 %v33366_v11 }
0x2711   :  { %29952 = vmatpush3.msra.mxu0 %v33366_v11 }
0x2712   :  { %29954 = vmatmul.mubr.f32.vlgmr.msra.gmra.mxu0 %v25644_v24 }
0x27b8   :  { %v29922_v61 = vpop.f32.mrf.mxu1 }
0x27ba   :  { %v25741_v12 = vpop.f32.mrf.mxu1 }
0x27c0   :  { %v29944_v1 = vpop.f32.mrf.mxu1 }
0x27c1   :  { %v29911_v54 = vpop.f32.mrf.mxu0 }
0x27c2   :  { %v25651_v37 = vadd.f32 %v33878_v10, %v29911_v54  ;;  %v25911_v48 = vpop.f32.mrf.mxu1 }
0x27c3   :  { %v25640_v14 = vpop.f32.mrf.mxu0 }
0x27c4   :  { %v25641_v7 = vadd.f32 %v33878_v10, %v25640_v14  ;;  %v25748_v40 = vadd.f32 %v29922_v61, %v25651_v37 }
0x27c6   :  { %v25742_v59 = vadd.f32 %v25741_v12, %v25641_v7 }
0x27c9   :  { %v29933_v31 = vpop.f32.mrf.mxu0 }
0x27ca   :  { %v25835_v38 = vadd.f32 %v29933_v31, %v25748_v40  ;;  %v29966_v36 = vpop.f32.mrf.mxu1 }
0x27cb   :  { %v25827_v0 = vpop.f32.mrf.mxu0 }
0x27cc   :  { %v25828_v9 = vadd.f32 %v25827_v0, %v25742_v59  ;;  %v25920_v26 = vadd.f32 %v29944_v1, %v25835_v38  ;;  %v26083_v58 = vpop.f32.mrf.mxu1 }
0x27ce   :  { %v25912_v29 = vadd.f32 %v25911_v48, %v25828_v9 }
0x27d2   :  { %v29955_v11 = vpop.f32.mrf.mxu0 }
0x27d3   :  { %v26009_v4 = vadd.f32 %v29955_v11, %v25920_v26 }
0x27d4   :  { %v26002_v20 = vpop.f32.mrf.mxu0 }
0x27d5   :  { %v26090_v3 = vadd.f32 %v29966_v36, %v26009_v4  ;;  %v26003_v18 = vadd.f32 %v26002_v20, %v25912_v29 }
0x27d7   :  { %26098 = vst.msk [vmem:[%s34116_s20 + $0x28] sm:$0xff] %vm227_vm1, %v26090_v3  ;;  %v26084_v10 = vadd.f32 %v26083_v58, %v26003_v18 }
0x27d9   :  { %26097 = vst.msk [vmem:[%s34116_s20 + $0x20] sm:$0xff] %vm227_vm1, %v26084_v10 }
0x27da   :  { %26103 = vsyncpa [#allocation3], 1 }
0x27db   :  { %26104 = vsyncpa [#allocation5], 1 }
0x27dc   :  { %26105 = vsyncpa [#allocation8], 1 }
0x27dd   :  { %26106 = vsyncpa [#allocation11], 1 }
0x27de   :  { %26107 = vsyncpa [#allocation14], 1 }
0x27df   :  { %26108 = vsyncpa [#allocation17], 1 }
0x27e0   :  { %26109 = vsyncpa [#allocation20], 1 }

</bundles_post_ra>
